<compile_context>
chip_gen: v7x
topology: tpu7x:2x2x1
jax: 0.10.0
libtpu: 0.0.40
codegen_flags: <defaults>
</compile_context>

<pallas_src>
import numpy as np
import jax
import jax.numpy as jnp
from jax import lax
from jax.experimental import pallas as pl
from jax.experimental.pallas import tpu as pltpu

LANES = 128
KSIZE = 5
RS = 16          # row stride of the pooled1 / conv2-output spatial layout


def _round_up(x, m):
    return (x + m - 1) // m * m


# ----------------------------------------------------------------------------
# Static configuration (all shapes / paddings derived from input_size)
# ----------------------------------------------------------------------------
def make_config(batch, in_channels, input_size, num_classes):
    assert input_size in (28, 32)
    oh1 = input_size                      # conv1 out spatial (stride 1, pad 2)
    ph1 = oh1 // 2                        # pool1 out spatial (14 / 16)
    oh2 = ph1 - KSIZE + 1                 # conv2 out spatial (10 / 12)
    ph2 = oh2 // 2                        # pool2 out spatial (5 / 6)
    npos = ph2 * ph2                      # flattened pool2 positions (25 / 36)
    lp2 = _round_up(npos, 8)
    # conv2 outputs live at rows r = oh2_i*RS + ow2_i (stride-16 layout)
    lc2 = _round_up((oh2 - 1) * RS + oh2, 8)
    off_max = (KSIZE - 1) * RS + (KSIZE - 1)
    # pooled1 rows per image; padded so every conv2 window read (including the
    # garbage output columns) stays inside data the kernel has written, and
    # rounded to 16 so the per-plane bf16 loads are tile-aligned.
    Q = _round_up(max(ph1 * RS, off_max + lc2), 16)
    L1 = 4 * Q                            # host-side im2col rows per image
    K1 = _round_up(KSIZE * KSIZE * in_channels, 8)   # im2col taps (lane dim)
    bt = batch if batch < 8 else 8        # images per grid step
    n_tiles = -(-batch // bt)
    nrows = n_tiles * bt
    return dict(batch=batch, in_channels=in_channels, input_size=input_size,
                num_classes=num_classes, oh1=oh1, ph1=ph1, oh2=oh2, ph2=ph2,
                npos=npos, lp2=lp2, lc2=lc2, Q=Q, L1=L1, K1=K1,
                bt=bt, n_tiles=n_tiles, nrows=nrows)


# ----------------------------------------------------------------------------
# Parameter init (PyTorch layouts) + one-time kernel-operand preparation
# ----------------------------------------------------------------------------
def init_params(key, in_channels=1, num_classes=10, input_size=28):
    assert input_size in (28, 32)
    d_flat = 400 if input_size == 28 else 576
    ks = jax.random.split(key, 16)
    p = {}
    p["conv1_w"] = 0.1 * jax.random.normal(ks[0], (6, in_channels, 5, 5), jnp.float32)
    p["bn1_gamma"] = 0.5 + jax.random.uniform(ks[1], (6,), jnp.float32)
    p["bn1_beta"] = 0.1 * jax.random.normal(ks[2], (6,), jnp.float32)
    p["bn1_mean"] = 0.1 * jax.random.normal(ks[3], (6,), jnp.float32)
    p["bn1_var"] = 0.5 + jax.random.uniform(ks[4], (6,), jnp.float32)
    p["conv2_w"] = 0.1 * jax.random.normal(ks[5], (16, 6, 5, 5), jnp.float32)
    p["bn2_gamma"] = 0.5 + jax.random.uniform(ks[6], (16,), jnp.float32)
    p["bn2_beta"] = 0.1 * jax.random.normal(ks[7], (16,), jnp.float32)
    p["bn2_mean"] = 0.1 * jax.random.normal(ks[8], (16,), jnp.float32)
    p["bn2_var"] = 0.5 + jax.random.uniform(ks[9], (16,), jnp.float32)
    # Linear weights stored (in, out)  (== transpose of PyTorch (out, in))
    p["fc_w"] = 0.05 * jax.random.normal(ks[10], (d_flat, 120), jnp.float32)
    p["fc_b"] = 0.05 * jax.random.normal(ks[11], (1, 120), jnp.float32)
    p["fc1_w"] = 0.05 * jax.random.normal(ks[12], (120, 84), jnp.float32)
    p["fc1_b"] = 0.05 * jax.random.normal(ks[13], (1, 84), jnp.float32)
    p["fc2_w"] = 0.05 * jax.random.normal(ks[14], (84, num_classes), jnp.float32)
    p["fc2_b"] = 0.05 * jax.random.normal(ks[15], (1, num_classes), jnp.float32)
    return p


def prepare_operands(p, cfg, eps=1e-5):
    """One-time transform of PyTorch-layout params into lane-dense, BN-folded
    bf16 kernel operands (done once at model-load time, outside the forward)."""
    cin = cfg["in_channels"]

    def bn_fold(gamma, beta, mean, var):
        scale = gamma / jnp.sqrt(var + eps)
        return scale, beta - mean * scale

    def pad_row(v):
        v = v.reshape(-1)
        return jnp.zeros((1, LANES), jnp.float32).at[0, :v.shape[0]].set(v)

    def pad_mat(w):
        a, b = w.shape
        return (jnp.zeros((LANES, LANES), jnp.float32)
                .at[:a, :b].set(w).astype(jnp.bfloat16))

    # --- conv1 + BN1 fold -> ONE (K1, 128) matmul operand (host im2col LHS) -
    sc1, sh1 = bn_fold(p["bn1_gamma"], p["bn1_beta"], p["bn1_mean"], p["bn1_var"])
    cout1 = p["conv1_w"].shape[0]
    w1 = jnp.transpose(p["conv1_w"], (2, 3, 1, 0)).reshape(
        KSIZE * KSIZE * cin, cout1) * sc1            # tap index = (kh*5+kw)*cin+c
    w1k = (jnp.zeros((cfg["K1"], LANES), jnp.float32)
           .at[:KSIZE * KSIZE * cin, :cout1].set(w1).astype(jnp.bfloat16))

    # --- conv2 + BN2 fold -> 25 (128,128) tap matrices -----------------------
    sc2, sh2 = bn_fold(p["bn2_gamma"], p["bn2_beta"], p["bn2_mean"], p["bn2_var"])
    cout2, cin2 = p["conv2_w"].shape[:2]
    w2 = (jnp.transpose(p["conv2_w"], (2, 3, 1, 0)) * sc2).reshape(
        KSIZE * KSIZE, cin2, cout2)
    w2k = (jnp.zeros((KSIZE * KSIZE, LANES, LANES), jnp.float32)
           .at[:, :cin2, :cout2].set(w2).astype(jnp.bfloat16))

    # --- pool2 as a tiny (lp2, lc2) selection matmul --------------------------
    ph2, npos, lp2, lc2 = cfg["ph2"], cfg["npos"], cfg["lp2"], cfg["lc2"]
    m = np.zeros((lp2, lc2), np.float32)
    for a in range(ph2):
        for b in range(ph2):
            for dy in (0, 1):
                for dx in (0, 1):
                    m[a * ph2 + b, (2 * a + dy) * RS + (2 * b + dx)] = 0.25
    s2 = jnp.asarray(m, jnp.bfloat16)

    # --- fc regrouped per spatial position (kills the NCHW flatten transpose) -
    d0 = p["fc_w"].shape[1]
    fcp = jnp.transpose(p["fc_w"].reshape(cout2, npos, d0), (1, 0, 2))
    fcp_pad = (jnp.zeros((npos, LANES, LANES), jnp.float32)
               .at[:, :cout2, :d0].set(fcp).astype(jnp.bfloat16))

    return dict(w1=w1k, sh1=pad_row(sh1), w2=w2k, sh2=pad_row(sh2), s2=s2,
                fcp=fcp_pad, b0=pad_row(p["fc_b"]), w1f=pad_mat(p["fc1_w"]),
                b1=pad_row(p["fc1_b"]), w2f=pad_mat(p["fc2_w"]),
                b2=pad_row(p["fc2_b"]))


def pack_input(x_nchw, cfg):
    """Host-side im2col for conv1, packed in pool-plane order.

    Output: (nrows, 4*Q, K1) bf16.  For each image, plane d = dy*2+dx holds,
    at row q = ph*16 + pw, the 25*Cin-tap conv1 patch for the conv1 output
    position (2*ph+dy, 2*pw+dx); tap lane index = (kh*5+kw)*Cin + c.  Rows
    with pw >= ph1 or q >= ph1*16 are zero padding.
    """
    N = x_nchw.shape[0]
    cin, H = cfg["in_channels"], cfg["input_size"]
    bt, n_tiles, Q, K1, ph1 = cfg["bt"], cfg["n_tiles"], cfg["Q"], cfg["K1"], cfg["ph1"]
    nrows = n_tiles * bt
    x = x_nchw.astype(jnp.float32)
    if nrows > N:
        x = jnp.pad(x, ((0, nrows - N), (0, 0), (0, 0), (0, 0)))
    xp = jnp.pad(x, ((0, 0), (0, 0), (2, 2), (2, 2)))      # conv1 pad=2
    planes = []
    for dy in (0, 1):
        for dx in (0, 1):
            taps = []
            for kh in range(KSIZE):
                for kw in range(KSIZE):
                    for c in range(cin):
                        sl = xp[:, c,
                                dy + kh: dy + kh + 2 * ph1: 2,
                                dx + kw: dx + kw + 2 * ph1: 2]   # (nrows, ph1, ph1)
                        taps.append(sl)
            plane = jnp.stack(taps, axis=-1)                 # (nrows, ph1, ph1, 25*cin)
            plane = jnp.pad(plane, ((0, 0), (0, 0),
                                    (0, RS - ph1), (0, K1 - KSIZE * KSIZE * cin)))
            plane = plane.reshape(nrows, ph1 * RS, K1)       # row q = ph*16 + pw
            plane = jnp.pad(plane, ((0, 0), (0, Q - ph1 * RS), (0, 0)))
            planes.append(plane)
    return jnp.concatenate(planes, axis=1).astype(jnp.bfloat16)   # (nrows, 4*Q, K1)


# ----------------------------------------------------------------------------
# The fused Pallas kernel (whole network; one image tile per grid step)
# ----------------------------------------------------------------------------
def _make_kernel(cfg):
    bt, Q, lc2, npos = cfg["bt"], cfg["Q"], cfg["lc2"], cfg["npos"]

    def kernel(x_ref, w1_ref, sh1_ref, w2_ref, sh2_ref, s2_ref, fcp_ref,
               b0_ref, w1f_ref, b1_ref, w2f_ref, b2_ref,
               o_ref, x2_s, p2_s):
        for n in range(bt):
            # --- layer1: conv5x5/pad2 (BN folded) + shift + ReLU + 2x2 avgpool
            # Host-side im2col is packed as 4 pool planes, so the whole layer
            # is 4 register-resident (Q,K1)@(K1,128) matmuls summed together.
            p1 = jnp.zeros((Q, LANES), jnp.float32)
            for d in range(4):
                h = jnp.dot(x_ref[n, pl.ds(d * Q, Q), :], w1_ref[...],
                            preferred_element_type=jnp.float32)
                p1 = p1 + jnp.maximum(h + sh1_ref[...], 0.0)
            x2_s[...] = (p1 * 0.25).astype(jnp.bfloat16)

            # --- layer2: conv5x5/pad0 (25 taps) + shift + ReLU ---------------
            # pooled1 uses a stride-16 row layout, so tap offsets kh*16+kw keep
            # the kh component tile-aligned.  The (lc2,128) f32 acc fits in vregs.
            acc = jnp.zeros((lc2, LANES), jnp.float32)
            for t in range(KSIZE * KSIZE):
                off = (t // KSIZE) * RS + (t % KSIZE)
                acc = acc + jnp.dot(x2_s[pl.ds(off, lc2), :], w2_ref[t],
                                    preferred_element_type=jnp.float32)
            h2 = jnp.maximum(acc + sh2_ref[...], 0.0)
            # --- fused 2x2 avg-pool: tiny constant selection matmul ----------
            p2_s[n] = jnp.dot(s2_ref[...], h2.astype(jnp.bfloat16),
                              preferred_element_type=jnp.float32
                              ).astype(jnp.bfloat16)

        # --- position-grouped fc, batched over the whole image tile ----------
        # (replaces the per-image 1-row matmuls: 25 matmuls total per grid step
        #  with a (bt,128) LHS, accumulated in registers)
        h0 = jnp.zeros((bt, LANES), jnp.float32)
        for pidx in range(npos):
            h0 = h0 + jnp.dot(p2_s[:, pidx, :], fcp_ref[pidx],
                              preferred_element_type=jnp.float32)

        # --- MLP tail on the whole tile at once -------------------------------
        a0 = jnp.maximum(h0 + b0_ref[...], 0.0)
        a1 = jnp.maximum(
            jnp.dot(a0.astype(jnp.bfloat16), w1f_ref[...],
                    preferred_element_type=jnp.float32) + b1_ref[...], 0.0)
        o_ref[...] = jnp.dot(a1.astype(jnp.bfloat16), w2f_ref[...],
                             preferred_element_type=jnp.float32) + b2_ref[...]

    return kernel


def lenet_pallas_forward(x_nchw, ops, cfg):
    xp = pack_input(x_nchw, cfg)                        # (nrows, L1, K1) bf16
    kernel = _make_kernel(cfg)
    bt, n_tiles, nrows = cfg["bt"], cfg["n_tiles"], cfg["nrows"]
    out = pl.pallas_call(
        kernel,
        out_shape=jax.ShapeDtypeStruct((nrows, LANES), jnp.float32),
        grid=(n_tiles,),
        in_specs=[
            pl.BlockSpec((bt, cfg["L1"], cfg["K1"]), lambda i: (i, 0, 0)),
            pl.BlockSpec(ops["w1"].shape, lambda i: (0, 0)),
            pl.BlockSpec(ops["sh1"].shape, lambda i: (0, 0)),
            pl.BlockSpec(ops["w2"].shape, lambda i: (0, 0, 0)),
            pl.BlockSpec(ops["sh2"].shape, lambda i: (0, 0)),
            pl.BlockSpec(ops["s2"].shape, lambda i: (0, 0)),
            pl.BlockSpec(ops["fcp"].shape, lambda i: (0, 0, 0)),
            pl.BlockSpec(ops["b0"].shape, lambda i: (0, 0)),
            pl.BlockSpec(ops["w1f"].shape, lambda i: (0, 0)),
            pl.BlockSpec(ops["b1"].shape, lambda i: (0, 0)),
            pl.BlockSpec(ops["w2f"].shape, lambda i: (0, 0)),
            pl.BlockSpec(ops["b2"].shape, lambda i: (0, 0)),
        ],
        out_specs=pl.BlockSpec((bt, LANES), lambda i: (i, 0)),
        scratch_shapes=[
            pltpu.VMEM((cfg["Q"], LANES), jnp.bfloat16),          # pooled1 (per image)
            pltpu.VMEM((bt, cfg["lp2"], LANES), jnp.bfloat16),    # pooled2 (whole tile)
        ],
        compiler_params=pltpu.CompilerParams(
            dimension_semantics=("parallel",)),
    )(xp, ops["w1"], ops["sh1"], ops["w2"], ops["sh2"], ops["s2"],
      ops["fcp"], ops["b0"], ops["w1f"], ops["b1"], ops["w2f"], ops["b2"])
    return out[:x_nchw.shape[0], :cfg["num_classes"]]


# ----------------------------------------------------------------------------
# Pure-JAX f32 reference (for correctness checking only)
# ----------------------------------------------------------------------------
def lenet_reference(x_nchw, p, eps=1e-5):
    x = jnp.transpose(x_nchw.astype(jnp.float32), (0, 2, 3, 1))

    def conv(x, w_oihw, pad):
        return lax.conv_general_dilated(
            x, jnp.transpose(w_oihw, (2, 3, 1, 0)), (1, 1),
            [(pad, pad), (pad, pad)],
            dimension_numbers=("NHWC", "HWIO", "NHWC"))

    def bn(x, g, b, m, v):
        s = g / jnp.sqrt(v + eps)
        return x * s + (b - m * s)

    def pool(x):
        n, h, w, c = x.shape
        return x.reshape(n, h // 2, 2, w // 2, 2, c).mean(axis=(2, 4))

    h = pool(jnp.maximum(bn(conv(x, p["conv1_w"], 2), p["bn1_gamma"],
                            p["bn1_beta"], p["bn1_mean"], p["bn1_var"]), 0.0))
    h = pool(jnp.maximum(bn(conv(h, p["conv2_w"], 0), p["bn2_gamma"],
                            p["bn2_beta"], p["bn2_mean"], p["bn2_var"]), 0.0))
    h = jnp.transpose(h, (0, 3, 1, 2)).reshape(h.shape[0], -1)   # NCHW flatten
    h = jnp.maximum(h @ p["fc_w"] + p["fc_b"], 0.0)
    h = jnp.maximum(h @ p["fc1_w"] + p["fc1_b"], 0.0)
    return h @ p["fc2_w"] + p["fc2_b"]


if __name__ == "__main__":
    key = jax.random.PRNGKey(0)
    k_params, k_x = jax.random.split(key)

    batch, in_channels, input_size, num_classes = 2, 1, 28, 10
    cfg = make_config(batch, in_channels, input_size, num_classes)
    params = init_params(k_params, in_channels, num_classes, input_size)
    ops = prepare_operands(params, cfg)

    x = jax.random.normal(k_x, (batch, in_channels, input_size, input_size),
                          jnp.float32)

    fwd = jax.jit(lambda xi: lenet_pallas_forward(xi, ops, cfg))
    out = jax.block_until_ready(fwd(x))
    assert out.shape == (batch, num_classes)
    assert bool(jnp.all(jnp.isfinite(out)))

    ref = jax.block_until_ready(lenet_reference(x, params))
    assert bool(jnp.allclose(out, ref, rtol=1e-1, atol=5e-2)), (out, ref)
    print("KERNEL_OK")
</pallas_src>

<mosaic_0001>
module attributes {stable_mosaic.version = 11 : i64} {
  func.func @kernel(%arg0: i32, %arg1: memref<2x960x32xbf16, #tpu.memory_space<vmem>>, %arg2: memref<32x128xbf16, #tpu.memory_space<vmem>>, %arg3: memref<1x128xf32, #tpu.memory_space<vmem>>, %arg4: memref<25x128x128xbf16, #tpu.memory_space<vmem>>, %arg5: memref<1x128xf32, #tpu.memory_space<vmem>>, %arg6: memref<32x160xbf16, #tpu.memory_space<vmem>>, %arg7: memref<25x128x128xbf16, #tpu.memory_space<vmem>>, %arg8: memref<1x128xf32, #tpu.memory_space<vmem>>, %arg9: memref<128x128xbf16, #tpu.memory_space<vmem>>, %arg10: memref<1x128xf32, #tpu.memory_space<vmem>>, %arg11: memref<128x128xbf16, #tpu.memory_space<vmem>>, %arg12: memref<1x128xf32, #tpu.memory_space<vmem>>, %arg13: memref<2x128xf32, #tpu.memory_space<vmem>>, %arg14: memref<240x128xbf16, #tpu.memory_space<vmem>>, %arg15: memref<2x32x128xbf16, #tpu.memory_space<vmem>>) attributes {dimension_semantics = [#tpu.dimension_semantics<parallel>], iteration_bounds = array<i64: 1>, scalar_prefetch = 0 : i64, scratch_operands = 2 : i64, tpu.core_type = #tpu.core_type<tc>, window_params = [{transform_indices = @transform_0, window_bounds = array<i64: 2, 960, 32>}, {pipeline_mode = #tpu.pipeline_mode<synchronous>, transform_indices = @transform_1, window_bounds = array<i64: 32, 128>}, {pipeline_mode = #tpu.pipeline_mode<synchronous>, transform_indices = @transform_2, window_bounds = array<i64: 1, 128>}, {pipeline_mode = #tpu.pipeline_mode<synchronous>, transform_indices = @transform_3, window_bounds = array<i64: 25, 128, 128>}, {pipeline_mode = #tpu.pipeline_mode<synchronous>, transform_indices = @transform_4, window_bounds = array<i64: 1, 128>}, {pipeline_mode = #tpu.pipeline_mode<synchronous>, transform_indices = @transform_5, window_bounds = array<i64: 32, 160>}, {pipeline_mode = #tpu.pipeline_mode<synchronous>, transform_indices = @transform_6, window_bounds = array<i64: 25, 128, 128>}, {pipeline_mode = #tpu.pipeline_mode<synchronous>, transform_indices = @transform_7, window_bounds = array<i64: 1, 128>}, {pipeline_mode = #tpu.pipeline_mode<synchronous>, transform_indices = @transform_8, window_bounds = array<i64: 128, 128>}, {pipeline_mode = #tpu.pipeline_mode<synchronous>, transform_indices = @transform_9, window_bounds = array<i64: 1, 128>}, {pipeline_mode = #tpu.pipeline_mode<synchronous>, transform_indices = @transform_10, window_bounds = array<i64: 128, 128>}, {pipeline_mode = #tpu.pipeline_mode<synchronous>, transform_indices = @transform_11, window_bounds = array<i64: 1, 128>}, {transform_indices = @transform_12, window_bounds = array<i64: 2, 128>}]} {
    %cst = arith.constant 0.000000e+00 : f32
    %0 = vector.broadcast %cst : f32 to vector<240x128xf32>
    %c0 = arith.constant 0 : index
    %c0_0 = arith.constant 0 : index
    %c0_1 = arith.constant 0 : index
    %1 = vector.load %arg1[%c0, %c0_0, %c0_1] : memref<2x960x32xbf16, #tpu.memory_space<vmem>>, vector<1x240x32xbf16>
    %2 = vector.shape_cast %1 : vector<1x240x32xbf16> to vector<240x32xbf16>
    %c0_2 = arith.constant 0 : index
    %c0_3 = arith.constant 0 : index
    %3 = vector.load %arg2[%c0_2, %c0_3] : memref<32x128xbf16, #tpu.memory_space<vmem>>, vector<32x128xbf16>
    %cst_4 = arith.constant dense<0.000000e+00> : vector<240x128xf32>
    %4 = tpu.matmul %2, %3, %cst_4 {dimension_numbers = #tpu.dot_dimension_numbers<[1], [0], [0], [1], [0, 0, 1, 1], [], []>} : vector<240x32xbf16>, vector<32x128xbf16>, vector<240x128xf32> -> vector<240x128xf32>
    %c0_5 = arith.constant 0 : index
    %c0_6 = arith.constant 0 : index
    %5 = vector.load %arg3[%c0_5, %c0_6] : memref<1x128xf32, #tpu.memory_space<vmem>>, vector<1x128xf32>
    %6 = vector.broadcast %5 : vector<1x128xf32> to vector<240x128xf32>
    %7 = arith.addf %4, %6 : vector<240x128xf32>
    %cst_7 = arith.constant 0.000000e+00 : f32
    %8 = vector.broadcast %cst_7 : f32 to vector<240x128xf32>
    %9 = arith.maximumf %7, %8 : vector<240x128xf32>
    %10 = arith.addf %0, %9 : vector<240x128xf32>
    %c0_8 = arith.constant 0 : index
    %c240 = arith.constant 240 : index
    %c0_9 = arith.constant 0 : index
    %11 = vector.load %arg1[%c0_8, %c240, %c0_9] : memref<2x960x32xbf16, #tpu.memory_space<vmem>>, vector<1x240x32xbf16>
    %12 = vector.shape_cast %11 : vector<1x240x32xbf16> to vector<240x32xbf16>
    %c0_10 = arith.constant 0 : index
    %c0_11 = arith.constant 0 : index
    %13 = vector.load %arg2[%c0_10, %c0_11] : memref<32x128xbf16, #tpu.memory_space<vmem>>, vector<32x128xbf16>
    %cst_12 = arith.constant dense<0.000000e+00> : vector<240x128xf32>
    %14 = tpu.matmul %12, %13, %cst_12 {dimension_numbers = #tpu.dot_dimension_numbers<[1], [0], [0], [1], [0, 0, 1, 1], [], []>} : vector<240x32xbf16>, vector<32x128xbf16>, vector<240x128xf32> -> vector<240x128xf32>
    %c0_13 = arith.constant 0 : index
    %c0_14 = arith.constant 0 : index
    %15 = vector.load %arg3[%c0_13, %c0_14] : memref<1x128xf32, #tpu.memory_space<vmem>>, vector<1x128xf32>
    %16 = vector.broadcast %15 : vector<1x128xf32> to vector<240x128xf32>
    %17 = arith.addf %14, %16 : vector<240x128xf32>
    %cst_15 = arith.constant 0.000000e+00 : f32
    %18 = vector.broadcast %cst_15 : f32 to vector<240x128xf32>
    %19 = arith.maximumf %17, %18 : vector<240x128xf32>
    %20 = arith.addf %10, %19 : vector<240x128xf32>
    %c0_16 = arith.constant 0 : index
    %c480 = arith.constant 480 : index
    %c0_17 = arith.constant 0 : index
    %21 = vector.load %arg1[%c0_16, %c480, %c0_17] : memref<2x960x32xbf16, #tpu.memory_space<vmem>>, vector<1x240x32xbf16>
    %22 = vector.shape_cast %21 : vector<1x240x32xbf16> to vector<240x32xbf16>
    %c0_18 = arith.constant 0 : index
    %c0_19 = arith.constant 0 : index
    %23 = vector.load %arg2[%c0_18, %c0_19] : memref<32x128xbf16, #tpu.memory_space<vmem>>, vector<32x128xbf16>
    %cst_20 = arith.constant dense<0.000000e+00> : vector<240x128xf32>
    %24 = tpu.matmul %22, %23, %cst_20 {dimension_numbers = #tpu.dot_dimension_numbers<[1], [0], [0], [1], [0, 0, 1, 1], [], []>} : vector<240x32xbf16>, vector<32x128xbf16>, vector<240x128xf32> -> vector<240x128xf32>
    %c0_21 = arith.constant 0 : index
    %c0_22 = arith.constant 0 : index
    %25 = vector.load %arg3[%c0_21, %c0_22] : memref<1x128xf32, #tpu.memory_space<vmem>>, vector<1x128xf32>
    %26 = vector.broadcast %25 : vector<1x128xf32> to vector<240x128xf32>
    %27 = arith.addf %24, %26 : vector<240x128xf32>
    %cst_23 = arith.constant 0.000000e+00 : f32
    %28 = vector.broadcast %cst_23 : f32 to vector<240x128xf32>
    %29 = arith.maximumf %27, %28 : vector<240x128xf32>
    %30 = arith.addf %20, %29 : vector<240x128xf32>
    %c0_24 = arith.constant 0 : index
    %c720 = arith.constant 720 : index
    %c0_25 = arith.constant 0 : index
    %31 = vector.load %arg1[%c0_24, %c720, %c0_25] : memref<2x960x32xbf16, #tpu.memory_space<vmem>>, vector<1x240x32xbf16>
    %32 = vector.shape_cast %31 : vector<1x240x32xbf16> to vector<240x32xbf16>
    %c0_26 = arith.constant 0 : index
    %c0_27 = arith.constant 0 : index
    %33 = vector.load %arg2[%c0_26, %c0_27] : memref<32x128xbf16, #tpu.memory_space<vmem>>, vector<32x128xbf16>
    %cst_28 = arith.constant dense<0.000000e+00> : vector<240x128xf32>
    %34 = tpu.matmul %32, %33, %cst_28 {dimension_numbers = #tpu.dot_dimension_numbers<[1], [0], [0], [1], [0, 0, 1, 1], [], []>} : vector<240x32xbf16>, vector<32x128xbf16>, vector<240x128xf32> -> vector<240x128xf32>
    %c0_29 = arith.constant 0 : index
    %c0_30 = arith.constant 0 : index
    %35 = vector.load %arg3[%c0_29, %c0_30] : memref<1x128xf32, #tpu.memory_space<vmem>>, vector<1x128xf32>
    %36 = vector.broadcast %35 : vector<1x128xf32> to vector<240x128xf32>
    %37 = arith.addf %34, %36 : vector<240x128xf32>
    %cst_31 = arith.constant 0.000000e+00 : f32
    %38 = vector.broadcast %cst_31 : f32 to vector<240x128xf32>
    %39 = arith.maximumf %37, %38 : vector<240x128xf32>
    %40 = arith.addf %30, %39 : vector<240x128xf32>
    %cst_32 = arith.constant 2.500000e-01 : f32
    %41 = vector.broadcast %cst_32 : f32 to vector<240x128xf32>
    %42 = arith.mulf %40, %41 : vector<240x128xf32>
    %43 = arith.truncf %42 : vector<240x128xf32> to vector<240x128xbf16>
    %c0_33 = arith.constant 0 : index
    %c0_34 = arith.constant 0 : index
    %44 = vector.load %arg14[%c0_33, %c0_34] : memref<240x128xbf16, #tpu.memory_space<vmem>>, vector<240x128xbf16>
    tpu.vector_store %arg14[%c0_33, %c0_34], %43 {strides = array<i32>} : memref<240x128xbf16, #tpu.memory_space<vmem>>, vector<240x128xbf16>,
    %cst_35 = arith.constant 0.000000e+00 : f32
    %45 = vector.broadcast %cst_35 : f32 to vector<160x128xf32>
    %c0_36 = arith.constant 0 : index
    %c0_37 = arith.constant 0 : index
    %46 = vector.load %arg14[%c0_36, %c0_37] : memref<240x128xbf16, #tpu.memory_space<vmem>>, vector<160x128xbf16>
    %c0_38 = arith.constant 0 : index
    %c0_39 = arith.constant 0 : index
    %c0_40 = arith.constant 0 : index
    %47 = vector.load %arg4[%c0_38, %c0_39, %c0_40] : memref<25x128x128xbf16, #tpu.memory_space<vmem>>, vector<1x128x128xbf16>
    %48 = vector.shape_cast %47 : vector<1x128x128xbf16> to vector<128x128xbf16>
    %cst_41 = arith.constant dense<0.000000e+00> : vector<160x128xf32>
    %49 = tpu.matmul %46, %48, %cst_41 {dimension_numbers = #tpu.dot_dimension_numbers<[1], [0], [0], [1], [0, 0, 1, 1], [], []>} : vector<160x128xbf16>, vector<128x128xbf16>, vector<160x128xf32> -> vector<160x128xf32>
    %50 = arith.addf %45, %49 : vector<160x128xf32>
    %c1 = arith.constant 1 : index
    %c0_42 = arith.constant 0 : index
    %51 = vector.load %arg14[%c1, %c0_42] : memref<240x128xbf16, #tpu.memory_space<vmem>>, vector<160x128xbf16>
    %c1_43 = arith.constant 1 : index
    %c0_44 = arith.constant 0 : index
    %c0_45 = arith.constant 0 : index
    %52 = vector.load %arg4[%c1_43, %c0_44, %c0_45] : memref<25x128x128xbf16, #tpu.memory_space<vmem>>, vector<1x128x128xbf16>
    %53 = vector.shape_cast %52 : vector<1x128x128xbf16> to vector<128x128xbf16>
    %cst_46 = arith.constant dense<0.000000e+00> : vector<160x128xf32>
    %54 = tpu.matmul %51, %53, %cst_46 {dimension_numbers = #tpu.dot_dimension_numbers<[1], [0], [0], [1], [0, 0, 1, 1], [], []>} : vector<160x128xbf16>, vector<128x128xbf16>, vector<160x128xf32> -> vector<160x128xf32>
    %55 = arith.addf %50, %54 : vector<160x128xf32>
    %c2 = arith.constant 2 : index
    %c0_47 = arith.constant 0 : index
    %56 = vector.load %arg14[%c2, %c0_47] : memref<240x128xbf16, #tpu.memory_space<vmem>>, vector<160x128xbf16>
    %c2_48 = arith.constant 2 : index
    %c0_49 = arith.constant 0 : index
    %c0_50 = arith.constant 0 : index
    %57 = vector.load %arg4[%c2_48, %c0_49, %c0_50] : memref<25x128x128xbf16, #tpu.memory_space<vmem>>, vector<1x128x128xbf16>
    %58 = vector.shape_cast %57 : vector<1x128x128xbf16> to vector<128x128xbf16>
    %cst_51 = arith.constant dense<0.000000e+00> : vector<160x128xf32>
    %59 = tpu.matmul %56, %58, %cst_51 {dimension_numbers = #tpu.dot_dimension_numbers<[1], [0], [0], [1], [0, 0, 1, 1], [], []>} : vector<160x128xbf16>, vector<128x128xbf16>, vector<160x128xf32> -> vector<160x128xf32>
    %60 = arith.addf %55, %59 : vector<160x128xf32>
    %c3 = arith.constant 3 : index
    %c0_52 = arith.constant 0 : index
    %61 = vector.load %arg14[%c3, %c0_52] : memref<240x128xbf16, #tpu.memory_space<vmem>>, vector<160x128xbf16>
    %c3_53 = arith.constant 3 : index
    %c0_54 = arith.constant 0 : index
    %c0_55 = arith.constant 0 : index
    %62 = vector.load %arg4[%c3_53, %c0_54, %c0_55] : memref<25x128x128xbf16, #tpu.memory_space<vmem>>, vector<1x128x128xbf16>
    %63 = vector.shape_cast %62 : vector<1x128x128xbf16> to vector<128x128xbf16>
    %cst_56 = arith.constant dense<0.000000e+00> : vector<160x128xf32>
    %64 = tpu.matmul %61, %63, %cst_56 {dimension_numbers = #tpu.dot_dimension_numbers<[1], [0], [0], [1], [0, 0, 1, 1], [], []>} : vector<160x128xbf16>, vector<128x128xbf16>, vector<160x128xf32> -> vector<160x128xf32>
    %65 = arith.addf %60, %64 : vector<160x128xf32>
    %c4 = arith.constant 4 : index
    %c0_57 = arith.constant 0 : index
    %66 = vector.load %arg14[%c4, %c0_57] : memref<240x128xbf16, #tpu.memory_space<vmem>>, vector<160x128xbf16>
    %c4_58 = arith.constant 4 : index
    %c0_59 = arith.constant 0 : index
    %c0_60 = arith.constant 0 : index
    %67 = vector.load %arg4[%c4_58, %c0_59, %c0_60] : memref<25x128x128xbf16, #tpu.memory_space<vmem>>, vector<1x128x128xbf16>
    %68 = vector.shape_cast %67 : vector<1x128x128xbf16> to vector<128x128xbf16>
    %cst_61 = arith.constant dense<0.000000e+00> : vector<160x128xf32>
    %69 = tpu.matmul %66, %68, %cst_61 {dimension_numbers = #tpu.dot_dimension_numbers<[1], [0], [0], [1], [0, 0, 1, 1], [], []>} : vector<160x128xbf16>, vector<128x128xbf16>, vector<160x128xf32> -> vector<160x128xf32>
    %70 = arith.addf %65, %69 : vector<160x128xf32>
    %c16 = arith.constant 16 : index
    %c0_62 = arith.constant 0 : index
    %71 = vector.load %arg14[%c16, %c0_62] : memref<240x128xbf16, #tpu.memory_space<vmem>>, vector<160x128xbf16>
    %c5 = arith.constant 5 : index
    %c0_63 = arith.constant 0 : index
    %c0_64 = arith.constant 0 : index
    %72 = vector.load %arg4[%c5, %c0_63, %c0_64] : memref<25x128x128xbf16, #tpu.memory_space<vmem>>, vector<1x128x128xbf16>
    %73 = vector.shape_cast %72 : vector<1x128x128xbf16> to vector<128x128xbf16>
    %cst_65 = arith.constant dense<0.000000e+00> : vector<160x128xf32>
    %74 = tpu.matmul %71, %73, %cst_65 {dimension_numbers = #tpu.dot_dimension_numbers<[1], [0], [0], [1], [0, 0, 1, 1], [], []>} : vector<160x128xbf16>, vector<128x128xbf16>, vector<160x128xf32> -> vector<160x128xf32>
    %75 = arith.addf %70, %74 : vector<160x128xf32>
    %c17 = arith.constant 17 : index
    %c0_66 = arith.constant 0 : index
    %76 = vector.load %arg14[%c17, %c0_66] : memref<240x128xbf16, #tpu.memory_space<vmem>>, vector<160x128xbf16>
    %c6 = arith.constant 6 : index
    %c0_67 = arith.constant 0 : index
    %c0_68 = arith.constant 0 : index
    %77 = vector.load %arg4[%c6, %c0_67, %c0_68] : memref<25x128x128xbf16, #tpu.memory_space<vmem>>, vector<1x128x128xbf16>
    %78 = vector.shape_cast %77 : vector<1x128x128xbf16> to vector<128x128xbf16>
    %cst_69 = arith.constant dense<0.000000e+00> : vector<160x128xf32>
    %79 = tpu.matmul %76, %78, %cst_69 {dimension_numbers = #tpu.dot_dimension_numbers<[1], [0], [0], [1], [0, 0, 1, 1], [], []>} : vector<160x128xbf16>, vector<128x128xbf16>, vector<160x128xf32> -> vector<160x128xf32>
    %80 = arith.addf %75, %79 : vector<160x128xf32>
    %c18 = arith.constant 18 : index
    %c0_70 = arith.constant 0 : index
    %81 = vector.load %arg14[%c18, %c0_70] : memref<240x128xbf16, #tpu.memory_space<vmem>>, vector<160x128xbf16>
    %c7 = arith.constant 7 : index
    %c0_71 = arith.constant 0 : index
    %c0_72 = arith.constant 0 : index
    %82 = vector.load %arg4[%c7, %c0_71, %c0_72] : memref<25x128x128xbf16, #tpu.memory_space<vmem>>, vector<1x128x128xbf16>
    %83 = vector.shape_cast %82 : vector<1x128x128xbf16> to vector<128x128xbf16>
    %cst_73 = arith.constant dense<0.000000e+00> : vector<160x128xf32>
    %84 = tpu.matmul %81, %83, %cst_73 {dimension_numbers = #tpu.dot_dimension_numbers<[1], [0], [0], [1], [0, 0, 1, 1], [], []>} : vector<160x128xbf16>, vector<128x128xbf16>, vector<160x128xf32> -> vector<160x128xf32>
    %85 = arith.addf %80, %84 : vector<160x128xf32>
    %c19 = arith.constant 19 : index
    %c0_74 = arith.constant 0 : index
    %86 = vector.load %arg14[%c19, %c0_74] : memref<240x128xbf16, #tpu.memory_space<vmem>>, vector<160x128xbf16>
    %c8 = arith.constant 8 : index
    %c0_75 = arith.constant 0 : index
    %c0_76 = arith.constant 0 : index
    %87 = vector.load %arg4[%c8, %c0_75, %c0_76] : memref<25x128x128xbf16, #tpu.memory_space<vmem>>, vector<1x128x128xbf16>
    %88 = vector.shape_cast %87 : vector<1x128x128xbf16> to vector<128x128xbf16>
    %cst_77 = arith.constant dense<0.000000e+00> : vector<160x128xf32>
    %89 = tpu.matmul %86, %88, %cst_77 {dimension_numbers = #tpu.dot_dimension_numbers<[1], [0], [0], [1], [0, 0, 1, 1], [], []>} : vector<160x128xbf16>, vector<128x128xbf16>, vector<160x128xf32> -> vector<160x128xf32>
    %90 = arith.addf %85, %89 : vector<160x128xf32>
    %c20 = arith.constant 20 : index
    %c0_78 = arith.constant 0 : index
    %91 = vector.load %arg14[%c20, %c0_78] : memref<240x128xbf16, #tpu.memory_space<vmem>>, vector<160x128xbf16>
    %c9 = arith.constant 9 : index
    %c0_79 = arith.constant 0 : index
    %c0_80 = arith.constant 0 : index
    %92 = vector.load %arg4[%c9, %c0_79, %c0_80] : memref<25x128x128xbf16, #tpu.memory_space<vmem>>, vector<1x128x128xbf16>
    %93 = vector.shape_cast %92 : vector<1x128x128xbf16> to vector<128x128xbf16>
    %cst_81 = arith.constant dense<0.000000e+00> : vector<160x128xf32>
    %94 = tpu.matmul %91, %93, %cst_81 {dimension_numbers = #tpu.dot_dimension_numbers<[1], [0], [0], [1], [0, 0, 1, 1], [], []>} : vector<160x128xbf16>, vector<128x128xbf16>, vector<160x128xf32> -> vector<160x128xf32>
    %95 = arith.addf %90, %94 : vector<160x128xf32>
    %c32 = arith.constant 32 : index
    %c0_82 = arith.constant 0 : index
    %96 = vector.load %arg14[%c32, %c0_82] : memref<240x128xbf16, #tpu.memory_space<vmem>>, vector<160x128xbf16>
    %c10 = arith.constant 10 : index
    %c0_83 = arith.constant 0 : index
    %c0_84 = arith.constant 0 : index
    %97 = vector.load %arg4[%c10, %c0_83, %c0_84] : memref<25x128x128xbf16, #tpu.memory_space<vmem>>, vector<1x128x128xbf16>
    %98 = vector.shape_cast %97 : vector<1x128x128xbf16> to vector<128x128xbf16>
    %cst_85 = arith.constant dense<0.000000e+00> : vector<160x128xf32>
    %99 = tpu.matmul %96, %98, %cst_85 {dimension_numbers = #tpu.dot_dimension_numbers<[1], [0], [0], [1], [0, 0, 1, 1], [], []>} : vector<160x128xbf16>, vector<128x128xbf16>, vector<160x128xf32> -> vector<160x128xf32>
    %100 = arith.addf %95, %99 : vector<160x128xf32>
    %c33 = arith.constant 33 : index
    %c0_86 = arith.constant 0 : index
    %101 = vector.load %arg14[%c33, %c0_86] : memref<240x128xbf16, #tpu.memory_space<vmem>>, vector<160x128xbf16>
    %c11 = arith.constant 11 : index
    %c0_87 = arith.constant 0 : index
    %c0_88 = arith.constant 0 : index
    %102 = vector.load %arg4[%c11, %c0_87, %c0_88] : memref<25x128x128xbf16, #tpu.memory_space<vmem>>, vector<1x128x128xbf16>
    %103 = vector.shape_cast %102 : vector<1x128x128xbf16> to vector<128x128xbf16>
    %cst_89 = arith.constant dense<0.000000e+00> : vector<160x128xf32>
    %104 = tpu.matmul %101, %103, %cst_89 {dimension_numbers = #tpu.dot_dimension_numbers<[1], [0], [0], [1], [0, 0, 1, 1], [], []>} : vector<160x128xbf16>, vector<128x128xbf16>, vector<160x128xf32> -> vector<160x128xf32>
    %105 = arith.addf %100, %104 : vector<160x128xf32>
    %c34 = arith.constant 34 : index
    %c0_90 = arith.constant 0 : index
    %106 = vector.load %arg14[%c34, %c0_90] : memref<240x128xbf16, #tpu.memory_space<vmem>>, vector<160x128xbf16>
    %c12 = arith.constant 12 : index
    %c0_91 = arith.constant 0 : index
    %c0_92 = arith.constant 0 : index
    %107 = vector.load %arg4[%c12, %c0_91, %c0_92] : memref<25x128x128xbf16, #tpu.memory_space<vmem>>, vector<1x128x128xbf16>
    %108 = vector.shape_cast %107 : vector<1x128x128xbf16> to vector<128x128xbf16>
    %cst_93 = arith.constant dense<0.000000e+00> : vector<160x128xf32>
    %109 = tpu.matmul %106, %108, %cst_93 {dimension_numbers = #tpu.dot_dimension_numbers<[1], [0], [0], [1], [0, 0, 1, 1], [], []>} : vector<160x128xbf16>, vector<128x128xbf16>, vector<160x128xf32> -> vector<160x128xf32>
    %110 = arith.addf %105, %109 : vector<160x128xf32>
    %c35 = arith.constant 35 : index
    %c0_94 = arith.constant 0 : index
    %111 = vector.load %arg14[%c35, %c0_94] : memref<240x128xbf16, #tpu.memory_space<vmem>>, vector<160x128xbf16>
    %c13 = arith.constant 13 : index
    %c0_95 = arith.constant 0 : index
    %c0_96 = arith.constant 0 : index
    %112 = vector.load %arg4[%c13, %c0_95, %c0_96] : memref<25x128x128xbf16, #tpu.memory_space<vmem>>, vector<1x128x128xbf16>
    %113 = vector.shape_cast %112 : vector<1x128x128xbf16> to vector<128x128xbf16>
    %cst_97 = arith.constant dense<0.000000e+00> : vector<160x128xf32>
    %114 = tpu.matmul %111, %113, %cst_97 {dimension_numbers = #tpu.dot_dimension_numbers<[1], [0], [0], [1], [0, 0, 1, 1], [], []>} : vector<160x128xbf16>, vector<128x128xbf16>, vector<160x128xf32> -> vector<160x128xf32>
    %115 = arith.addf %110, %114 : vector<160x128xf32>
    %c36 = arith.constant 36 : index
    %c0_98 = arith.constant 0 : index
    %116 = vector.load %arg14[%c36, %c0_98] : memref<240x128xbf16, #tpu.memory_space<vmem>>, vector<160x128xbf16>
    %c14 = arith.constant 14 : index
    %c0_99 = arith.constant 0 : index
    %c0_100 = arith.constant 0 : index
    %117 = vector.load %arg4[%c14, %c0_99, %c0_100] : memref<25x128x128xbf16, #tpu.memory_space<vmem>>, vector<1x128x128xbf16>
    %118 = vector.shape_cast %117 : vector<1x128x128xbf16> to vector<128x128xbf16>
    %cst_101 = arith.constant dense<0.000000e+00> : vector<160x128xf32>
    %119 = tpu.matmul %116, %118, %cst_101 {dimension_numbers = #tpu.dot_dimension_numbers<[1], [0], [0], [1], [0, 0, 1, 1], [], []>} : vector<160x128xbf16>, vector<128x128xbf16>, vector<160x128xf32> -> vector<160x128xf32>
    %120 = arith.addf %115, %119 : vector<160x128xf32>
    %c48 = arith.constant 48 : index
    %c0_102 = arith.constant 0 : index
    %121 = vector.load %arg14[%c48, %c0_102] : memref<240x128xbf16, #tpu.memory_space<vmem>>, vector<160x128xbf16>
    %c15 = arith.constant 15 : index
    %c0_103 = arith.constant 0 : index
    %c0_104 = arith.constant 0 : index
    %122 = vector.load %arg4[%c15, %c0_103, %c0_104] : memref<25x128x128xbf16, #tpu.memory_space<vmem>>, vector<1x128x128xbf16>
    %123 = vector.shape_cast %122 : vector<1x128x128xbf16> to vector<128x128xbf16>
    %cst_105 = arith.constant dense<0.000000e+00> : vector<160x128xf32>
    %124 = tpu.matmul %121, %123, %cst_105 {dimension_numbers = #tpu.dot_dimension_numbers<[1], [0], [0], [1], [0, 0, 1, 1], [], []>} : vector<160x128xbf16>, vector<128x128xbf16>, vector<160x128xf32> -> vector<160x128xf32>
    %125 = arith.addf %120, %124 : vector<160x128xf32>
    %c49 = arith.constant 49 : index
    %c0_106 = arith.constant 0 : index
    %126 = vector.load %arg14[%c49, %c0_106] : memref<240x128xbf16, #tpu.memory_space<vmem>>, vector<160x128xbf16>
    %c16_107 = arith.constant 16 : index
    %c0_108 = arith.constant 0 : index
    %c0_109 = arith.constant 0 : index
    %127 = vector.load %arg4[%c16_107, %c0_108, %c0_109] : memref<25x128x128xbf16, #tpu.memory_space<vmem>>, vector<1x128x128xbf16>
    %128 = vector.shape_cast %127 : vector<1x128x128xbf16> to vector<128x128xbf16>
    %cst_110 = arith.constant dense<0.000000e+00> : vector<160x128xf32>
    %129 = tpu.matmul %126, %128, %cst_110 {dimension_numbers = #tpu.dot_dimension_numbers<[1], [0], [0], [1], [0, 0, 1, 1], [], []>} : vector<160x128xbf16>, vector<128x128xbf16>, vector<160x128xf32> -> vector<160x128xf32>
    %130 = arith.addf %125, %129 : vector<160x128xf32>
    %c50 = arith.constant 50 : index
    %c0_111 = arith.constant 0 : index
    %131 = vector.load %arg14[%c50, %c0_111] : memref<240x128xbf16, #tpu.memory_space<vmem>>, vector<160x128xbf16>
    %c17_112 = arith.constant 17 : index
    %c0_113 = arith.constant 0 : index
    %c0_114 = arith.constant 0 : index
    %132 = vector.load %arg4[%c17_112, %c0_113, %c0_114] : memref<25x128x128xbf16, #tpu.memory_space<vmem>>, vector<1x128x128xbf16>
    %133 = vector.shape_cast %132 : vector<1x128x128xbf16> to vector<128x128xbf16>
    %cst_115 = arith.constant dense<0.000000e+00> : vector<160x128xf32>
    %134 = tpu.matmul %131, %133, %cst_115 {dimension_numbers = #tpu.dot_dimension_numbers<[1], [0], [0], [1], [0, 0, 1, 1], [], []>} : vector<160x128xbf16>, vector<128x128xbf16>, vector<160x128xf32> -> vector<160x128xf32>
    %135 = arith.addf %130, %134 : vector<160x128xf32>
    %c51 = arith.constant 51 : index
    %c0_116 = arith.constant 0 : index
    %136 = vector.load %arg14[%c51, %c0_116] : memref<240x128xbf16, #tpu.memory_space<vmem>>, vector<160x128xbf16>
    %c18_117 = arith.constant 18 : index
    %c0_118 = arith.constant 0 : index
    %c0_119 = arith.constant 0 : index
    %137 = vector.load %arg4[%c18_117, %c0_118, %c0_119] : memref<25x128x128xbf16, #tpu.memory_space<vmem>>, vector<1x128x128xbf16>
    %138 = vector.shape_cast %137 : vector<1x128x128xbf16> to vector<128x128xbf16>
    %cst_120 = arith.constant dense<0.000000e+00> : vector<160x128xf32>
    %139 = tpu.matmul %136, %138, %cst_120 {dimension_numbers = #tpu.dot_dimension_numbers<[1], [0], [0], [1], [0, 0, 1, 1], [], []>} : vector<160x128xbf16>, vector<128x128xbf16>, vector<160x128xf32> -> vector<160x128xf32>
    %140 = arith.addf %135, %139 : vector<160x128xf32>
    %c52 = arith.constant 52 : index
    %c0_121 = arith.constant 0 : index
    %141 = vector.load %arg14[%c52, %c0_121] : memref<240x128xbf16, #tpu.memory_space<vmem>>, vector<160x128xbf16>
    %c19_122 = arith.constant 19 : index
    %c0_123 = arith.constant 0 : index
    %c0_124 = arith.constant 0 : index
    %142 = vector.load %arg4[%c19_122, %c0_123, %c0_124] : memref<25x128x128xbf16, #tpu.memory_space<vmem>>, vector<1x128x128xbf16>
    %143 = vector.shape_cast %142 : vector<1x128x128xbf16> to vector<128x128xbf16>
    %cst_125 = arith.constant dense<0.000000e+00> : vector<160x128xf32>
    %144 = tpu.matmul %141, %143, %cst_125 {dimension_numbers = #tpu.dot_dimension_numbers<[1], [0], [0], [1], [0, 0, 1, 1], [], []>} : vector<160x128xbf16>, vector<128x128xbf16>, vector<160x128xf32> -> vector<160x128xf32>
    %145 = arith.addf %140, %144 : vector<160x128xf32>
    %c64 = arith.constant 64 : index
    %c0_126 = arith.constant 0 : index
    %146 = vector.load %arg14[%c64, %c0_126] : memref<240x128xbf16, #tpu.memory_space<vmem>>, vector<160x128xbf16>
    %c20_127 = arith.constant 20 : index
    %c0_128 = arith.constant 0 : index
    %c0_129 = arith.constant 0 : index
    %147 = vector.load %arg4[%c20_127, %c0_128, %c0_129] : memref<25x128x128xbf16, #tpu.memory_space<vmem>>, vector<1x128x128xbf16>
    %148 = vector.shape_cast %147 : vector<1x128x128xbf16> to vector<128x128xbf16>
    %cst_130 = arith.constant dense<0.000000e+00> : vector<160x128xf32>
    %149 = tpu.matmul %146, %148, %cst_130 {dimension_numbers = #tpu.dot_dimension_numbers<[1], [0], [0], [1], [0, 0, 1, 1], [], []>} : vector<160x128xbf16>, vector<128x128xbf16>, vector<160x128xf32> -> vector<160x128xf32>
    %150 = arith.addf %145, %149 : vector<160x128xf32>
    %c65 = arith.constant 65 : index
    %c0_131 = arith.constant 0 : index
    %151 = vector.load %arg14[%c65, %c0_131] : memref<240x128xbf16, #tpu.memory_space<vmem>>, vector<160x128xbf16>
    %c21 = arith.constant 21 : index
    %c0_132 = arith.constant 0 : index
    %c0_133 = arith.constant 0 : index
    %152 = vector.load %arg4[%c21, %c0_132, %c0_133] : memref<25x128x128xbf16, #tpu.memory_space<vmem>>, vector<1x128x128xbf16>
    %153 = vector.shape_cast %152 : vector<1x128x128xbf16> to vector<128x128xbf16>
    %cst_134 = arith.constant dense<0.000000e+00> : vector<160x128xf32>
    %154 = tpu.matmul %151, %153, %cst_134 {dimension_numbers = #tpu.dot_dimension_numbers<[1], [0], [0], [1], [0, 0, 1, 1], [], []>} : vector<160x128xbf16>, vector<128x128xbf16>, vector<160x128xf32> -> vector<160x128xf32>
    %155 = arith.addf %150, %154 : vector<160x128xf32>
    %c66 = arith.constant 66 : index
    %c0_135 = arith.constant 0 : index
    %156 = vector.load %arg14[%c66, %c0_135] : memref<240x128xbf16, #tpu.memory_space<vmem>>, vector<160x128xbf16>
    %c22 = arith.constant 22 : index
    %c0_136 = arith.constant 0 : index
    %c0_137 = arith.constant 0 : index
    %157 = vector.load %arg4[%c22, %c0_136, %c0_137] : memref<25x128x128xbf16, #tpu.memory_space<vmem>>, vector<1x128x128xbf16>
    %158 = vector.shape_cast %157 : vector<1x128x128xbf16> to vector<128x128xbf16>
    %cst_138 = arith.constant dense<0.000000e+00> : vector<160x128xf32>
    %159 = tpu.matmul %156, %158, %cst_138 {dimension_numbers = #tpu.dot_dimension_numbers<[1], [0], [0], [1], [0, 0, 1, 1], [], []>} : vector<160x128xbf16>, vector<128x128xbf16>, vector<160x128xf32> -> vector<160x128xf32>
    %160 = arith.addf %155, %159 : vector<160x128xf32>
    %c67 = arith.constant 67 : index
    %c0_139 = arith.constant 0 : index
    %161 = vector.load %arg14[%c67, %c0_139] : memref<240x128xbf16, #tpu.memory_space<vmem>>, vector<160x128xbf16>
    %c23 = arith.constant 23 : index
    %c0_140 = arith.constant 0 : index
    %c0_141 = arith.constant 0 : index
    %162 = vector.load %arg4[%c23, %c0_140, %c0_141] : memref<25x128x128xbf16, #tpu.memory_space<vmem>>, vector<1x128x128xbf16>
    %163 = vector.shape_cast %162 : vector<1x128x128xbf16> to vector<128x128xbf16>
    %cst_142 = arith.constant dense<0.000000e+00> : vector<160x128xf32>
    %164 = tpu.matmul %161, %163, %cst_142 {dimension_numbers = #tpu.dot_dimension_numbers<[1], [0], [0], [1], [0, 0, 1, 1], [], []>} : vector<160x128xbf16>, vector<128x128xbf16>, vector<160x128xf32> -> vector<160x128xf32>
    %165 = arith.addf %160, %164 : vector<160x128xf32>
    %c68 = arith.constant 68 : index
    %c0_143 = arith.constant 0 : index
    %166 = vector.load %arg14[%c68, %c0_143] : memref<240x128xbf16, #tpu.memory_space<vmem>>, vector<160x128xbf16>
    %c24 = arith.constant 24 : index
    %c0_144 = arith.constant 0 : index
    %c0_145 = arith.constant 0 : index
    %167 = vector.load %arg4[%c24, %c0_144, %c0_145] : memref<25x128x128xbf16, #tpu.memory_space<vmem>>, vector<1x128x128xbf16>
    %168 = vector.shape_cast %167 : vector<1x128x128xbf16> to vector<128x128xbf16>
    %cst_146 = arith.constant dense<0.000000e+00> : vector<160x128xf32>
    %169 = tpu.matmul %166, %168, %cst_146 {dimension_numbers = #tpu.dot_dimension_numbers<[1], [0], [0], [1], [0, 0, 1, 1], [], []>} : vector<160x128xbf16>, vector<128x128xbf16>, vector<160x128xf32> -> vector<160x128xf32>
    %170 = arith.addf %165, %169 : vector<160x128xf32>
    %c0_147 = arith.constant 0 : index
    %c0_148 = arith.constant 0 : index
    %171 = vector.load %arg5[%c0_147, %c0_148] : memref<1x128xf32, #tpu.memory_space<vmem>>, vector<1x128xf32>
    %172 = vector.broadcast %171 : vector<1x128xf32> to vector<160x128xf32>
    %173 = arith.addf %170, %172 : vector<160x128xf32>
    %cst_149 = arith.constant 0.000000e+00 : f32
    %174 = vector.broadcast %cst_149 : f32 to vector<160x128xf32>
    %175 = arith.maximumf %173, %174 : vector<160x128xf32>
    %c0_150 = arith.constant 0 : index
    %c0_151 = arith.constant 0 : index
    %176 = vector.load %arg6[%c0_150, %c0_151] : memref<32x160xbf16, #tpu.memory_space<vmem>>, vector<32x160xbf16>
    %177 = arith.truncf %175 : vector<160x128xf32> to vector<160x128xbf16>
    %cst_152 = arith.constant dense<0.000000e+00> : vector<32x128xf32>
    %178 = tpu.matmul %176, %177, %cst_152 {dimension_numbers = #tpu.dot_dimension_numbers<[1], [0], [0], [1], [0, 0, 1, 1], [], []>} : vector<32x160xbf16>, vector<160x128xbf16>, vector<32x128xf32> -> vector<32x128xf32>
    %179 = arith.truncf %178 : vector<32x128xf32> to vector<32x128xbf16>
    %c0_153 = arith.constant 0 : index
    %c0_154 = arith.constant 0 : index
    %c0_155 = arith.constant 0 : index
    %180 = vector.load %arg15[%c0_153, %c0_154, %c0_155] : memref<2x32x128xbf16, #tpu.memory_space<vmem>>, vector<1x32x128xbf16>
    %181 = vector.shape_cast %180 : vector<1x32x128xbf16> to vector<32x128xbf16>
    %182 = vector.shape_cast %179 : vector<32x128xbf16> to vector<1x32x128xbf16>
    tpu.vector_store %arg15[%c0_153, %c0_154, %c0_155], %182 {strides = array<i32>} : memref<2x32x128xbf16, #tpu.memory_space<vmem>>, vector<1x32x128xbf16>,
    %cst_156 = arith.constant 0.000000e+00 : f32
    %183 = vector.broadcast %cst_156 : f32 to vector<240x128xf32>
    %c1_157 = arith.constant 1 : index
    %c0_158 = arith.constant 0 : index
    %c0_159 = arith.constant 0 : index
    %184 = vector.load %arg1[%c1_157, %c0_158, %c0_159] : memref<2x960x32xbf16, #tpu.memory_space<vmem>>, vector<1x240x32xbf16>
    %185 = vector.shape_cast %184 : vector<1x240x32xbf16> to vector<240x32xbf16>
    %c0_160 = arith.constant 0 : index
    %c0_161 = arith.constant 0 : index
    %186 = vector.load %arg2[%c0_160, %c0_161] : memref<32x128xbf16, #tpu.memory_space<vmem>>, vector<32x128xbf16>
    %cst_162 = arith.constant dense<0.000000e+00> : vector<240x128xf32>
    %187 = tpu.matmul %185, %186, %cst_162 {dimension_numbers = #tpu.dot_dimension_numbers<[1], [0], [0], [1], [0, 0, 1, 1], [], []>} : vector<240x32xbf16>, vector<32x128xbf16>, vector<240x128xf32> -> vector<240x128xf32>
    %c0_163 = arith.constant 0 : index
    %c0_164 = arith.constant 0 : index
    %188 = vector.load %arg3[%c0_163, %c0_164] : memref<1x128xf32, #tpu.memory_space<vmem>>, vector<1x128xf32>
    %189 = vector.broadcast %188 : vector<1x128xf32> to vector<240x128xf32>
    %190 = arith.addf %187, %189 : vector<240x128xf32>
    %cst_165 = arith.constant 0.000000e+00 : f32
    %191 = vector.broadcast %cst_165 : f32 to vector<240x128xf32>
    %192 = arith.maximumf %190, %191 : vector<240x128xf32>
    %193 = arith.addf %183, %192 : vector<240x128xf32>
    %c1_166 = arith.constant 1 : index
    %c240_167 = arith.constant 240 : index
    %c0_168 = arith.constant 0 : index
    %194 = vector.load %arg1[%c1_166, %c240_167, %c0_168] : memref<2x960x32xbf16, #tpu.memory_space<vmem>>, vector<1x240x32xbf16>
    %195 = vector.shape_cast %194 : vector<1x240x32xbf16> to vector<240x32xbf16>
    %c0_169 = arith.constant 0 : index
    %c0_170 = arith.constant 0 : index
    %196 = vector.load %arg2[%c0_169, %c0_170] : memref<32x128xbf16, #tpu.memory_space<vmem>>, vector<32x128xbf16>
    %cst_171 = arith.constant dense<0.000000e+00> : vector<240x128xf32>
    %197 = tpu.matmul %195, %196, %cst_171 {dimension_numbers = #tpu.dot_dimension_numbers<[1], [0], [0], [1], [0, 0, 1, 1], [], []>} : vector<240x32xbf16>, vector<32x128xbf16>, vector<240x128xf32> -> vector<240x128xf32>
    %c0_172 = arith.constant 0 : index
    %c0_173 = arith.constant 0 : index
    %198 = vector.load %arg3[%c0_172, %c0_173] : memref<1x128xf32, #tpu.memory_space<vmem>>, vector<1x128xf32>
    %199 = vector.broadcast %198 : vector<1x128xf32> to vector<240x128xf32>
    %200 = arith.addf %197, %199 : vector<240x128xf32>
    %cst_174 = arith.constant 0.000000e+00 : f32
    %201 = vector.broadcast %cst_174 : f32 to vector<240x128xf32>
    %202 = arith.maximumf %200, %201 : vector<240x128xf32>
    %203 = arith.addf %193, %202 : vector<240x128xf32>
    %c1_175 = arith.constant 1 : index
    %c480_176 = arith.constant 480 : index
    %c0_177 = arith.constant 0 : index
    %204 = vector.load %arg1[%c1_175, %c480_176, %c0_177] : memref<2x960x32xbf16, #tpu.memory_space<vmem>>, vector<1x240x32xbf16>
    %205 = vector.shape_cast %204 : vector<1x240x32xbf16> to vector<240x32xbf16>
    %c0_178 = arith.constant 0 : index
    %c0_179 = arith.constant 0 : index
    %206 = vector.load %arg2[%c0_178, %c0_179] : memref<32x128xbf16, #tpu.memory_space<vmem>>, vector<32x128xbf16>
    %cst_180 = arith.constant dense<0.000000e+00> : vector<240x128xf32>
    %207 = tpu.matmul %205, %206, %cst_180 {dimension_numbers = #tpu.dot_dimension_numbers<[1], [0], [0], [1], [0, 0, 1, 1], [], []>} : vector<240x32xbf16>, vector<32x128xbf16>, vector<240x128xf32> -> vector<240x128xf32>
    %c0_181 = arith.constant 0 : index
    %c0_182 = arith.constant 0 : index
    %208 = vector.load %arg3[%c0_181, %c0_182] : memref<1x128xf32, #tpu.memory_space<vmem>>, vector<1x128xf32>
    %209 = vector.broadcast %208 : vector<1x128xf32> to vector<240x128xf32>
    %210 = arith.addf %207, %209 : vector<240x128xf32>
    %cst_183 = arith.constant 0.000000e+00 : f32
    %211 = vector.broadcast %cst_183 : f32 to vector<240x128xf32>
    %212 = arith.maximumf %210, %211 : vector<240x128xf32>
    %213 = arith.addf %203, %212 : vector<240x128xf32>
    %c1_184 = arith.constant 1 : index
    %c720_185 = arith.constant 720 : index
    %c0_186 = arith.constant 0 : index
    %214 = vector.load %arg1[%c1_184, %c720_185, %c0_186] : memref<2x960x32xbf16, #tpu.memory_space<vmem>>, vector<1x240x32xbf16>
    %215 = vector.shape_cast %214 : vector<1x240x32xbf16> to vector<240x32xbf16>
    %c0_187 = arith.constant 0 : index
    %c0_188 = arith.constant 0 : index
    %216 = vector.load %arg2[%c0_187, %c0_188] : memref<32x128xbf16, #tpu.memory_space<vmem>>, vector<32x128xbf16>
    %cst_189 = arith.constant dense<0.000000e+00> : vector<240x128xf32>
    %217 = tpu.matmul %215, %216, %cst_189 {dimension_numbers = #tpu.dot_dimension_numbers<[1], [0], [0], [1], [0, 0, 1, 1], [], []>} : vector<240x32xbf16>, vector<32x128xbf16>, vector<240x128xf32> -> vector<240x128xf32>
    %c0_190 = arith.constant 0 : index
    %c0_191 = arith.constant 0 : index
    %218 = vector.load %arg3[%c0_190, %c0_191] : memref<1x128xf32, #tpu.memory_space<vmem>>, vector<1x128xf32>
    %219 = vector.broadcast %218 : vector<1x128xf32> to vector<240x128xf32>
    %220 = arith.addf %217, %219 : vector<240x128xf32>
    %cst_192 = arith.constant 0.000000e+00 : f32
    %221 = vector.broadcast %cst_192 : f32 to vector<240x128xf32>
    %222 = arith.maximumf %220, %221 : vector<240x128xf32>
    %223 = arith.addf %213, %222 : vector<240x128xf32>
    %cst_193 = arith.constant 2.500000e-01 : f32
    %224 = vector.broadcast %cst_193 : f32 to vector<240x128xf32>
    %225 = arith.mulf %223, %224 : vector<240x128xf32>
    %226 = arith.truncf %225 : vector<240x128xf32> to vector<240x128xbf16>
    %c0_194 = arith.constant 0 : index
    %c0_195 = arith.constant 0 : index
    %227 = vector.load %arg14[%c0_194, %c0_195] : memref<240x128xbf16, #tpu.memory_space<vmem>>, vector<240x128xbf16>
    tpu.vector_store %arg14[%c0_194, %c0_195], %226 {strides = array<i32>} : memref<240x128xbf16, #tpu.memory_space<vmem>>, vector<240x128xbf16>,
    %cst_196 = arith.constant 0.000000e+00 : f32
    %228 = vector.broadcast %cst_196 : f32 to vector<160x128xf32>
    %c0_197 = arith.constant 0 : index
    %c0_198 = arith.constant 0 : index
    %229 = vector.load %arg14[%c0_197, %c0_198] : memref<240x128xbf16, #tpu.memory_space<vmem>>, vector<160x128xbf16>
    %c0_199 = arith.constant 0 : index
    %c0_200 = arith.constant 0 : index
    %c0_201 = arith.constant 0 : index
    %230 = vector.load %arg4[%c0_199, %c0_200, %c0_201] : memref<25x128x128xbf16, #tpu.memory_space<vmem>>, vector<1x128x128xbf16>
    %231 = vector.shape_cast %230 : vector<1x128x128xbf16> to vector<128x128xbf16>
    %cst_202 = arith.constant dense<0.000000e+00> : vector<160x128xf32>
    %232 = tpu.matmul %229, %231, %cst_202 {dimension_numbers = #tpu.dot_dimension_numbers<[1], [0], [0], [1], [0, 0, 1, 1], [], []>} : vector<160x128xbf16>, vector<128x128xbf16>, vector<160x128xf32> -> vector<160x128xf32>
    %233 = arith.addf %228, %232 : vector<160x128xf32>
    %c1_203 = arith.constant 1 : index
    %c0_204 = arith.constant 0 : index
    %234 = vector.load %arg14[%c1_203, %c0_204] : memref<240x128xbf16, #tpu.memory_space<vmem>>, vector<160x128xbf16>
    %c1_205 = arith.constant 1 : index
    %c0_206 = arith.constant 0 : index
    %c0_207 = arith.constant 0 : index
    %235 = vector.load %arg4[%c1_205, %c0_206, %c0_207] : memref<25x128x128xbf16, #tpu.memory_space<vmem>>, vector<1x128x128xbf16>
    %236 = vector.shape_cast %235 : vector<1x128x128xbf16> to vector<128x128xbf16>
    %cst_208 = arith.constant dense<0.000000e+00> : vector<160x128xf32>
    %237 = tpu.matmul %234, %236, %cst_208 {dimension_numbers = #tpu.dot_dimension_numbers<[1], [0], [0], [1], [0, 0, 1, 1], [], []>} : vector<160x128xbf16>, vector<128x128xbf16>, vector<160x128xf32> -> vector<160x128xf32>
    %238 = arith.addf %233, %237 : vector<160x128xf32>
    %c2_209 = arith.constant 2 : index
    %c0_210 = arith.constant 0 : index
    %239 = vector.load %arg14[%c2_209, %c0_210] : memref<240x128xbf16, #tpu.memory_space<vmem>>, vector<160x128xbf16>
    %c2_211 = arith.constant 2 : index
    %c0_212 = arith.constant 0 : index
    %c0_213 = arith.constant 0 : index
    %240 = vector.load %arg4[%c2_211, %c0_212, %c0_213] : memref<25x128x128xbf16, #tpu.memory_space<vmem>>, vector<1x128x128xbf16>
    %241 = vector.shape_cast %240 : vector<1x128x128xbf16> to vector<128x128xbf16>
    %cst_214 = arith.constant dense<0.000000e+00> : vector<160x128xf32>
    %242 = tpu.matmul %239, %241, %cst_214 {dimension_numbers = #tpu.dot_dimension_numbers<[1], [0], [0], [1], [0, 0, 1, 1], [], []>} : vector<160x128xbf16>, vector<128x128xbf16>, vector<160x128xf32> -> vector<160x128xf32>
    %243 = arith.addf %238, %242 : vector<160x128xf32>
    %c3_215 = arith.constant 3 : index
    %c0_216 = arith.constant 0 : index
    %244 = vector.load %arg14[%c3_215, %c0_216] : memref<240x128xbf16, #tpu.memory_space<vmem>>, vector<160x128xbf16>
    %c3_217 = arith.constant 3 : index
    %c0_218 = arith.constant 0 : index
    %c0_219 = arith.constant 0 : index
    %245 = vector.load %arg4[%c3_217, %c0_218, %c0_219] : memref<25x128x128xbf16, #tpu.memory_space<vmem>>, vector<1x128x128xbf16>
    %246 = vector.shape_cast %245 : vector<1x128x128xbf16> to vector<128x128xbf16>
    %cst_220 = arith.constant dense<0.000000e+00> : vector<160x128xf32>
    %247 = tpu.matmul %244, %246, %cst_220 {dimension_numbers = #tpu.dot_dimension_numbers<[1], [0], [0], [1], [0, 0, 1, 1], [], []>} : vector<160x128xbf16>, vector<128x128xbf16>, vector<160x128xf32> -> vector<160x128xf32>
    %248 = arith.addf %243, %247 : vector<160x128xf32>
    %c4_221 = arith.constant 4 : index
    %c0_222 = arith.constant 0 : index
    %249 = vector.load %arg14[%c4_221, %c0_222] : memref<240x128xbf16, #tpu.memory_space<vmem>>, vector<160x128xbf16>
    %c4_223 = arith.constant 4 : index
    %c0_224 = arith.constant 0 : index
    %c0_225 = arith.constant 0 : index
    %250 = vector.load %arg4[%c4_223, %c0_224, %c0_225] : memref<25x128x128xbf16, #tpu.memory_space<vmem>>, vector<1x128x128xbf16>
    %251 = vector.shape_cast %250 : vector<1x128x128xbf16> to vector<128x128xbf16>
    %cst_226 = arith.constant dense<0.000000e+00> : vector<160x128xf32>
    %252 = tpu.matmul %249, %251, %cst_226 {dimension_numbers = #tpu.dot_dimension_numbers<[1], [0], [0], [1], [0, 0, 1, 1], [], []>} : vector<160x128xbf16>, vector<128x128xbf16>, vector<160x128xf32> -> vector<160x128xf32>
    %253 = arith.addf %248, %252 : vector<160x128xf32>
    %c16_227 = arith.constant 16 : index
    %c0_228 = arith.constant 0 : index
    %254 = vector.load %arg14[%c16_227, %c0_228] : memref<240x128xbf16, #tpu.memory_space<vmem>>, vector<160x128xbf16>
    %c5_229 = arith.constant 5 : index
    %c0_230 = arith.constant 0 : index
    %c0_231 = arith.constant 0 : index
    %255 = vector.load %arg4[%c5_229, %c0_230, %c0_231] : memref<25x128x128xbf16, #tpu.memory_space<vmem>>, vector<1x128x128xbf16>
    %256 = vector.shape_cast %255 : vector<1x128x128xbf16> to vector<128x128xbf16>
    %cst_232 = arith.constant dense<0.000000e+00> : vector<160x128xf32>
    %257 = tpu.matmul %254, %256, %cst_232 {dimension_numbers = #tpu.dot_dimension_numbers<[1], [0], [0], [1], [0, 0, 1, 1], [], []>} : vector<160x128xbf16>, vector<128x128xbf16>, vector<160x128xf32> -> vector<160x128xf32>
    %258 = arith.addf %253, %257 : vector<160x128xf32>
    %c17_233 = arith.constant 17 : index
    %c0_234 = arith.constant 0 : index
    %259 = vector.load %arg14[%c17_233, %c0_234] : memref<240x128xbf16, #tpu.memory_space<vmem>>, vector<160x128xbf16>
    %c6_235 = arith.constant 6 : index
    %c0_236 = arith.constant 0 : index
    %c0_237 = arith.constant 0 : index
    %260 = vector.load %arg4[%c6_235, %c0_236, %c0_237] : memref<25x128x128xbf16, #tpu.memory_space<vmem>>, vector<1x128x128xbf16>
    %261 = vector.shape_cast %260 : vector<1x128x128xbf16> to vector<128x128xbf16>
    %cst_238 = arith.constant dense<0.000000e+00> : vector<160x128xf32>
    %262 = tpu.matmul %259, %261, %cst_238 {dimension_numbers = #tpu.dot_dimension_numbers<[1], [0], [0], [1], [0, 0, 1, 1], [], []>} : vector<160x128xbf16>, vector<128x128xbf16>, vector<160x128xf32> -> vector<160x128xf32>
    %263 = arith.addf %258, %262 : vector<160x128xf32>
    %c18_239 = arith.constant 18 : index
    %c0_240 = arith.constant 0 : index
    %264 = vector.load %arg14[%c18_239, %c0_240] : memref<240x128xbf16, #tpu.memory_space<vmem>>, vector<160x128xbf16>
    %c7_241 = arith.constant 7 : index
    %c0_242 = arith.constant 0 : index
    %c0_243 = arith.constant 0 : index
    %265 = vector.load %arg4[%c7_241, %c0_242, %c0_243] : memref<25x128x128xbf16, #tpu.memory_space<vmem>>, vector<1x128x128xbf16>
    %266 = vector.shape_cast %265 : vector<1x128x128xbf16> to vector<128x128xbf16>
    %cst_244 = arith.constant dense<0.000000e+00> : vector<160x128xf32>
    %267 = tpu.matmul %264, %266, %cst_244 {dimension_numbers = #tpu.dot_dimension_numbers<[1], [0], [0], [1], [0, 0, 1, 1], [], []>} : vector<160x128xbf16>, vector<128x128xbf16>, vector<160x128xf32> -> vector<160x128xf32>
    %268 = arith.addf %263, %267 : vector<160x128xf32>
    %c19_245 = arith.constant 19 : index
    %c0_246 = arith.constant 0 : index
    %269 = vector.load %arg14[%c19_245, %c0_246] : memref<240x128xbf16, #tpu.memory_space<vmem>>, vector<160x128xbf16>
    %c8_247 = arith.constant 8 : index
    %c0_248 = arith.constant 0 : index
    %c0_249 = arith.constant 0 : index
    %270 = vector.load %arg4[%c8_247, %c0_248, %c0_249] : memref<25x128x128xbf16, #tpu.memory_space<vmem>>, vector<1x128x128xbf16>
    %271 = vector.shape_cast %270 : vector<1x128x128xbf16> to vector<128x128xbf16>
    %cst_250 = arith.constant dense<0.000000e+00> : vector<160x128xf32>
    %272 = tpu.matmul %269, %271, %cst_250 {dimension_numbers = #tpu.dot_dimension_numbers<[1], [0], [0], [1], [0, 0, 1, 1], [], []>} : vector<160x128xbf16>, vector<128x128xbf16>, vector<160x128xf32> -> vector<160x128xf32>
    %273 = arith.addf %268, %272 : vector<160x128xf32>
    %c20_251 = arith.constant 20 : index
    %c0_252 = arith.constant 0 : index
    %274 = vector.load %arg14[%c20_251, %c0_252] : memref<240x128xbf16, #tpu.memory_space<vmem>>, vector<160x128xbf16>
    %c9_253 = arith.constant 9 : index
    %c0_254 = arith.constant 0 : index
    %c0_255 = arith.constant 0 : index
    %275 = vector.load %arg4[%c9_253, %c0_254, %c0_255] : memref<25x128x128xbf16, #tpu.memory_space<vmem>>, vector<1x128x128xbf16>
    %276 = vector.shape_cast %275 : vector<1x128x128xbf16> to vector<128x128xbf16>
    %cst_256 = arith.constant dense<0.000000e+00> : vector<160x128xf32>
    %277 = tpu.matmul %274, %276, %cst_256 {dimension_numbers = #tpu.dot_dimension_numbers<[1], [0], [0], [1], [0, 0, 1, 1], [], []>} : vector<160x128xbf16>, vector<128x128xbf16>, vector<160x128xf32> -> vector<160x128xf32>
    %278 = arith.addf %273, %277 : vector<160x128xf32>
    %c32_257 = arith.constant 32 : index
    %c0_258 = arith.constant 0 : index
    %279 = vector.load %arg14[%c32_257, %c0_258] : memref<240x128xbf16, #tpu.memory_space<vmem>>, vector<160x128xbf16>
    %c10_259 = arith.constant 10 : index
    %c0_260 = arith.constant 0 : index
    %c0_261 = arith.constant 0 : index
    %280 = vector.load %arg4[%c10_259, %c0_260, %c0_261] : memref<25x128x128xbf16, #tpu.memory_space<vmem>>, vector<1x128x128xbf16>
    %281 = vector.shape_cast %280 : vector<1x128x128xbf16> to vector<128x128xbf16>
    %cst_262 = arith.constant dense<0.000000e+00> : vector<160x128xf32>
    %282 = tpu.matmul %279, %281, %cst_262 {dimension_numbers = #tpu.dot_dimension_numbers<[1], [0], [0], [1], [0, 0, 1, 1], [], []>} : vector<160x128xbf16>, vector<128x128xbf16>, vector<160x128xf32> -> vector<160x128xf32>
    %283 = arith.addf %278, %282 : vector<160x128xf32>
    %c33_263 = arith.constant 33 : index
    %c0_264 = arith.constant 0 : index
    %284 = vector.load %arg14[%c33_263, %c0_264] : memref<240x128xbf16, #tpu.memory_space<vmem>>, vector<160x128xbf16>
    %c11_265 = arith.constant 11 : index
    %c0_266 = arith.constant 0 : index
    %c0_267 = arith.constant 0 : index
    %285 = vector.load %arg4[%c11_265, %c0_266, %c0_267] : memref<25x128x128xbf16, #tpu.memory_space<vmem>>, vector<1x128x128xbf16>
    %286 = vector.shape_cast %285 : vector<1x128x128xbf16> to vector<128x128xbf16>
    %cst_268 = arith.constant dense<0.000000e+00> : vector<160x128xf32>
    %287 = tpu.matmul %284, %286, %cst_268 {dimension_numbers = #tpu.dot_dimension_numbers<[1], [0], [0], [1], [0, 0, 1, 1], [], []>} : vector<160x128xbf16>, vector<128x128xbf16>, vector<160x128xf32> -> vector<160x128xf32>
    %288 = arith.addf %283, %287 : vector<160x128xf32>
    %c34_269 = arith.constant 34 : index
    %c0_270 = arith.constant 0 : index
    %289 = vector.load %arg14[%c34_269, %c0_270] : memref<240x128xbf16, #tpu.memory_space<vmem>>, vector<160x128xbf16>
    %c12_271 = arith.constant 12 : index
    %c0_272 = arith.constant 0 : index
    %c0_273 = arith.constant 0 : index
    %290 = vector.load %arg4[%c12_271, %c0_272, %c0_273] : memref<25x128x128xbf16, #tpu.memory_space<vmem>>, vector<1x128x128xbf16>
    %291 = vector.shape_cast %290 : vector<1x128x128xbf16> to vector<128x128xbf16>
    %cst_274 = arith.constant dense<0.000000e+00> : vector<160x128xf32>
    %292 = tpu.matmul %289, %291, %cst_274 {dimension_numbers = #tpu.dot_dimension_numbers<[1], [0], [0], [1], [0, 0, 1, 1], [], []>} : vector<160x128xbf16>, vector<128x128xbf16>, vector<160x128xf32> -> vector<160x128xf32>
    %293 = arith.addf %288, %292 : vector<160x128xf32>
    %c35_275 = arith.constant 35 : index
    %c0_276 = arith.constant 0 : index
    %294 = vector.load %arg14[%c35_275, %c0_276] : memref<240x128xbf16, #tpu.memory_space<vmem>>, vector<160x128xbf16>
    %c13_277 = arith.constant 13 : index
    %c0_278 = arith.constant 0 : index
    %c0_279 = arith.constant 0 : index
    %295 = vector.load %arg4[%c13_277, %c0_278, %c0_279] : memref<25x128x128xbf16, #tpu.memory_space<vmem>>, vector<1x128x128xbf16>
    %296 = vector.shape_cast %295 : vector<1x128x128xbf16> to vector<128x128xbf16>
    %cst_280 = arith.constant dense<0.000000e+00> : vector<160x128xf32>
    %297 = tpu.matmul %294, %296, %cst_280 {dimension_numbers = #tpu.dot_dimension_numbers<[1], [0], [0], [1], [0, 0, 1, 1], [], []>} : vector<160x128xbf16>, vector<128x128xbf16>, vector<160x128xf32> -> vector<160x128xf32>
    %298 = arith.addf %293, %297 : vector<160x128xf32>
    %c36_281 = arith.constant 36 : index
    %c0_282 = arith.constant 0 : index
    %299 = vector.load %arg14[%c36_281, %c0_282] : memref<240x128xbf16, #tpu.memory_space<vmem>>, vector<160x128xbf16>
    %c14_283 = arith.constant 14 : index
    %c0_284 = arith.constant 0 : index
    %c0_285 = arith.constant 0 : index
    %300 = vector.load %arg4[%c14_283, %c0_284, %c0_285] : memref<25x128x128xbf16, #tpu.memory_space<vmem>>, vector<1x128x128xbf16>
    %301 = vector.shape_cast %300 : vector<1x128x128xbf16> to vector<128x128xbf16>
    %cst_286 = arith.constant dense<0.000000e+00> : vector<160x128xf32>
    %302 = tpu.matmul %299, %301, %cst_286 {dimension_numbers = #tpu.dot_dimension_numbers<[1], [0], [0], [1], [0, 0, 1, 1], [], []>} : vector<160x128xbf16>, vector<128x128xbf16>, vector<160x128xf32> -> vector<160x128xf32>
    %303 = arith.addf %298, %302 : vector<160x128xf32>
    %c48_287 = arith.constant 48 : index
    %c0_288 = arith.constant 0 : index
    %304 = vector.load %arg14[%c48_287, %c0_288] : memref<240x128xbf16, #tpu.memory_space<vmem>>, vector<160x128xbf16>
    %c15_289 = arith.constant 15 : index
    %c0_290 = arith.constant 0 : index
    %c0_291 = arith.constant 0 : index
    %305 = vector.load %arg4[%c15_289, %c0_290, %c0_291] : memref<25x128x128xbf16, #tpu.memory_space<vmem>>, vector<1x128x128xbf16>
    %306 = vector.shape_cast %305 : vector<1x128x128xbf16> to vector<128x128xbf16>
    %cst_292 = arith.constant dense<0.000000e+00> : vector<160x128xf32>
    %307 = tpu.matmul %304, %306, %cst_292 {dimension_numbers = #tpu.dot_dimension_numbers<[1], [0], [0], [1], [0, 0, 1, 1], [], []>} : vector<160x128xbf16>, vector<128x128xbf16>, vector<160x128xf32> -> vector<160x128xf32>
    %308 = arith.addf %303, %307 : vector<160x128xf32>
    %c49_293 = arith.constant 49 : index
    %c0_294 = arith.constant 0 : index
    %309 = vector.load %arg14[%c49_293, %c0_294] : memref<240x128xbf16, #tpu.memory_space<vmem>>, vector<160x128xbf16>
    %c16_295 = arith.constant 16 : index
    %c0_296 = arith.constant 0 : index
    %c0_297 = arith.constant 0 : index
    %310 = vector.load %arg4[%c16_295, %c0_296, %c0_297] : memref<25x128x128xbf16, #tpu.memory_space<vmem>>, vector<1x128x128xbf16>
    %311 = vector.shape_cast %310 : vector<1x128x128xbf16> to vector<128x128xbf16>
    %cst_298 = arith.constant dense<0.000000e+00> : vector<160x128xf32>
    %312 = tpu.matmul %309, %311, %cst_298 {dimension_numbers = #tpu.dot_dimension_numbers<[1], [0], [0], [1], [0, 0, 1, 1], [], []>} : vector<160x128xbf16>, vector<128x128xbf16>, vector<160x128xf32> -> vector<160x128xf32>
    %313 = arith.addf %308, %312 : vector<160x128xf32>
    %c50_299 = arith.constant 50 : index
    %c0_300 = arith.constant 0 : index
    %314 = vector.load %arg14[%c50_299, %c0_300] : memref<240x128xbf16, #tpu.memory_space<vmem>>, vector<160x128xbf16>
    %c17_301 = arith.constant 17 : index
    %c0_302 = arith.constant 0 : index
    %c0_303 = arith.constant 0 : index
    %315 = vector.load %arg4[%c17_301, %c0_302, %c0_303] : memref<25x128x128xbf16, #tpu.memory_space<vmem>>, vector<1x128x128xbf16>
    %316 = vector.shape_cast %315 : vector<1x128x128xbf16> to vector<128x128xbf16>
    %cst_304 = arith.constant dense<0.000000e+00> : vector<160x128xf32>
    %317 = tpu.matmul %314, %316, %cst_304 {dimension_numbers = #tpu.dot_dimension_numbers<[1], [0], [0], [1], [0, 0, 1, 1], [], []>} : vector<160x128xbf16>, vector<128x128xbf16>, vector<160x128xf32> -> vector<160x128xf32>
    %318 = arith.addf %313, %317 : vector<160x128xf32>
    %c51_305 = arith.constant 51 : index
    %c0_306 = arith.constant 0 : index
    %319 = vector.load %arg14[%c51_305, %c0_306] : memref<240x128xbf16, #tpu.memory_space<vmem>>, vector<160x128xbf16>
    %c18_307 = arith.constant 18 : index
    %c0_308 = arith.constant 0 : index
    %c0_309 = arith.constant 0 : index
    %320 = vector.load %arg4[%c18_307, %c0_308, %c0_309] : memref<25x128x128xbf16, #tpu.memory_space<vmem>>, vector<1x128x128xbf16>
    %321 = vector.shape_cast %320 : vector<1x128x128xbf16> to vector<128x128xbf16>
    %cst_310 = arith.constant dense<0.000000e+00> : vector<160x128xf32>
    %322 = tpu.matmul %319, %321, %cst_310 {dimension_numbers = #tpu.dot_dimension_numbers<[1], [0], [0], [1], [0, 0, 1, 1], [], []>} : vector<160x128xbf16>, vector<128x128xbf16>, vector<160x128xf32> -> vector<160x128xf32>
    %323 = arith.addf %318, %322 : vector<160x128xf32>
    %c52_311 = arith.constant 52 : index
    %c0_312 = arith.constant 0 : index
    %324 = vector.load %arg14[%c52_311, %c0_312] : memref<240x128xbf16, #tpu.memory_space<vmem>>, vector<160x128xbf16>
    %c19_313 = arith.constant 19 : index
    %c0_314 = arith.constant 0 : index
    %c0_315 = arith.constant 0 : index
    %325 = vector.load %arg4[%c19_313, %c0_314, %c0_315] : memref<25x128x128xbf16, #tpu.memory_space<vmem>>, vector<1x128x128xbf16>
    %326 = vector.shape_cast %325 : vector<1x128x128xbf16> to vector<128x128xbf16>
    %cst_316 = arith.constant dense<0.000000e+00> : vector<160x128xf32>
    %327 = tpu.matmul %324, %326, %cst_316 {dimension_numbers = #tpu.dot_dimension_numbers<[1], [0], [0], [1], [0, 0, 1, 1], [], []>} : vector<160x128xbf16>, vector<128x128xbf16>, vector<160x128xf32> -> vector<160x128xf32>
    %328 = arith.addf %323, %327 : vector<160x128xf32>
    %c64_317 = arith.constant 64 : index
    %c0_318 = arith.constant 0 : index
    %329 = vector.load %arg14[%c64_317, %c0_318] : memref<240x128xbf16, #tpu.memory_space<vmem>>, vector<160x128xbf16>
    %c20_319 = arith.constant 20 : index
    %c0_320 = arith.constant 0 : index
    %c0_321 = arith.constant 0 : index
    %330 = vector.load %arg4[%c20_319, %c0_320, %c0_321] : memref<25x128x128xbf16, #tpu.memory_space<vmem>>, vector<1x128x128xbf16>
    %331 = vector.shape_cast %330 : vector<1x128x128xbf16> to vector<128x128xbf16>
    %cst_322 = arith.constant dense<0.000000e+00> : vector<160x128xf32>
    %332 = tpu.matmul %329, %331, %cst_322 {dimension_numbers = #tpu.dot_dimension_numbers<[1], [0], [0], [1], [0, 0, 1, 1], [], []>} : vector<160x128xbf16>, vector<128x128xbf16>, vector<160x128xf32> -> vector<160x128xf32>
    %333 = arith.addf %328, %332 : vector<160x128xf32>
    %c65_323 = arith.constant 65 : index
    %c0_324 = arith.constant 0 : index
    %334 = vector.load %arg14[%c65_323, %c0_324] : memref<240x128xbf16, #tpu.memory_space<vmem>>, vector<160x128xbf16>
    %c21_325 = arith.constant 21 : index
    %c0_326 = arith.constant 0 : index
    %c0_327 = arith.constant 0 : index
    %335 = vector.load %arg4[%c21_325, %c0_326, %c0_327] : memref<25x128x128xbf16, #tpu.memory_space<vmem>>, vector<1x128x128xbf16>
    %336 = vector.shape_cast %335 : vector<1x128x128xbf16> to vector<128x128xbf16>
    %cst_328 = arith.constant dense<0.000000e+00> : vector<160x128xf32>
    %337 = tpu.matmul %334, %336, %cst_328 {dimension_numbers = #tpu.dot_dimension_numbers<[1], [0], [0], [1], [0, 0, 1, 1], [], []>} : vector<160x128xbf16>, vector<128x128xbf16>, vector<160x128xf32> -> vector<160x128xf32>
    %338 = arith.addf %333, %337 : vector<160x128xf32>
    %c66_329 = arith.constant 66 : index
    %c0_330 = arith.constant 0 : index
    %339 = vector.load %arg14[%c66_329, %c0_330] : memref<240x128xbf16, #tpu.memory_space<vmem>>, vector<160x128xbf16>
    %c22_331 = arith.constant 22 : index
    %c0_332 = arith.constant 0 : index
    %c0_333 = arith.constant 0 : index
    %340 = vector.load %arg4[%c22_331, %c0_332, %c0_333] : memref<25x128x128xbf16, #tpu.memory_space<vmem>>, vector<1x128x128xbf16>
    %341 = vector.shape_cast %340 : vector<1x128x128xbf16> to vector<128x128xbf16>
    %cst_334 = arith.constant dense<0.000000e+00> : vector<160x128xf32>
    %342 = tpu.matmul %339, %341, %cst_334 {dimension_numbers = #tpu.dot_dimension_numbers<[1], [0], [0], [1], [0, 0, 1, 1], [], []>} : vector<160x128xbf16>, vector<128x128xbf16>, vector<160x128xf32> -> vector<160x128xf32>
    %343 = arith.addf %338, %342 : vector<160x128xf32>
    %c67_335 = arith.constant 67 : index
    %c0_336 = arith.constant 0 : index
    %344 = vector.load %arg14[%c67_335, %c0_336] : memref<240x128xbf16, #tpu.memory_space<vmem>>, vector<160x128xbf16>
    %c23_337 = arith.constant 23 : index
    %c0_338 = arith.constant 0 : index
    %c0_339 = arith.constant 0 : index
    %345 = vector.load %arg4[%c23_337, %c0_338, %c0_339] : memref<25x128x128xbf16, #tpu.memory_space<vmem>>, vector<1x128x128xbf16>
    %346 = vector.shape_cast %345 : vector<1x128x128xbf16> to vector<128x128xbf16>
    %cst_340 = arith.constant dense<0.000000e+00> : vector<160x128xf32>
    %347 = tpu.matmul %344, %346, %cst_340 {dimension_numbers = #tpu.dot_dimension_numbers<[1], [0], [0], [1], [0, 0, 1, 1], [], []>} : vector<160x128xbf16>, vector<128x128xbf16>, vector<160x128xf32> -> vector<160x128xf32>
    %348 = arith.addf %343, %347 : vector<160x128xf32>
    %c68_341 = arith.constant 68 : index
    %c0_342 = arith.constant 0 : index
    %349 = vector.load %arg14[%c68_341, %c0_342] : memref<240x128xbf16, #tpu.memory_space<vmem>>, vector<160x128xbf16>
    %c24_343 = arith.constant 24 : index
    %c0_344 = arith.constant 0 : index
    %c0_345 = arith.constant 0 : index
    %350 = vector.load %arg4[%c24_343, %c0_344, %c0_345] : memref<25x128x128xbf16, #tpu.memory_space<vmem>>, vector<1x128x128xbf16>
    %351 = vector.shape_cast %350 : vector<1x128x128xbf16> to vector<128x128xbf16>
    %cst_346 = arith.constant dense<0.000000e+00> : vector<160x128xf32>
    %352 = tpu.matmul %349, %351, %cst_346 {dimension_numbers = #tpu.dot_dimension_numbers<[1], [0], [0], [1], [0, 0, 1, 1], [], []>} : vector<160x128xbf16>, vector<128x128xbf16>, vector<160x128xf32> -> vector<160x128xf32>
    %353 = arith.addf %348, %352 : vector<160x128xf32>
    %c0_347 = arith.constant 0 : index
    %c0_348 = arith.constant 0 : index
    %354 = vector.load %arg5[%c0_347, %c0_348] : memref<1x128xf32, #tpu.memory_space<vmem>>, vector<1x128xf32>
    %355 = vector.broadcast %354 : vector<1x128xf32> to vector<160x128xf32>
    %356 = arith.addf %353, %355 : vector<160x128xf32>
    %cst_349 = arith.constant 0.000000e+00 : f32
    %357 = vector.broadcast %cst_349 : f32 to vector<160x128xf32>
    %358 = arith.maximumf %356, %357 : vector<160x128xf32>
    %c0_350 = arith.constant 0 : index
    %c0_351 = arith.constant 0 : index
    %359 = vector.load %arg6[%c0_350, %c0_351] : memref<32x160xbf16, #tpu.memory_space<vmem>>, vector<32x160xbf16>
    %360 = arith.truncf %358 : vector<160x128xf32> to vector<160x128xbf16>
    %cst_352 = arith.constant dense<0.000000e+00> : vector<32x128xf32>
    %361 = tpu.matmul %359, %360, %cst_352 {dimension_numbers = #tpu.dot_dimension_numbers<[1], [0], [0], [1], [0, 0, 1, 1], [], []>} : vector<32x160xbf16>, vector<160x128xbf16>, vector<32x128xf32> -> vector<32x128xf32>
    %362 = arith.truncf %361 : vector<32x128xf32> to vector<32x128xbf16>
    %c1_353 = arith.constant 1 : index
    %c0_354 = arith.constant 0 : index
    %c0_355 = arith.constant 0 : index
    %363 = vector.load %arg15[%c1_353, %c0_354, %c0_355] : memref<2x32x128xbf16, #tpu.memory_space<vmem>>, vector<1x32x128xbf16>
    %364 = vector.shape_cast %363 : vector<1x32x128xbf16> to vector<32x128xbf16>
    %365 = vector.shape_cast %362 : vector<32x128xbf16> to vector<1x32x128xbf16>
    tpu.vector_store %arg15[%c1_353, %c0_354, %c0_355], %365 {strides = array<i32>} : memref<2x32x128xbf16, #tpu.memory_space<vmem>>, vector<1x32x128xbf16>,
    %cst_356 = arith.constant 0.000000e+00 : f32
    %366 = vector.broadcast %cst_356 : f32 to vector<2x128xf32>
    %c0_357 = arith.constant 0 : index
    %c0_358 = arith.constant 0 : index
    %c0_359 = arith.constant 0 : index
    %367 = vector.load %arg15[%c0_357, %c0_358, %c0_359] : memref<2x32x128xbf16, #tpu.memory_space<vmem>>, vector<2x1x128xbf16>
    %368 = vector.shape_cast %367 : vector<2x1x128xbf16> to vector<2x128xbf16>
    %c0_360 = arith.constant 0 : index
    %c0_361 = arith.constant 0 : index
    %c0_362 = arith.constant 0 : index
    %369 = vector.load %arg7[%c0_360, %c0_361, %c0_362] : memref<25x128x128xbf16, #tpu.memory_space<vmem>>, vector<1x128x128xbf16>
    %370 = vector.shape_cast %369 : vector<1x128x128xbf16> to vector<128x128xbf16>
    %cst_363 = arith.constant dense<0.000000e+00> : vector<2x128xf32>
    %371 = tpu.matmul %368, %370, %cst_363 {dimension_numbers = #tpu.dot_dimension_numbers<[1], [0], [0], [1], [0, 0, 1, 1], [], []>} : vector<2x128xbf16>, vector<128x128xbf16>, vector<2x128xf32> -> vector<2x128xf32>
    %372 = arith.addf %366, %371 : vector<2x128xf32>
    %c0_364 = arith.constant 0 : index
    %c1_365 = arith.constant 1 : index
    %c0_366 = arith.constant 0 : index
    %373 = vector.load %arg15[%c0_364, %c1_365, %c0_366] : memref<2x32x128xbf16, #tpu.memory_space<vmem>>, vector<2x1x128xbf16>
    %374 = vector.shape_cast %373 : vector<2x1x128xbf16> to vector<2x128xbf16>
    %c1_367 = arith.constant 1 : index
    %c0_368 = arith.constant 0 : index
    %c0_369 = arith.constant 0 : index
    %375 = vector.load %arg7[%c1_367, %c0_368, %c0_369] : memref<25x128x128xbf16, #tpu.memory_space<vmem>>, vector<1x128x128xbf16>
    %376 = vector.shape_cast %375 : vector<1x128x128xbf16> to vector<128x128xbf16>
    %cst_370 = arith.constant dense<0.000000e+00> : vector<2x128xf32>
    %377 = tpu.matmul %374, %376, %cst_370 {dimension_numbers = #tpu.dot_dimension_numbers<[1], [0], [0], [1], [0, 0, 1, 1], [], []>} : vector<2x128xbf16>, vector<128x128xbf16>, vector<2x128xf32> -> vector<2x128xf32>
    %378 = arith.addf %372, %377 : vector<2x128xf32>
    %c0_371 = arith.constant 0 : index
    %c2_372 = arith.constant 2 : index
    %c0_373 = arith.constant 0 : index
    %379 = vector.load %arg15[%c0_371, %c2_372, %c0_373] : memref<2x32x128xbf16, #tpu.memory_space<vmem>>, vector<2x1x128xbf16>
    %380 = vector.shape_cast %379 : vector<2x1x128xbf16> to vector<2x128xbf16>
    %c2_374 = arith.constant 2 : index
    %c0_375 = arith.constant 0 : index
    %c0_376 = arith.constant 0 : index
    %381 = vector.load %arg7[%c2_374, %c0_375, %c0_376] : memref<25x128x128xbf16, #tpu.memory_space<vmem>>, vector<1x128x128xbf16>
    %382 = vector.shape_cast %381 : vector<1x128x128xbf16> to vector<128x128xbf16>
    %cst_377 = arith.constant dense<0.000000e+00> : vector<2x128xf32>
    %383 = tpu.matmul %380, %382, %cst_377 {dimension_numbers = #tpu.dot_dimension_numbers<[1], [0], [0], [1], [0, 0, 1, 1], [], []>} : vector<2x128xbf16>, vector<128x128xbf16>, vector<2x128xf32> -> vector<2x128xf32>
    %384 = arith.addf %378, %383 : vector<2x128xf32>
    %c0_378 = arith.constant 0 : index
    %c3_379 = arith.constant 3 : index
    %c0_380 = arith.constant 0 : index
    %385 = vector.load %arg15[%c0_378, %c3_379, %c0_380] : memref<2x32x128xbf16, #tpu.memory_space<vmem>>, vector<2x1x128xbf16>
    %386 = vector.shape_cast %385 : vector<2x1x128xbf16> to vector<2x128xbf16>
    %c3_381 = arith.constant 3 : index
    %c0_382 = arith.constant 0 : index
    %c0_383 = arith.constant 0 : index
    %387 = vector.load %arg7[%c3_381, %c0_382, %c0_383] : memref<25x128x128xbf16, #tpu.memory_space<vmem>>, vector<1x128x128xbf16>
    %388 = vector.shape_cast %387 : vector<1x128x128xbf16> to vector<128x128xbf16>
    %cst_384 = arith.constant dense<0.000000e+00> : vector<2x128xf32>
    %389 = tpu.matmul %386, %388, %cst_384 {dimension_numbers = #tpu.dot_dimension_numbers<[1], [0], [0], [1], [0, 0, 1, 1], [], []>} : vector<2x128xbf16>, vector<128x128xbf16>, vector<2x128xf32> -> vector<2x128xf32>
    %390 = arith.addf %384, %389 : vector<2x128xf32>
    %c0_385 = arith.constant 0 : index
    %c4_386 = arith.constant 4 : index
    %c0_387 = arith.constant 0 : index
    %391 = vector.load %arg15[%c0_385, %c4_386, %c0_387] : memref<2x32x128xbf16, #tpu.memory_space<vmem>>, vector<2x1x128xbf16>
    %392 = vector.shape_cast %391 : vector<2x1x128xbf16> to vector<2x128xbf16>
    %c4_388 = arith.constant 4 : index
    %c0_389 = arith.constant 0 : index
    %c0_390 = arith.constant 0 : index
    %393 = vector.load %arg7[%c4_388, %c0_389, %c0_390] : memref<25x128x128xbf16, #tpu.memory_space<vmem>>, vector<1x128x128xbf16>
    %394 = vector.shape_cast %393 : vector<1x128x128xbf16> to vector<128x128xbf16>
    %cst_391 = arith.constant dense<0.000000e+00> : vector<2x128xf32>
    %395 = tpu.matmul %392, %394, %cst_391 {dimension_numbers = #tpu.dot_dimension_numbers<[1], [0], [0], [1], [0, 0, 1, 1], [], []>} : vector<2x128xbf16>, vector<128x128xbf16>, vector<2x128xf32> -> vector<2x128xf32>
    %396 = arith.addf %390, %395 : vector<2x128xf32>
    %c0_392 = arith.constant 0 : index
    %c5_393 = arith.constant 5 : index
    %c0_394 = arith.constant 0 : index
    %397 = vector.load %arg15[%c0_392, %c5_393, %c0_394] : memref<2x32x128xbf16, #tpu.memory_space<vmem>>, vector<2x1x128xbf16>
    %398 = vector.shape_cast %397 : vector<2x1x128xbf16> to vector<2x128xbf16>
    %c5_395 = arith.constant 5 : index
    %c0_396 = arith.constant 0 : index
    %c0_397 = arith.constant 0 : index
    %399 = vector.load %arg7[%c5_395, %c0_396, %c0_397] : memref<25x128x128xbf16, #tpu.memory_space<vmem>>, vector<1x128x128xbf16>
    %400 = vector.shape_cast %399 : vector<1x128x128xbf16> to vector<128x128xbf16>
    %cst_398 = arith.constant dense<0.000000e+00> : vector<2x128xf32>
    %401 = tpu.matmul %398, %400, %cst_398 {dimension_numbers = #tpu.dot_dimension_numbers<[1], [0], [0], [1], [0, 0, 1, 1], [], []>} : vector<2x128xbf16>, vector<128x128xbf16>, vector<2x128xf32> -> vector<2x128xf32>
    %402 = arith.addf %396, %401 : vector<2x128xf32>
    %c0_399 = arith.constant 0 : index
    %c6_400 = arith.constant 6 : index
    %c0_401 = arith.constant 0 : index
    %403 = vector.load %arg15[%c0_399, %c6_400, %c0_401] : memref<2x32x128xbf16, #tpu.memory_space<vmem>>, vector<2x1x128xbf16>
    %404 = vector.shape_cast %403 : vector<2x1x128xbf16> to vector<2x128xbf16>
    %c6_402 = arith.constant 6 : index
    %c0_403 = arith.constant 0 : index
    %c0_404 = arith.constant 0 : index
    %405 = vector.load %arg7[%c6_402, %c0_403, %c0_404] : memref<25x128x128xbf16, #tpu.memory_space<vmem>>, vector<1x128x128xbf16>
    %406 = vector.shape_cast %405 : vector<1x128x128xbf16> to vector<128x128xbf16>
    %cst_405 = arith.constant dense<0.000000e+00> : vector<2x128xf32>
    %407 = tpu.matmul %404, %406, %cst_405 {dimension_numbers = #tpu.dot_dimension_numbers<[1], [0], [0], [1], [0, 0, 1, 1], [], []>} : vector<2x128xbf16>, vector<128x128xbf16>, vector<2x128xf32> -> vector<2x128xf32>
    %408 = arith.addf %402, %407 : vector<2x128xf32>
    %c0_406 = arith.constant 0 : index
    %c7_407 = arith.constant 7 : index
    %c0_408 = arith.constant 0 : index
    %409 = vector.load %arg15[%c0_406, %c7_407, %c0_408] : memref<2x32x128xbf16, #tpu.memory_space<vmem>>, vector<2x1x128xbf16>
    %410 = vector.shape_cast %409 : vector<2x1x128xbf16> to vector<2x128xbf16>
    %c7_409 = arith.constant 7 : index
    %c0_410 = arith.constant 0 : index
    %c0_411 = arith.constant 0 : index
    %411 = vector.load %arg7[%c7_409, %c0_410, %c0_411] : memref<25x128x128xbf16, #tpu.memory_space<vmem>>, vector<1x128x128xbf16>
    %412 = vector.shape_cast %411 : vector<1x128x128xbf16> to vector<128x128xbf16>
    %cst_412 = arith.constant dense<0.000000e+00> : vector<2x128xf32>
    %413 = tpu.matmul %410, %412, %cst_412 {dimension_numbers = #tpu.dot_dimension_numbers<[1], [0], [0], [1], [0, 0, 1, 1], [], []>} : vector<2x128xbf16>, vector<128x128xbf16>, vector<2x128xf32> -> vector<2x128xf32>
    %414 = arith.addf %408, %413 : vector<2x128xf32>
    %c0_413 = arith.constant 0 : index
    %c8_414 = arith.constant 8 : index
    %c0_415 = arith.constant 0 : index
    %415 = vector.load %arg15[%c0_413, %c8_414, %c0_415] : memref<2x32x128xbf16, #tpu.memory_space<vmem>>, vector<2x1x128xbf16>
    %416 = vector.shape_cast %415 : vector<2x1x128xbf16> to vector<2x128xbf16>
    %c8_416 = arith.constant 8 : index
    %c0_417 = arith.constant 0 : index
    %c0_418 = arith.constant 0 : index
    %417 = vector.load %arg7[%c8_416, %c0_417, %c0_418] : memref<25x128x128xbf16, #tpu.memory_space<vmem>>, vector<1x128x128xbf16>
    %418 = vector.shape_cast %417 : vector<1x128x128xbf16> to vector<128x128xbf16>
    %cst_419 = arith.constant dense<0.000000e+00> : vector<2x128xf32>
    %419 = tpu.matmul %416, %418, %cst_419 {dimension_numbers = #tpu.dot_dimension_numbers<[1], [0], [0], [1], [0, 0, 1, 1], [], []>} : vector<2x128xbf16>, vector<128x128xbf16>, vector<2x128xf32> -> vector<2x128xf32>
    %420 = arith.addf %414, %419 : vector<2x128xf32>
    %c0_420 = arith.constant 0 : index
    %c9_421 = arith.constant 9 : index
    %c0_422 = arith.constant 0 : index
    %421 = vector.load %arg15[%c0_420, %c9_421, %c0_422] : memref<2x32x128xbf16, #tpu.memory_space<vmem>>, vector<2x1x128xbf16>
    %422 = vector.shape_cast %421 : vector<2x1x128xbf16> to vector<2x128xbf16>
    %c9_423 = arith.constant 9 : index
    %c0_424 = arith.constant 0 : index
    %c0_425 = arith.constant 0 : index
    %423 = vector.load %arg7[%c9_423, %c0_424, %c0_425] : memref<25x128x128xbf16, #tpu.memory_space<vmem>>, vector<1x128x128xbf16>
    %424 = vector.shape_cast %423 : vector<1x128x128xbf16> to vector<128x128xbf16>
    %cst_426 = arith.constant dense<0.000000e+00> : vector<2x128xf32>
    %425 = tpu.matmul %422, %424, %cst_426 {dimension_numbers = #tpu.dot_dimension_numbers<[1], [0], [0], [1], [0, 0, 1, 1], [], []>} : vector<2x128xbf16>, vector<128x128xbf16>, vector<2x128xf32> -> vector<2x128xf32>
    %426 = arith.addf %420, %425 : vector<2x128xf32>
    %c0_427 = arith.constant 0 : index
    %c10_428 = arith.constant 10 : index
    %c0_429 = arith.constant 0 : index
    %427 = vector.load %arg15[%c0_427, %c10_428, %c0_429] : memref<2x32x128xbf16, #tpu.memory_space<vmem>>, vector<2x1x128xbf16>
    %428 = vector.shape_cast %427 : vector<2x1x128xbf16> to vector<2x128xbf16>
    %c10_430 = arith.constant 10 : index
    %c0_431 = arith.constant 0 : index
    %c0_432 = arith.constant 0 : index
    %429 = vector.load %arg7[%c10_430, %c0_431, %c0_432] : memref<25x128x128xbf16, #tpu.memory_space<vmem>>, vector<1x128x128xbf16>
    %430 = vector.shape_cast %429 : vector<1x128x128xbf16> to vector<128x128xbf16>
    %cst_433 = arith.constant dense<0.000000e+00> : vector<2x128xf32>
    %431 = tpu.matmul %428, %430, %cst_433 {dimension_numbers = #tpu.dot_dimension_numbers<[1], [0], [0], [1], [0, 0, 1, 1], [], []>} : vector<2x128xbf16>, vector<128x128xbf16>, vector<2x128xf32> -> vector<2x128xf32>
    %432 = arith.addf %426, %431 : vector<2x128xf32>
    %c0_434 = arith.constant 0 : index
    %c11_435 = arith.constant 11 : index
    %c0_436 = arith.constant 0 : index
    %433 = vector.load %arg15[%c0_434, %c11_435, %c0_436] : memref<2x32x128xbf16, #tpu.memory_space<vmem>>, vector<2x1x128xbf16>
    %434 = vector.shape_cast %433 : vector<2x1x128xbf16> to vector<2x128xbf16>
    %c11_437 = arith.constant 11 : index
    %c0_438 = arith.constant 0 : index
    %c0_439 = arith.constant 0 : index
    %435 = vector.load %arg7[%c11_437, %c0_438, %c0_439] : memref<25x128x128xbf16, #tpu.memory_space<vmem>>, vector<1x128x128xbf16>
    %436 = vector.shape_cast %435 : vector<1x128x128xbf16> to vector<128x128xbf16>
    %cst_440 = arith.constant dense<0.000000e+00> : vector<2x128xf32>
    %437 = tpu.matmul %434, %436, %cst_440 {dimension_numbers = #tpu.dot_dimension_numbers<[1], [0], [0], [1], [0, 0, 1, 1], [], []>} : vector<2x128xbf16>, vector<128x128xbf16>, vector<2x128xf32> -> vector<2x128xf32>
    %438 = arith.addf %432, %437 : vector<2x128xf32>
    %c0_441 = arith.constant 0 : index
    %c12_442 = arith.constant 12 : index
    %c0_443 = arith.constant 0 : index
    %439 = vector.load %arg15[%c0_441, %c12_442, %c0_443] : memref<2x32x128xbf16, #tpu.memory_space<vmem>>, vector<2x1x128xbf16>
    %440 = vector.shape_cast %439 : vector<2x1x128xbf16> to vector<2x128xbf16>
    %c12_444 = arith.constant 12 : index
    %c0_445 = arith.constant 0 : index
    %c0_446 = arith.constant 0 : index
    %441 = vector.load %arg7[%c12_444, %c0_445, %c0_446] : memref<25x128x128xbf16, #tpu.memory_space<vmem>>, vector<1x128x128xbf16>
    %442 = vector.shape_cast %441 : vector<1x128x128xbf16> to vector<128x128xbf16>
    %cst_447 = arith.constant dense<0.000000e+00> : vector<2x128xf32>
    %443 = tpu.matmul %440, %442, %cst_447 {dimension_numbers = #tpu.dot_dimension_numbers<[1], [0], [0], [1], [0, 0, 1, 1], [], []>} : vector<2x128xbf16>, vector<128x128xbf16>, vector<2x128xf32> -> vector<2x128xf32>
    %444 = arith.addf %438, %443 : vector<2x128xf32>
    %c0_448 = arith.constant 0 : index
    %c13_449 = arith.constant 13 : index
    %c0_450 = arith.constant 0 : index
    %445 = vector.load %arg15[%c0_448, %c13_449, %c0_450] : memref<2x32x128xbf16, #tpu.memory_space<vmem>>, vector<2x1x128xbf16>
    %446 = vector.shape_cast %445 : vector<2x1x128xbf16> to vector<2x128xbf16>
    %c13_451 = arith.constant 13 : index
    %c0_452 = arith.constant 0 : index
    %c0_453 = arith.constant 0 : index
    %447 = vector.load %arg7[%c13_451, %c0_452, %c0_453] : memref<25x128x128xbf16, #tpu.memory_space<vmem>>, vector<1x128x128xbf16>
    %448 = vector.shape_cast %447 : vector<1x128x128xbf16> to vector<128x128xbf16>
    %cst_454 = arith.constant dense<0.000000e+00> : vector<2x128xf32>
    %449 = tpu.matmul %446, %448, %cst_454 {dimension_numbers = #tpu.dot_dimension_numbers<[1], [0], [0], [1], [0, 0, 1, 1], [], []>} : vector<2x128xbf16>, vector<128x128xbf16>, vector<2x128xf32> -> vector<2x128xf32>
    %450 = arith.addf %444, %449 : vector<2x128xf32>
    %c0_455 = arith.constant 0 : index
    %c14_456 = arith.constant 14 : index
    %c0_457 = arith.constant 0 : index
    %451 = vector.load %arg15[%c0_455, %c14_456, %c0_457] : memref<2x32x128xbf16, #tpu.memory_space<vmem>>, vector<2x1x128xbf16>
    %452 = vector.shape_cast %451 : vector<2x1x128xbf16> to vector<2x128xbf16>
    %c14_458 = arith.constant 14 : index
    %c0_459 = arith.constant 0 : index
    %c0_460 = arith.constant 0 : index
    %453 = vector.load %arg7[%c14_458, %c0_459, %c0_460] : memref<25x128x128xbf16, #tpu.memory_space<vmem>>, vector<1x128x128xbf16>
    %454 = vector.shape_cast %453 : vector<1x128x128xbf16> to vector<128x128xbf16>
    %cst_461 = arith.constant dense<0.000000e+00> : vector<2x128xf32>
    %455 = tpu.matmul %452, %454, %cst_461 {dimension_numbers = #tpu.dot_dimension_numbers<[1], [0], [0], [1], [0, 0, 1, 1], [], []>} : vector<2x128xbf16>, vector<128x128xbf16>, vector<2x128xf32> -> vector<2x128xf32>
    %456 = arith.addf %450, %455 : vector<2x128xf32>
    %c0_462 = arith.constant 0 : index
    %c15_463 = arith.constant 15 : index
    %c0_464 = arith.constant 0 : index
    %457 = vector.load %arg15[%c0_462, %c15_463, %c0_464] : memref<2x32x128xbf16, #tpu.memory_space<vmem>>, vector<2x1x128xbf16>
    %458 = vector.shape_cast %457 : vector<2x1x128xbf16> to vector<2x128xbf16>
    %c15_465 = arith.constant 15 : index
    %c0_466 = arith.constant 0 : index
    %c0_467 = arith.constant 0 : index
    %459 = vector.load %arg7[%c15_465, %c0_466, %c0_467] : memref<25x128x128xbf16, #tpu.memory_space<vmem>>, vector<1x128x128xbf16>
    %460 = vector.shape_cast %459 : vector<1x128x128xbf16> to vector<128x128xbf16>
    %cst_468 = arith.constant dense<0.000000e+00> : vector<2x128xf32>
    %461 = tpu.matmul %458, %460, %cst_468 {dimension_numbers = #tpu.dot_dimension_numbers<[1], [0], [0], [1], [0, 0, 1, 1], [], []>} : vector<2x128xbf16>, vector<128x128xbf16>, vector<2x128xf32> -> vector<2x128xf32>
    %462 = arith.addf %456, %461 : vector<2x128xf32>
    %c0_469 = arith.constant 0 : index
    %c16_470 = arith.constant 16 : index
    %c0_471 = arith.constant 0 : index
    %463 = vector.load %arg15[%c0_469, %c16_470, %c0_471] : memref<2x32x128xbf16, #tpu.memory_space<vmem>>, vector<2x1x128xbf16>
    %464 = vector.shape_cast %463 : vector<2x1x128xbf16> to vector<2x128xbf16>
    %c16_472 = arith.constant 16 : index
    %c0_473 = arith.constant 0 : index
    %c0_474 = arith.constant 0 : index
    %465 = vector.load %arg7[%c16_472, %c0_473, %c0_474] : memref<25x128x128xbf16, #tpu.memory_space<vmem>>, vector<1x128x128xbf16>
    %466 = vector.shape_cast %465 : vector<1x128x128xbf16> to vector<128x128xbf16>
    %cst_475 = arith.constant dense<0.000000e+00> : vector<2x128xf32>
    %467 = tpu.matmul %464, %466, %cst_475 {dimension_numbers = #tpu.dot_dimension_numbers<[1], [0], [0], [1], [0, 0, 1, 1], [], []>} : vector<2x128xbf16>, vector<128x128xbf16>, vector<2x128xf32> -> vector<2x128xf32>
    %468 = arith.addf %462, %467 : vector<2x128xf32>
    %c0_476 = arith.constant 0 : index
    %c17_477 = arith.constant 17 : index
    %c0_478 = arith.constant 0 : index
    %469 = vector.load %arg15[%c0_476, %c17_477, %c0_478] : memref<2x32x128xbf16, #tpu.memory_space<vmem>>, vector<2x1x128xbf16>
    %470 = vector.shape_cast %469 : vector<2x1x128xbf16> to vector<2x128xbf16>
    %c17_479 = arith.constant 17 : index
    %c0_480 = arith.constant 0 : index
    %c0_481 = arith.constant 0 : index
    %471 = vector.load %arg7[%c17_479, %c0_480, %c0_481] : memref<25x128x128xbf16, #tpu.memory_space<vmem>>, vector<1x128x128xbf16>
    %472 = vector.shape_cast %471 : vector<1x128x128xbf16> to vector<128x128xbf16>
    %cst_482 = arith.constant dense<0.000000e+00> : vector<2x128xf32>
    %473 = tpu.matmul %470, %472, %cst_482 {dimension_numbers = #tpu.dot_dimension_numbers<[1], [0], [0], [1], [0, 0, 1, 1], [], []>} : vector<2x128xbf16>, vector<128x128xbf16>, vector<2x128xf32> -> vector<2x128xf32>
    %474 = arith.addf %468, %473 : vector<2x128xf32>
    %c0_483 = arith.constant 0 : index
    %c18_484 = arith.constant 18 : index
    %c0_485 = arith.constant 0 : index
    %475 = vector.load %arg15[%c0_483, %c18_484, %c0_485] : memref<2x32x128xbf16, #tpu.memory_space<vmem>>, vector<2x1x128xbf16>
    %476 = vector.shape_cast %475 : vector<2x1x128xbf16> to vector<2x128xbf16>
    %c18_486 = arith.constant 18 : index
    %c0_487 = arith.constant 0 : index
    %c0_488 = arith.constant 0 : index
    %477 = vector.load %arg7[%c18_486, %c0_487, %c0_488] : memref<25x128x128xbf16, #tpu.memory_space<vmem>>, vector<1x128x128xbf16>
    %478 = vector.shape_cast %477 : vector<1x128x128xbf16> to vector<128x128xbf16>
    %cst_489 = arith.constant dense<0.000000e+00> : vector<2x128xf32>
    %479 = tpu.matmul %476, %478, %cst_489 {dimension_numbers = #tpu.dot_dimension_numbers<[1], [0], [0], [1], [0, 0, 1, 1], [], []>} : vector<2x128xbf16>, vector<128x128xbf16>, vector<2x128xf32> -> vector<2x128xf32>
    %480 = arith.addf %474, %479 : vector<2x128xf32>
    %c0_490 = arith.constant 0 : index
    %c19_491 = arith.constant 19 : index
    %c0_492 = arith.constant 0 : index
    %481 = vector.load %arg15[%c0_490, %c19_491, %c0_492] : memref<2x32x128xbf16, #tpu.memory_space<vmem>>, vector<2x1x128xbf16>
    %482 = vector.shape_cast %481 : vector<2x1x128xbf16> to vector<2x128xbf16>
    %c19_493 = arith.constant 19 : index
    %c0_494 = arith.constant 0 : index
    %c0_495 = arith.constant 0 : index
    %483 = vector.load %arg7[%c19_493, %c0_494, %c0_495] : memref<25x128x128xbf16, #tpu.memory_space<vmem>>, vector<1x128x128xbf16>
    %484 = vector.shape_cast %483 : vector<1x128x128xbf16> to vector<128x128xbf16>
    %cst_496 = arith.constant dense<0.000000e+00> : vector<2x128xf32>
    %485 = tpu.matmul %482, %484, %cst_496 {dimension_numbers = #tpu.dot_dimension_numbers<[1], [0], [0], [1], [0, 0, 1, 1], [], []>} : vector<2x128xbf16>, vector<128x128xbf16>, vector<2x128xf32> -> vector<2x128xf32>
    %486 = arith.addf %480, %485 : vector<2x128xf32>
    %c0_497 = arith.constant 0 : index
    %c20_498 = arith.constant 20 : index
    %c0_499 = arith.constant 0 : index
    %487 = vector.load %arg15[%c0_497, %c20_498, %c0_499] : memref<2x32x128xbf16, #tpu.memory_space<vmem>>, vector<2x1x128xbf16>
    %488 = vector.shape_cast %487 : vector<2x1x128xbf16> to vector<2x128xbf16>
    %c20_500 = arith.constant 20 : index
    %c0_501 = arith.constant 0 : index
    %c0_502 = arith.constant 0 : index
    %489 = vector.load %arg7[%c20_500, %c0_501, %c0_502] : memref<25x128x128xbf16, #tpu.memory_space<vmem>>, vector<1x128x128xbf16>
    %490 = vector.shape_cast %489 : vector<1x128x128xbf16> to vector<128x128xbf16>
    %cst_503 = arith.constant dense<0.000000e+00> : vector<2x128xf32>
    %491 = tpu.matmul %488, %490, %cst_503 {dimension_numbers = #tpu.dot_dimension_numbers<[1], [0], [0], [1], [0, 0, 1, 1], [], []>} : vector<2x128xbf16>, vector<128x128xbf16>, vector<2x128xf32> -> vector<2x128xf32>
    %492 = arith.addf %486, %491 : vector<2x128xf32>
    %c0_504 = arith.constant 0 : index
    %c21_505 = arith.constant 21 : index
    %c0_506 = arith.constant 0 : index
    %493 = vector.load %arg15[%c0_504, %c21_505, %c0_506] : memref<2x32x128xbf16, #tpu.memory_space<vmem>>, vector<2x1x128xbf16>
    %494 = vector.shape_cast %493 : vector<2x1x128xbf16> to vector<2x128xbf16>
    %c21_507 = arith.constant 21 : index
    %c0_508 = arith.constant 0 : index
    %c0_509 = arith.constant 0 : index
    %495 = vector.load %arg7[%c21_507, %c0_508, %c0_509] : memref<25x128x128xbf16, #tpu.memory_space<vmem>>, vector<1x128x128xbf16>
    %496 = vector.shape_cast %495 : vector<1x128x128xbf16> to vector<128x128xbf16>
    %cst_510 = arith.constant dense<0.000000e+00> : vector<2x128xf32>
    %497 = tpu.matmul %494, %496, %cst_510 {dimension_numbers = #tpu.dot_dimension_numbers<[1], [0], [0], [1], [0, 0, 1, 1], [], []>} : vector<2x128xbf16>, vector<128x128xbf16>, vector<2x128xf32> -> vector<2x128xf32>
    %498 = arith.addf %492, %497 : vector<2x128xf32>
    %c0_511 = arith.constant 0 : index
    %c22_512 = arith.constant 22 : index
    %c0_513 = arith.constant 0 : index
    %499 = vector.load %arg15[%c0_511, %c22_512, %c0_513] : memref<2x32x128xbf16, #tpu.memory_space<vmem>>, vector<2x1x128xbf16>
    %500 = vector.shape_cast %499 : vector<2x1x128xbf16> to vector<2x128xbf16>
    %c22_514 = arith.constant 22 : index
    %c0_515 = arith.constant 0 : index
    %c0_516 = arith.constant 0 : index
    %501 = vector.load %arg7[%c22_514, %c0_515, %c0_516] : memref<25x128x128xbf16, #tpu.memory_space<vmem>>, vector<1x128x128xbf16>
    %502 = vector.shape_cast %501 : vector<1x128x128xbf16> to vector<128x128xbf16>
    %cst_517 = arith.constant dense<0.000000e+00> : vector<2x128xf32>
    %503 = tpu.matmul %500, %502, %cst_517 {dimension_numbers = #tpu.dot_dimension_numbers<[1], [0], [0], [1], [0, 0, 1, 1], [], []>} : vector<2x128xbf16>, vector<128x128xbf16>, vector<2x128xf32> -> vector<2x128xf32>
    %504 = arith.addf %498, %503 : vector<2x128xf32>
    %c0_518 = arith.constant 0 : index
    %c23_519 = arith.constant 23 : index
    %c0_520 = arith.constant 0 : index
    %505 = vector.load %arg15[%c0_518, %c23_519, %c0_520] : memref<2x32x128xbf16, #tpu.memory_space<vmem>>, vector<2x1x128xbf16>
    %506 = vector.shape_cast %505 : vector<2x1x128xbf16> to vector<2x128xbf16>
    %c23_521 = arith.constant 23 : index
    %c0_522 = arith.constant 0 : index
    %c0_523 = arith.constant 0 : index
    %507 = vector.load %arg7[%c23_521, %c0_522, %c0_523] : memref<25x128x128xbf16, #tpu.memory_space<vmem>>, vector<1x128x128xbf16>
    %508 = vector.shape_cast %507 : vector<1x128x128xbf16> to vector<128x128xbf16>
    %cst_524 = arith.constant dense<0.000000e+00> : vector<2x128xf32>
    %509 = tpu.matmul %506, %508, %cst_524 {dimension_numbers = #tpu.dot_dimension_numbers<[1], [0], [0], [1], [0, 0, 1, 1], [], []>} : vector<2x128xbf16>, vector<128x128xbf16>, vector<2x128xf32> -> vector<2x128xf32>
    %510 = arith.addf %504, %509 : vector<2x128xf32>
    %c0_525 = arith.constant 0 : index
    %c24_526 = arith.constant 24 : index
    %c0_527 = arith.constant 0 : index
    %511 = vector.load %arg15[%c0_525, %c24_526, %c0_527] : memref<2x32x128xbf16, #tpu.memory_space<vmem>>, vector<2x1x128xbf16>
    %512 = vector.shape_cast %511 : vector<2x1x128xbf16> to vector<2x128xbf16>
    %c24_528 = arith.constant 24 : index
    %c0_529 = arith.constant 0 : index
    %c0_530 = arith.constant 0 : index
    %513 = vector.load %arg7[%c24_528, %c0_529, %c0_530] : memref<25x128x128xbf16, #tpu.memory_space<vmem>>, vector<1x128x128xbf16>
    %514 = vector.shape_cast %513 : vector<1x128x128xbf16> to vector<128x128xbf16>
    %cst_531 = arith.constant dense<0.000000e+00> : vector<2x128xf32>
    %515 = tpu.matmul %512, %514, %cst_531 {dimension_numbers = #tpu.dot_dimension_numbers<[1], [0], [0], [1], [0, 0, 1, 1], [], []>} : vector<2x128xbf16>, vector<128x128xbf16>, vector<2x128xf32> -> vector<2x128xf32>
    %516 = arith.addf %510, %515 : vector<2x128xf32>
    %c0_532 = arith.constant 0 : index
    %c0_533 = arith.constant 0 : index
    %517 = vector.load %arg8[%c0_532, %c0_533] : memref<1x128xf32, #tpu.memory_space<vmem>>, vector<1x128xf32>
    %518 = vector.broadcast %517 : vector<1x128xf32> to vector<2x128xf32>
    %519 = arith.addf %516, %518 : vector<2x128xf32>
    %cst_534 = arith.constant 0.000000e+00 : f32
    %520 = vector.broadcast %cst_534 : f32 to vector<2x128xf32>
    %521 = arith.maximumf %519, %520 : vector<2x128xf32>
    %522 = arith.truncf %521 : vector<2x128xf32> to vector<2x128xbf16>
    %c0_535 = arith.constant 0 : index
    %c0_536 = arith.constant 0 : index
    %523 = vector.load %arg9[%c0_535, %c0_536] : memref<128x128xbf16, #tpu.memory_space<vmem>>, vector<128x128xbf16>
    %cst_537 = arith.constant dense<0.000000e+00> : vector<2x128xf32>
    %524 = tpu.matmul %522, %523, %cst_537 {dimension_numbers = #tpu.dot_dimension_numbers<[1], [0], [0], [1], [0, 0, 1, 1], [], []>} : vector<2x128xbf16>, vector<128x128xbf16>, vector<2x128xf32> -> vector<2x128xf32>
    %c0_538 = arith.constant 0 : index
    %c0_539 = arith.constant 0 : index
    %525 = vector.load %arg10[%c0_538, %c0_539] : memref<1x128xf32, #tpu.memory_space<vmem>>, vector<1x128xf32>
    %526 = vector.broadcast %525 : vector<1x128xf32> to vector<2x128xf32>
    %527 = arith.addf %524, %526 : vector<2x128xf32>
    %cst_540 = arith.constant 0.000000e+00 : f32
    %528 = vector.broadcast %cst_540 : f32 to vector<2x128xf32>
    %529 = arith.maximumf %527, %528 : vector<2x128xf32>
    %530 = arith.truncf %529 : vector<2x128xf32> to vector<2x128xbf16>
    %c0_541 = arith.constant 0 : index
    %c0_542 = arith.constant 0 : index
    %531 = vector.load %arg11[%c0_541, %c0_542] : memref<128x128xbf16, #tpu.memory_space<vmem>>, vector<128x128xbf16>
    %cst_543 = arith.constant dense<0.000000e+00> : vector<2x128xf32>
    %532 = tpu.matmul %530, %531, %cst_543 {dimension_numbers = #tpu.dot_dimension_numbers<[1], [0], [0], [1], [0, 0, 1, 1], [], []>} : vector<2x128xbf16>, vector<128x128xbf16>, vector<2x128xf32> -> vector<2x128xf32>
    %c0_544 = arith.constant 0 : index
    %c0_545 = arith.constant 0 : index
    %533 = vector.load %arg12[%c0_544, %c0_545] : memref<1x128xf32, #tpu.memory_space<vmem>>, vector<1x128xf32>
    %534 = vector.broadcast %533 : vector<1x128xf32> to vector<2x128xf32>
    %535 = arith.addf %532, %534 : vector<2x128xf32>
    %c0_546 = arith.constant 0 : index
    %c0_547 = arith.constant 0 : index
    %536 = vector.load %arg13[%c0_546, %c0_547] : memref<2x128xf32, #tpu.memory_space<vmem>>, vector<2x128xf32>
    tpu.vector_store %arg13[%c0_546, %c0_547], %535 {strides = array<i32>} : memref<2x128xf32, #tpu.memory_space<vmem>>, vector<2x128xf32>,
    return
  }
  func.func @transform_0(%arg0: i32) -> (i32, i32, i32) {
    %c0_i32 = arith.constant 0 : i32
    %c0_i32_0 = arith.constant 0 : i32
    %c0_i32_1 = arith.constant 0 : i32
    return %arg0, %c0_i32, %c0_i32_0 : i32, i32, i32
  }
  func.func @transform_1(%arg0: i32) -> (i32, i32) {
    %c0_i32 = arith.constant 0 : i32
    %c0_i32_0 = arith.constant 0 : i32
    %c0_i32_1 = arith.constant 0 : i32
    return %c0_i32, %c0_i32_0 : i32, i32
  }
  func.func @transform_2(%arg0: i32) -> (i32, i32) {
    %c0_i32 = arith.constant 0 : i32
    %c0_i32_0 = arith.constant 0 : i32
    %c0_i32_1 = arith.constant 0 : i32
    return %c0_i32, %c0_i32_0 : i32, i32
  }
  func.func @transform_3(%arg0: i32) -> (i32, i32, i32) {
    %c0_i32 = arith.constant 0 : i32
    %c0_i32_0 = arith.constant 0 : i32
    %c0_i32_1 = arith.constant 0 : i32
    %c0_i32_2 = arith.constant 0 : i32
    return %c0_i32, %c0_i32_0, %c0_i32_1 : i32, i32, i32
  }
  func.func @transform_4(%arg0: i32) -> (i32, i32) {
    %c0_i32 = arith.constant 0 : i32
    %c0_i32_0 = arith.constant 0 : i32
    %c0_i32_1 = arith.constant 0 : i32
    return %c0_i32, %c0_i32_0 : i32, i32
  }
  func.func @transform_5(%arg0: i32) -> (i32, i32) {
    %c0_i32 = arith.constant 0 : i32
    %c0_i32_0 = arith.constant 0 : i32
    %c0_i32_1 = arith.constant 0 : i32
    return %c0_i32, %c0_i32_0 : i32, i32
  }
  func.func @transform_6(%arg0: i32) -> (i32, i32, i32) {
    %c0_i32 = arith.constant 0 : i32
    %c0_i32_0 = arith.constant 0 : i32
    %c0_i32_1 = arith.constant 0 : i32
    %c0_i32_2 = arith.constant 0 : i32
    return %c0_i32, %c0_i32_0, %c0_i32_1 : i32, i32, i32
  }
  func.func @transform_7(%arg0: i32) -> (i32, i32) {
    %c0_i32 = arith.constant 0 : i32
    %c0_i32_0 = arith.constant 0 : i32
    %c0_i32_1 = arith.constant 0 : i32
    return %c0_i32, %c0_i32_0 : i32, i32
  }
  func.func @transform_8(%arg0: i32) -> (i32, i32) {
    %c0_i32 = arith.constant 0 : i32
    %c0_i32_0 = arith.constant 0 : i32
    %c0_i32_1 = arith.constant 0 : i32
    return %c0_i32, %c0_i32_0 : i32, i32
  }
  func.func @transform_9(%arg0: i32) -> (i32, i32) {
    %c0_i32 = arith.constant 0 : i32
    %c0_i32_0 = arith.constant 0 : i32
    %c0_i32_1 = arith.constant 0 : i32
    return %c0_i32, %c0_i32_0 : i32, i32
  }
  func.func @transform_10(%arg0: i32) -> (i32, i32) {
    %c0_i32 = arith.constant 0 : i32
    %c0_i32_0 = arith.constant 0 : i32
    %c0_i32_1 = arith.constant 0 : i32
    return %c0_i32, %c0_i32_0 : i32, i32
  }
  func.func @transform_11(%arg0: i32) -> (i32, i32) {
    %c0_i32 = arith.constant 0 : i32
    %c0_i32_0 = arith.constant 0 : i32
    %c0_i32_1 = arith.constant 0 : i32
    return %c0_i32, %c0_i32_0 : i32, i32
  }
  func.func @transform_12(%arg0: i32) -> (i32, i32) {
    %c0_i32 = arith.constant 0 : i32
    %c0_i32_0 = arith.constant 0 : i32
    return %arg0, %c0_i32 : i32, i32
  }
}

</mosaic_0001>

<bundles_post_ra>
// kernel: _lambda_.1
= control target key start
LH: loop header
LB: loop body
LE: loop exit
PB: predicated region body
PF: predicated region fallthrough
CT: control target
= control target key end

     0   :  { %v32854_v1 = vmov 0.0   ;;  %vm26838_vm0 = vmmov 0   ;;  %vm171_vm1 = vcmask 261120   ;;  %vm1623_vm2 = vsmask.f32 7424  ;;  %s32841_s0 = inlined_call_operand.vmem [shape: bf16[2,960,32], index: 0, kind: input, shape index: {}]   ;;  %s32842_s1 = inlined_call_operand.vmem [shape: bf16[32,128], index: 1, kind: input, shape index: {}]   ;;  %s32843_s2 = inlined_call_operand.vmem [shape: f32[1,128], index: 2, kind: input, shape index: {}]   ;;  %s32844_s3 = inlined_call_operand.vmem [shape: bf16[25,128,128], index: 3, kind: input, shape index: {}]   ;;  %s32845_s4 = inlined_call_operand.vmem [shape: f32[1,128], index: 4, kind: input, shape index: {}]   ;;  %s32846_s5 = inlined_call_operand.vmem [shape: bf16[32,160], index: 5, kind: input, shape index: {}]   ;;  %s32847_s6 = inlined_call_operand.vmem [shape: bf16[25,128,128], index: 6, kind: input, shape index: {}]   ;;  %s32848_s7 = inlined_call_operand.vmem [shape: f32[1,128], index: 7, kind: input, shape index: {}]   ;;  %s32849_s8 = inlined_call_operand.vmem [shape: bf16[128,128], index: 8, kind: input, shape index: {}]   ;;  %s32850_s9 = inlined_call_operand.vmem [shape: f32[1,128], index: 9, kind: input, shape index: {}]   ;;  %s32851_s10 = inlined_call_operand.vmem [shape: bf16[128,128], index: 10, kind: input, shape index: {}]   ;;  %s32852_s11 = inlined_call_operand.vmem [shape: f32[1,128], index: 11, kind: input, shape index: {}]   ;;  %s32853_s12 = inlined_call_operand.hbm [shape: f32[2,128], index: 12, kind: output, shape index: {}]  }
   0x1   :  { %v26001_v0 = vld [vmem:[%s32842_s1] sm:$0xff]   ;;  %22181 = vmatprep.subr.bf16.mxu0 %v32854_v1  ;;  %25033 = vmatprep.subr.bf16.mxu1 %v32854_v1  ;;  %v26002_v2 = vld [vmem:[%s32842_s1 + $0x8] sm:$0xff]   ;;  %v26004_v4 = vld [vmem:[%s32841_s0 + $0x70] sm:$0xff]   ;;  %vm2300_vm3 = vsmask.f32 6400  ;;  %vm2069_vm4 = vcmask 1046528  }
   0x2   :  { %22182 = vmatpush3.bf16.msra.mxu0 %v26001_v0  ;;  %25035 = vmatpush3.bf16.msra.mxu1 %v26001_v0  ;;  %v26003_v3 = vld [vmem:[%s32841_s0] sm:$0xff]   ;;  %v26005_v5 = vld [vmem:[%s32841_s0 + $0x8] sm:$0xff]   ;;  %v26006_v6 = vld [vmem:[%s32841_s0 + $0x78] sm:$0xff]   ;;  %vm2565_vm5 = vcmask 1045504  }
   0x3   :  { %22183 = vmatprep.subr.bf16.mxu0 %v32854_v1  ;;  %25034 = vmatprep.subr.bf16.mxu1 %v32854_v1  ;;  %v26007_v7 = vld [vmem:[%s32841_s0 + $0x10] sm:$0xff]   ;;  %v26008_v8 = vld [vmem:[%s32841_s0 + $0x80] sm:$0xff]   ;;  %v26009_v9 = vld [vmem:[%s32841_s0 + $0x18] sm:$0xff]  }
   0x4   :  { %22185 = vmatprep.mubr.msk.bf16.mxu0 %vm26838_vm0, %v32854_v1  ;;  %22241 = vmatprep.mubr.msk.bf16.mxu1 %vm26838_vm0, %v32854_v1  ;;  %v26010_v10 = vld [vmem:[%s32841_s0 + $0x88] sm:$0xff]   ;;  %v26011_v11 = vld [vmem:[%s32841_s0 + $0x20] sm:$0xff]   ;;  %v26012_v12 = vld [vmem:[%s32841_s0 + $0x90] sm:$0xff]  }
   0x5   :  { %v26013_v13 = vld [vmem:[%s32841_s0 + $0x28] sm:$0xff]   ;;  %v26014_v14 = vld [vmem:[%s32841_s0 + $0x98] sm:$0xff]   ;;  %v26015_v15 = vld [vmem:[%s32841_s0 + $0x30] sm:$0xff]  }
   0x6   :  { %22184 = vmatpush3.bf16.msra.mxu0 %v26002_v2  ;;  %25036 = vmatpush3.bf16.msra.mxu1 %v26002_v2  ;;  %v26016_v16 = vld [vmem:[%s32841_s0 + $0xa0] sm:$0xff]   ;;  %v26017_v17 = vld [vmem:[%s32841_s0 + $0x38] sm:$0xff]   ;;  %v26018_v18 = vld [vmem:[%s32841_s0 + $0xa8] sm:$0xff]  }
   0x7   :  { %22245 = vmatprep.subr.bf16.mxu1 %v32854_v1  ;;  %22309 = vmatprep.subr.bf16.mxu0 %v32854_v1  ;;  %v26019_v19 = vld [vmem:[%s32841_s0 + $0x40] sm:$0xff]   ;;  %v26020_v20 = vld [vmem:[%s32841_s0 + $0xb0] sm:$0xff]   ;;  %v26021_v21 = vld [vmem:[%s32841_s0 + $0x48] sm:$0xff]  }
   0x8   :  { %v26022_v22 = vld [vmem:[%s32841_s0 + $0xb8] sm:$0xff]   ;;  %v26023_v23 = vld [vmem:[%s32841_s0 + $0x50] sm:$0xff]   ;;  %v26024_v24 = vld [vmem:[%s32841_s0 + $0xc0] sm:$0xff]  }
   0x9   :  { %22186 = vmatmul.mubr.msk.bf16.vlgmr.msra.gmra.mrb[0].mxu0 %vm171_vm1, %v26003_v3  ;;  %22242 = vmatmul.mubr.msk.bf16.vlgmr.msra.gmra.mrb[0].mxu1 %vm171_vm1, %v26004_v4  ;;  %v26025_v25 = vld [vmem:[%s32841_s0 + $0x58] sm:$0xff]   ;;  %v26026_v26 = vld [vmem:[%s32841_s0 + $0xc8] sm:$0xff]   ;;  %v26027_v27 = vld [vmem:[%s32841_s0 + $0x60] sm:$0xff]  }
   0xa   :  { %22246 = vmatpush3.bf16.msra.mxu1 %v26001_v0  ;;  %22189 = vmatprep.mubr.msk.bf16.mxu0 %vm26838_vm0, %v32854_v1  ;;  %v26028_v28 = vld [vmem:[%s32841_s0 + $0xd0] sm:$0xff]   ;;  %v26029_v29 = vld [vmem:[%s32841_s0 + $0x68] sm:$0xff]   ;;  %v26030_v30 = vld [vmem:[%s32841_s0 + $0xd8] sm:$0xff]  }
   0xb   :  { %22247 = vmatprep.subr.bf16.mxu1 %v32854_v1  ;;  %22249 = vmatprep.mubr.msk.bf16.mxu1 %vm26838_vm0, %v32854_v1  ;;  %v26031_v31 = vld [vmem:[%s32841_s0 + $0xe0] sm:$0xff]   ;;  %v26032_v32 = vld [vmem:[%s32841_s0 + $0xf0] sm:$0xff]   ;;  %v26033_v33 = vld [vmem:[%s32841_s0 + $0xe8] sm:$0xff]  }
   0xc   :  { %22310 = vmatpush3.bf16.msra.mxu0 %v26001_v0  ;;  %v26034_v34 = vld [vmem:[%s32841_s0 + $0xf8] sm:$0xff]   ;;  %v26035_v35 = vld [vmem:[%s32841_s0 + $0x100] sm:$0xff]   ;;  %v26036_v36 = vld [vmem:[%s32841_s0 + $0x168] sm:$0xff]  }
   0xd   :  { %22311 = vmatprep.subr.bf16.mxu0 %v32854_v1  ;;  %v26037_v37 = vld [vmem:[%s32841_s0 + $0x108] sm:$0xff]   ;;  %v26038_v38 = vld [vmem:[%s32841_s0 + $0x170] sm:$0xff]   ;;  %v26040_v40 = vld [vmem:[%s32841_s0 + $0x178] sm:$0xff]  }
   0xe   :  { %22248 = vmatpush3.bf16.msra.mxu1 %v26002_v2  ;;  %v26039_v39 = vld [vmem:[%s32841_s0 + $0x110] sm:$0xff]   ;;  %v26041_v41 = vld [vmem:[%s32841_s0 + $0x118] sm:$0xff]   ;;  %v26042_v42 = vld [vmem:[%s32841_s0 + $0x180] sm:$0xff]  }
   0xf   :  { %22373 = vmatprep.subr.bf16.mxu1 %v32854_v1  ;;  %v26043_v43 = vld [vmem:[%s32841_s0 + $0x120] sm:$0xff]   ;;  %v26044_v44 = vld [vmem:[%s32841_s0 + $0x188] sm:$0xff]   ;;  %v26046_v46 = vld [vmem:[%s32841_s0 + $0x190] sm:$0xff]  }
  0x10   :  { %22312 = vmatpush3.bf16.msra.mxu0 %v26002_v2  ;;  %v26045_v45 = vld [vmem:[%s32841_s0 + $0x128] sm:$0xff]   ;;  %v26047_v47 = vld [vmem:[%s32841_s0 + $0x130] sm:$0xff]   ;;  %v26048_v48 = vld [vmem:[%s32841_s0 + $0x198] sm:$0xff]  }
  0x11   :  { %22190 = vmatmul.mubr.msk.bf16.gmra.mrb[4].mxu0 %vm171_vm1, %v26005_v5  ;;  %22250 = vmatmul.mubr.msk.bf16.vlgmr.msra.gmra.mrb[4].mxu1 %vm171_vm1, %v26006_v6  ;;  %v26049_v49 = vld [vmem:[%s32841_s0 + $0x138] sm:$0xff]   ;;  %v26050_v50 = vld [vmem:[%s32841_s0 + $0x1a0] sm:$0xff]   ;;  %v26052_v52 = vld [vmem:[%s32841_s0 + $0x1a8] sm:$0xff]  }
  0x12   :  { %22193 = vmatprep.mubr.msk.bf16.mxu0 %vm26838_vm0, %v32854_v1  ;;  %22253 = vmatprep.mubr.msk.bf16.mxu1 %vm26838_vm0, %v32854_v1  ;;  %v26051_v51 = vld [vmem:[%s32841_s0 + $0x140] sm:$0xff]   ;;  %v26053_v53 = vld [vmem:[%s32841_s0 + $0x148] sm:$0xff]   ;;  %v26054_v54 = vld [vmem:[%s32841_s0 + $0x1b0] sm:$0xff]  }
  0x13   :  { %22374 = vmatpush3.bf16.msra.mxu1 %v26001_v0  ;;  %v26055_v55 = vld [vmem:[%s32841_s0 + $0x150] sm:$0xff]   ;;  %v26056_v56 = vld [vmem:[%s32841_s0 + $0x1b8] sm:$0xff]   ;;  %v27249_v57 = vld [vmem:[%s32843_s2] ss:$0 sm:$0xff] }
  0x14   :  { %22375 = vmatprep.subr.bf16.mxu1 %v32854_v1  ;;  %v26057_v58 = vld [vmem:[%s32841_s0 + $0x158] sm:$0xff]   ;;  %v26058_v59 = vld [vmem:[%s32841_s0 + $0x1c0] sm:$0xff]  }
  0x17   :  { %22376 = vmatpush3.bf16.msra.mxu1 %v26002_v2  ;;  %v26063_v2 = vld [vmem:[%s32844_s3 + $0x40] sm:$0xff]  }
  0x18   :  { %22437 = vmatprep.subr.bf16.mxu0 %v26063_v2 }
  0x19   :  { %22194 = vmatmul.mubr.msk.bf16.gmra.mrb[8].mxu0 %vm171_vm1, %v26007_v7  ;;  %22254 = vmatmul.mubr.msk.bf16.gmra.mrb[8].mxu1 %vm171_vm1, %v26008_v8  ;;  %v26064_v8 = vld [vmem:[%s32844_s3 + $0x48] sm:$0xff]  }
  0x1a   :  { %22197 = vmatprep.mubr.msk.bf16.mxu0 %vm26838_vm0, %v32854_v1  ;;  %22257 = vmatprep.mubr.msk.bf16.mxu1 %vm26838_vm0, %v32854_v1 }
  0x21   :  { %22198 = vmatmul.mubr.msk.bf16.gmra.mrb[12].mxu0 %vm171_vm1, %v26009_v9  ;;  %22258 = vmatmul.mubr.msk.bf16.gmra.mrb[12].mxu1 %vm171_vm1, %v26010_v10  ;;  %v26059_v10 = vld [vmem:[%s32841_s0 + $0x160] sm:$0xff]  }
  0x22   :  { %22201 = vmatprep.mubr.msk.bf16.mxu0 %vm26838_vm0, %v32854_v1  ;;  %22261 = vmatprep.mubr.msk.bf16.mxu1 %vm26838_vm0, %v32854_v1 }
  0x29   :  { %22202 = vmatmul.mubr.msk.bf16.gmra.mrb[16].mxu0 %vm171_vm1, %v26011_v11  ;;  %22262 = vmatmul.mubr.msk.bf16.gmra.mrb[16].mxu1 %vm171_vm1, %v26012_v12  ;;  %v26060_v11 = vld [vmem:[%s32841_s0 + $0x1c8] sm:$0xff]  }
  0x2a   :  { %22205 = vmatprep.mubr.msk.bf16.mxu0 %vm26838_vm0, %v32854_v1  ;;  %22265 = vmatprep.mubr.msk.bf16.mxu1 %vm26838_vm0, %v32854_v1 }
  0x31   :  { %22206 = vmatmul.mubr.msk.bf16.gmra.mrb[20].mxu0 %vm171_vm1, %v26013_v13  ;;  %22266 = vmatmul.mubr.msk.bf16.gmra.mrb[20].mxu1 %vm171_vm1, %v26014_v14 }
  0x32   :  { %22209 = vmatprep.mubr.msk.bf16.mxu0 %vm26838_vm0, %v32854_v1  ;;  %22269 = vmatprep.mubr.msk.bf16.mxu1 %vm26838_vm0, %v32854_v1 }
  0x39   :  { %22210 = vmatmul.mubr.msk.bf16.gmra.mrb[24].mxu0 %vm171_vm1, %v26015_v15  ;;  %22270 = vmatmul.mubr.msk.bf16.gmra.mrb[24].mxu1 %vm171_vm1, %v26016_v16 }
  0x3a   :  { %22213 = vmatprep.mubr.msk.bf16.mxu0 %vm26838_vm0, %v32854_v1  ;;  %22273 = vmatprep.mubr.msk.bf16.mxu1 %vm26838_vm0, %v32854_v1 }
  0x41   :  { %22214 = vmatmul.mubr.msk.bf16.gmra.mrb[28].mxu0 %vm171_vm1, %v26017_v17  ;;  %22274 = vmatmul.mubr.msk.bf16.gmra.mrb[28].mxu1 %vm171_vm1, %v26018_v18  ;;  %v26065_v17 = vld [vmem:[%s32844_s3 + $0x50] sm:$0xff]  }
  0x42   :  { %22217 = vmatprep.mubr.msk.bf16.mxu0 %vm26838_vm0, %v32854_v1  ;;  %22277 = vmatprep.mubr.msk.bf16.mxu1 %vm26838_vm0, %v32854_v1 }
  0x49   :  { %22218 = vmatmul.mubr.msk.bf16.gmra.mrb[32].mxu0 %vm171_vm1, %v26019_v19  ;;  %22278 = vmatmul.mubr.msk.bf16.gmra.mrb[32].mxu1 %vm171_vm1, %v26020_v20 }
  0x4a   :  { %22221 = vmatprep.mubr.msk.bf16.mxu0 %vm26838_vm0, %v32854_v1  ;;  %22281 = vmatprep.mubr.msk.bf16.mxu1 %vm26838_vm0, %v32854_v1 }
  0x51   :  { %22222 = vmatmul.mubr.msk.bf16.gmra.mrb[36].mxu0 %vm171_vm1, %v26021_v21  ;;  %22282 = vmatmul.mubr.msk.bf16.gmra.mrb[36].mxu1 %vm171_vm1, %v26022_v22 }
  0x52   :  { %22225 = vmatprep.mubr.msk.bf16.mxu0 %vm26838_vm0, %v32854_v1  ;;  %22285 = vmatprep.mubr.msk.bf16.mxu1 %vm26838_vm0, %v32854_v1 }
  0x59   :  { %22226 = vmatmul.mubr.msk.bf16.gmra.mrb[40].mxu0 %vm171_vm1, %v26023_v23  ;;  %22286 = vmatmul.mubr.msk.bf16.gmra.mrb[40].mxu1 %vm171_vm1, %v26024_v24 }
  0x5a   :  { %22229 = vmatprep.mubr.msk.bf16.mxu0 %vm26838_vm0, %v32854_v1  ;;  %22289 = vmatprep.mubr.msk.bf16.mxu1 %vm26838_vm0, %v32854_v1 }
  0x61   :  { %22230 = vmatmul.mubr.msk.bf16.gmra.mrb[44].mxu0 %vm171_vm1, %v26025_v25  ;;  %22290 = vmatmul.mubr.msk.bf16.gmra.mrb[44].mxu1 %vm171_vm1, %v26026_v26 }
  0x62   :  { %22233 = vmatprep.mubr.msk.bf16.mxu0 %vm26838_vm0, %v32854_v1  ;;  %22293 = vmatprep.mubr.msk.bf16.mxu1 %vm26838_vm0, %v32854_v1 }
  0x69   :  { %22234 = vmatmul.mubr.msk.bf16.gmra.mrb[48].mxu0 %vm171_vm1, %v26027_v27  ;;  %22294 = vmatmul.mubr.msk.bf16.gmra.mrb[48].mxu1 %vm171_vm1, %v26028_v28  ;;  %v26066_v28 = vld [vmem:[%s32844_s3 + $0x58] sm:$0xff]  }
  0x6a   :  { %22237 = vmatprep.mubr.msk.bf16.mxu0 %vm26838_vm0, %v32854_v1  ;;  %22297 = vmatprep.mubr.msk.bf16.mxu1 %vm26838_vm0, %v32854_v1 }
  0x71   :  { %22238 = vmatmul.mubr.msk.bf16.gmra.mrb[52].mxu0 %vm171_vm1, %v26029_v29  ;;  %22298 = vmatmul.mubr.msk.bf16.gmra.mrb[52].mxu1 %vm171_vm1, %v26030_v30  ;;  %v26061_v30 = vld [vmem:[%s32841_s0 + $0x1d0] sm:$0xff]  }
  0x72   :  { %22301 = vmatprep.mubr.msk.bf16.mxu1 %vm26838_vm0, %v32854_v1  ;;  %22313 = vmatprep.mubr.msk.bf16.mxu0 %vm26838_vm0, %v32854_v1 }
  0x79   :  { %22302 = vmatmul.mubr.msk.bf16.gmra.mrb[56].mxu1 %vm171_vm1, %v26031_v31  ;;  %22314 = vmatmul.mubr.msk.bf16.vlgmr.msra.gmra.mrb[56].mxu0 %vm171_vm1, %v26032_v32 }
  0x7a   :  { %22305 = vmatprep.mubr.msk.bf16.mxu1 %vm26838_vm0, %v32854_v1  ;;  %22317 = vmatprep.mubr.msk.bf16.mxu0 %vm26838_vm0, %v32854_v1 }
  0x7b   :  { %22438 = vmatpush3.bf16.msra.mxu0 %v26063_v2 }
  0x7c   :  { %22439 = vmatprep.subr.bf16.mxu0 %v26064_v8 }
  0x7f   :  { %22440 = vmatpush3.bf16.msra.mxu0 %v26064_v8 }
  0x80   :  { %22441 = vmatprep.subr.bf16.mxu0 %v26065_v17 }
  0x81   :  { %22306 = vmatmul.mubr.msk.bf16.gmra.mrb[60].mxu1 %vm171_vm1, %v26033_v33  ;;  %22318 = vmatmul.mubr.msk.bf16.gmra.mrb[60].mxu0 %vm171_vm1, %v26034_v34 }
  0x82   :  { %22321 = vmatprep.mubr.msk.bf16.mxu0 %vm26838_vm0, %v32854_v1  ;;  %22377 = vmatprep.mubr.msk.bf16.mxu1 %vm26838_vm0, %v32854_v1 }
  0x83   :  { %22442 = vmatpush3.bf16.msra.mxu0 %v26065_v17 }
  0x84   :  { %22443 = vmatprep.subr.bf16.mxu0 %v26066_v28 }
  0x87   :  { %22444 = vmatpush3.bf16.msra.mxu0 %v26066_v28 }
  0x89   :  { %22322 = vmatmul.mubr.msk.bf16.gmra.mrb[64].mxu0 %vm171_vm1, %v26035_v35  ;;  %22378 = vmatmul.mubr.msk.bf16.vlgmr.msra.gmra.mrb[64].mxu1 %vm171_vm1, %v26036_v36 }
  0x8a   :  { %22325 = vmatprep.mubr.msk.bf16.mxu0 %vm26838_vm0, %v32854_v1  ;;  %22381 = vmatprep.mubr.msk.bf16.mxu1 %vm26838_vm0, %v32854_v1 }
  0x91   :  { %22326 = vmatmul.mubr.msk.bf16.gmra.mrb[68].mxu0 %vm171_vm1, %v26037_v37  ;;  %22382 = vmatmul.mubr.msk.bf16.gmra.mrb[68].mxu1 %vm171_vm1, %v26038_v38  ;;  %v26067_v38 = vld [vmem:[%s32844_s3 + $0x60] sm:$0xff]  }
  0x92   :  { %22329 = vmatprep.mubr.msk.bf16.mxu0 %vm26838_vm0, %v32854_v1  ;;  %22385 = vmatprep.mubr.msk.bf16.mxu1 %vm26838_vm0, %v32854_v1 }
  0x93   :  { %22445 = vmatprep.subr.bf16.mxu0 %v26067_v38 }
  0x94   :  { %22446 = vmatpush3.bf16.msra.mxu0 %v26067_v38 }
  0x99   :  { %22330 = vmatmul.mubr.msk.bf16.gmra.mrb[72].mxu0 %vm171_vm1, %v26039_v39  ;;  %22386 = vmatmul.mubr.msk.bf16.gmra.mrb[72].mxu1 %vm171_vm1, %v26040_v40 }
  0x9a   :  { %22333 = vmatprep.mubr.msk.bf16.mxu0 %vm26838_vm0, %v32854_v1  ;;  %22389 = vmatprep.mubr.msk.bf16.mxu1 %vm26838_vm0, %v32854_v1 }
  0xa1   :  { %22334 = vmatmul.mubr.msk.bf16.gmra.mrb[76].mxu0 %vm171_vm1, %v26041_v41  ;;  %22390 = vmatmul.mubr.msk.bf16.gmra.mrb[76].mxu1 %vm171_vm1, %v26042_v42 }
  0xa2   :  { %22337 = vmatprep.mubr.msk.bf16.mxu0 %vm26838_vm0, %v32854_v1  ;;  %22393 = vmatprep.mubr.msk.bf16.mxu1 %vm26838_vm0, %v32854_v1 }
  0xa9   :  { %22338 = vmatmul.mubr.msk.bf16.gmra.mrb[80].mxu0 %vm171_vm1, %v26043_v43  ;;  %22394 = vmatmul.mubr.msk.bf16.gmra.mrb[80].mxu1 %vm171_vm1, %v26044_v44 }
  0xaa   :  { %22341 = vmatprep.mubr.msk.bf16.mxu0 %vm26838_vm0, %v32854_v1  ;;  %22397 = vmatprep.mubr.msk.bf16.mxu1 %vm26838_vm0, %v32854_v1 }
  0xb1   :  { %22342 = vmatmul.mubr.msk.bf16.gmra.mrb[84].mxu0 %vm171_vm1, %v26045_v45  ;;  %22398 = vmatmul.mubr.msk.bf16.gmra.mrb[84].mxu1 %vm171_vm1, %v26046_v46 }
  0xb2   :  { %22345 = vmatprep.mubr.msk.bf16.mxu0 %vm26838_vm0, %v32854_v1  ;;  %22401 = vmatprep.mubr.msk.bf16.mxu1 %vm26838_vm0, %v32854_v1 }
  0xb9   :  { %22346 = vmatmul.mubr.msk.bf16.gmra.mrb[88].mxu0 %vm171_vm1, %v26047_v47  ;;  %22402 = vmatmul.mubr.msk.bf16.gmra.mrb[88].mxu1 %vm171_vm1, %v26048_v48 }
  0xba   :  { %22349 = vmatprep.mubr.msk.bf16.mxu0 %vm26838_vm0, %v32854_v1  ;;  %22405 = vmatprep.mubr.msk.bf16.mxu1 %vm26838_vm0, %v32854_v1 }
  0xc1   :  { %22350 = vmatmul.mubr.msk.bf16.gmra.mrb[92].mxu0 %vm171_vm1, %v26049_v49  ;;  %22406 = vmatmul.mubr.msk.bf16.gmra.mrb[92].mxu1 %vm171_vm1, %v26050_v50  ;;  %v26068_v49 = vld [vmem:[%s32844_s3 + $0x68] sm:$0xff]  }
  0xc2   :  { %22353 = vmatprep.mubr.msk.bf16.mxu0 %vm26838_vm0, %v32854_v1  ;;  %22409 = vmatprep.mubr.msk.bf16.mxu1 %vm26838_vm0, %v32854_v1 }
  0xc3   :  { %22447 = vmatprep.subr.bf16.mxu0 %v26068_v49 }
  0xc4   :  { %22448 = vmatpush3.bf16.msra.mxu0 %v26068_v49 }
  0xc9   :  { %22354 = vmatmul.mubr.msk.bf16.gmra.mrb[96].mxu0 %vm171_vm1, %v26051_v51  ;;  %22410 = vmatmul.mubr.msk.bf16.gmra.mrb[96].mxu1 %vm171_vm1, %v26052_v52 }
  0xca   :  { %22357 = vmatprep.mubr.msk.bf16.mxu0 %vm26838_vm0, %v32854_v1  ;;  %22413 = vmatprep.mubr.msk.bf16.mxu1 %vm26838_vm0, %v32854_v1 }
  0xd1   :  { %22358 = vmatmul.mubr.msk.bf16.gmra.mrb[100].mxu0 %vm171_vm1, %v26053_v53  ;;  %22414 = vmatmul.mubr.msk.bf16.gmra.mrb[100].mxu1 %vm171_vm1, %v26054_v54 }
  0xd2   :  { %22361 = vmatprep.mubr.msk.bf16.mxu0 %vm26838_vm0, %v32854_v1  ;;  %22417 = vmatprep.mubr.msk.bf16.mxu1 %vm26838_vm0, %v32854_v1 }
  0xd9   :  { %22362 = vmatmul.mubr.msk.bf16.gmra.mrb[104].mxu0 %vm171_vm1, %v26055_v55  ;;  %22418 = vmatmul.mubr.msk.bf16.gmra.mrb[104].mxu1 %vm171_vm1, %v26056_v56 }
  0xda   :  { %22365 = vmatprep.mubr.msk.bf16.mxu0 %vm26838_vm0, %v32854_v1  ;;  %22421 = vmatprep.mubr.msk.bf16.mxu1 %vm26838_vm0, %v32854_v1 }
  0xdc   :  { %v27261_v60 = vpop.f32.mrb[0].mxu1  ;;  %v251_v61 = vpop.f32.mrb[0].mxu0 }
  0xdd   :  { %v22243_v62 = vpop.f32.mrb[1].mxu1  ;;  %v252_v63 = vadd.f32 %v27249_v57, %v251_v61  ;;  %v22187_v0 = vpop.f32.mrb[1].mxu0 }
  0xde   :  { %v27267_v3 = vpop.f32.mrb[2].mxu1  ;;  %v254_v4 = vpop.f32.mrb[2].mxu0  ;;  %v26069_v62 = vld [vmem:[%s32844_s3 + $0x70] sm:$0xff]  }
  0xdf   :  { %v22244_v5 = vpop.f32.mrb[3].mxu1  ;;  %v22188_v6 = vpop.f32.mrb[3].mxu0  ;;  %v370_v7 = vmax.f32 %v252_v63, 0.0  ;;  %v255_v9 = vadd.f32 %v27249_v57, %v254_v4  ;;  %22449 = vmatprep.subr.bf16.mxu0 %v26069_v62 }
  0xe0   :  { %22450 = vmatpush3.bf16.msra.mxu0 %v26069_v62 }
  0xe1   :  { %22366 = vmatmul.mubr.msk.bf16.gmra.mrb[108].mxu0 %vm171_vm1, %v26057_v58  ;;  %22422 = vmatmul.mubr.msk.bf16.gmra.mrb[108].mxu1 %vm171_vm1, %v26058_v59  ;;  %v371_v21 = vmax.f32 %v255_v9, 0.0  ;;  %v26062_v58 = vld [vmem:[%s32841_s0 + $0x1d8] sm:$0xff]  }
  0xe2   :  { %22369 = vmatprep.mubr.msk.bf16.mxu0 %vm26838_vm0, %v32854_v1  ;;  %22425 = vmatprep.mubr.msk.bf16.mxu1 %vm26838_vm0, %v32854_v1 }
  0xe4   :  { %v614_v12 = vpop.f32.mrb[4].mxu1  ;;  %v259_v13 = vpop.f32.mrb[4].mxu0 }
  0xe5   :  { %v615_v14 = vadd.f32 %v27249_v57, %v614_v12  ;;  %v22251_v15 = vpop.f32.mrb[5].mxu1  ;;  %v22191_v16 = vpop.f32.mrb[5].mxu0  ;;  %v260_v26 = vadd.f32 %v27249_v57, %v259_v13 }
  0xe6   :  { %v617_v18 = vpop.f32.mrb[6].mxu1  ;;  %v262_v19 = vpop.f32.mrb[6].mxu0 }
  0xe7   :  { %v733_v20 = vmax.f32 %v615_v14, 0.0  ;;  %v618_v22 = vadd.f32 %v27249_v57, %v617_v18  ;;  %v22252_v23 = vpop.f32.mrb[7].mxu1  ;;  %v22192_v24 = vpop.f32.mrb[7].mxu0  ;;  %v263_v29 = vadd.f32 %v27249_v57, %v262_v19  ;;  %v372_v34 = vmax.f32 %v260_v26, 0.0 }
  0xe9   :  { %v734_v25 = vmax.f32 %v618_v22, 0.0  ;;  %22370 = vmatmul.mubr.msk.bf16.gmra.mrb[112].mxu0 %vm171_vm1, %v26059_v10  ;;  %22426 = vmatmul.mubr.msk.bf16.gmra.mrb[112].mxu1 %vm171_vm1, %v26060_v11  ;;  %v27293_v27 = vadd.f32 %v733_v20, %v370_v7  ;;  %v373_v42 = vmax.f32 %v263_v29, 0.0  ;;  %v26070_v11 = vld [vmem:[%s32844_s3 + $0x78] sm:$0xff]  }
  0xea   :  { %22429 = vmatprep.mubr.msk.bf16.mxu1 %vm26838_vm0, %v32854_v1  ;;  %22451 = vmatprep.subr.bf16.mxu0 %v26070_v11 }
  0xeb   :  { %v27304_v31 = vadd.f32 %v734_v25, %v371_v21  ;;  %22452 = vmatpush3.bf16.msra.mxu0 %v26070_v11 }
  0xec   :  { %v622_v32 = vpop.f32.mrb[8].mxu1  ;;  %v267_v33 = vpop.f32.mrb[8].mxu0 }
  0xed   :  { %v623_v35 = vadd.f32 %v27249_v57, %v622_v32  ;;  %v22255_v36 = vpop.f32.mrb[9].mxu1  ;;  %v22195_v37 = vpop.f32.mrb[9].mxu0  ;;  %v268_v47 = vadd.f32 %v27249_v57, %v267_v33 }
  0xee   :  { %v625_v39 = vpop.f32.mrb[10].mxu1  ;;  %v270_v40 = vpop.f32.mrb[10].mxu0 }
  0xef   :  { %v735_v41 = vmax.f32 %v623_v35, 0.0  ;;  %v626_v43 = vadd.f32 %v27249_v57, %v625_v39  ;;  %v22256_v44 = vpop.f32.mrb[11].mxu1  ;;  %v22196_v45 = vpop.f32.mrb[11].mxu0  ;;  %v271_v50 = vadd.f32 %v27249_v57, %v270_v40  ;;  %v374_v54 = vmax.f32 %v268_v47, 0.0 }
  0xf1   :  { %v736_v46 = vmax.f32 %v626_v43, 0.0  ;;  %22430 = vmatmul.mubr.msk.bf16.gmra.mrb[116].mxu1 %vm171_vm1, %v26061_v30  ;;  %v27313_v48 = vadd.f32 %v735_v41, %v372_v34  ;;  %v375_v4 = vmax.f32 %v271_v50, 0.0 }
  0xf2   :  { %22433 = vmatprep.mubr.msk.bf16.mxu1 %vm26838_vm0, %v32854_v1 }
  0xf3   :  { %v27321_v51 = vadd.f32 %v736_v46, %v373_v42 }
  0xf4   :  { %v630_v52 = vpop.f32.mrb[12].mxu1  ;;  %v275_v53 = vpop.f32.mrb[12].mxu0 }
  0xf5   :  { %v631_v55 = vadd.f32 %v27249_v57, %v630_v52  ;;  %v22259_v56 = vpop.f32.mrb[13].mxu1  ;;  %v276_v59 = vadd.f32 %v27249_v57, %v275_v53  ;;  %v22199_v61 = vpop.f32.mrb[13].mxu0 }
  0xf6   :  { %v633_v63 = vpop.f32.mrb[14].mxu1  ;;  %v278_v0 = vpop.f32.mrb[14].mxu0 }
  0xf7   :  { %v737_v2 = vmax.f32 %v631_v55, 0.0  ;;  %v634_v5 = vadd.f32 %v27249_v57, %v633_v63  ;;  %v22260_v6 = vpop.f32.mrb[15].mxu1  ;;  %v22200_v7 = vpop.f32.mrb[15].mxu0  ;;  %v376_v9 = vmax.f32 %v276_v59, 0.0  ;;  %v279_v12 = vadd.f32 %v27249_v57, %v278_v0 }
  0xf9   :  { %v738_v8 = vmax.f32 %v634_v5, 0.0  ;;  %22434 = vmatmul.mubr.msk.bf16.gmra.mrb[120].mxu1 %vm171_vm1, %v26062_v58  ;;  %v27333_v10 = vadd.f32 %v737_v2, %v374_v54  ;;  %v377_v23 = vmax.f32 %v279_v12, 0.0 }
  0xfb   :  { %v27339_v13 = vadd.f32 %v738_v8, %v375_v4 }
  0xfc   :  { %v638_v14 = vpop.f32.mrb[16].mxu1  ;;  %v283_v15 = vpop.f32.mrb[16].mxu0 }
  0xfd   :  { %v639_v16 = vadd.f32 %v27249_v57, %v638_v14  ;;  %v22263_v17 = vpop.f32.mrb[17].mxu1  ;;  %v284_v18 = vadd.f32 %v27249_v57, %v283_v15  ;;  %v22203_v19 = vpop.f32.mrb[17].mxu0 }
  0xfe   :  { %v641_v20 = vpop.f32.mrb[18].mxu1  ;;  %v286_v21 = vpop.f32.mrb[18].mxu0 }
  0xff   :  { %v739_v22 = vmax.f32 %v639_v16, 0.0  ;;  %v642_v24 = vadd.f32 %v27249_v57, %v641_v20  ;;  %v22264_v25 = vpop.f32.mrb[19].mxu1  ;;  %v22204_v26 = vpop.f32.mrb[19].mxu0  ;;  %v378_v29 = vmax.f32 %v284_v18, 0.0  ;;  %v287_v32 = vadd.f32 %v27249_v57, %v286_v21 }
 0x101   :  { %v740_v28 = vmax.f32 %v642_v24, 0.0  ;;  %v27344_v30 = vadd.f32 %v739_v22, %v376_v9  ;;  %v379_v43 = vmax.f32 %v287_v32, 0.0 }
 0x103   :  { %v27347_v33 = vadd.f32 %v740_v28, %v377_v23 }
 0x104   :  { %v646_v34 = vpop.f32.mrb[20].mxu1  ;;  %v291_v35 = vpop.f32.mrb[20].mxu0 }
 0x105   :  { %v647_v36 = vadd.f32 %v27249_v57, %v646_v34  ;;  %v22267_v37 = vpop.f32.mrb[21].mxu1  ;;  %v292_v38 = vadd.f32 %v27249_v57, %v291_v35  ;;  %v22207_v39 = vpop.f32.mrb[21].mxu0 }
 0x106   :  { %v649_v40 = vpop.f32.mrb[22].mxu1  ;;  %v294_v41 = vpop.f32.mrb[22].mxu0 }
 0x107   :  { %v741_v42 = vmax.f32 %v647_v36, 0.0  ;;  %v650_v44 = vadd.f32 %v27249_v57, %v649_v40  ;;  %v22268_v45 = vpop.f32.mrb[23].mxu1  ;;  %v22208_v46 = vpop.f32.mrb[23].mxu0  ;;  %v380_v49 = vmax.f32 %v292_v38, 0.0  ;;  %v295_v52 = vadd.f32 %v27249_v57, %v294_v41 }
 0x109   :  { %v742_v47 = vmax.f32 %v650_v44, 0.0  ;;  %v27352_v50 = vadd.f32 %v741_v42, %v378_v29  ;;  %v381_v2 = vmax.f32 %v295_v52, 0.0 }
 0x10b   :  { %v27355_v53 = vadd.f32 %v742_v47, %v379_v43 }
 0x10c   :  { %v654_v54 = vpop.f32.mrb[24].mxu1  ;;  %v299_v55 = vpop.f32.mrb[24].mxu0 }
 0x10d   :  { %v655_v56 = vadd.f32 %v27249_v57, %v654_v54  ;;  %v22271_v58 = vpop.f32.mrb[25].mxu1  ;;  %v300_v59 = vadd.f32 %v27249_v57, %v299_v55  ;;  %v22211_v61 = vpop.f32.mrb[25].mxu0 }
 0x10e   :  { %v657_v62 = vpop.f32.mrb[26].mxu1  ;;  %v302_v63 = vpop.f32.mrb[26].mxu0 }
 0x10f   :  { %v743_v0 = vmax.f32 %v655_v56, 0.0  ;;  %v658_v4 = vadd.f32 %v27249_v57, %v657_v62  ;;  %v22272_v5 = vpop.f32.mrb[27].mxu1  ;;  %v22212_v6 = vpop.f32.mrb[27].mxu0  ;;  %v382_v8 = vmax.f32 %v300_v59, 0.0  ;;  %v303_v11 = vadd.f32 %v27249_v57, %v302_v63 }
 0x111   :  { %v744_v7 = vmax.f32 %v658_v4, 0.0  ;;  %v27360_v9 = vadd.f32 %v743_v0, %v380_v49  ;;  %v383_v23 = vmax.f32 %v303_v11, 0.0 }
 0x113   :  { %v27363_v12 = vadd.f32 %v744_v7, %v381_v2 }
 0x114   :  { %v662_v14 = vpop.f32.mrb[28].mxu1  ;;  %v307_v15 = vpop.f32.mrb[28].mxu0 }
 0x115   :  { %v663_v16 = vadd.f32 %v27249_v57, %v662_v14  ;;  %v22275_v17 = vpop.f32.mrb[29].mxu1  ;;  %v308_v18 = vadd.f32 %v27249_v57, %v307_v15  ;;  %v22215_v19 = vpop.f32.mrb[29].mxu0 }
 0x116   :  { %v665_v20 = vpop.f32.mrb[30].mxu1  ;;  %v310_v21 = vpop.f32.mrb[30].mxu0 }
 0x117   :  { %v745_v22 = vmax.f32 %v663_v16, 0.0  ;;  %v666_v24 = vadd.f32 %v27249_v57, %v665_v20  ;;  %v22276_v25 = vpop.f32.mrb[31].mxu1  ;;  %v22216_v26 = vpop.f32.mrb[31].mxu0  ;;  %v384_v29 = vmax.f32 %v308_v18, 0.0  ;;  %v311_v34 = vadd.f32 %v27249_v57, %v310_v21 }
 0x118   :  { %v27393_v25 = vld [vmem:[%s32844_s3] sm:$0xff]  }
 0x119   :  { %v746_v28 = vmax.f32 %v666_v24, 0.0  ;;  %v27368_v32 = vadd.f32 %v745_v22, %v382_v8  ;;  %v385_v45 = vmax.f32 %v311_v34, 0.0  ;;  %22473 = vmatprep.subr.bf16.mxu0 %v27393_v25 }
 0x11b   :  { %v27371_v35 = vadd.f32 %v746_v28, %v383_v23 }
 0x11c   :  { %v670_v36 = vpop.f32.mrb[32].mxu1  ;;  %v315_v37 = vpop.f32.mrb[32].mxu0 }
 0x11d   :  { %v671_v38 = vadd.f32 %v27249_v57, %v670_v36  ;;  %v22279_v39 = vpop.f32.mrb[33].mxu1  ;;  %v316_v40 = vadd.f32 %v27249_v57, %v315_v37  ;;  %v22219_v41 = vpop.f32.mrb[33].mxu0 }
 0x11e   :  { %v673_v42 = vpop.f32.mrb[34].mxu1  ;;  %v318_v43 = vpop.f32.mrb[34].mxu0 }
 0x11f   :  { %v747_v44 = vmax.f32 %v671_v38, 0.0  ;;  %v674_v46 = vadd.f32 %v27249_v57, %v673_v42  ;;  %v22280_v47 = vpop.f32.mrb[35].mxu1  ;;  %v22220_v49 = vpop.f32.mrb[35].mxu0  ;;  %v386_v54 = vmax.f32 %v316_v40, 0.0  ;;  %v319_v56 = vadd.f32 %v27249_v57, %v318_v43 }
 0x121   :  { %v748_v52 = vmax.f32 %v674_v46, 0.0  ;;  %v27376_v55 = vadd.f32 %v747_v44, %v384_v29  ;;  %v387_v6 = vmax.f32 %v319_v56, 0.0 }
 0x123   :  { %v27379_v58 = vadd.f32 %v748_v52, %v385_v45 }
 0x124   :  { %v678_v59 = vpop.f32.mrb[36].mxu1  ;;  %v323_v61 = vpop.f32.mrb[36].mxu0 }
 0x125   :  { %v679_v62 = vadd.f32 %v27249_v57, %v678_v59  ;;  %v22283_v63 = vpop.f32.mrb[37].mxu1  ;;  %v22223_v0 = vpop.f32.mrb[37].mxu0  ;;  %v324_v15 = vadd.f32 %v27249_v57, %v323_v61 }
 0x126   :  { %v681_v2 = vpop.f32.mrb[38].mxu1  ;;  %v326_v4 = vpop.f32.mrb[38].mxu0 }
 0x127   :  { %v749_v5 = vmax.f32 %v679_v62, 0.0  ;;  %v682_v7 = vadd.f32 %v27249_v57, %v681_v2  ;;  %v22284_v8 = vpop.f32.mrb[39].mxu1  ;;  %v22224_v11 = vpop.f32.mrb[39].mxu0  ;;  %v327_v17 = vadd.f32 %v27249_v57, %v326_v4  ;;  %v388_v21 = vmax.f32 %v324_v15, 0.0 }
 0x129   :  { %v750_v14 = vmax.f32 %v682_v7, 0.0  ;;  %v27384_v16 = vadd.f32 %v749_v5, %v386_v54  ;;  %v389_v34 = vmax.f32 %v327_v17, 0.0 }
 0x12b   :  { %v27387_v18 = vadd.f32 %v750_v14, %v387_v6 }
 0x12c   :  { %v686_v19 = vpop.f32.mrb[40].mxu1  ;;  %v331_v20 = vpop.f32.mrb[40].mxu0 }
 0x12d   :  { %v687_v22 = vadd.f32 %v27249_v57, %v686_v19  ;;  %v22287_v23 = vpop.f32.mrb[41].mxu1  ;;  %v22227_v24 = vpop.f32.mrb[41].mxu0  ;;  %v332_v40 = vadd.f32 %v27249_v57, %v331_v20 }
 0x12e   :  { %v689_v26 = vpop.f32.mrb[42].mxu1  ;;  %v334_v28 = vpop.f32.mrb[42].mxu0 }
 0x12f   :  { %v751_v29 = vmax.f32 %v687_v22, 0.0  ;;  %v690_v36 = vadd.f32 %v27249_v57, %v689_v26  ;;  %v22288_v37 = vpop.f32.mrb[43].mxu1  ;;  %v22228_v38 = vpop.f32.mrb[43].mxu0  ;;  %v335_v42 = vadd.f32 %v27249_v57, %v334_v28  ;;  %v390_v46 = vmax.f32 %v332_v40, 0.0 }
 0x131   :  { %v752_v39 = vmax.f32 %v690_v36, 0.0  ;;  %v27398_v41 = vadd.f32 %v751_v29, %v388_v21  ;;  %v391_v61 = vmax.f32 %v335_v42, 0.0 }
 0x133   :  { %v27401_v43 = vadd.f32 %v752_v39, %v389_v34 }
 0x134   :  { %v694_v44 = vpop.f32.mrb[44].mxu1  ;;  %v339_v45 = vpop.f32.mrb[44].mxu0 }
 0x135   :  { %v695_v47 = vadd.f32 %v27249_v57, %v694_v44  ;;  %v22291_v49 = vpop.f32.mrb[45].mxu1  ;;  %v22231_v52 = vpop.f32.mrb[45].mxu0  ;;  %v340_v4 = vadd.f32 %v27249_v57, %v339_v45 }
 0x136   :  { %v697_v54 = vpop.f32.mrb[46].mxu1  ;;  %v342_v56 = vpop.f32.mrb[46].mxu0 }
 0x137   :  { %v753_v59 = vmax.f32 %v695_v47, 0.0  ;;  %v698_v62 = vadd.f32 %v27249_v57, %v697_v54  ;;  %v22292_v63 = vpop.f32.mrb[47].mxu1  ;;  %v22232_v0 = vpop.f32.mrb[47].mxu0  ;;  %v343_v6 = vadd.f32 %v27249_v57, %v342_v56  ;;  %v392_v14 = vmax.f32 %v340_v4, 0.0 }
 0x139   :  { %v754_v2 = vmax.f32 %v698_v62, 0.0  ;;  %v27406_v5 = vadd.f32 %v753_v59, %v390_v46  ;;  %v393_v23 = vmax.f32 %v343_v6, 0.0  ;;  %v27424_v59 = vld [vmem:[%s32843_s2] ss:$0 sm:$0xff] }
 0x13b   :  { %v27409_v7 = vadd.f32 %v754_v2, %v391_v61 }
 0x13c   :  { %v702_v8 = vpop.f32.mrb[48].mxu1  ;;  %v347_v11 = vpop.f32.mrb[48].mxu0 }
 0x13d   :  { %v703_v15 = vadd.f32 %v27249_v57, %v702_v8  ;;  %v22295_v17 = vpop.f32.mrb[49].mxu1  ;;  %v22235_v19 = vpop.f32.mrb[49].mxu0  ;;  %v348_v34 = vadd.f32 %v27249_v57, %v347_v11 }
 0x13e   :  { %v705_v20 = vpop.f32.mrb[50].mxu1  ;;  %v350_v21 = vpop.f32.mrb[50].mxu0 }
 0x13f   :  { %v755_v22 = vmax.f32 %v703_v15, 0.0  ;;  %v706_v24 = vadd.f32 %v27249_v57, %v705_v20  ;;  %v22296_v26 = vpop.f32.mrb[51].mxu1  ;;  %v22236_v28 = vpop.f32.mrb[51].mxu0  ;;  %v351_v37 = vadd.f32 %v27249_v57, %v350_v21  ;;  %v394_v42 = vmax.f32 %v348_v34, 0.0 }
 0x141   :  { %v756_v29 = vmax.f32 %v706_v24, 0.0  ;;  %v27414_v36 = vadd.f32 %v755_v22, %v392_v14  ;;  %v395_v56 = vmax.f32 %v351_v37, 0.0  ;;  %v364_v37 = vadd.f32 %v27424_v59, %v27261_v60 }
 0x143   :  { %v27417_v38 = vadd.f32 %v756_v29, %v393_v23 }
 0x144   :  { %v710_v39 = vpop.f32.mrb[52].mxu1  ;;  %v355_v40 = vpop.f32.mrb[52].mxu0 }
 0x145   :  { %v711_v44 = vadd.f32 %v27249_v57, %v710_v39  ;;  %v22299_v45 = vpop.f32.mrb[53].mxu1  ;;  %v356_v46 = vadd.f32 %v27249_v57, %v355_v40  ;;  %v22239_v47 = vpop.f32.mrb[53].mxu0 }
 0x146   :  { %v713_v49 = vpop.f32.mrb[54].mxu1  ;;  %v358_v52 = vpop.f32.mrb[54].mxu0  ;;  %v367_v47 = vadd.f32 %v27424_v59, %v27267_v3 }
 0x147   :  { %v757_v54 = vmax.f32 %v711_v44, 0.0  ;;  %v714_v61 = vadd.f32 %v27424_v59, %v713_v49  ;;  %v22300_v62 = vpop.f32.mrb[55].mxu1  ;;  %v359_v63 = vadd.f32 %v27424_v59, %v358_v52  ;;  %v22240_v0 = vpop.f32.mrb[55].mxu0  ;;  %v396_v4 = vmax.f32 %v356_v46, 0.0 }
 0x148   :  { %v399_v3 = vmax.f32 %v367_v47, 0.0 }
 0x149   :  { %v758_v2 = vmax.f32 %v714_v61, 0.0  ;;  %v397_v6 = vmax.f32 %v359_v63, 0.0  ;;  %v27428_v57 = vadd.f32 %v757_v54, %v394_v42  ;;  %v398_v54 = vmax.f32 %v364_v37, 0.0 }
 0x14b   :  { %v27430_v8 = vadd.f32 %v758_v2, %v395_v56 }
 0x14c   :  { %v718_v11 = vpop.f32.mrb[56].mxu1  ;;  %v977_v14 = vpop.f32.mrb[56].mxu0 }
 0x14d   :  { %v719_v15 = vadd.f32 %v27424_v59, %v718_v11  ;;  %v978_v17 = vadd.f32 %v27424_v59, %v977_v14  ;;  %v22303_v19 = vpop.f32.mrb[57].mxu1  ;;  %v22315_v20 = vpop.f32.mrb[57].mxu0 }
 0x14e   :  { %v721_v21 = vpop.f32.mrb[58].mxu1  ;;  %v980_v22 = vpop.f32.mrb[58].mxu0 }
 0x14f   :  { %v759_v23 = vmax.f32 %v719_v15, 0.0  ;;  %v1096_v24 = vmax.f32 %v978_v17, 0.0  ;;  %v722_v26 = vadd.f32 %v27424_v59, %v721_v21  ;;  %v981_v28 = vadd.f32 %v27424_v59, %v980_v22  ;;  %v22304_v29 = vpop.f32.mrb[59].mxu1  ;;  %v22316_v34 = vpop.f32.mrb[59].mxu0 }
 0x151   :  { %v1126_v39 = vadd.f32 %v1096_v24, %v27293_v27  ;;  %v760_v40 = vmax.f32 %v722_v26, 0.0  ;;  %v1097_v42 = vmax.f32 %v981_v28, 0.0  ;;  %v27439_v44 = vadd.f32 %v759_v23, %v396_v4 }
 0x153   :  { %v1127_v45 = vadd.f32 %v1097_v42, %v27304_v31  ;;  %v27442_v46 = vadd.f32 %v760_v40, %v397_v6 }
 0x154   :  { %v726_v49 = vpop.f32.mrb[60].mxu1  ;;  %v985_v52 = vpop.f32.mrb[60].mxu0 }
 0x155   :  { %v727_v56 = vadd.f32 %v27424_v59, %v726_v49  ;;  %v986_v60 = vadd.f32 %v27424_v59, %v985_v52  ;;  %v22307_v61 = vpop.f32.mrb[61].mxu1  ;;  %v22319_v27 = vpop.f32.mrb[61].mxu0 }
 0x156   :  { %v729_v62 = vpop.f32.mrb[62].mxu1  ;;  %v988_v63 = vpop.f32.mrb[62].mxu0 }
 0x157   :  { %v761_v0 = vmax.f32 %v727_v56, 0.0  ;;  %v1098_v2 = vmax.f32 %v986_v60, 0.0  ;;  %v730_v31 = vadd.f32 %v27424_v59, %v729_v62  ;;  %v989_v4 = vadd.f32 %v27424_v59, %v988_v63  ;;  %v22308_v6 = vpop.f32.mrb[63].mxu1  ;;  %v22320_v11 = vpop.f32.mrb[63].mxu0 }
 0x159   :  { %v1128_v14 = vadd.f32 %v1098_v2, %v27313_v48  ;;  %v762_v15 = vmax.f32 %v730_v31, 0.0  ;;  %v1099_v17 = vmax.f32 %v989_v4, 0.0  ;;  %v27451_v19 = vadd.f32 %v761_v0, %v398_v54 }
 0x15b   :  { %v1129_v20 = vadd.f32 %v1099_v17, %v27321_v51  ;;  %v27454_v21 = vadd.f32 %v762_v15, %v399_v3 }
 0x15c   :  { %v993_v22 = vpop.f32.mrb[64].mxu0  ;;  %v1340_v23 = vpop.f32.mrb[64].mxu1 }
 0x15d   :  { %v994_v24 = vadd.f32 %v27424_v59, %v993_v22  ;;  %v1341_v26 = vadd.f32 %v27424_v59, %v1340_v23  ;;  %v22323_v28 = vpop.f32.mrb[65].mxu0  ;;  %v22379_v29 = vpop.f32.mrb[65].mxu1 }
 0x15e   :  { %v996_v34 = vpop.f32.mrb[66].mxu0  ;;  %v1343_v37 = vpop.f32.mrb[66].mxu1 }
 0x15f   :  { %v1100_v40 = vmax.f32 %v994_v24, 0.0  ;;  %v1459_v48 = vmax.f32 %v1341_v26, 0.0  ;;  %v997_v42 = vadd.f32 %v27424_v59, %v996_v34  ;;  %v1344_v47 = vadd.f32 %v27424_v59, %v1343_v37  ;;  %v22380_v49 = vpop.f32.mrb[67].mxu1  ;;  %v22324_v51 = vpop.f32.mrb[67].mxu0 }
 0x161   :  { %v1130_v52 = vadd.f32 %v1100_v40, %v27333_v10  ;;  %v1489_v54 = vadd.f32 %v1459_v48, %v1126_v39  ;;  %v1101_v56 = vmax.f32 %v997_v42, 0.0  ;;  %v1460_v60 = vmax.f32 %v1344_v47, 0.0 }
 0x163   :  { %v1131_v61 = vadd.f32 %v1101_v56, %v27339_v13  ;;  %v1490_v27 = vadd.f32 %v1460_v60, %v1127_v45  ;;  %v1519_v0 = vmul.f32 0.25, %v1489_v54 }
 0x164   :  { %v1001_v62 = vpop.f32.mrb[68].mxu0  ;;  %v1348_v63 = vpop.f32.mrb[68].mxu1 }
 0x165   :  { %v1520_v2 = vmul.f32 0.25, %v1490_v27  ;;  %v1002_v31 = vadd.f32 %v27424_v59, %v1001_v62  ;;  %v1349_v4 = vadd.f32 %v27424_v59, %v1348_v63  ;;  %v22327_v6 = vpop.f32.mrb[69].mxu0  ;;  %v22383_v11 = vpop.f32.mrb[69].mxu1 }
 0x166   :  { %v1004_v3 = vpop.f32.mrb[70].mxu0  ;;  %v1351_v15 = vpop.f32.mrb[70].mxu1 }
 0x167   :  { %v27464_v17 = vpack.c.bf16 %v1520_v2, %v1519_v0  ;;  %v1102_v10 = vmax.f32 %v1002_v31, 0.0  ;;  %v1461_v39 = vmax.f32 %v1349_v4, 0.0  ;;  %v1005_v22 = vadd.f32 %v27424_v59, %v1004_v3  ;;  %v22384_v13 = vpop.f32.mrb[71].mxu1  ;;  %v22328_v45 = vpop.f32.mrb[71].mxu0 }
 0x168   :  { %v1352_v23 = vadd.f32 %v27424_v59, %v1351_v15 }
 0x169   :  { %1564 = vst [vmem:[#allocation2] sm:$0xff] %v27464_v17  ;;  %v1132_v24 = vadd.f32 %v1102_v10, %v27344_v30  ;;  %v1491_v26 = vadd.f32 %v1461_v39, %v1128_v14  ;;  %v1103_v28 = vmax.f32 %v1005_v22, 0.0  ;;  %v1627_v42 = vshll.u32 %v27464_v17, 16 }
 0x16a   :  { %v1462_v29 = vmax.f32 %v1352_v23, 0.0  ;;  %v1625_v15 = vshrl.u32 %v27464_v17, 16 }
 0x16b   :  { %v27471_v34 = vadd.f32 %v1103_v28, %v27347_v33  ;;  %v1521_v56 = vmul.f32 0.25, %v1491_v26  ;;  %v1629_v31 = vrot.slane %v1627_v42, 1 }
 0x16c   :  { %v1492_v37 = vadd.f32 %v1462_v29, %v1129_v20  ;;  %v1009_v40 = vpop.f32.mrb[72].mxu0  ;;  %v1356_v48 = vpop.f32.mrb[72].mxu1 }
 0x16d   :  { %v1010_v47 = vadd.f32 %v27424_v59, %v1009_v40  ;;  %v1357_v49 = vadd.f32 %v27424_v59, %v1356_v48  ;;  %v22331_v51 = vpop.f32.mrb[73].mxu0  ;;  %v22387_v54 = vpop.f32.mrb[73].mxu1 }
 0x16e   :  { %v1522_v60 = vmul.f32 0.25, %v1492_v37  ;;  %v1012_v30 = vpop.f32.mrb[74].mxu0  ;;  %v1359_v14 = vpop.f32.mrb[74].mxu1 }
 0x16f   :  { %v1104_v27 = vmax.f32 %v1010_v47, 0.0  ;;  %v1463_v62 = vmax.f32 %v1357_v49, 0.0  ;;  %v1013_v33 = vadd.f32 %v27424_v59, %v1012_v30  ;;  %v1360_v20 = vadd.f32 %v27424_v59, %v1359_v14  ;;  %v22388_v63 = vpop.f32.mrb[75].mxu1  ;;  %v22332_v0 = vpop.f32.mrb[75].mxu0 }
 0x170   :  { %v27478_v2 = vpack.c.bf16 %v1522_v60, %v1521_v56 }
 0x171   :  { %v27481_v4 = vadd.f32 %v1104_v27, %v27352_v50  ;;  %v1493_v6 = vadd.f32 %v1463_v62, %v1130_v52  ;;  %v1105_v11 = vmax.f32 %v1013_v33, 0.0  ;;  %v1464_v3 = vmax.f32 %v1360_v20, 0.0 }
 0x172   :  { %1565 = vst [vmem:[#allocation2 + $0x8] sm:$0xff] %v27478_v2  ;;  %v1632_v10 = vshll.u32 %v27478_v2, 16  ;;  %v1636_v39 = vshrl.u32 %v27478_v2, 16  ;;  %v1630_v50 = vor.u32 %v1629_v31, %v1625_v15 }
 0x173   :  { %v27488_v22 = vadd.f32 %v1105_v11, %v27355_v53  ;;  %v1494_v13 = vadd.f32 %v1464_v3, %v1131_v61  ;;  %v1523_v28 = vmul.f32 0.25, %v1493_v6 }
 0x174   :  { %v1017_v45 = vpop.f32.mrb[76].mxu0  ;;  %v1364_v23 = vpop.f32.mrb[76].mxu1  ;;  %v1634_v26 = vrot.slane %v1632_v10, 1  ;;  %v2309_v52 = vrot.slane %v1636_v39, 1  ;;  %v2310_v51 = vrot.slane %v1632_v10, 2 }
 0x175   :  { %v1524_v29 = vmul.f32 0.25, %v1494_v13  ;;  %v1018_v37 = vadd.f32 %v27424_v59, %v1017_v45  ;;  %v1365_v40 = vadd.f32 %v27424_v59, %v1364_v23  ;;  %v22335_v48 = vpop.f32.mrb[77].mxu0  ;;  %v22391_v42 = vpop.f32.mrb[77].mxu1 }
 0x176   :  { %v1020_v47 = vpop.f32.mrb[78].mxu0  ;;  %v1367_v49 = vpop.f32.mrb[78].mxu1  ;;  %v1635_v53 = vsel %vm1623_vm2, %v1630_v50, %v1634_v26  ;;  %v27497_v62 = vor.u32 %v2310_v51, %v2309_v52  ;;  %v1638_v3 = vor.u32 %v1636_v39, %v1634_v26 }
 0x177   :  { %v27493_v61 = vpack.c.bf16 %v1524_v29, %v1523_v28  ;;  %v1106_v54 = vmax.f32 %v1018_v37, 0.0  ;;  %v1465_v56 = vmax.f32 %v1365_v40, 0.0  ;;  %v1021_v60 = vadd.f32 %v27424_v59, %v1020_v47  ;;  %v22392_v30 = vpop.f32.mrb[79].mxu1  ;;  %v22336_v14 = vpop.f32.mrb[79].mxu0  ;;  %22453 = vmatprep.mubr.bf16.mxu0 %v1635_v53 }
 0x178   :  { %v1368_v27 = vadd.f32 %v27424_v59, %v1367_v49 }
 0x179   :  { %1566 = vst [vmem:[#allocation2 + $0x10] sm:$0xff] %v27493_v61  ;;  %v27501_v33 = vadd.f32 %v1106_v54, %v27360_v9  ;;  %v1495_v20 = vadd.f32 %v1465_v56, %v1132_v24  ;;  %v1107_v63 = vmax.f32 %v1021_v60, 0.0  ;;  %v1640_v0 = vshll.u32 %v27493_v61, 16  ;;  %v26072_v9 = vld [vmem:[%s32844_s3 + $0x8] sm:$0xff]   ;;  %v26073_v56 = vld [vmem:[%s32844_s3 + $0x10] sm:$0xff]  }
 0x17a   :  { %v1466_v31 = vmax.f32 %v1368_v27, 0.0  ;;  %v1644_v6 = vshrl.u32 %v27493_v61, 16 }
 0x17b   :  { %v27506_v11 = vadd.f32 %v1107_v63, %v27363_v12  ;;  %v1642_v15 = vrot.slane %v1640_v0, 1  ;;  %v2314_v10 = vrot.slane %v1640_v0, 2  ;;  %v1525_v39 = vmul.f32 0.25, %v1495_v20 }
 0x17c   :  { %v1496_v13 = vadd.f32 %v1466_v31, %v27471_v34  ;;  %v1025_v45 = vpop.f32.mrb[80].mxu0  ;;  %v1372_v23 = vpop.f32.mrb[80].mxu1  ;;  %v2313_v50 = vrot.slane %v1644_v6, 1 }
 0x17d   :  { %v1026_v24 = vadd.f32 %v27424_v59, %v1025_v45  ;;  %v1373_v52 = vadd.f32 %v27424_v59, %v1372_v23  ;;  %v22339_v28 = vpop.f32.mrb[81].mxu0  ;;  %v22395_v29 = vpop.f32.mrb[81].mxu1  ;;  %v1643_v12 = vsel %vm1623_vm2, %v1638_v3, %v1642_v15 }
 0x17e   :  { %v1526_v26 = vmul.f32 0.25, %v1496_v13  ;;  %v1028_v37 = vpop.f32.mrb[82].mxu0  ;;  %v1375_v34 = vpop.f32.mrb[82].mxu1  ;;  %22454 = vmatmul.mubr.bf16.vlgmr.msra.gmra.mrb[116].mxu0 %v1643_v12  ;;  %v2315_v40 = vor.u32 %v2314_v10, %v2313_v50 }
 0x17f   :  { %v1108_v48 = vmax.f32 %v1026_v24, 0.0  ;;  %v1467_v42 = vmax.f32 %v1373_v52, 0.0  ;;  %v1029_v47 = vadd.f32 %v27424_v59, %v1028_v37  ;;  %v1376_v49 = vadd.f32 %v27424_v59, %v1375_v34  ;;  %v22396_v53 = vpop.f32.mrb[83].mxu1  ;;  %v22340_v51 = vpop.f32.mrb[83].mxu0  ;;  %22474 = vmatpush3.bf16.msra.mxu0 %v27393_v25 }
 0x180   :  { %v27518_v54 = vpack.c.bf16 %v1526_v26, %v1525_v39  ;;  %22475 = vmatprep.subr.bf16.mxu0 %v26072_v9  ;;  %v27525_v60 = vsel %vm2300_vm3, %v27497_v62, %v2315_v40 }
 0x181   :  { %v27528_v30 = vadd.f32 %v1108_v48, %v27368_v32  ;;  %v1497_v14 = vadd.f32 %v1467_v42, %v27481_v4  ;;  %v1109_v27 = vmax.f32 %v1029_v47, 0.0  ;;  %v1468_v20 = vmax.f32 %v1376_v49, 0.0  ;;  %v26074_v4 = vld [vmem:[%s32844_s3 + $0x18] sm:$0xff]   ;;  %v26075_v47 = vld [vmem:[%s32844_s3 + $0x20] sm:$0xff]  }
 0x182   :  { %1567 = vst [vmem:[#allocation2 + $0x18] sm:$0xff] %v27518_v54  ;;  %v1648_v25 = vshll.u32 %v27518_v54, 16  ;;  %v1652_v63 = vshrl.u32 %v27518_v54, 16  ;;  %v1646_v32 = vor.u32 %v1644_v6, %v1642_v15 }
 0x183   :  { %v27535_v0 = vadd.f32 %v1109_v27, %v27371_v35  ;;  %v1498_v31 = vadd.f32 %v1468_v20, %v27488_v22  ;;  %22476 = vmatpush3.bf16.msra.mxu0 %v26072_v9  ;;  %v1527_v50 = vmul.f32 0.25, %v1497_v14 }
 0x184   :  { %v1033_v3 = vpop.f32.mrb[84].mxu0  ;;  %v1380_v10 = vpop.f32.mrb[84].mxu1  ;;  %v1650_v13 = vrot.slane %v1648_v25, 1  ;;  %22477 = vmatprep.subr.bf16.mxu0 %v26073_v56  ;;  %v2317_v45 = vrot.slane %v1652_v63, 1  ;;  %v2318_v23 = vrot.slane %v1648_v25, 2 }
 0x185   :  { %v1528_v24 = vmul.f32 0.25, %v1498_v31  ;;  %v1034_v52 = vadd.f32 %v27424_v59, %v1033_v3  ;;  %v1381_v35 = vadd.f32 %v27424_v59, %v1380_v10  ;;  %v22343_v28 = vpop.f32.mrb[85].mxu0  ;;  %v22399_v22 = vpop.f32.mrb[85].mxu1 }
 0x186   :  { %v1036_v9 = vpop.f32.mrb[86].mxu0  ;;  %v1383_v29 = vpop.f32.mrb[86].mxu1  ;;  %v1651_v6 = vsel %vm1623_vm2, %v1646_v32, %v1650_v13  ;;  %v2319_v15 = vor.u32 %v2318_v23, %v2317_v45  ;;  %v1654_v31 = vor.u32 %v1652_v63, %v1650_v13 }
 0x187   :  { %v27544_v12 = vpack.c.bf16 %v1528_v24, %v1527_v50  ;;  %v1110_v39 = vmax.f32 %v1034_v52, 0.0  ;;  %v1469_v26 = vmax.f32 %v1381_v35, 0.0  ;;  %v1037_v37 = vadd.f32 %v27424_v59, %v1036_v9  ;;  %v22400_v34 = vpop.f32.mrb[87].mxu1  ;;  %v22344_v48 = vpop.f32.mrb[87].mxu0  ;;  %22457 = vmatprep.mubr.bf16.mxu0 %v1651_v6  ;;  %22478 = vmatpush3.bf16.msra.mxu0 %v26073_v56 }
 0x188   :  { %v1384_v42 = vadd.f32 %v27424_v59, %v1383_v29  ;;  %22479 = vmatprep.subr.bf16.mxu0 %v26074_v4  ;;  %v27552_v49 = vsel %vm2300_vm3, %v2315_v40, %v2319_v15 }
 0x189   :  { %1568 = vst [vmem:[#allocation2 + $0x20] sm:$0xff] %v27544_v12  ;;  %v27556_v53 = vadd.f32 %v1110_v39, %v27376_v55  ;;  %v1499_v51 = vadd.f32 %v1469_v26, %v27501_v33  ;;  %v1111_v14 = vmax.f32 %v1037_v37, 0.0  ;;  %v1656_v56 = vshll.u32 %v27544_v12, 16  ;;  %v26076_v33 = vld [vmem:[%s32844_s3 + $0x28] sm:$0xff]   ;;  %v26077_v37 = vld [vmem:[%s32844_s3 + $0x30] sm:$0xff]  }
 0x18a   :  { %v1470_v27 = vmax.f32 %v1384_v42, 0.0  ;;  %v1660_v20 = vshrl.u32 %v27544_v12, 16 }
 0x18b   :  { %v27562_v25 = vadd.f32 %v1111_v14, %v27379_v58  ;;  %v1658_v3 = vrot.slane %v1656_v56, 1  ;;  %22480 = vmatpush3.bf16.msra.mxu0 %v26074_v4  ;;  %v2322_v40 = vrot.slane %v1656_v56, 2  ;;  %v1529_v13 = vmul.f32 0.25, %v1499_v51 }
 0x18c   :  { %v1500_v10 = vadd.f32 %v1470_v27, %v27506_v11  ;;  %v1041_v32 = vpop.f32.mrb[88].mxu0  ;;  %v1388_v55 = vpop.f32.mrb[88].mxu1  ;;  %22481 = vmatprep.subr.bf16.mxu0 %v26075_v47  ;;  %v2321_v45 = vrot.slane %v1660_v20, 1 }
 0x18d   :  { %v1042_v23 = vadd.f32 %v27424_v59, %v1041_v32  ;;  %v1389_v50 = vadd.f32 %v27424_v59, %v1388_v55  ;;  %v22347_v58 = vpop.f32.mrb[89].mxu0  ;;  %v22403_v24 = vpop.f32.mrb[89].mxu1  ;;  %v1659_v63 = vsel %vm1623_vm2, %v1654_v31, %v1658_v3 }
 0x18e   :  { %v1530_v4 = vmul.f32 0.25, %v1500_v10  ;;  %v1044_v52 = vpop.f32.mrb[90].mxu0  ;;  %v1391_v11 = vpop.f32.mrb[90].mxu1  ;;  %22458 = vmatmul.mubr.bf16.gmra.mrb[120].mxu0 %v1659_v63  ;;  %v2323_v35 = vor.u32 %v2322_v40, %v2321_v45 }
 0x18f   :  { %v1112_v28 = vmax.f32 %v1042_v23, 0.0  ;;  %v1471_v22 = vmax.f32 %v1389_v50, 0.0  ;;  %v1045_v9 = vadd.f32 %v27424_v59, %v1044_v52  ;;  %v1392_v29 = vadd.f32 %v27424_v59, %v1391_v11  ;;  %v22404_v6 = vpop.f32.mrb[91].mxu1  ;;  %v22348_v39 = vpop.f32.mrb[91].mxu0  ;;  %22482 = vmatpush3.bf16.msra.mxu0 %v26075_v47 }
 0x190   :  { %v27573_v26 = vpack.c.bf16 %v1530_v4, %v1529_v13  ;;  %22483 = vmatprep.subr.bf16.mxu0 %v26076_v33  ;;  %v27579_v34 = vsel %vm2300_vm3, %v2319_v15, %v2323_v35 }
 0x191   :  { %v27582_v48 = vadd.f32 %v1112_v28, %v27384_v16  ;;  %v1501_v42 = vadd.f32 %v1471_v22, %v27528_v30  ;;  %v1113_v51 = vmax.f32 %v1045_v9, 0.0  ;;  %v1472_v14 = vmax.f32 %v1392_v29, 0.0  ;;  %v26078_v30 = vld [vmem:[%s32844_s3 + $0x38] sm:$0xff]   ;;  %v27605_v9 = vld [vmem:[%s32844_s3 + $0x80] sm:$0xff]  }
 0x192   :  { %1569 = vst [vmem:[#allocation2 + $0x28] sm:$0xff] %v27573_v26  ;;  %v1664_v47 = vshll.u32 %v27573_v26, 16  ;;  %v1668_v56 = vshrl.u32 %v27573_v26, 16  ;;  %v1662_v16 = vor.u32 %v1660_v20, %v1658_v3 }
 0x193   :  { %v27589_v27 = vadd.f32 %v1113_v51, %v27387_v18  ;;  %v1502_v31 = vadd.f32 %v1472_v14, %v27535_v0  ;;  %22484 = vmatpush3.bf16.msra.mxu0 %v26076_v33  ;;  %v1531_v45 = vmul.f32 0.25, %v1501_v42 }
 0x194   :  { %v1049_v15 = vpop.f32.mrb[92].mxu0  ;;  %v1396_v40 = vpop.f32.mrb[92].mxu1  ;;  %v1666_v10 = vrot.slane %v1664_v47, 1  ;;  %22485 = vmatprep.subr.bf16.mxu0 %v26077_v37  ;;  %v2325_v32 = vrot.slane %v1668_v56, 1  ;;  %v2326_v55 = vrot.slane %v1664_v47, 2 }
 0x195   :  { %v1532_v23 = vmul.f32 0.25, %v1502_v31  ;;  %v1050_v50 = vadd.f32 %v27424_v59, %v1049_v15  ;;  %v1397_v18 = vadd.f32 %v27424_v59, %v1396_v40  ;;  %v22351_v58 = vpop.f32.mrb[93].mxu0  ;;  %v22407_v0 = vpop.f32.mrb[93].mxu1 }
 0x196   :  { %v1052_v33 = vpop.f32.mrb[94].mxu0  ;;  %v1399_v24 = vpop.f32.mrb[94].mxu1  ;;  %v1667_v20 = vsel %vm1623_vm2, %v1662_v16, %v1666_v10  ;;  %v2327_v3 = vor.u32 %v2326_v55, %v2325_v32  ;;  %v1670_v31 = vor.u32 %v1668_v56, %v1666_v10 }
 0x197   :  { %v27598_v63 = vpack.c.bf16 %v1532_v23, %v1531_v45  ;;  %v1114_v13 = vmax.f32 %v1050_v50, 0.0  ;;  %v1473_v4 = vmax.f32 %v1397_v18, 0.0  ;;  %v1053_v52 = vadd.f32 %v27424_v59, %v1052_v33  ;;  %v22408_v11 = vpop.f32.mrb[95].mxu1  ;;  %v22352_v28 = vpop.f32.mrb[95].mxu0  ;;  %22461 = vmatprep.mubr.bf16.mxu0 %v1667_v20  ;;  %22486 = vmatpush3.bf16.msra.mxu0 %v26077_v37 }
 0x198   :  { %v1400_v22 = vadd.f32 %v27424_v59, %v1399_v24  ;;  %22487 = vmatprep.subr.bf16.mxu0 %v26078_v30  ;;  %v27608_v29 = vsel %vm2300_vm3, %v2323_v35, %v2327_v3 }
 0x199   :  { %1570 = vst [vmem:[#allocation2 + $0x30] sm:$0xff] %v27598_v63  ;;  %v27612_v6 = vadd.f32 %v1114_v13, %v27398_v41  ;;  %v1503_v39 = vadd.f32 %v1473_v4, %v27556_v53  ;;  %v1115_v42 = vmax.f32 %v1053_v52, 0.0  ;;  %v1672_v37 = vshll.u32 %v27598_v63, 16 }
 0x19a   :  { %v1474_v51 = vmax.f32 %v1400_v22, 0.0  ;;  %v1676_v14 = vshrl.u32 %v27598_v63, 16 }
 0x19b   :  { %v27618_v47 = vadd.f32 %v1115_v42, %v27401_v43  ;;  %v1674_v15 = vrot.slane %v1672_v37, 1  ;;  %22488 = vmatpush3.bf16.msra.mxu0 %v26078_v30  ;;  %v2330_v35 = vrot.slane %v1672_v37, 2  ;;  %v1533_v50 = vmul.f32 0.25, %v1503_v39 }
 0x19c   :  { %v1504_v40 = vadd.f32 %v1474_v51, %v27562_v25  ;;  %v1057_v16 = vpop.f32.mrb[96].mxu0  ;;  %v1404_v41 = vpop.f32.mrb[96].mxu1  ;;  %22509 = vmatprep.subr.bf16.mxu0 %v27605_v9  ;;  %v2329_v53 = vrot.slane %v1676_v14, 1 }
 0x19d   :  { %v1058_v32 = vadd.f32 %v27424_v59, %v1057_v16  ;;  %v1405_v55 = vadd.f32 %v27424_v59, %v1404_v41  ;;  %v22355_v45 = vpop.f32.mrb[97].mxu0  ;;  %v22411_v23 = vpop.f32.mrb[97].mxu1  ;;  %v1675_v43 = vsel %vm1623_vm2, %v1670_v31, %v1674_v15 }
 0x19e   :  { %v1534_v56 = vmul.f32 0.25, %v1504_v40  ;;  %v1060_v10 = vpop.f32.mrb[98].mxu0  ;;  %v1407_v30 = vpop.f32.mrb[98].mxu1  ;;  %22462 = vmatmul.mubr.bf16.gmra.mrb[124].mxu0 %v1675_v43  ;;  %v2331_v18 = vor.u32 %v2330_v35, %v2329_v53  ;;  %v1678_v35 = vor.u32 %v1676_v14, %v1674_v15 }
 0x19f   :  { %v1116_v25 = vmax.f32 %v1058_v32, 0.0  ;;  %v1475_v58 = vmax.f32 %v1405_v55, 0.0  ;;  %v1061_v0 = vadd.f32 %v27424_v59, %v1060_v10  ;;  %v1408_v33 = vadd.f32 %v27424_v59, %v1407_v30  ;;  %v22412_v24 = vpop.f32.mrb[99].mxu1  ;;  %v22356_v20 = vpop.f32.mrb[99].mxu0 }
 0x1a0   :  { %v27627_v13 = vpack.c.bf16 %v1534_v56, %v1533_v50  ;;  %v27630_v4 = vsel %vm2300_vm3, %v2327_v3, %v2331_v18 }
 0x1a1   :  { %v27633_v52 = vadd.f32 %v1116_v25, %v27406_v5  ;;  %v1505_v11 = vadd.f32 %v1475_v58, %v27582_v48  ;;  %v1117_v28 = vmax.f32 %v1061_v0, 0.0  ;;  %v1476_v22 = vmax.f32 %v1408_v33, 0.0 }
 0x1a2   :  { %1571 = vst [vmem:[#allocation2 + $0x38] sm:$0xff] %v27627_v13  ;;  %v1680_v39 = vshll.u32 %v27627_v13, 16  ;;  %v1684_v42 = vshrl.u32 %v27627_v13, 16 }
 0x1a3   :  { %v27640_v37 = vadd.f32 %v1117_v28, %v27409_v7  ;;  %v1506_v51 = vadd.f32 %v1476_v22, %v27589_v27  ;;  %v1535_v48 = vmul.f32 0.25, %v1505_v11 }
 0x1a4   :  { %v1065_v3 = vpop.f32.mrb[100].mxu0  ;;  %v1412_v31 = vpop.f32.mrb[100].mxu1  ;;  %v1682_v5 = vrot.slane %v1680_v39, 1  ;;  %v2333_v40 = vrot.slane %v1684_v42, 1  ;;  %v2334_v16 = vrot.slane %v1680_v39, 2 }
 0x1a5   :  { %v1536_v41 = vmul.f32 0.25, %v1506_v51  ;;  %v1066_v53 = vadd.f32 %v27424_v59, %v1065_v3  ;;  %v1413_v32 = vadd.f32 %v27424_v59, %v1412_v31  ;;  %v22359_v55 = vpop.f32.mrb[101].mxu0  ;;  %v22415_v45 = vpop.f32.mrb[101].mxu1 }
 0x1a6   :  { %v1068_v23 = vpop.f32.mrb[102].mxu0  ;;  %v1415_v43 = vpop.f32.mrb[102].mxu1  ;;  %v1683_v7 = vsel %vm1623_vm2, %v1678_v35, %v1682_v5  ;;  %v2335_v50 = vor.u32 %v2334_v16, %v2333_v40 }
 0x1a7   :  { %v27646_v27 = vpack.c.bf16 %v1536_v41, %v1535_v48  ;;  %v1118_v56 = vmax.f32 %v1066_v53, 0.0  ;;  %v1477_v14 = vmax.f32 %v1413_v32, 0.0  ;;  %v1069_v15 = vadd.f32 %v27424_v59, %v1068_v23  ;;  %v22416_v10 = vpop.f32.mrb[103].mxu1  ;;  %v22360_v30 = vpop.f32.mrb[103].mxu0  ;;  %22465 = vmatprep.mubr.bf16.mxu0 %v1683_v7 }
 0x1a8   :  { %v1416_v25 = vadd.f32 %v27424_v59, %v1415_v43  ;;  %v27651_v58 = vsel %vm2300_vm3, %v2331_v18, %v2335_v50  ;;  %v1686_v59 = vor.u32 %v1684_v42, %v1682_v5 }
 0x1a9   :  { %1572 = vst [vmem:[#allocation2 + $0x40] sm:$0xff] %v27646_v27  ;;  %v27655_v0 = vadd.f32 %v1118_v56, %v27414_v36  ;;  %v1507_v33 = vadd.f32 %v1477_v14, %v27612_v6  ;;  %v1119_v24 = vmax.f32 %v1069_v15, 0.0  ;;  %v1688_v20 = vshll.u32 %v27646_v27, 16  ;;  %v27667_v6 = vld [vmem:[%s32843_s2] ss:$0 sm:$0xff] }
 0x1aa   :  { %v1478_v11 = vmax.f32 %v1416_v25, 0.0  ;;  %v1692_v28 = vshrl.u32 %v27646_v27, 16 }
 0x1ab   :  { %v27661_v22 = vadd.f32 %v1119_v24, %v27417_v38  ;;  %v1690_v39 = vrot.slane %v1688_v20, 1  ;;  %v2338_v18 = vrot.slane %v1688_v20, 2  ;;  %v1537_v5 = vmul.f32 0.25, %v1507_v33 }
 0x1ac   :  { %v1508_v51 = vadd.f32 %v1478_v11, %v27618_v47  ;;  %v1073_v3 = vpop.f32.mrb[104].mxu0  ;;  %v1420_v31 = vpop.f32.mrb[104].mxu1  ;;  %v2337_v36 = vrot.slane %v1692_v28, 1 }
 0x1ad   :  { %v1074_v35 = vadd.f32 %v27667_v6, %v1073_v3  ;;  %v1421_v40 = vadd.f32 %v27667_v6, %v1420_v31  ;;  %v22363_v16 = vpop.f32.mrb[105].mxu0  ;;  %v22419_v38 = vpop.f32.mrb[105].mxu1  ;;  %v1691_v42 = vsel %vm1623_vm2, %v1686_v59, %v1690_v39 }
 0x1ae   :  { %v1538_v48 = vmul.f32 0.25, %v1508_v51  ;;  %v1076_v41 = vpop.f32.mrb[106].mxu0  ;;  %v1423_v47 = vpop.f32.mrb[106].mxu1  ;;  %22466 = vmatmul.mubr.bf16.gmra.mrb[128].mxu0 %v1691_v42  ;;  %v2339_v53 = vor.u32 %v2338_v18, %v2337_v36 }
 0x1af   :  { %v1120_v32 = vmax.f32 %v1074_v35, 0.0  ;;  %v1479_v55 = vmax.f32 %v1421_v40, 0.0  ;;  %v1077_v45 = vadd.f32 %v27667_v6, %v1076_v41  ;;  %v1424_v23 = vadd.f32 %v27667_v6, %v1423_v47  ;;  %v22420_v43 = vpop.f32.mrb[107].mxu1  ;;  %v22364_v7 = vpop.f32.mrb[107].mxu0 }
 0x1b0   :  { %v27674_v56 = vpack.c.bf16 %v1538_v48, %v1537_v5  ;;  %v27677_v14 = vsel %vm2300_vm3, %v2335_v50, %v2339_v53  ;;  %v1694_v50 = vor.u32 %v1692_v28, %v1690_v39 }
 0x1b1   :  { %v1150_v15 = vadd.f32 %v1120_v32, %v27428_v57  ;;  %v1509_v10 = vadd.f32 %v1479_v55, %v27633_v52  ;;  %v1121_v30 = vmax.f32 %v1077_v45, 0.0  ;;  %v1480_v25 = vmax.f32 %v1424_v23, 0.0 }
 0x1b2   :  { %1573 = vst [vmem:[#allocation2 + $0x48] sm:$0xff] %v27674_v56  ;;  %v1696_v33 = vshll.u32 %v27674_v56, 16  ;;  %v1700_v24 = vshrl.u32 %v27674_v56, 16 }
 0x1b3   :  { %v1151_v20 = vadd.f32 %v1121_v30, %v27430_v8  ;;  %v1510_v11 = vadd.f32 %v1480_v25, %v27640_v37  ;;  %v1539_v3 = vmul.f32 0.25, %v1509_v10 }
 0x1b4   :  { %v1081_v59 = vpop.f32.mrb[108].mxu0  ;;  %v1428_v18 = vpop.f32.mrb[108].mxu1  ;;  %v1698_v51 = vrot.slane %v1696_v33, 1  ;;  %v2341_v57 = vrot.slane %v1700_v24, 1  ;;  %v2342_v52 = vrot.slane %v1696_v33, 2 }
 0x1b5   :  { %v1540_v31 = vmul.f32 0.25, %v1510_v11  ;;  %v1082_v36 = vadd.f32 %v27667_v6, %v1081_v59  ;;  %v1429_v35 = vadd.f32 %v27667_v6, %v1428_v18  ;;  %v22367_v40 = vpop.f32.mrb[109].mxu0  ;;  %v22423_v16 = vpop.f32.mrb[109].mxu1 }
 0x1b6   :  { %v1084_v38 = vpop.f32.mrb[110].mxu0  ;;  %v1431_v8 = vpop.f32.mrb[110].mxu1  ;;  %v1699_v37 = vsel %vm1623_vm2, %v1694_v50, %v1698_v51  ;;  %v27691_v42 = vor.u32 %v2342_v52, %v2341_v57 }
 0x1b7   :  { %v1559_v28 = vpack.c.bf16 %v1540_v31, %v1539_v3  ;;  %v1122_v39 = vmax.f32 %v1082_v36, 0.0  ;;  %v1481_v5 = vmax.f32 %v1429_v35, 0.0  ;;  %v1085_v48 = vadd.f32 %v27667_v6, %v1084_v38  ;;  %v22368_v41 = vpop.f32.mrb[111].mxu0  ;;  %v22424_v47 = vpop.f32.mrb[111].mxu1  ;;  %22469 = vmatprep.mubr.bf16.mxu0 %v1699_v37 }
 0x1b8   :  { %v1432_v32 = vadd.f32 %v27667_v6, %v1431_v8  ;;  %v27697_v55 = vsel %vm2300_vm3, %v2339_v53, %v27691_v42  ;;  %v1702_v47 = vor.u32 %v1700_v24, %v1698_v51  ;;  %v27736_v24 = vld [vmem:[#allocation2 + $0x30] sm:$0xff] }
 0x1b9   :  { %1574 = vst [vmem:[#allocation2 + $0x50] sm:$0xff] %v1559_v28  ;;  %v27700_v45 = vadd.f32 %v1122_v39, %v27439_v44  ;;  %v1511_v23 = vadd.f32 %v1481_v5, %v27655_v0  ;;  %v1123_v43 = vmax.f32 %v1085_v48, 0.0  ;;  %v27717_v39 = vld [vmem:[#allocation2 + $0x18] sm:$0xff] }
 0x1ba   :  { %v1482_v7 = vmax.f32 %v1432_v32, 0.0 }
 0x1bb   :  { %v27704_v10 = vadd.f32 %v1123_v43, %v27442_v46  ;;  %v1541_v50 = vmul.f32 0.25, %v1511_v23 }
 0x1bc   :  { %v1512_v30 = vadd.f32 %v1482_v7, %v27661_v22  ;;  %v1089_v25 = vpop.f32.mrb[112].mxu0  ;;  %v1436_v33 = vpop.f32.mrb[112].mxu1  ;;  %v32856_v7 = vshrl.u32 %v27717_v39, 16 }
 0x1bd   :  { %v1090_v11 = vadd.f32 %v27667_v6, %v1089_v25  ;;  %v1437_v53 = vadd.f32 %v27667_v6, %v1436_v33  ;;  %v22371_v59 = vpop.f32.mrb[113].mxu0  ;;  %v22427_v18 = vpop.f32.mrb[113].mxu1 }
 0x1be   :  { %v1542_v44 = vmul.f32 0.25, %v1512_v30  ;;  %v1092_v57 = vpop.f32.mrb[114].mxu0  ;;  %v1439_v52 = vpop.f32.mrb[114].mxu1  ;;  %v32858_v18 = vshll.u32 %v27717_v39, 16 }
 0x1bf   :  { %v1124_v0 = vmax.f32 %v1090_v11, 0.0  ;;  %v1483_v3 = vmax.f32 %v1437_v53, 0.0  ;;  %v1093_v31 = vadd.f32 %v27667_v6, %v1092_v57  ;;  %v1440_v46 = vadd.f32 %v27667_v6, %v1439_v52  ;;  %v22428_v36 = vpop.f32.mrb[115].mxu1  ;;  %v22372_v22 = vpop.f32.mrb[115].mxu0  ;;  %v27734_v11 = vld [vmem:[#allocation2 + $0x28] sm:$0xff]  ;;  %v27740_v53 = vld [vmem:[#allocation2 + $0x38] sm:$0xff] }
 0x1c0   :  { %v1560_v35 = vpack.c.bf16 %v1542_v44, %v1541_v50  ;;  %v27711_v40 = vld [vmem:[#allocation2 + $0x50] sm:$0x1]  ;;  %v3551_v44 = vrot.slane %v32856_v7, 1  ;;  %v27747_v57 = vld [vmem:[#allocation2 + $0x40] sm:$0xff]  ;;  %v27749_v52 = vld [vmem:[#allocation2 + $0x48] sm:$0xff]  ;;  %v32862_v36 = vshrl.u32 %v27736_v24, 16 }
 0x1c1   :  { %v27714_v16 = vadd.f32 %v1124_v0, %v27451_v19  ;;  %v1513_v38 = vadd.f32 %v1483_v3, %v1150_v15  ;;  %v1125_v8 = vmax.f32 %v1093_v31, 0.0  ;;  %v1484_v37 = vmax.f32 %v1440_v46, 0.0  ;;  %v27726_v19 = vld [vmem:[#allocation2 + $0x10] sm:$0xff]  ;;  %32965 = vst [vmem:[#allocation7_spill] sm:$0xff] %v27749_v52  ;;  %v26080_v46 = vld [vmem:[%s32844_s3 + $0x88] sm:$0xff]  }
 0x1c2   :  { %1575 = vst [vmem:[#allocation2 + $0x58] sm:$0xff] %v1560_v35  ;;  %v1704_v28 = vshll.u32 %v27711_v40, 16  ;;  %v32875_v51 = vshll.u32 %v27726_v19, 16  ;;  %v32857_v59 = vshrl.u32 %v27726_v19, 16  ;;  %v32861_v0 = vshll.u32 %v27734_v11, 16 }
 0x1c3   :  { %v27720_v5 = vadd.f32 %v1125_v8, %v27454_v21  ;;  %v1514_v48 = vadd.f32 %v1484_v37, %v1151_v20  ;;  %v1543_v15 = vmul.f32 0.25, %v1513_v38  ;;  %v27732_v21 = vld [vmem:[#allocation2 + $0x20] sm:$0xff]  ;;  %v32860_v3 = vshrl.u32 %v27734_v11, 16  ;;  %v27761_v38 = vld [vmem:[#allocation2 + $0x50] sm:$0xff] }
 0x1c4   :  { %v27722_v41 = vpop.f32.mrb[116].mxu1  ;;  %v1706_v32 = vrot.slane %v1704_v28, 1  ;;  %v32863_v50 = vshll.u32 %v27732_v21, 16  ;;  %v32867_v31 = vshll.u32 %v27736_v24, 16  ;;  %v32866_v22 = vshll.u32 %v27740_v53, 16  ;;  %32966 = vst [vmem:[#allocation8_spill] sm:$0xff] %v27761_v38 }
 0x1c5   :  { %v1544_v23 = vmul.f32 0.25, %v1514_v48  ;;  %v22431_v43 = vpop.f32.mrb[117].mxu1  ;;  %v32865_v35 = vshrl.u32 %v27740_v53, 16  ;;  %v32874_v37 = vshll.u32 %v27747_v57, 16  ;;  %v32864_v28 = vshrl.u32 %v27747_v57, 16 }
 0x1c6   :  { %v27729_v30 = vpop.f32.mrb[118].mxu1  ;;  %v1707_v25 = vsel %vm1623_vm2, %v1702_v47, %v1706_v32  ;;  %v32873_v48 = vshll.u32 %v27749_v52, 16  ;;  %v32871_v32 = vshrl.u32 %v27749_v52, 16  ;;  %v3547_v43 = vrot.slane %v32857_v59, 1 }
 0x1c7   :  { %v1561_v20 = vpack.c.bf16 %v1544_v23, %v1543_v15  ;;  %22470 = vmatmul.mubr.bf16.gmra.mrb[132].mxu0 %v1707_v25  ;;  %v22432_v33 = vpop.f32.mrb[119].mxu1  ;;  %v32872_v23 = vshll.u32 %v27761_v38, 16  ;;  %v3548_v25 = vrot.slane %v32875_v51, 2  ;;  %v3559_v1 = vrot.slane %v32860_v3, 1  ;;  %v26081_v3 = vld [vmem:[%s32844_s3 + $0x90] sm:$0xff]  }
 0x1c8   :  { %22489 = vmatprep.mubr.bf16.mxu0 %v27464_v17  ;;  %v32859_v17 = vshrl.u32 %v27732_v21, 16  ;;  %v32870_v59 = vshrl.u32 %v27761_v38, 16 }
 0x1c9   :  { %1576 = vst [vmem:[#allocation2 + $0x60] sm:$0xff] %v1561_v20  ;;  %v3552_v20 = vrot.slane %v32858_v18, 2  ;;  %v3560_v18 = vrot.slane %v32861_v0, 2  ;;  %v3568_v0 = vrot.slane %v32866_v22, 2 }
 0x1ca   :  { %v3555_v33 = vrot.slane %v32859_v17, 1  ;;  %v3563_v17 = vrot.slane %v32862_v36, 1  ;;  %v3571_v36 = vrot.slane %v32864_v28, 1  ;;  %v3575_v28 = vrot.slane %v32871_v32, 1 }
 0x1cc   :  { %v27763_v8 = vpop.f32.mrb[120].mxu1 }
 0x1cd   :  { %v22435_v47 = vpop.f32.mrb[121].mxu1 }
 0x1ce   :  { %v27769_v15 = vpop.f32.mrb[122].mxu1  ;;  %v3556_v47 = vrot.slane %v32863_v50, 2  ;;  %v26082_v50 = vld [vmem:[%s32844_s3 + $0x98] sm:$0xff]  }
 0x1cf   :  { %22490 = vmatmul.mubr.bf16.vlgmr.msra.gmra.mrb[116].mxu0 %v27478_v2  ;;  %v22436_v7 = vpop.f32.mrb[123].mxu1  ;;  %v27788_v2 = vor.u32 %v3548_v25, %v3547_v43  ;;  %v3567_v43 = vrot.slane %v32865_v35, 1  ;;  %v3561_v25 = vor.u32 %v3560_v18, %v3559_v1  ;;  %v3572_v18 = vrot.slane %v32874_v37, 2  ;;  %v27905_v37 = vld [vmem:[#allocation2 + $0x30] sm:$0xff] }
 0x1d0   :  { %22493 = vmatprep.mubr.bf16.mxu0 %v27493_v61  ;;  %22510 = vmatpush3.bf16.msra.mxu0 %v27605_v9  ;;  %v27797_v7 = vor.u32 %v3552_v20, %v3551_v44  ;;  %v3557_v61 = vor.u32 %v3556_v47, %v3555_v33  ;;  %v3564_v9 = vrot.slane %v32867_v31, 2  ;;  %v3576_v35 = vrot.slane %v32873_v48, 2  ;;  %v27902_v48 = vld [vmem:[#allocation2 + $0x28] sm:$0xff]  ;;  %32980 = vst [vmem:[#allocation22_spill] sm:$0xff] %v27905_v37 }
 0x1d1   :  { %32967 = vst [vmem:[#allocation9_spill] sm:$0xff] %v27788_v2  ;;  %22511 = vmatprep.subr.bf16.mxu0 %v26080_v46  ;;  %v3569_v47 = vor.u32 %v3568_v0, %v3567_v43  ;;  %v3573_v31 = vor.u32 %v3572_v18, %v3571_v36  ;;  %v32982_v51 = vshrl.u32 %v27902_v48, 16 }
 0x1d2   :  { %32968 = vst [vmem:[#allocation10_spill] sm:$0xff] %v27797_v7  ;;  %v27813_v44 = vsel %vm2300_vm3, %v27788_v2, %v27797_v7  ;;  %v27817_v20 = vsel %vm2300_vm3, %v27797_v7, %v3557_v61  ;;  %v3565_v1 = vor.u32 %v3564_v9, %v3563_v17  ;;  %v27822_v33 = vsel %vm2300_vm3, %v3557_v61, %v3561_v25  ;;  %v26088_v7 = vld [vmem:[%s32844_s3 + $0xc8] sm:$0xff]  }
 0x1d3   :  { %32969 = vst [vmem:[#allocation11_spill] sm:$0xff] %v27813_v44  ;;  %32970 = vst [vmem:[#allocation12_spill] sm:$0xff] %v27817_v20  ;;  %v3579_v17 = vrot.slane %v32870_v59, 1  ;;  %v3577_v0 = vor.u32 %v3576_v35, %v3575_v28  ;;  %v27840_v9 = vsel %vm2300_vm3, %v3569_v47, %v3573_v31  ;;  %v27897_v59 = vld [vmem:[#allocation2 + $0x18] sm:$0xff]  ;;  %v32986_v20 = vshll.u32 %v27902_v48, 16 }
 0x1d4   :  { %22512 = vmatpush3.bf16.msra.mxu0 %v26080_v46  ;;  %32971 = vst [vmem:[#allocation13_spill] sm:$0xff] %v27822_v33  ;;  %v27829_v22 = vsel %vm2300_vm3, %v3561_v25, %v3565_v1  ;;  %v3580_v46 = vrot.slane %v32872_v23, 2  ;;  %v27836_v61 = vsel %vm2300_vm3, %v3565_v1, %v3569_v47  ;;  %32974 = vst [vmem:[#allocation16_spill] sm:$0xff] %v27840_v9  ;;  %v26083_v25 = vld [vmem:[%s32844_s3 + $0xa0] sm:$0xff]   ;;  %v26086_v47 = vld [vmem:[%s32844_s3 + $0xb8] sm:$0xff]   ;;  %v2075_v32 = vrot.slane %v27897_v59, 1 }
 0x1d5   :  { %22513 = vmatprep.subr.bf16.mxu0 %v26081_v3  ;;  %32972 = vst [vmem:[#allocation14_spill] sm:$0xff] %v27829_v22  ;;  %32973 = vst [vmem:[#allocation15_spill] sm:$0xff] %v27836_v61  ;;  %v27846_v36 = vsel %vm2300_vm3, %v3573_v31, %v3577_v0  ;;  %v27900_v23 = vld [vmem:[#allocation2 + $0x20] sm:$0xff]  ;;  %v27925_v9 = vld [vmem:[#allocation2 + $0x50] sm:$0xff] }
 0x1d6   :  { %v27842_v43 = vor.u32 %v3580_v46, %v3579_v17  ;;  %32976 = vst [vmem:[#allocation18_spill] sm:$0xff] %v27846_v36  ;;  %v32985_v33 = vshll.u32 %v27900_v23, 16 }
 0x1d7   :  { %22494 = vmatmul.mubr.bf16.gmra.mrb[120].mxu0 %v27518_v54  ;;  %v27855_v54 = vld [vmem:[#allocation2 + $0x58] sm:$0xff] }
 0x1d8   :  { %32975 = vst [vmem:[#allocation17_spill] sm:$0xff] %v27842_v43  ;;  %22497 = vmatprep.mubr.bf16.mxu0 %v27544_v12  ;;  %22514 = vmatpush3.bf16.msra.mxu0 %v26081_v3  ;;  %v27853_v35 = vsel %vm2300_vm3, %v3577_v0, %v27842_v43  ;;  %32978 = vst [vmem:[#allocation20_spill] sm:$0xff] %v27855_v54  ;;  %v26084_v3 = vld [vmem:[%s32844_s3 + $0xa8] sm:$0xff]   ;;  %v32869_v31 = vshll.u32 %v27855_v54, 16  ;;  %v32868_v28 = vshrl.u32 %v27855_v54, 16 }
 0x1d9   :  { %22515 = vmatprep.subr.bf16.mxu0 %v26082_v50  ;;  %32977 = vst [vmem:[#allocation19_spill] sm:$0xff] %v27853_v35  ;;  %v27883_v0 = vld [vmem:[#allocation2] sm:$0xfe]  ;;  %v27921_v35 = vld [vmem:[#allocation2 + $0x48] sm:$0xff] }
 0x1da   :  { %v4816_v1 = vrot.slane %v32868_v28, 1  ;;  %v4817_v18 = vrot.slane %v32869_v31, 2  ;;  %v27894_v28 = vld [vmem:[#allocation2 + $0x10] sm:$0xff]  ;;  %v32992_v38 = vshrl.u32 %v27921_v35, 16 }
 0x1db   :  { %v2073_v31 = vrot.slane %v27894_v28, 1 }
 0x1dc   :  { %22516 = vmatpush3.bf16.msra.mxu0 %v26082_v50  ;;  %v26085_v50 = vld [vmem:[%s32844_s3 + $0xb0] sm:$0xff]   ;;  %v27874_v17 = vor.u32 %v4817_v18, %v4816_v1  ;;  %v27889_v1 = vld [vmem:[#allocation2 + $0x8] sm:$0xff]  ;;  %v6041_v52 = vrot.slane %v32992_v38, 1 }
 0x1dd   :  { %22517 = vmatprep.subr.bf16.mxu0 %v26083_v25  ;;  %v2071_v18 = vrot.slane %v27889_v1, 1 }
 0x1de   :  { %v27880_v46 = vsel %vm2300_vm3, %v27842_v43, %v27874_v17  ;;  %v27919_v43 = vld [vmem:[#allocation2 + $0x40] sm:$0xff] }
 0x1df   :  { %22498 = vmatmul.mubr.bf16.gmra.mrb[124].mxu0 %v27573_v26  ;;  %32979 = vst [vmem:[#allocation21_spill] sm:$0xff] %v27880_v46  ;;  %v27912_v46 = vld [vmem:[#allocation2 + $0x38] sm:$0xff]  ;;  %v2074_v54 = vsel %vm2069_vm4, %v2071_v18, %v2073_v31 }
 0x1e0   :  { %22501 = vmatprep.mubr.bf16.mxu0 %v27598_v63  ;;  %22518 = vmatpush3.bf16.msra.mxu0 %v26083_v25  ;;  %v26087_v25 = vld [vmem:[%s32844_s3 + $0xc0] sm:$0xff]   ;;  %32981 = vst [vmem:[#allocation23_spill] sm:$0xff] %v27912_v46 }
 0x1e1   :  { %22519 = vmatprep.subr.bf16.mxu0 %v26084_v3 }
 0x1e4   :  { %22520 = vmatpush3.bf16.msra.mxu0 %v26084_v3  ;;  %v2070_v3 = vrot.slane %v27883_v0, 1 }
 0x1e5   :  { %22521 = vmatprep.subr.bf16.mxu0 %v26085_v50 }
 0x1e7   :  { %22502 = vmatmul.mubr.bf16.gmra.mrb[128].mxu0 %v27627_v13 }
 0x1e8   :  { %22505 = vmatprep.mubr.bf16.mxu0 %v27646_v27  ;;  %22522 = vmatpush3.bf16.msra.mxu0 %v26085_v50  ;;  %v2072_v50 = vsel %vm2069_vm4, %v2070_v3, %v2071_v18  ;;  %v1445_v3 = vadd.f32 %v27667_v6, %v27722_v41 }
 0x1e9   :  { %22523 = vmatprep.subr.bf16.mxu0 %v26086_v47 }
 0x1ea   :  { %v1485_v41 = vmax.f32 %v1445_v3, 0.0  ;;  %v26089_v3 = vld [vmem:[%s32844_s3 + $0xd0] sm:$0xff]  }
 0x1ec   :  { %22524 = vmatpush3.bf16.msra.mxu0 %v26086_v47  ;;  %v2077_v47 = vrot.slane %v27544_v12, 1  ;;  %v1515_v61 = vadd.f32 %v1485_v41, %v27700_v45  ;;  %v2076_v12 = vsel %vm2069_vm4, %v2073_v31, %v2075_v32  ;;  %v6025_v45 = vrot.slane %v32982_v51, 1 }
 0x1ed   :  { %22545 = vmatprep.subr.bf16.mxu0 %v26087_v25  ;;  %v32889_v31 = vshrl.u32 %v27912_v46, 16 }
 0x1ef   :  { %22506 = vmatmul.mubr.bf16.gmra.mrb[132].mxu0 %v27674_v56 }
 0x1f0   :  { %22525 = vmatprep.mubr.bf16.mxu0 %v2072_v50  ;;  %v1448_v50 = vadd.f32 %v27667_v6, %v27729_v30  ;;  %v6026_v30 = vrot.slane %v32986_v20, 2 }
 0x1f2   :  { %v1486_v36 = vmax.f32 %v1448_v50, 0.0  ;;  %v27936_v50 = vld [vmem:[#allocation2 + $0x60] sm:$0xff] }
 0x1f4   :  { %v1516_v22 = vadd.f32 %v1486_v36, %v27704_v10  ;;  %v32895_v10 = vshll.u32 %v27912_v46, 16  ;;  %v1545_v36 = vmul.f32 0.25, %v1515_v61  ;;  %v2078_v61 = vsel %vm2069_vm4, %v2075_v32, %v2077_v47 }
 0x1f5   :  { %v32988_v32 = vshll.u32 %v27905_v37, 16 }
 0x1f6   :  { %v1546_v18 = vmul.f32 0.25, %v1516_v22  ;;  %v6034_v20 = vrot.slane %v32895_v10, 2  ;;  %v32994_v10 = vshll.u32 %v27921_v35, 16 }
 0x1f7   :  { %22526 = vmatmul.mubr.bf16.vlgmr.msra.gmra.mrb[116].mxu0 %v2074_v54  ;;  %v6022_v54 = vrot.slane %v32985_v33, 2  ;;  %v6030_v22 = vrot.slane %v32988_v32, 2  ;;  %v32993_v33 = vrot.slane %v27573_v26, 1 }
 0x1f8   :  { %22529 = vmatprep.mubr.bf16.mxu0 %v2076_v12  ;;  %22546 = vmatpush3.bf16.msra.mxu0 %v26087_v25  ;;  %v27947_v51 = vpack.c.bf16 %v1546_v18, %v1545_v36  ;;  %v32984_v12 = vshrl.u32 %v27900_v23, 16  ;;  %v32987_v36 = vshrl.u32 %v27905_v37, 16  ;;  %v6033_v25 = vrot.slane %v32889_v31, 1 }
 0x1f9   :  { %22547 = vmatprep.subr.bf16.mxu0 %v26088_v7  ;;  %v27975_v37 = vor.u32 %v6026_v30, %v6025_v45  ;;  %v32991_v31 = vshll.u32 %v27919_v43, 16  ;;  %v6042_v46 = vrot.slane %v32994_v10, 2  ;;  %v26091_v10 = vld [vmem:[%s32844_s3 + $0xe0] sm:$0xff]  }
 0x1fa   :  { %32983 = vst [vmem:[#allocation24_spill] sm:$0xff] %v27947_v51  ;;  %1577 = vst [vmem:[#allocation2 + $0x68] sm:$0xff] %v27947_v51  ;;  %v6021_v41 = vrot.slane %v32984_v12, 1  ;;  %v6029_v18 = vrot.slane %v32987_v36, 1  ;;  %v26090_v12 = vld [vmem:[%s32844_s3 + $0xd8] sm:$0xff]   ;;  %v32989_v36 = vshrl.u32 %v27919_v43, 16 }
 0x1fb   :  { %32990 = vst [vmem:[#allocation25_spill] sm:$0xff] %v27975_v37  ;;  %v6038_v2 = vrot.slane %v32991_v31, 2 }
 0x1fc   :  { %22548 = vmatpush3.bf16.msra.mxu0 %v26088_v7  ;;  %v27969_v7 = vor.u32 %v6022_v54, %v6021_v41  ;;  %v6037_v44 = vrot.slane %v32989_v36, 1  ;;  %v6031_v32 = vor.u32 %v6030_v22, %v6029_v18  ;;  %v2080_v41 = vsel %vm2069_vm4, %v2077_v47, %v32993_v33 }
 0x1fd   :  { %22549 = vmatprep.subr.bf16.mxu0 %v26089_v3  ;;  %v6035_v54 = vor.u32 %v6034_v20, %v6033_v25  ;;  %v32995_v36 = vshrl.u32 %v27925_v9, 16  ;;  %v32996_v47 = vshll.u32 %v27925_v9, 16  ;;  %v6043_v22 = vor.u32 %v6042_v46, %v6041_v52 }
 0x1fe   :  { %v27991_v45 = vsel %vm2300_vm3, %v27969_v7, %v27975_v37  ;;  %v27995_v38 = vsel %vm2300_vm3, %v27975_v37, %v6031_v32  ;;  %v6039_v31 = vor.u32 %v6038_v2, %v6037_v44  ;;  %v32997_v25 = vshrl.u32 %v27936_v50, 16 }
 0x1ff   :  { %22530 = vmatmul.mubr.bf16.gmra.mrb[120].mxu0 %v2078_v61  ;;  %v6045_v30 = vrot.slane %v32995_v36, 1  ;;  %v6046_v61 = vrot.slane %v32996_v47, 2  ;;  %v2081_v33 = vrot.slane %v27598_v63, 1  ;;  %v32998_v44 = vshll.u32 %v27936_v50, 16 }
 0x200   :  { %22533 = vmatprep.mubr.bf16.mxu0 %v2080_v41  ;;  %22550 = vmatpush3.bf16.msra.mxu0 %v26089_v3  ;;  %v28003_v3 = vsel %vm2300_vm3, %v6031_v32, %v6035_v54  ;;  %v6053_v18 = vrot.slane %v32997_v25, 1  ;;  %v28009_v20 = vsel %vm2300_vm3, %v6035_v54, %v6039_v31  ;;  %v2083_v36 = vrot.slane %v27627_v13, 1  ;;  %v26092_v13 = vld [vmem:[%s32844_s3 + $0xe8] sm:$0xff]  }
 0x201   :  { %22551 = vmatprep.subr.bf16.mxu0 %v26090_v12  ;;  %v28011_v2 = vor.u32 %v6046_v61, %v6045_v30  ;;  %v6054_v41 = vrot.slane %v32998_v44, 2  ;;  %v28017_v47 = vsel %vm2300_vm3, %v6039_v31, %v6043_v22  ;;  %v33003_v32 = vrot.slane %v27573_v26, 1 }
 0x202   :  { %32999 = vst [vmem:[#allocation26_spill] sm:$0xff] %v28017_v47  ;;  %v33004_v54 = vshll.u32 %v27900_v23, 16  ;;  %v2084_v61 = vsel %vm2069_vm4, %v2081_v33, %v2083_v36  ;;  %v33006_v26 = vshll.u32 %v27902_v48, 16  ;;  %v2305_v44 = vshll.u32 %v27883_v0, 16 }
 0x203   :  { %v28021_v52 = vsel %vm2300_vm3, %v6043_v22, %v28011_v2  ;;  %v28026_v63 = vsel %vm2300_vm3, %v28011_v2, %v27874_v17  ;;  %v28028_v46 = vor.u32 %v6054_v41, %v6053_v18  ;;  %v2302_v22 = vshrl.u32 %v27883_v0, 16  ;;  %v26093_v18 = vld [vmem:[%s32844_s3 + $0xf0] sm:$0xff]   ;;  %v26094_v0 = vld [vmem:[%s32844_s3 + $0xf8] sm:$0xff]  }
 0x204   :  { %22552 = vmatpush3.bf16.msra.mxu0 %v26090_v12  ;;  %33000 = vst [vmem:[#allocation27_spill] sm:$0xff] %v28021_v52  ;;  %33001 = vst [vmem:[#allocation28_spill] sm:$0xff] %v28026_v63  ;;  %v2082_v12 = vsel %vm2069_vm4, %v33003_v32, %v2081_v33  ;;  %v28038_v30 = vrot.slane %v33004_v54, 1  ;;  %v28049_v25 = vrot.slane %v33006_v26, 1  ;;  %v2085_v41 = vrot.slane %v27646_v27, 1  ;;  %v28064_v54 = vld [vmem:[#allocation2 + $0x58] sm:$0xff] }
 0x205   :  { %33002 = vst [vmem:[#allocation29_spill] sm:$0xff] %v28028_v46  ;;  %22553 = vmatprep.subr.bf16.mxu0 %v26091_v10  ;;  %v28043_v31 = vsel %vm2300_vm3, %v27874_v17, %v28028_v46  ;;  %v2087_v32 = vrot.slane %v27674_v56, 1  ;;  %33008 = vst [vmem:[#allocation31_spill] sm:$0xff] %v28064_v54  ;;  %v1453_v27 = vadd.f32 %v27667_v6, %v27763_v8  ;;  %v2307_v26 = vrot.slane %v2305_v44, 2 }
 0x206   :  { %33005 = vst [vmem:[#allocation30_spill] sm:$0xff] %v28043_v31  ;;  %v1456_v56 = vadd.f32 %v27667_v6, %v27769_v15  ;;  %v32901_v37 = vshrl.u32 %v28064_v54, 16  ;;  %v32900_v6 = vshll.u32 %v27947_v51, 16  ;;  %v32899_v15 = vshrl.u32 %v27947_v51, 16 }
 0x207   :  { %22534 = vmatmul.mubr.bf16.gmra.mrb[124].mxu0 %v2082_v12  ;;  %v1487_v31 = vmax.f32 %v1453_v27, 0.0  ;;  %v2089_v44 = vrot.slane %v27711_v40, 1 }
 0x208   :  { %22537 = vmatprep.mubr.bf16.mxu0 %v2084_v61  ;;  %22554 = vmatpush3.bf16.msra.mxu0 %v26091_v10  ;;  %v33007_v10 = vshrl.u32 %v27900_v23, 16  ;;  %v2086_v23 = vsel %vm2069_vm4, %v2083_v36, %v2085_v41  ;;  %v2304_v61 = vrot.slane %v2302_v22, 1  ;;  %v1488_v8 = vmax.f32 %v1456_v56, 0.0 }
 0x209   :  { %22555 = vmatprep.subr.bf16.mxu0 %v26092_v13  ;;  %v1517_v36 = vadd.f32 %v1487_v31, %v27714_v16  ;;  %v7282_v27 = vrot.slane %v32901_v37, 1  ;;  %v7291_v16 = vrot.slane %v32900_v6, 2  ;;  %v2090_v40 = vsel %vm2069_vm4, %v2087_v32, %v2089_v44  ;;  %v26100_v44 = vld [vmem:[%s32844_s3 + $0x128] sm:$0xff]  }
 0x20a   :  { %v6722_v33 = vor.u32 %v33007_v10, %v28038_v30  ;;  %v26095_v10 = vld [vmem:[%s32844_s3 + $0x100] sm:$0xff]   ;;  %v1518_v22 = vadd.f32 %v1488_v8, %v27720_v5 }
 0x20c   :  { %22556 = vmatpush3.bf16.msra.mxu0 %v26092_v13  ;;  %v28062_v12 = vsel %vm1623_vm2, %v6722_v33, %v28049_v25  ;;  %v2088_v13 = vsel %vm2069_vm4, %v2085_v41, %v2087_v32  ;;  %v2308_v41 = vor.u32 %v2307_v26, %v2304_v61  ;;  %v1548_v33 = vmul.f32 0.25, %v1518_v22  ;;  %v2545_v22 = vld [vmem:[#allocation2] sm:$0xfc] }
 0x20d   :  { %22557 = vmatprep.subr.bf16.mxu0 %v26093_v18 }
 0x20f   :  { %22538 = vmatmul.mubr.bf16.gmra.mrb[128].mxu0 %v2086_v23  ;;  %v1547_v23 = vmul.f32 0.25, %v1517_v36  ;;  %v28122_v36 = vld [vmem:[#allocation2 + $0x50] sm:$0x3] }
 0x210   :  { %22541 = vmatprep.mubr.bf16.mxu0 %v2088_v13  ;;  %22558 = vmatpush3.bf16.msra.mxu0 %v26093_v18  ;;  %v33009_v18 = vshll.u32 %v28064_v54, 16  ;;  %v7290_v13 = vrot.slane %v32899_v15, 1 }
 0x211   :  { %22559 = vmatprep.subr.bf16.mxu0 %v26094_v0  ;;  %v1563_v5 = vpack.c.bf16 %v1548_v33, %v1547_v23  ;;  %v26096_v33 = vld [vmem:[%s32844_s3 + $0x108] sm:$0xff]  }
 0x212   :  { %v7283_v56 = vrot.slane %v33009_v18, 2  ;;  %v28094_v61 = vor.u32 %v7291_v16, %v7290_v13  ;;  %v2569_v18 = vrot.slane %v27894_v28, 2  ;;  %v28158_v16 = vld [vmem:[#allocation2 + $0x20] sm:$0xff] }
 0x213   :  { %1578 = vst [vmem:[#allocation2 + $0x70] sm:$0xff] %v1563_v5  ;;  %v2573_v5 = vrot.slane %v28158_v16, 2 }
 0x214   :  { %22560 = vmatpush3.bf16.msra.mxu0 %v26094_v0  ;;  %v7284_v31 = vor.u32 %v7283_v56, %v7282_v27  ;;  %33010 = vst [vmem:[#allocation32_spill] sm:$0xff] %v28094_v61  ;;  %v2312_v0 = vsel %vm2300_vm3, %v2308_v41, %v27497_v62  ;;  %v28109_v32 = vsel %vm2300_vm3, %v28028_v46, %v28094_v61  ;;  %v26097_v62 = vld [vmem:[%s32844_s3 + $0x110] sm:$0xff]   ;;  %v26102_v27 = vld [vmem:[%s32844_s3 + $0x138] sm:$0xff]   ;;  %v26103_v56 = vld [vmem:[%s32844_s3 + $0x140] sm:$0xff]  }
 0x215   :  { %22581 = vmatprep.subr.bf16.mxu0 %v26095_v10  ;;  %33013 = vst [vmem:[#allocation35_spill] sm:$0xff] %v28109_v32 }
 0x216   :  { %v28100_v26 = vsel %vm2300_vm3, %v28011_v2, %v7284_v31  ;;  %v28104_v8 = vsel %vm2300_vm3, %v7284_v31, %v28028_v46  ;;  %v26098_v2 = vld [vmem:[%s32844_s3 + $0x118] sm:$0xff]   ;;  %v26105_v31 = vld [vmem:[%s32844_s3 + $0x150] sm:$0xff]  }
 0x217   :  { %22542 = vmatmul.mubr.bf16.gmra.mrb[132].mxu0 %v2090_v40  ;;  %33011 = vst [vmem:[#allocation33_spill] sm:$0xff] %v28100_v26  ;;  %33012 = vst [vmem:[#allocation34_spill] sm:$0xff] %v28104_v8  ;;  %v26759_v40 = vld [vmem:[#allocation2 + $0x28] sm:$0xff] }
 0x218   :  { %22561 = vmatprep.mubr.bf16.mxu0 %v2312_v0  ;;  %v26106_v0 = vld [vmem:[%s32844_s3 + $0x158] sm:$0xff]  }
 0x21f   :  { %22562 = vmatmul.mubr.bf16.vlgmr.msra.gmra.mrb[116].mxu0 %v27525_v60  ;;  %v26099_v60 = vld [vmem:[%s32844_s3 + $0x120] sm:$0xff]  }
 0x220   :  { %22565 = vmatprep.mubr.bf16.mxu0 %v27552_v49  ;;  %22582 = vmatpush3.bf16.msra.mxu0 %v26095_v10  ;;  %v2346_v49 = vshrl.u32 %v28122_v36, 16  ;;  %v2349_v10 = vshll.u32 %v28122_v36, 16 }
 0x221   :  { %22583 = vmatprep.subr.bf16.mxu0 %v26096_v33 }
 0x222   :  { %v2348_v41 = vrot.slane %v2346_v49, 1  ;;  %v2351_v23 = vrot.slane %v2349_v10, 2  ;;  %v26761_v49 = vld [vmem:[#allocation2 + $0x38] sm:$0xff] }
 0x223   :  { %v2579_v10 = vrot.slane %v26761_v49, 2 }
 0x224   :  { %22584 = vmatpush3.bf16.msra.mxu0 %v26096_v33  ;;  %v2352_v13 = vor.u32 %v2351_v23, %v2348_v41  ;;  %v26762_v41 = vld [vmem:[#allocation2 + $0x40] sm:$0xff] }
 0x225   :  { %22585 = vmatprep.subr.bf16.mxu0 %v26097_v62  ;;  %v2581_v23 = vrot.slane %v26762_v41, 2 }
 0x227   :  { %22566 = vmatmul.mubr.bf16.gmra.mrb[120].mxu0 %v27579_v34  ;;  %v26101_v34 = vld [vmem:[%s32844_s3 + $0x130] sm:$0xff]  }
 0x228   :  { %22569 = vmatprep.mubr.bf16.mxu0 %v27608_v29  ;;  %22586 = vmatpush3.bf16.msra.mxu0 %v26097_v62  ;;  %v2566_v29 = vrot.slane %v2545_v22, 2  ;;  %v26107_v22 = vld [vmem:[%s32844_s3 + $0x160] sm:$0xff]  }
 0x229   :  { %22587 = vmatprep.subr.bf16.mxu0 %v26098_v2 }
 0x22c   :  { %22588 = vmatpush3.bf16.msra.mxu0 %v26098_v2  ;;  %v26760_v2 = vld [vmem:[#allocation2 + $0x30] sm:$0xff] }
 0x22d   :  { %22589 = vmatprep.subr.bf16.mxu0 %v26099_v60 }
 0x22f   :  { %22570 = vmatmul.mubr.bf16.gmra.mrb[124].mxu0 %v27630_v4  ;;  %v2567_v4 = vrot.slane %v27889_v1, 2 }
 0x230   :  { %22573 = vmatprep.mubr.bf16.mxu0 %v27651_v58  ;;  %22590 = vmatpush3.bf16.msra.mxu0 %v26099_v60  ;;  %v2571_v58 = vrot.slane %v27897_v59, 2  ;;  %v2577_v60 = vrot.slane %v26760_v2, 2 }
 0x231   :  { %22591 = vmatprep.subr.bf16.mxu0 %v26100_v44  ;;  %v2568_v1 = vsel %vm2565_vm5, %v2566_v29, %v2567_v4  ;;  %v2570_v59 = vsel %vm2565_vm5, %v2567_v4, %v2569_v18 }
 0x232   :  { %v2572_v28 = vsel %vm2565_vm5, %v2569_v18, %v2571_v58  ;;  %v2574_v33 = vsel %vm2565_vm5, %v2571_v58, %v2573_v5  ;;  %v2580_v29 = vsel %vm2565_vm5, %v2577_v60, %v2579_v10  ;;  %v26109_v18 = vld [vmem:[%s32844_s3 + $0x170] sm:$0xff]   ;;  %v26110_v58 = vld [vmem:[%s32844_s3 + $0x178] sm:$0xff]  }
 0x234   :  { %22592 = vmatpush3.bf16.msra.mxu0 %v26100_v44  ;;  %v26108_v44 = vld [vmem:[%s32844_s3 + $0x168] sm:$0xff]  }
 0x235   :  { %22593 = vmatprep.subr.bf16.mxu0 %v26101_v34 }
 0x237   :  { %22574 = vmatmul.mubr.bf16.gmra.mrb[128].mxu0 %v27677_v14  ;;  %v2353_v14 = vsel %vm2300_vm3, %v27691_v42, %v2352_v13  ;;  %v2575_v42 = vrot.slane %v26759_v40, 2 }
 0x238   :  { %22577 = vmatprep.mubr.bf16.mxu0 %v27697_v55  ;;  %22594 = vmatpush3.bf16.msra.mxu0 %v26101_v34  ;;  %v26104_v55 = vld [vmem:[%s32844_s3 + $0x148] sm:$0xff]  }
 0x239   :  { %22595 = vmatprep.subr.bf16.mxu0 %v26102_v27  ;;  %v2576_v62 = vsel %vm2565_vm5, %v2573_v5, %v2575_v42  ;;  %v2578_v34 = vsel %vm2565_vm5, %v2575_v42, %v2577_v60  ;;  %v26765_v5 = vld [vmem:[#allocation2 + $0x10] sm:$0xff]  ;;  %v26116_v60 = vld [vmem:[%s32844_s3 + $0x1a8] sm:$0xff]  }
 0x23a   :  { %v26113_v42 = vld [vmem:[%s32844_s3 + $0x190] sm:$0xff]  }
 0x23c   :  { %22596 = vmatpush3.bf16.msra.mxu0 %v26102_v27  ;;  %v26763_v27 = vld [vmem:[#allocation2 + $0x48] sm:$0xff] }
 0x23d   :  { %22617 = vmatprep.subr.bf16.mxu0 %v26103_v56  ;;  %v2583_v4 = vrot.slane %v26763_v27, 2 }
 0x23f   :  { %22578 = vmatmul.mubr.bf16.gmra.mrb[132].mxu0 %v2353_v14  ;;  %v2584_v13 = vsel %vm2565_vm5, %v2581_v23, %v2583_v4  ;;  %v2585_v14 = vrot.slane %v28122_v36, 2  ;;  %v26766_v36 = vld [vmem:[#allocation2 + $0x18] sm:$0xff] }
 0x240   :  { %22597 = vmatprep.mubr.bf16.mxu0 %v2568_v1  ;;  %v26111_v1 = vld [vmem:[%s32844_s3 + $0x180] sm:$0xff]  }
 0x247   :  { %22598 = vmatmul.mubr.bf16.vlgmr.msra.gmra.mrb[116].mxu0 %v2570_v59  ;;  %v26764_v59 = vld [vmem:[#allocation2 + $0x8] sm:$0xff] }
 0x248   :  { %22601 = vmatprep.mubr.bf16.mxu0 %v2572_v28  ;;  %22618 = vmatpush3.bf16.msra.mxu0 %v26103_v56  ;;  %v2582_v56 = vsel %vm2565_vm5, %v2579_v10, %v2581_v23  ;;  %v26112_v28 = vld [vmem:[%s32844_s3 + $0x188] sm:$0xff]  }
 0x249   :  { %22619 = vmatprep.subr.bf16.mxu0 %v26104_v55 }
 0x24c   :  { %22620 = vmatpush3.bf16.msra.mxu0 %v26104_v55  ;;  %v2586_v55 = vsel %vm2565_vm5, %v2583_v4, %v2585_v14  ;;  %v26119_v4 = vld [vmem:[%s32844_s3 + $0x1c0] sm:$0xff]   ;;  %v33018_v14 = vshrl.u32 %v27717_v39, 16 }
 0x24d   :  { %22621 = vmatprep.subr.bf16.mxu0 %v26105_v31 }
 0x24f   :  { %22602 = vmatmul.mubr.bf16.gmra.mrb[120].mxu0 %v2574_v33  ;;  %v26115_v33 = vld [vmem:[%s32844_s3 + $0x1a0] sm:$0xff]  }
 0x250   :  { %22605 = vmatprep.mubr.bf16.mxu0 %v2576_v62  ;;  %22622 = vmatpush3.bf16.msra.mxu0 %v26105_v31  ;;  %v26114_v31 = vld [vmem:[%s32844_s3 + $0x198] sm:$0xff]  }
 0x251   :  { %22623 = vmatprep.subr.bf16.mxu0 %v26106_v0 }
 0x254   :  { %22624 = vmatpush3.bf16.msra.mxu0 %v26106_v0  ;;  %v2977_v0 = vld [vmem:[#allocation2 + $0x8] sm:$0xff] }
 0x255   :  { %22625 = vmatprep.subr.bf16.mxu0 %v26107_v22  ;;  %v3008_v62 = vshll.u32 %v2977_v0, 16  ;;  %v3006_v10 = vshrl.u32 %v2977_v0, 16 }
 0x257   :  { %22606 = vmatmul.mubr.bf16.gmra.mrb[124].mxu0 %v2578_v34 }
 0x258   :  { %22609 = vmatprep.mubr.bf16.mxu0 %v2580_v29  ;;  %22626 = vmatpush3.bf16.msra.mxu0 %v26107_v22  ;;  %v26118_v22 = vld [vmem:[%s32844_s3 + $0x1b8] sm:$0xff]   ;;  %v33016_v29 = vshll.u32 %v27732_v21, 16 }
 0x259   :  { %22627 = vmatprep.subr.bf16.mxu0 %v26108_v44 }
 0x25a   :  { %v3031_v23 = vrot.slane %v33016_v29, 1 }
 0x25c   :  { %22628 = vmatpush3.bf16.msra.mxu0 %v26108_v44  ;;  %v33014_v44 = vshll.u32 %v27726_v19, 16 }
 0x25d   :  { %22629 = vmatprep.subr.bf16.mxu0 %v26109_v18 }
 0x25e   :  { %v3015_v34 = vrot.slane %v33014_v44, 1 }
 0x25f   :  { %22610 = vmatmul.mubr.bf16.gmra.mrb[128].mxu0 %v2582_v56  ;;  %v33017_v56 = vshrl.u32 %v27726_v19, 16 }
 0x260   :  { %22613 = vmatprep.mubr.bf16.mxu0 %v2584_v13  ;;  %22630 = vmatpush3.bf16.msra.mxu0 %v26109_v18 }
 0x261   :  { %22631 = vmatprep.subr.bf16.mxu0 %v26110_v58  ;;  %v3019_v13 = vor.u32 %v33017_v56, %v3015_v34 }
 0x264   :  { %22632 = vmatpush3.bf16.msra.mxu0 %v26110_v58 }
 0x265   :  { %22653 = vmatprep.subr.bf16.mxu0 %v26111_v1 }
 0x267   :  { %22614 = vmatmul.mubr.bf16.gmra.mrb[132].mxu0 %v2586_v55 }
 0x268   :  { %22633 = vmatprep.mubr.bf16.mxu0 %v26764_v59 }
 0x26f   :  { %22634 = vmatmul.mubr.bf16.vlgmr.msra.gmra.mrb[116].mxu0 %v26765_v5 }
 0x270   :  { %22637 = vmatprep.mubr.bf16.mxu0 %v26766_v36  ;;  %22654 = vmatpush3.bf16.msra.mxu0 %v26111_v1  ;;  %v33020_v36 = vshll.u32 %v27736_v24, 16 }
 0x271   :  { %22655 = vmatprep.subr.bf16.mxu0 %v26112_v28 }
 0x272   :  { %v3047_v19 = vrot.slane %v33020_v36, 1 }
 0x274   :  { %22656 = vmatpush3.bf16.msra.mxu0 %v26112_v28  ;;  %v33019_v28 = vshll.u32 %v27734_v11, 16 }
 0x275   :  { %22657 = vmatprep.subr.bf16.mxu0 %v26113_v42 }
 0x276   :  { %v3039_v5 = vrot.slane %v33019_v28, 1 }
 0x277   :  { %22638 = vmatmul.mubr.bf16.gmra.mrb[120].mxu0 %v28158_v16  ;;  %v26117_v16 = vld [vmem:[%s32844_s3 + $0x1b0] sm:$0xff]  }
 0x278   :  { %22641 = vmatprep.mubr.bf16.mxu0 %v26759_v40  ;;  %22658 = vmatpush3.bf16.msra.mxu0 %v26113_v42  ;;  %v3010_v40 = vrot.slane %v3008_v62, 1  ;;  %v26122_v42 = vld [vmem:[%s32844_s3 + $0x1d8] sm:$0xff]  }
 0x279   :  { %22659 = vmatprep.subr.bf16.mxu0 %v26114_v31 }
 0x27a   :  { %v3011_v18 = vor.u32 %v3010_v40, %v3006_v10 }
 0x27c   :  { %22660 = vmatpush3.bf16.msra.mxu0 %v26114_v31  ;;  %v3016_v58 = vsel %vm1623_vm2, %v3011_v18, %v3015_v34  ;;  %v33021_v31 = vshrl.u32 %v27732_v21, 16  ;;  %v26123_v21 = vld [vmem:[%s32844_s3 + $0x1e0] sm:$0xff]  }
 0x27d   :  { %22661 = vmatprep.subr.bf16.mxu0 %v26115_v33 }
 0x27e   :  { %v3035_v0 = vor.u32 %v33021_v31, %v3031_v23 }
 0x27f   :  { %22642 = vmatmul.mubr.bf16.gmra.mrb[124].mxu0 %v26760_v2  ;;  %v33015_v2 = vshll.u32 %v27717_v39, 16  ;;  %v26121_v39 = vld [vmem:[%s32844_s3 + $0x1d0] sm:$0xff]  }
 0x280   :  { %22645 = vmatprep.mubr.bf16.mxu0 %v26761_v49  ;;  %22662 = vmatpush3.bf16.msra.mxu0 %v26115_v33  ;;  %v33022_v33 = vshrl.u32 %v27734_v11, 16  ;;  %v33024_v11 = vshll.u32 %v27747_v57, 16 }
 0x281   :  { %22663 = vmatprep.subr.bf16.mxu0 %v26116_v60  ;;  %v3023_v49 = vrot.slane %v33015_v2, 1 }
 0x282   :  { %v3043_v62 = vor.u32 %v33022_v33, %v3039_v5 }
 0x283   :  { %v3027_v1 = vor.u32 %v33018_v14, %v3023_v49  ;;  %v28230_v55 = vsel %vm1623_vm2, %v3019_v13, %v3023_v49 }
 0x284   :  { %22664 = vmatpush3.bf16.msra.mxu0 %v26116_v60  ;;  %v28252_v60 = vsel %vm1623_vm2, %v3035_v0, %v3039_v5  ;;  %v28256_v10 = vsel %vm1623_vm2, %v3043_v62, %v3047_v19 }
 0x285   :  { %22665 = vmatprep.subr.bf16.mxu0 %v26117_v16  ;;  %v28234_v59 = vsel %vm1623_vm2, %v3027_v1, %v3031_v23 }
 0x287   :  { %22646 = vmatmul.mubr.bf16.gmra.mrb[128].mxu0 %v26762_v41  ;;  %v26767_v41 = vld [vmem:[#allocation2 + $0x50] sm:$0xff] }
 0x288   :  { %22649 = vmatprep.mubr.bf16.mxu0 %v26763_v27  ;;  %22666 = vmatpush3.bf16.msra.mxu0 %v26117_v16  ;;  %v26120_v27 = vld [vmem:[%s32844_s3 + $0x1c8] sm:$0xff]   ;;  %v33023_v16 = vshll.u32 %v27740_v53, 16 }
 0x289   :  { %22667 = vmatprep.subr.bf16.mxu0 %v26118_v22 }
 0x28a   :  { %v3055_v40 = vrot.slane %v33023_v16, 1 }
 0x28c   :  { %22668 = vmatpush3.bf16.msra.mxu0 %v26118_v22  ;;  %v3063_v22 = vrot.slane %v33024_v11, 1 }
 0x28d   :  { %22689 = vmatprep.subr.bf16.mxu0 %v26119_v4 }
 0x28f   :  { %22650 = vmatmul.mubr.bf16.gmra.mrb[132].mxu0 %v26767_v41 }
 0x290   :  { %22669 = vmatprep.mubr.bf16.mxu0 %v3016_v58 }
 0x297   :  { %22670 = vmatmul.mubr.bf16.vlgmr.msra.gmra.mrb[116].mxu0 %v28230_v55 }
 0x298   :  { %22673 = vmatprep.mubr.bf16.mxu0 %v28234_v59  ;;  %22690 = vmatpush3.bf16.msra.mxu0 %v26119_v4 }
 0x299   :  { %22691 = vmatprep.subr.bf16.mxu0 %v26120_v27 }
 0x29c   :  { %22692 = vmatpush3.bf16.msra.mxu0 %v26120_v27 }
 0x29d   :  { %22693 = vmatprep.subr.bf16.mxu0 %v26121_v39 }
 0x29f   :  { %22674 = vmatmul.mubr.bf16.gmra.mrb[120].mxu0 %v28252_v60 }
 0x2a0   :  { %22677 = vmatprep.mubr.bf16.mxu0 %v28256_v10  ;;  %22694 = vmatpush3.bf16.msra.mxu0 %v26121_v39 }
 0x2a1   :  { %22695 = vmatprep.subr.bf16.mxu0 %v26122_v42 }
 0x2a2   :  { %17 = vsyncpa [#allocation5], 0  ;;  %v33025_v44 = vshrl.u32 %v27736_v24, 16  ;;  %v33026_v2 = vshrl.u32 %v27740_v53, 16  ;;  %v26124_v29 = vld [vmem:[%s32844_s3 + $0x1e8] sm:$0xff]   ;;  %v33027_v24 = vld [vmem:[#allocation7_spill] sm:$0xff] }
 0x2a3   :  { %v33028_v18 = vshll.u32 %v33027_v24, 16  ;;  %v26125_v41 = vld [vmem:[%s32844_s3 + $0x1f0] sm:$0xff]   ;;  %v33029_v58 = vld [vmem:[#allocation8_spill] sm:$0xff]  ;;  %v28288_v13 = vld [vmem:[#allocation2 + $0x58] sm:$0x1]  ;;  %v33031_v14 = vshrl.u32 %v27747_v57, 16 }
 0x2a4   :  { %v3051_v34 = vor.u32 %v33025_v44, %v3047_v19  ;;  %22696 = vmatpush3.bf16.msra.mxu0 %v26122_v42  ;;  %v3059_v49 = vor.u32 %v33026_v2, %v3055_v40  ;;  %v33030_v27 = vshll.u32 %v33029_v58, 16  ;;  %v33032_v28 = vshrl.u32 %v33027_v24, 16  ;;  %v26126_v36 = vld [vmem:[%s32844_s3 + $0x1f8] sm:$0xff]   ;;  %v26127_v57 = vld [vmem:[%s32844_s3 + $0x200] sm:$0xff]   ;;  %v28309_v0 = vld [vmem:[#allocation2 + $0x8] sm:$0xfe] }
 0x2a5   :  { %22697 = vmatprep.subr.bf16.mxu0 %v26123_v21  ;;  %v3071_v53 = vrot.slane %v33028_v18, 1  ;;  %v3067_v1 = vor.u32 %v33031_v14, %v3063_v22  ;;  %v3085_v39 = vshll.u32 %v28288_v13, 16  ;;  %v28311_v33 = vld [vmem:[#allocation2 + $0x10] sm:$0xff]  ;;  %v33033_v16 = vshrl.u32 %v33029_v58, 16  ;;  %v28322_v44 = vld [vmem:[#allocation2 + $0x18] sm:$0xff]  ;;  %v28327_v2 = vld [vmem:[#allocation2 + $0x20] sm:$0xff] }
 0x2a6   :  { %v28274_v23 = vsel %vm1623_vm2, %v3051_v34, %v3055_v40  ;;  %v28278_v4 = vsel %vm1623_vm2, %v3059_v49, %v3063_v22  ;;  %v3079_v56 = vrot.slane %v33030_v27, 1  ;;  %v3310_v62 = vrot.slane %v28311_v33, 1  ;;  %v28346_v27 = vld [vmem:[#allocation2 + $0x30] sm:$0xff]  ;;  %v26130_v14 = vld [vmem:[%s32844_s3 + $0x218] sm:$0xff]   ;;  %v26143_v8 = vld [vmem:[%s32844_s3 + $0x280] sm:$0xff]  }
 0x2a7   :  { %22678 = vmatmul.mubr.bf16.gmra.mrb[124].mxu0 %v28274_v23  ;;  %v3075_v5 = vor.u32 %v33032_v28, %v3071_v53  ;;  %v28298_v19 = vsel %vm1623_vm2, %v3067_v1, %v3071_v53  ;;  %v3087_v31 = vrot.slane %v3085_v39, 1  ;;  %v28325_v34 = vrot.slane %v28322_v44, 1  ;;  %v26129_v53 = vld [vmem:[%s32844_s3 + $0x210] sm:$0xff]   ;;  %v3783_v51 = vld [vmem:[#allocation2 + $0x8] sm:$0xfc] }
 0x2a8   :  { %22681 = vmatprep.mubr.bf16.mxu0 %v28278_v4  ;;  %22698 = vmatpush3.bf16.msra.mxu0 %v26123_v21  ;;  %v28316_v40 = vor.u32 %v33033_v16, %v3079_v56  ;;  %v3309_v21 = vrot.slane %v28309_v0, 1  ;;  %v3314_v49 = vrot.slane %v28327_v2, 1  ;;  %v3328_v15 = vrot.slane %v28288_v13, 1  ;;  %v26137_v13 = vld [vmem:[%s32844_s3 + $0x250] sm:$0xff]  }
 0x2a9   :  { %22699 = vmatprep.subr.bf16.mxu0 %v26124_v29  ;;  %v28303_v42 = vsel %vm1623_vm2, %v3075_v5, %v3079_v56  ;;  %v3313_v24 = vsel %vm2069_vm4, %v3310_v62, %v28325_v34  ;;  %v3318_v56 = vrot.slane %v28346_v27, 1  ;;  %v26131_v5 = vld [vmem:[%s32844_s3 + $0x220] sm:$0xff]   ;;  %v33041_v32 = vld [vmem:[#allocation18_spill] sm:$0xff]  ;;  %v3803_v54 = vrot.slane %v3783_v51, 2  ;;  %v33043_v46 = vld [vmem:[#allocation17_spill] sm:$0xff] }
 0x2aa   :  { %v3088_v11 = vsel %vm1623_vm2, %v28316_v40, %v3087_v31  ;;  %v3311_v22 = vsel %vm2069_vm4, %v3309_v21, %v3310_v62  ;;  %v28337_v18 = vsel %vm2069_vm4, %v28325_v34, %v3314_v49  ;;  %v26132_v62 = vld [vmem:[%s32844_s3 + $0x228] sm:$0xff]   ;;  %v3808_v63 = vrot.slane %v28327_v2, 2 }
 0x2ab   :  { %vm15698_vm6 = vcmask 1041409  }
 0x2ac   :  { %22700 = vmatpush3.bf16.msra.mxu0 %v26124_v29  ;;  %v26128_v29 = vld [vmem:[%s32844_s3 + $0x208] sm:$0xff]  }
 0x2ad   :  { %22701 = vmatprep.subr.bf16.mxu0 %v26125_v41 }
 0x2af   :  { %22682 = vmatmul.mubr.bf16.gmra.mrb[128].mxu0 %v28298_v19 }
 0x2b0   :  { %22685 = vmatprep.mubr.bf16.mxu0 %v28303_v42  ;;  %22702 = vmatpush3.bf16.msra.mxu0 %v26125_v41  ;;  %v28343_v41 = vld [vmem:[#allocation2 + $0x28] sm:$0xff] }
 0x2b1   :  { %22703 = vmatprep.subr.bf16.mxu0 %v26126_v36  ;;  %v3316_v58 = vrot.slane %v28343_v41, 1 }
 0x2b3   :  { %v28353_v1 = vsel %vm2069_vm4, %v3314_v49, %v3316_v58  ;;  %v28357_v28 = vsel %vm2069_vm4, %v3316_v58, %v3318_v56  ;;  %v3543_v58 = vshll.u32 %v28309_v0, 16 }
 0x2b4   :  { %22704 = vmatpush3.bf16.msra.mxu0 %v26126_v36  ;;  %v28363_v36 = vld [vmem:[#allocation2 + $0x38] sm:$0xff] }
 0x2b5   :  { %22725 = vmatprep.subr.bf16.mxu0 %v26127_v57  ;;  %v3320_v39 = vrot.slane %v28363_v36, 1 }
 0x2b7   :  { %22686 = vmatmul.mubr.bf16.gmra.mrb[132].mxu0 %v3088_v11  ;;  %v28373_v16 = vsel %vm2069_vm4, %v3318_v56, %v3320_v39  ;;  %v26133_v11 = vld [vmem:[%s32844_s3 + $0x230] sm:$0xff]   ;;  %v26134_v56 = vld [vmem:[%s32844_s3 + $0x238] sm:$0xff]  }
 0x2b8   :  { %22705 = vmatprep.mubr.bf16.mxu0 %v3311_v22  ;;  %v28383_v22 = vld [vmem:[#allocation2 + $0x48] sm:$0xff] }
 0x2b9   :  { %v3324_v49 = vrot.slane %v28383_v22, 1 }
 0x2bf   :  { %22706 = vmatmul.mubr.bf16.vlgmr.msra.gmra.mrb[116].mxu0 %v3313_v24 }
 0x2c0   :  { %22709 = vmatprep.mubr.bf16.mxu0 %v28337_v18  ;;  %22726 = vmatpush3.bf16.msra.mxu0 %v26127_v57  ;;  %v28366_v57 = vld [vmem:[#allocation2 + $0x40] sm:$0xff] }
 0x2c1   :  { %22727 = vmatprep.subr.bf16.mxu0 %v26128_v29  ;;  %v3322_v31 = vrot.slane %v28366_v57, 1 }
 0x2c3   :  { %v28377_v21 = vsel %vm2069_vm4, %v3320_v39, %v3322_v31 }
 0x2c4   :  { %22728 = vmatpush3.bf16.msra.mxu0 %v26128_v29  ;;  %v28386_v29 = vld [vmem:[#allocation2 + $0x50] sm:$0xff] }
 0x2c5   :  { %22729 = vmatprep.subr.bf16.mxu0 %v26129_v53  ;;  %v28389_v24 = vrot.slane %v28386_v29, 1  ;;  %v28504_v52 = vrot.slane %v28386_v29, 2 }
 0x2c7   :  { %22710 = vmatmul.mubr.bf16.gmra.mrb[120].mxu0 %v28353_v1  ;;  %v3329_v6 = vsel %vm2069_vm4, %v28389_v24, %v3328_v15  ;;  %v33038_v15 = vld [vmem:[#allocation14_spill] sm:$0xff] }
 0x2c8   :  { %22713 = vmatprep.mubr.bf16.mxu0 %v28357_v28  ;;  %22730 = vmatpush3.bf16.msra.mxu0 %v26129_v53  ;;  %v3540_v53 = vshrl.u32 %v28309_v0, 16  ;;  %v26135_v0 = vld [vmem:[%s32844_s3 + $0x240] sm:$0xff]  }
 0x2c9   :  { %22731 = vmatprep.subr.bf16.mxu0 %v26130_v14 }
 0x2ca   :  { %v3542_v39 = vrot.slane %v3540_v53, 1  ;;  %v33035_v53 = vld [vmem:[#allocation11_spill] sm:$0xff] }
 0x2cc   :  { %22732 = vmatpush3.bf16.msra.mxu0 %v26130_v14  ;;  %v28397_v14 = vsel %vm2069_vm4, %v3322_v31, %v3324_v49 }
 0x2cd   :  { %22733 = vmatprep.subr.bf16.mxu0 %v26131_v5 }
 0x2cf   :  { %22714 = vmatmul.mubr.bf16.gmra.mrb[124].mxu0 %v28373_v16 }
 0x2d0   :  { %22717 = vmatprep.mubr.bf16.mxu0 %v28377_v21  ;;  %22734 = vmatpush3.bf16.msra.mxu0 %v26131_v5  ;;  %v28402_v5 = vsel %vm2069_vm4, %v3324_v49, %v28389_v24  ;;  %v33034_v49 = vld [vmem:[#allocation9_spill] sm:$0xff] }
 0x2d1   :  { %22735 = vmatprep.subr.bf16.mxu0 %v26132_v62 }
 0x2d4   :  { %22736 = vmatpush3.bf16.msra.mxu0 %v26132_v62  ;;  %v3545_v62 = vrot.slane %v3543_v58, 2  ;;  %v33036_v58 = vld [vmem:[#allocation12_spill] sm:$0xff] }
 0x2d5   :  { %22737 = vmatprep.subr.bf16.mxu0 %v26133_v11 }
 0x2d6   :  { %v3546_v31 = vor.u32 %v3545_v62, %v3542_v39  ;;  %v26140_v39 = vld [vmem:[%s32844_s3 + $0x268] sm:$0xff]   ;;  %v33039_v62 = vld [vmem:[#allocation15_spill] sm:$0xff] }
 0x2d7   :  { %22718 = vmatmul.mubr.bf16.gmra.mrb[128].mxu0 %v28397_v14 }
 0x2d8   :  { %22721 = vmatprep.mubr.bf16.mxu0 %v28402_v5  ;;  %22738 = vmatpush3.bf16.msra.mxu0 %v26133_v11  ;;  %v3550_v37 = vsel %vm2300_vm3, %v3546_v31, %v33034_v49  ;;  %v26136_v11 = vld [vmem:[%s32844_s3 + $0x248] sm:$0xff]   ;;  %v26141_v49 = vld [vmem:[%s32844_s3 + $0x270] sm:$0xff]  }
 0x2d9   :  { %22739 = vmatprep.subr.bf16.mxu0 %v26134_v56  ;;  %v33040_v31 = vld [vmem:[#allocation16_spill] sm:$0xff] }
 0x2dc   :  { %22740 = vmatpush3.bf16.msra.mxu0 %v26134_v56  ;;  %v26139_v56 = vld [vmem:[%s32844_s3 + $0x260] sm:$0xff]  }
 0x2dd   :  { %22761 = vmatprep.subr.bf16.mxu0 %v26135_v0 }
 0x2df   :  { %22722 = vmatmul.mubr.bf16.gmra.mrb[132].mxu0 %v3329_v6  ;;  %v33037_v6 = vld [vmem:[#allocation13_spill] sm:$0xff] }
 0x2e0   :  { %22741 = vmatprep.mubr.bf16.mxu0 %v3550_v37  ;;  %v26138_v37 = vld [vmem:[%s32844_s3 + $0x258] sm:$0xff]  }
 0x2e7   :  { %22742 = vmatmul.mubr.bf16.vlgmr.msra.gmra.mrb[116].mxu0 %v33035_v53 }
 0x2e8   :  { %22745 = vmatprep.mubr.bf16.mxu0 %v33036_v58  ;;  %22762 = vmatpush3.bf16.msra.mxu0 %v26135_v0  ;;  %v28433_v0 = vld [vmem:[#allocation2 + $0x58] sm:$0x3] }
 0x2e9   :  { %22763 = vmatprep.subr.bf16.mxu0 %v26136_v11  ;;  %v3587_v53 = vshll.u32 %v28433_v0, 16  ;;  %v3822_v47 = vrot.slane %v28433_v0, 2 }
 0x2eb   :  { %v3589_v61 = vrot.slane %v3587_v53, 2 }
 0x2ec   :  { %22764 = vmatpush3.bf16.msra.mxu0 %v26136_v11  ;;  %v3584_v11 = vshrl.u32 %v28433_v0, 16  ;;  %v26153_v0 = vld [vmem:[%s32844_s3 + $0x2d0] sm:$0xff]  }
 0x2ed   :  { %22765 = vmatprep.subr.bf16.mxu0 %v26137_v13 }
 0x2ef   :  { %22746 = vmatmul.mubr.bf16.gmra.mrb[120].mxu0 %v33037_v6 }
 0x2f0   :  { %22749 = vmatprep.mubr.bf16.mxu0 %v33038_v15  ;;  %22766 = vmatpush3.bf16.msra.mxu0 %v26137_v13  ;;  %v26142_v13 = vld [vmem:[%s32844_s3 + $0x278] sm:$0xff]  }
 0x2f1   :  { %22767 = vmatprep.subr.bf16.mxu0 %v26138_v37 }
 0x2f4   :  { %22768 = vmatpush3.bf16.msra.mxu0 %v26138_v37  ;;  %v3586_v37 = vrot.slane %v3584_v11, 1 }
 0x2f5   :  { %22769 = vmatprep.subr.bf16.mxu0 %v26139_v56 }
 0x2f6   :  { %v3590_v26 = vor.u32 %v3589_v61, %v3586_v37  ;;  %v26144_v61 = vld [vmem:[%s32844_s3 + $0x288] sm:$0xff]   ;;  %v26146_v37 = vld [vmem:[%s32844_s3 + $0x298] sm:$0xff]  }
 0x2f7   :  { %22750 = vmatmul.mubr.bf16.gmra.mrb[124].mxu0 %v33039_v62 }
 0x2f8   :  { %22753 = vmatprep.mubr.bf16.mxu0 %v33040_v31  ;;  %22770 = vmatpush3.bf16.msra.mxu0 %v26139_v56  ;;  %v33042_v56 = vld [vmem:[#allocation19_spill] sm:$0xff]  ;;  %v3591_v11 = vsel %vm2300_vm3, %v33043_v46, %v3590_v26  ;;  %v3810_v26 = vrot.slane %v28343_v41, 2 }
 0x2f9   :  { %22771 = vmatprep.subr.bf16.mxu0 %v26140_v39 }
 0x2fc   :  { %22772 = vmatpush3.bf16.msra.mxu0 %v26140_v39  ;;  %v3804_v39 = vrot.slane %v28311_v33, 2 }
 0x2fd   :  { %22773 = vmatprep.subr.bf16.mxu0 %v26141_v49 }
 0x2fe   :  { %v3805_v53 = vsel %vm2565_vm5, %v3803_v54, %v3804_v39  ;;  %v26145_v54 = vld [vmem:[%s32844_s3 + $0x290] sm:$0xff]  }
 0x2ff   :  { %22754 = vmatmul.mubr.bf16.gmra.mrb[128].mxu0 %v33041_v32 }
 0x300   :  { %22757 = vmatprep.mubr.bf16.mxu0 %v33042_v56  ;;  %22774 = vmatpush3.bf16.msra.mxu0 %v26141_v49  ;;  %v28454_v49 = vrot.slane %v28322_v44, 2 }
 0x301   :  { %22775 = vmatprep.subr.bf16.mxu0 %v26142_v13 }
 0x302   :  { %v3807_v51 = vsel %vm2565_vm5, %v3804_v39, %v28454_v49  ;;  %v28464_v46 = vsel %vm2565_vm5, %v28454_v49, %v3808_v63  ;;  %v28476_v39 = vsel %vm2565_vm5, %v3808_v63, %v3810_v26  ;;  %v26148_v63 = vld [vmem:[%s32844_s3 + $0x2a8] sm:$0xff]  }
 0x304   :  { %22776 = vmatpush3.bf16.msra.mxu0 %v26142_v13  ;;  %v3812_v13 = vrot.slane %v28346_v27, 2 }
 0x305   :  { %22797 = vmatprep.subr.bf16.mxu0 %v26143_v8 }
 0x307   :  { %22758 = vmatmul.mubr.bf16.gmra.mrb[132].mxu0 %v3591_v11  ;;  %v26147_v11 = vld [vmem:[%s32844_s3 + $0x2a0] sm:$0xff]  }
 0x308   :  { %22777 = vmatprep.mubr.bf16.mxu0 %v3805_v53  ;;  %v3814_v53 = vrot.slane %v28363_v36, 2 }
 0x30f   :  { %22778 = vmatmul.mubr.bf16.vlgmr.msra.gmra.mrb[116].mxu0 %v3807_v51  ;;  %v28492_v51 = vsel %vm2565_vm5, %v3812_v13, %v3814_v53 }
 0x310   :  { %22781 = vmatprep.mubr.bf16.mxu0 %v28464_v46  ;;  %22798 = vmatpush3.bf16.msra.mxu0 %v26143_v8  ;;  %v28480_v8 = vsel %vm2565_vm5, %v3810_v26, %v3812_v13  ;;  %v26149_v26 = vld [vmem:[%s32844_s3 + $0x2b0] sm:$0xff]   ;;  %v26150_v13 = vld [vmem:[%s32844_s3 + $0x2b8] sm:$0xff]  }
 0x311   :  { %22799 = vmatprep.subr.bf16.mxu0 %v26144_v61 }
 0x314   :  { %22800 = vmatpush3.bf16.msra.mxu0 %v26144_v61  ;;  %v3816_v61 = vrot.slane %v28366_v57, 2 }
 0x315   :  { %22801 = vmatprep.subr.bf16.mxu0 %v26145_v54 }
 0x317   :  { %22782 = vmatmul.mubr.bf16.gmra.mrb[120].mxu0 %v28476_v39 }
 0x318   :  { %22785 = vmatprep.mubr.bf16.mxu0 %v28480_v8  ;;  %22802 = vmatpush3.bf16.msra.mxu0 %v26145_v54  ;;  %v28496_v54 = vsel %vm2565_vm5, %v3814_v53, %v3816_v61 }
 0x319   :  { %22803 = vmatprep.subr.bf16.mxu0 %v26146_v37 }
 0x31c   :  { %22804 = vmatpush3.bf16.msra.mxu0 %v26146_v37  ;;  %v3818_v37 = vrot.slane %v28383_v22, 2 }
 0x31d   :  { %22805 = vmatprep.subr.bf16.mxu0 %v26147_v11 }
 0x31e   :  { %v28510_v53 = vsel %vm2565_vm5, %v3816_v61, %v3818_v37  ;;  %v3823_v61 = vsel %vm2565_vm5, %v28504_v52, %v3822_v47  ;;  %v26154_v47 = vld [vmem:[%s32844_s3 + $0x2d8] sm:$0xff]  }
 0x31f   :  { %22786 = vmatmul.mubr.bf16.gmra.mrb[124].mxu0 %v28492_v51 }
 0x320   :  { %22789 = vmatprep.mubr.bf16.mxu0 %v28496_v54  ;;  %22806 = vmatpush3.bf16.msra.mxu0 %v26147_v11  ;;  %v28515_v11 = vsel %vm2565_vm5, %v3818_v37, %v28504_v52  ;;  %v26152_v37 = vld [vmem:[%s32844_s3 + $0x2c8] sm:$0xff]  }
 0x321   :  { %22807 = vmatprep.subr.bf16.mxu0 %v26148_v63 }
 0x324   :  { %22808 = vmatpush3.bf16.msra.mxu0 %v26148_v63  ;;  %v26151_v63 = vld [vmem:[%s32844_s3 + $0x2c0] sm:$0xff]  }
 0x325   :  { %22809 = vmatprep.subr.bf16.mxu0 %v26149_v26 }
 0x327   :  { %22790 = vmatmul.mubr.bf16.gmra.mrb[128].mxu0 %v28510_v53 }
 0x328   :  { %22793 = vmatprep.mubr.bf16.mxu0 %v28515_v11  ;;  %22810 = vmatpush3.bf16.msra.mxu0 %v26149_v26  ;;  %v26156_v26 = vld [vmem:[%s32844_s3 + $0x2e8] sm:$0xff]  }
 0x329   :  { %22811 = vmatprep.subr.bf16.mxu0 %v26150_v13 }
 0x32c   :  { %22812 = vmatpush3.bf16.msra.mxu0 %v26150_v13  ;;  %v26157_v13 = vld [vmem:[%s32844_s3 + $0x2f0] sm:$0xff]  }
 0x32d   :  { %22833 = vmatprep.subr.bf16.mxu0 %v26151_v63 }
 0x32f   :  { %22794 = vmatmul.mubr.bf16.gmra.mrb[132].mxu0 %v3823_v61  ;;  %v26159_v61 = vld [vmem:[%s32844_s3 + $0x300] sm:$0xff]  }
 0x330   :  { %22813 = vmatprep.mubr.bf16.mxu0 %v28311_v33  ;;  %v26155_v33 = vld [vmem:[%s32844_s3 + $0x2e0] sm:$0xff]  }
 0x337   :  { %22814 = vmatmul.mubr.bf16.vlgmr.msra.gmra.mrb[116].mxu0 %v28322_v44 }
 0x338   :  { %22817 = vmatprep.mubr.bf16.mxu0 %v28327_v2  ;;  %22834 = vmatpush3.bf16.msra.mxu0 %v26151_v63  ;;  %v26158_v63 = vld [vmem:[%s32844_s3 + $0x2f8] sm:$0xff]  }
 0x339   :  { %22835 = vmatprep.subr.bf16.mxu0 %v26152_v37 }
 0x33c   :  { %22836 = vmatpush3.bf16.msra.mxu0 %v26152_v37  ;;  %v28557_v37 = vld [vmem:[#allocation2 + $0x58] sm:$0xff] }
 0x33d   :  { %22837 = vmatprep.subr.bf16.mxu0 %v26153_v0 }
 0x33f   :  { %22818 = vmatmul.mubr.bf16.gmra.mrb[120].mxu0 %v28343_v41 }
 0x340   :  { %22821 = vmatprep.mubr.bf16.mxu0 %v28346_v27  ;;  %22838 = vmatpush3.bf16.msra.mxu0 %v26153_v0  ;;  %v26160_v0 = vld [vmem:[%s32844_s3 + $0x308] sm:$0xff]  }
 0x341   :  { %22839 = vmatprep.subr.bf16.mxu0 %v26154_v47 }
 0x344   :  { %22840 = vmatpush3.bf16.msra.mxu0 %v26154_v47  ;;  %v26161_v47 = vld [vmem:[%s32844_s3 + $0x310] sm:$0xff]  }
 0x345   :  { %22841 = vmatprep.subr.bf16.mxu0 %v26155_v33 }
 0x347   :  { %22822 = vmatmul.mubr.bf16.gmra.mrb[124].mxu0 %v28363_v36 }
 0x348   :  { %22825 = vmatprep.mubr.bf16.mxu0 %v28366_v57  ;;  %22842 = vmatpush3.bf16.msra.mxu0 %v26155_v33 }
 0x349   :  { %22843 = vmatprep.subr.bf16.mxu0 %v26156_v26 }
 0x34c   :  { %22844 = vmatpush3.bf16.msra.mxu0 %v26156_v26 }
 0x34d   :  { %22845 = vmatprep.subr.bf16.mxu0 %v26157_v13 }
 0x34f   :  { %22826 = vmatmul.mubr.bf16.gmra.mrb[128].mxu0 %v28383_v22 }
 0x350   :  { %22829 = vmatprep.mubr.bf16.mxu0 %v28386_v29  ;;  %22846 = vmatpush3.bf16.msra.mxu0 %v26157_v13  ;;  %v28589_v13 = vld [vmem:[#allocation2 + $0x60] sm:$0x1] }
 0x351   :  { %22847 = vmatprep.subr.bf16.mxu0 %v26158_v63 }
 0x354   :  { %22848 = vmatpush3.bf16.msra.mxu0 %v26158_v63 }
 0x355   :  { %22869 = vmatprep.subr.bf16.mxu0 %v26159_v61 }
 0x357   :  { %22830 = vmatmul.mubr.bf16.gmra.mrb[132].mxu0 %v28557_v37 }
 0x358   :  { %22849 = vmatprep.mubr.bf16.mxu0 %v28230_v55  ;;  %v26162_v55 = vld [vmem:[%s32844_s3 + $0x318] sm:$0xff]  }
 0x35f   :  { %22850 = vmatmul.mubr.bf16.vlgmr.msra.gmra.mrb[116].mxu0 %v28234_v59  ;;  %v26163_v59 = vld [vmem:[%s32844_s3 + $0x320] sm:$0xff]  }
 0x360   :  { %22853 = vmatprep.mubr.bf16.mxu0 %v28252_v60  ;;  %22870 = vmatpush3.bf16.msra.mxu0 %v26159_v61  ;;  %v26164_v60 = vld [vmem:[%s32844_s3 + $0x328] sm:$0xff]   ;;  %v26167_v61 = vld [vmem:[%s32844_s3 + $0x340] sm:$0xff]  }
 0x361   :  { %22871 = vmatprep.subr.bf16.mxu0 %v26160_v0 }
 0x364   :  { %22872 = vmatpush3.bf16.msra.mxu0 %v26160_v0 }
 0x365   :  { %22873 = vmatprep.subr.bf16.mxu0 %v26161_v47 }
 0x367   :  { %22854 = vmatmul.mubr.bf16.gmra.mrb[120].mxu0 %v28256_v10  ;;  %v26165_v10 = vld [vmem:[%s32844_s3 + $0x330] sm:$0xff]  }
 0x368   :  { %22857 = vmatprep.mubr.bf16.mxu0 %v28274_v23  ;;  %22874 = vmatpush3.bf16.msra.mxu0 %v26161_v47  ;;  %v33044_v23 = vld [vmem:[#allocation20_spill] sm:$0xff]  ;;  %v4517_v47 = vld [vmem:[#allocation2 + $0x10] sm:$0xfe] }
 0x369   :  { %22875 = vmatprep.subr.bf16.mxu0 %v26162_v55  ;;  %v33045_v33 = vshll.u32 %v33044_v23, 16 }
 0x36b   :  { %v28587_v26 = vrot.slane %v33045_v33, 1  ;;  %v4777_v33 = vshrl.u32 %v4517_v47, 16 }
 0x36c   :  { %22876 = vmatpush3.bf16.msra.mxu0 %v26162_v55  ;;  %v33046_v55 = vshrl.u32 %v33044_v23, 16  ;;  %v26169_v23 = vld [vmem:[%s32844_s3 + $0x350] sm:$0xff]  }
 0x36d   :  { %22877 = vmatprep.subr.bf16.mxu0 %v26163_v59  ;;  %v4317_v63 = vsel %vm1623_vm2, %v28316_v40, %v28587_v26 }
 0x36f   :  { %22858 = vmatmul.mubr.bf16.gmra.mrb[124].mxu0 %v28278_v4  ;;  %v26166_v4 = vld [vmem:[%s32844_s3 + $0x338] sm:$0xff]  }
 0x370   :  { %22861 = vmatprep.mubr.bf16.mxu0 %v28298_v19  ;;  %22878 = vmatpush3.bf16.msra.mxu0 %v26163_v59  ;;  %v4322_v19 = vshll.u32 %v28589_v13, 16  ;;  %v28605_v59 = vor.u32 %v33046_v55, %v28587_v26  ;;  %v33047_v55 = vld [vmem:[#allocation10_spill] sm:$0xff] }
 0x371   :  { %22879 = vmatprep.subr.bf16.mxu0 %v26164_v60 }
 0x372   :  { %v4324_v0 = vrot.slane %v4322_v19, 1  ;;  %v26174_v19 = vld [vmem:[%s32844_s3 + $0x378] sm:$0xff]  }
 0x374   :  { %22880 = vmatpush3.bf16.msra.mxu0 %v26164_v60  ;;  %v4325_v40 = vsel %vm1623_vm2, %v28605_v59, %v4324_v0  ;;  %v4565_v0 = vrot.slane %v28589_v13, 1  ;;  %v26177_v13 = vld [vmem:[%s32844_s3 + $0x390] sm:$0xff]  }
 0x375   :  { %22881 = vmatprep.subr.bf16.mxu0 %v26165_v10 }
 0x377   :  { %22862 = vmatmul.mubr.bf16.gmra.mrb[128].mxu0 %v28303_v42  ;;  %v4546_v42 = vrot.slane %v4517_v47, 1 }
 0x378   :  { %22865 = vmatprep.mubr.bf16.mxu0 %v4317_v63  ;;  %22882 = vmatpush3.bf16.msra.mxu0 %v26165_v10  ;;  %v26168_v10 = vld [vmem:[%s32844_s3 + $0x348] sm:$0xff]  }
 0x379   :  { %22883 = vmatprep.subr.bf16.mxu0 %v26166_v4  ;;  %v4548_v60 = vsel %vm2069_vm4, %v4546_v42, %v28325_v34  ;;  %v26170_v34 = vld [vmem:[%s32844_s3 + $0x358] sm:$0xff]   ;;  %v26176_v42 = vld [vmem:[%s32844_s3 + $0x388] sm:$0xff]  }
 0x37c   :  { %22884 = vmatpush3.bf16.msra.mxu0 %v26166_v4  ;;  %v4780_v4 = vshll.u32 %v4517_v47, 16 }
 0x37d   :  { %22905 = vmatprep.subr.bf16.mxu0 %v26167_v61 }
 0x37e   :  { %v4782_v63 = vrot.slane %v4780_v4, 2 }
 0x37f   :  { %22866 = vmatmul.mubr.bf16.gmra.mrb[132].mxu0 %v4325_v40  ;;  %v26178_v40 = vld [vmem:[%s32844_s3 + $0x398] sm:$0xff]  }
 0x380   :  { %22885 = vmatprep.mubr.bf16.mxu0 %v4548_v60  ;;  %v28673_v60 = vld [vmem:[#allocation2 + $0x60] sm:$0x3] }
 0x387   :  { %22886 = vmatmul.mubr.bf16.vlgmr.msra.gmra.mrb[116].mxu0 %v28337_v18  ;;  %v26171_v18 = vld [vmem:[%s32844_s3 + $0x360] sm:$0xff]  }
 0x388   :  { %22889 = vmatprep.mubr.bf16.mxu0 %v28353_v1  ;;  %22906 = vmatpush3.bf16.msra.mxu0 %v26167_v61  ;;  %v26172_v1 = vld [vmem:[%s32844_s3 + $0x368] sm:$0xff]   ;;  %v26175_v61 = vld [vmem:[%s32844_s3 + $0x380] sm:$0xff]  }
 0x389   :  { %22907 = vmatprep.subr.bf16.mxu0 %v26168_v10 }
 0x38c   :  { %22908 = vmatpush3.bf16.msra.mxu0 %v26168_v10  ;;  %v4824_v10 = vshll.u32 %v28673_v60, 16 }
 0x38d   :  { %22909 = vmatprep.subr.bf16.mxu0 %v26169_v23 }
 0x38f   :  { %22890 = vmatmul.mubr.bf16.gmra.mrb[120].mxu0 %v28357_v28  ;;  %v26173_v28 = vld [vmem:[%s32844_s3 + $0x370] sm:$0xff]  }
 0x390   :  { %22893 = vmatprep.mubr.bf16.mxu0 %v28373_v16  ;;  %22910 = vmatpush3.bf16.msra.mxu0 %v26169_v23  ;;  %v28636_v16 = vrot.slane %v28557_v37, 1 }
 0x391   :  { %22911 = vmatprep.subr.bf16.mxu0 %v26170_v34 }
 0x394   :  { %22912 = vmatpush3.bf16.msra.mxu0 %v26170_v34  ;;  %v4826_v34 = vrot.slane %v4824_v10, 2 }
 0x395   :  { %22913 = vmatprep.subr.bf16.mxu0 %v26171_v18 }
 0x397   :  { %22894 = vmatmul.mubr.bf16.gmra.mrb[124].mxu0 %v28377_v21  ;;  %v4564_v21 = vsel %vm2069_vm4, %v28389_v24, %v28636_v16 }
 0x398   :  { %22897 = vmatprep.mubr.bf16.mxu0 %v28397_v14  ;;  %22914 = vmatpush3.bf16.msra.mxu0 %v26171_v18  ;;  %v4779_v14 = vrot.slane %v4777_v33, 1  ;;  %v26183_v18 = vld [vmem:[%s32844_s3 + $0x3c0] sm:$0xff]  }
 0x399   :  { %22915 = vmatprep.subr.bf16.mxu0 %v26172_v1 }
 0x39a   :  { %v4783_v47 = vor.u32 %v4782_v63, %v4779_v14  ;;  %v5059_v14 = vrot.slane %v28673_v60, 2 }
 0x39c   :  { %22916 = vmatpush3.bf16.msra.mxu0 %v26172_v1  ;;  %v4787_v24 = vsel %vm2300_vm3, %v4783_v47, %v33047_v55  ;;  %v28766_v55 = vld [vmem:[#allocation2 + $0x60] sm:$0xff] }
 0x39d   :  { %22917 = vmatprep.subr.bf16.mxu0 %v26173_v28 }
 0x39f   :  { %22898 = vmatmul.mubr.bf16.gmra.mrb[128].mxu0 %v28402_v5  ;;  %v4566_v5 = vsel %vm2069_vm4, %v28636_v16, %v4565_v0  ;;  %v26198_v0 = vld [vmem:[%s32844_s3 + $0x438] sm:$0xff]  }
 0x3a0   :  { %22901 = vmatprep.mubr.bf16.mxu0 %v4564_v21  ;;  %22918 = vmatpush3.bf16.msra.mxu0 %v26173_v28  ;;  %v5020_v28 = vld [vmem:[#allocation2 + $0x10] sm:$0xfc] }
 0x3a1   :  { %22919 = vmatprep.subr.bf16.mxu0 %v26174_v19  ;;  %v5040_v33 = vrot.slane %v5020_v28, 2  ;;  %v26185_v21 = vld [vmem:[%s32844_s3 + $0x3d0] sm:$0xff]  }
 0x3a4   :  { %22920 = vmatpush3.bf16.msra.mxu0 %v26174_v19  ;;  %v26184_v19 = vld [vmem:[%s32844_s3 + $0x3c8] sm:$0xff]  }
 0x3a5   :  { %22941 = vmatprep.subr.bf16.mxu0 %v26175_v61 }
 0x3a7   :  { %22902 = vmatmul.mubr.bf16.gmra.mrb[132].mxu0 %v4566_v5 }
 0x3a8   :  { %22921 = vmatprep.mubr.bf16.mxu0 %v4787_v24  ;;  %v33049_v24 = vld [vmem:[#allocation22_spill] sm:$0xff] }
 0x3af   :  { %22922 = vmatmul.mubr.bf16.vlgmr.msra.gmra.mrb[116].mxu0 %v33036_v58  ;;  %v26179_v58 = vld [vmem:[%s32844_s3 + $0x3a0] sm:$0xff]  }
 0x3b0   :  { %22925 = vmatprep.mubr.bf16.mxu0 %v33037_v6  ;;  %22942 = vmatpush3.bf16.msra.mxu0 %v26175_v61  ;;  %v26180_v6 = vld [vmem:[%s32844_s3 + $0x3a8] sm:$0xff]  }
 0x3b1   :  { %22943 = vmatprep.subr.bf16.mxu0 %v26176_v42 }
 0x3b4   :  { %22944 = vmatpush3.bf16.msra.mxu0 %v26176_v42  ;;  %v33050_v42 = vshll.u32 %v33049_v24, 16 }
 0x3b5   :  { %22945 = vmatprep.subr.bf16.mxu0 %v26177_v13 }
 0x3b7   :  { %22926 = vmatmul.mubr.bf16.gmra.mrb[120].mxu0 %v33038_v15  ;;  %v26181_v15 = vld [vmem:[%s32844_s3 + $0x3b0] sm:$0xff]  }
 0x3b8   :  { %22929 = vmatprep.mubr.bf16.mxu0 %v33039_v62  ;;  %22946 = vmatpush3.bf16.msra.mxu0 %v26177_v13  ;;  %v4821_v62 = vshrl.u32 %v28673_v60, 16  ;;  %v5505_v13 = vrot.slane %v33050_v42, 1  ;;  %v28873_v42 = vld [vmem:[#allocation2 + $0x30] sm:$0xff] }
 0x3b9   :  { %22947 = vmatprep.subr.bf16.mxu0 %v26178_v40 }
 0x3ba   :  { %v4823_v23 = vrot.slane %v4821_v62, 1 }
 0x3bc   :  { %22948 = vmatpush3.bf16.msra.mxu0 %v26178_v40  ;;  %v4827_v1 = vor.u32 %v4826_v34, %v4823_v23  ;;  %v33051_v40 = vshrl.u32 %v27902_v48, 16  ;;  %v26201_v48 = vld [vmem:[%s32844_s3 + $0x450] sm:$0xff]  }
 0x3bd   :  { %22949 = vmatprep.subr.bf16.mxu0 %v26179_v58 }
 0x3be   :  { %v4828_v4 = vsel %vm2300_vm3, %v27874_v17, %v4827_v1  ;;  %v26186_v17 = vld [vmem:[%s32844_s3 + $0x3d8] sm:$0xff]  }
 0x3bf   :  { %22930 = vmatmul.mubr.bf16.gmra.mrb[124].mxu0 %v33040_v31  ;;  %v26182_v31 = vld [vmem:[%s32844_s3 + $0x3b8] sm:$0xff]  }
 0x3c0   :  { %22933 = vmatprep.mubr.bf16.mxu0 %v33041_v32  ;;  %22950 = vmatpush3.bf16.msra.mxu0 %v26179_v58  ;;  %v33048_v32 = vld [vmem:[#allocation21_spill] sm:$0xff]  ;;  %v5501_v58 = vor.u32 %v33051_v40, %v28049_v25  ;;  %v33054_v25 = vshll.u32 %v27919_v43, 16 }
 0x3c1   :  { %22951 = vmatprep.subr.bf16.mxu0 %v26180_v6 }
 0x3c2   :  { %v28781_v60 = vsel %vm1623_vm2, %v5501_v58, %v5505_v13  ;;  %v5521_v10 = vrot.slane %v33054_v25, 1  ;;  %v26210_v25 = vld [vmem:[%s32844_s3 + $0x498] sm:$0xff]  }
 0x3c4   :  { %22952 = vmatpush3.bf16.msra.mxu0 %v26180_v6  ;;  %v26200_v6 = vld [vmem:[%s32844_s3 + $0x448] sm:$0xff]  }
 0x3c5   :  { %22953 = vmatprep.subr.bf16.mxu0 %v26181_v15 }
 0x3c7   :  { %22934 = vmatmul.mubr.bf16.gmra.mrb[128].mxu0 %v33042_v56  ;;  %v5042_v56 = vsel %vm2565_vm5, %v5040_v33, %v28454_v49  ;;  %v26187_v49 = vld [vmem:[%s32844_s3 + $0x3e0] sm:$0xff]   ;;  %v33057_v33 = vshll.u32 %v27921_v35, 16 }
 0x3c8   :  { %22937 = vmatprep.mubr.bf16.mxu0 %v33048_v32  ;;  %22954 = vmatpush3.bf16.msra.mxu0 %v26181_v15 }
 0x3c9   :  { %22955 = vmatprep.subr.bf16.mxu0 %v26182_v31 }
 0x3cc   :  { %22956 = vmatpush3.bf16.msra.mxu0 %v26182_v31  ;;  %v33055_v31 = vshrl.u32 %v33049_v24, 16 }
 0x3cd   :  { %22977 = vmatprep.subr.bf16.mxu0 %v26183_v18 }
 0x3ce   :  { %v5509_v23 = vor.u32 %v33055_v31, %v5505_v13  ;;  %v26208_v13 = vld [vmem:[%s32844_s3 + $0x488] sm:$0xff]  }
 0x3cf   :  { %22938 = vmatmul.mubr.bf16.gmra.mrb[132].mxu0 %v4828_v4  ;;  %v5529_v4 = vrot.slane %v33057_v33, 1 }
 0x3d0   :  { %22957 = vmatprep.mubr.bf16.mxu0 %v5042_v56  ;;  %v26203_v56 = vld [vmem:[%s32844_s3 + $0x460] sm:$0xff]  }
 0x3d7   :  { %22958 = vmatmul.mubr.bf16.vlgmr.msra.gmra.mrb[116].mxu0 %v28464_v46  ;;  %v26188_v46 = vld [vmem:[%s32844_s3 + $0x3e8] sm:$0xff]  }
 0x3d8   :  { %22961 = vmatprep.mubr.bf16.mxu0 %v28476_v39  ;;  %22978 = vmatpush3.bf16.msra.mxu0 %v26183_v18  ;;  %v26189_v39 = vld [vmem:[%s32844_s3 + $0x3f0] sm:$0xff]   ;;  %v26202_v18 = vld [vmem:[%s32844_s3 + $0x458] sm:$0xff]  }
 0x3d9   :  { %22979 = vmatprep.subr.bf16.mxu0 %v26184_v19 }
 0x3dc   :  { %22980 = vmatpush3.bf16.msra.mxu0 %v26184_v19  ;;  %v33058_v19 = vshll.u32 %v27925_v9, 16 }
 0x3dd   :  { %22981 = vmatprep.subr.bf16.mxu0 %v26185_v21 }
 0x3df   :  { %22962 = vmatmul.mubr.bf16.gmra.mrb[120].mxu0 %v28480_v8  ;;  %v28718_v8 = vrot.slane %v28557_v37, 2 }
 0x3e0   :  { %22965 = vmatprep.mubr.bf16.mxu0 %v28492_v51  ;;  %22982 = vmatpush3.bf16.msra.mxu0 %v26185_v21  ;;  %v26190_v51 = vld [vmem:[%s32844_s3 + $0x3f8] sm:$0xff]   ;;  %v5537_v21 = vrot.slane %v33058_v19, 1 }
 0x3e1   :  { %22983 = vmatprep.subr.bf16.mxu0 %v26186_v17  ;;  %v5060_v63 = vsel %vm2565_vm5, %v28718_v8, %v5059_v14 }
 0x3e4   :  { %22984 = vmatpush3.bf16.msra.mxu0 %v26186_v17  ;;  %v33059_v17 = vshrl.u32 %v27919_v43, 16  ;;  %v26205_v43 = vld [vmem:[%s32844_s3 + $0x470] sm:$0xff]  }
 0x3e5   :  { %22985 = vmatprep.subr.bf16.mxu0 %v26187_v49 }
 0x3e7   :  { %22966 = vmatmul.mubr.bf16.gmra.mrb[124].mxu0 %v28496_v54  ;;  %v5058_v54 = vsel %vm2565_vm5, %v28504_v52, %v28718_v8  ;;  %v26192_v52 = vld [vmem:[%s32844_s3 + $0x408] sm:$0xff]  }
 0x3e8   :  { %22969 = vmatprep.mubr.bf16.mxu0 %v28510_v53  ;;  %22986 = vmatpush3.bf16.msra.mxu0 %v26187_v49  ;;  %v26191_v53 = vld [vmem:[%s32844_s3 + $0x400] sm:$0xff]   ;;  %v5525_v49 = vor.u32 %v33059_v17, %v5521_v10  ;;  %v28933_v17 = vrot.slane %v28766_v55, 1 }
 0x3e9   :  { %22987 = vmatprep.subr.bf16.mxu0 %v26188_v46 }
 0x3ec   :  { %22988 = vmatpush3.bf16.msra.mxu0 %v26188_v46  ;;  %v33060_v46 = vshrl.u32 %v27921_v35, 16  ;;  %v33061_v35 = vshll.u32 %v27936_v50, 16 }
 0x3ed   :  { %22989 = vmatprep.subr.bf16.mxu0 %v26189_v39 }
 0x3ee   :  { %v28833_v14 = vrot.slane %v33061_v35, 1 }
 0x3ef   :  { %22970 = vmatmul.mubr.bf16.gmra.mrb[128].mxu0 %v28515_v11  ;;  %v26193_v11 = vld [vmem:[%s32844_s3 + $0x410] sm:$0xff]  }
 0x3f0   :  { %22973 = vmatprep.mubr.bf16.mxu0 %v5058_v54  ;;  %22990 = vmatpush3.bf16.msra.mxu0 %v26189_v39  ;;  %v5533_v39 = vor.u32 %v33060_v46, %v5529_v4  ;;  %v28821_v54 = vsel %vm1623_vm2, %v5525_v49, %v5529_v4  ;;  %v26212_v4 = vld [vmem:[%s32844_s3 + $0x4a8] sm:$0xff]  }
 0x3f1   :  { %22991 = vmatprep.subr.bf16.mxu0 %v26190_v51 }
 0x3f4   :  { %22992 = vmatpush3.bf16.msra.mxu0 %v26190_v51  ;;  %v26204_v51 = vld [vmem:[%s32844_s3 + $0x468] sm:$0xff]  }
 0x3f5   :  { %23013 = vmatprep.subr.bf16.mxu0 %v26191_v53 }
 0x3f7   :  { %22974 = vmatmul.mubr.bf16.gmra.mrb[132].mxu0 %v5060_v63  ;;  %v28835_v63 = vld [vmem:[#allocation2 + $0x68] sm:$0x1] }
 0x3f8   :  { %22993 = vmatprep.mubr.bf16.mxu0 %v28322_v44  ;;  %v26194_v44 = vld [vmem:[%s32844_s3 + $0x418] sm:$0xff]  }
 0x3ff   :  { %22994 = vmatmul.mubr.bf16.vlgmr.msra.gmra.mrb[116].mxu0 %v28327_v2  ;;  %v26195_v2 = vld [vmem:[%s32844_s3 + $0x420] sm:$0xff]  }
 0x400   :  { %22997 = vmatprep.mubr.bf16.mxu0 %v28343_v41  ;;  %23014 = vmatpush3.bf16.msra.mxu0 %v26191_v53  ;;  %v26196_v41 = vld [vmem:[%s32844_s3 + $0x428] sm:$0xff]   ;;  %v28825_v53 = vsel %vm1623_vm2, %v5533_v39, %v5537_v21  ;;  %v26214_v39 = vld [vmem:[%s32844_s3 + $0x4b8] sm:$0xff]  }
 0x401   :  { %23015 = vmatprep.subr.bf16.mxu0 %v26192_v52 }
 0x404   :  { %23016 = vmatpush3.bf16.msra.mxu0 %v26192_v52  ;;  %v33062_v52 = vshrl.u32 %v27925_v9, 16  ;;  %v26207_v9 = vld [vmem:[%s32844_s3 + $0x480] sm:$0xff]  }
 0x405   :  { %23017 = vmatprep.subr.bf16.mxu0 %v26193_v11 }
 0x407   :  { %22998 = vmatmul.mubr.bf16.gmra.mrb[120].mxu0 %v28346_v27  ;;  %v26197_v27 = vld [vmem:[%s32844_s3 + $0x430] sm:$0xff]  }
 0x408   :  { %23001 = vmatprep.mubr.bf16.mxu0 %v28363_v36  ;;  %23018 = vmatpush3.bf16.msra.mxu0 %v26193_v11  ;;  %v5451_v36 = vld [vmem:[#allocation2 + $0x18] sm:$0xff]  ;;  %v28839_v11 = vor.u32 %v33062_v52, %v5537_v21  ;;  %v26213_v21 = vld [vmem:[%s32844_s3 + $0x4b0] sm:$0xff]  }
 0x409   :  { %23019 = vmatprep.subr.bf16.mxu0 %v26194_v44  ;;  %v5482_v61 = vshll.u32 %v5451_v36, 16  ;;  %v5480_v47 = vshrl.u32 %v5451_v36, 16 }
 0x40c   :  { %23020 = vmatpush3.bf16.msra.mxu0 %v26194_v44  ;;  %v26206_v44 = vld [vmem:[%s32844_s3 + $0x478] sm:$0xff]  }
 0x40d   :  { %23021 = vmatprep.subr.bf16.mxu0 %v26195_v2 }
 0x40f   :  { %23002 = vmatmul.mubr.bf16.gmra.mrb[124].mxu0 %v28366_v57  ;;  %v5484_v57 = vrot.slane %v5482_v61, 1  ;;  %v28854_v61 = vld [vmem:[#allocation2 + $0x18] sm:$0xfe] }
 0x410   :  { %23005 = vmatprep.mubr.bf16.mxu0 %v28383_v22  ;;  %23022 = vmatpush3.bf16.msra.mxu0 %v26195_v2  ;;  %v26199_v22 = vld [vmem:[%s32844_s3 + $0x440] sm:$0xff]   ;;  %v5546_v2 = vsel %vm1623_vm2, %v28839_v11, %v28587_v26  ;;  %v6014_v49 = vshrl.u32 %v28854_v61, 16  ;;  %v6017_v46 = vshll.u32 %v28854_v61, 16 }
 0x411   :  { %23023 = vmatprep.subr.bf16.mxu0 %v26196_v41  ;;  %v5485_v5 = vor.u32 %v5484_v57, %v5480_v47  ;;  %v33063_v57 = vshrl.u32 %v27936_v50, 16  ;;  %v5788_v50 = vrot.slane %v28873_v42, 1 }
 0x412   :  { %v6016_v35 = vrot.slane %v6014_v49, 1  ;;  %v6019_v52 = vrot.slane %v6017_v46, 2 }
 0x414   :  { %23024 = vmatpush3.bf16.msra.mxu0 %v26196_v41  ;;  %v5559_v41 = vshll.u32 %v28835_v63, 16 }
 0x415   :  { %23025 = vmatprep.subr.bf16.mxu0 %v26197_v27 }
 0x416   :  { %v5561_v36 = vrot.slane %v5559_v41, 1  ;;  %v6020_v41 = vor.u32 %v6019_v52, %v6016_v35 }
 0x417   :  { %23006 = vmatmul.mubr.bf16.gmra.mrb[128].mxu0 %v28386_v29  ;;  %v5490_v29 = vsel %vm1623_vm2, %v5485_v5, %v28038_v30  ;;  %v33052_v30 = vld [vmem:[#allocation23_spill] sm:$0xff] }
 0x418   :  { %23009 = vmatprep.mubr.bf16.mxu0 %v28557_v37  ;;  %23026 = vmatpush3.bf16.msra.mxu0 %v26197_v27  ;;  %v33053_v15 = vshll.u32 %v33052_v30, 16  ;;  %v33056_v34 = vshrl.u32 %v33052_v30, 16  ;;  %v5554_v27 = vsel %vm1623_vm2, %v28605_v59, %v28833_v14  ;;  %v5783_v59 = vrot.slane %v28854_v61, 1  ;;  %v28889_v30 = vld [vmem:[#allocation2 + $0x38] sm:$0xff] }
 0x419   :  { %23027 = vmatprep.subr.bf16.mxu0 %v26198_v0  ;;  %v33064_v61 = vld [vmem:[#allocation26_spill] sm:$0xff] }
 0x41a   :  { %v5513_v62 = vrot.slane %v33053_v15, 1  ;;  %v5790_v15 = vrot.slane %v28889_v30, 1 }
 0x41c   :  { %23028 = vmatpush3.bf16.msra.mxu0 %v26198_v0  ;;  %v5517_v32 = vor.u32 %v33056_v34, %v5513_v62  ;;  %v28799_v1 = vsel %vm1623_vm2, %v5509_v23, %v5513_v62  ;;  %v28856_v0 = vld [vmem:[#allocation2 + $0x20] sm:$0xff]  ;;  %v28909_v34 = vld [vmem:[#allocation2 + $0x48] sm:$0xff] }
 0x41d   :  { %23049 = vmatprep.subr.bf16.mxu0 %v26199_v22  ;;  %v5784_v26 = vrot.slane %v28856_v0, 1  ;;  %v28892_v62 = vld [vmem:[#allocation2 + $0x40] sm:$0xff] }
 0x41e   :  { %v28803_v28 = vsel %vm1623_vm2, %v5517_v32, %v5521_v10  ;;  %v28899_v10 = vsel %vm2069_vm4, %v5788_v50, %v5790_v15  ;;  %v26211_v23 = vld [vmem:[%s32844_s3 + $0x4a0] sm:$0xff]   ;;  %v5794_v32 = vrot.slane %v28909_v34, 1 }
 0x41f   :  { %23010 = vmatmul.mubr.bf16.gmra.mrb[132].mxu0 %v28766_v55  ;;  %v5785_v5 = vsel %vm2069_vm4, %v5783_v59, %v5784_v26  ;;  %v26221_v59 = vld [vmem:[%s32844_s3 + $0x4f0] sm:$0xff]  }
 0x420   :  { %23029 = vmatprep.mubr.bf16.mxu0 %v5490_v29  ;;  %v28868_v29 = vld [vmem:[#allocation2 + $0x28] sm:$0xff] }
 0x421   :  { %v28871_v24 = vrot.slane %v28868_v29, 1 }
 0x423   :  { %v5787_v40 = vsel %vm2069_vm4, %v5784_v26, %v28871_v24  ;;  %v28883_v58 = vsel %vm2069_vm4, %v28871_v24, %v5788_v50  ;;  %v28974_v26 = vld [vmem:[#allocation2 + $0x68] sm:$0x3]  ;;  %v26222_v50 = vld [vmem:[%s32844_s3 + $0x4f8] sm:$0xff]  }
 0x427   :  { %23030 = vmatmul.mubr.bf16.vlgmr.msra.gmra.mrb[116].mxu0 %v28062_v12 }
 0x428   :  { %23033 = vmatprep.mubr.bf16.mxu0 %v28781_v60  ;;  %23050 = vmatpush3.bf16.msra.mxu0 %v26199_v22  ;;  %v28862_v22 = vor.u32 %v33063_v57, %v28833_v14  ;;  %v33065_v57 = vld [vmem:[#allocation27_spill] sm:$0xff] }
 0x429   :  { %23051 = vmatprep.subr.bf16.mxu0 %v26200_v6 }
 0x42a   :  { %v5562_v47 = vsel %vm1623_vm2, %v28862_v22, %v5561_v36  ;;  %v26220_v36 = vld [vmem:[%s32844_s3 + $0x4e8] sm:$0xff]  }
 0x42c   :  { %23052 = vmatpush3.bf16.msra.mxu0 %v26200_v6  ;;  %v26209_v6 = vld [vmem:[%s32844_s3 + $0x490] sm:$0xff]  }
 0x42d   :  { %23053 = vmatprep.subr.bf16.mxu0 %v26201_v48 }
 0x42f   :  { %23034 = vmatmul.mubr.bf16.gmra.mrb[120].mxu0 %v28799_v1 }
 0x430   :  { %23037 = vmatprep.mubr.bf16.mxu0 %v28803_v28  ;;  %23054 = vmatpush3.bf16.msra.mxu0 %v26201_v48  ;;  %v5792_v48 = vrot.slane %v28892_v62, 1 }
 0x431   :  { %23055 = vmatprep.subr.bf16.mxu0 %v26202_v18 }
 0x432   :  { %v28903_v31 = vsel %vm2069_vm4, %v5790_v15, %v5792_v48  ;;  %v33067_v15 = vld [vmem:[#allocation30_spill] sm:$0xff] }
 0x434   :  { %23056 = vmatpush3.bf16.msra.mxu0 %v26202_v18  ;;  %v28912_v18 = vld [vmem:[#allocation2 + $0x50] sm:$0xff] }
 0x435   :  { %23057 = vmatprep.subr.bf16.mxu0 %v26203_v56  ;;  %v28915_v33 = vrot.slane %v28912_v18, 1 }
 0x437   :  { %23038 = vmatmul.mubr.bf16.gmra.mrb[124].mxu0 %v28821_v54  ;;  %v28926_v19 = vsel %vm2069_vm4, %v5794_v32, %v28915_v33 }
 0x438   :  { %23041 = vmatprep.mubr.bf16.mxu0 %v28825_v53  ;;  %23058 = vmatpush3.bf16.msra.mxu0 %v26203_v56  ;;  %v28921_v56 = vsel %vm2069_vm4, %v5792_v48, %v5794_v32  ;;  %v26223_v48 = vld [vmem:[%s32844_s3 + $0x500] sm:$0xff]   ;;  %v6278_v32 = vrot.slane %v28856_v0, 2 }
 0x439   :  { %23059 = vmatprep.subr.bf16.mxu0 %v26204_v51 }
 0x43c   :  { %23060 = vmatpush3.bf16.msra.mxu0 %v26204_v51  ;;  %v5799_v51 = vsel %vm2069_vm4, %v28915_v33, %v28636_v16 }
 0x43d   :  { %23061 = vmatprep.subr.bf16.mxu0 %v26205_v43 }
 0x43f   :  { %23042 = vmatmul.mubr.bf16.gmra.mrb[128].mxu0 %v5546_v2  ;;  %v5802_v2 = vrot.slane %v28835_v63, 1  ;;  %v26217_v63 = vld [vmem:[%s32844_s3 + $0x4d0] sm:$0xff]  }
 0x440   :  { %23045 = vmatprep.mubr.bf16.mxu0 %v5554_v27  ;;  %23062 = vmatpush3.bf16.msra.mxu0 %v26205_v43  ;;  %v5801_v43 = vsel %vm2069_vm4, %v28636_v16, %v28933_v17  ;;  %v6024_v16 = vsel %vm2300_vm3, %v6020_v41, %v27969_v7  ;;  %v26218_v7 = vld [vmem:[%s32844_s3 + $0x4d8] sm:$0xff]   ;;  %v6286_v41 = vrot.slane %v28892_v62, 2 }
 0x441   :  { %23063 = vmatprep.subr.bf16.mxu0 %v26206_v44  ;;  %v5803_v27 = vsel %vm2069_vm4, %v28933_v17, %v5802_v2  ;;  %v6284_v2 = vrot.slane %v28889_v30, 2 }
 0x444   :  { %23064 = vmatpush3.bf16.msra.mxu0 %v26206_v44  ;;  %v26215_v44 = vld [vmem:[%s32844_s3 + $0x4c0] sm:$0xff]  }
 0x445   :  { %23085 = vmatprep.subr.bf16.mxu0 %v26207_v9 }
 0x447   :  { %23046 = vmatmul.mubr.bf16.gmra.mrb[132].mxu0 %v5562_v47  ;;  %v6058_v47 = vshrl.u32 %v28974_v26, 16 }
 0x448   :  { %23065 = vmatprep.mubr.bf16.mxu0 %v5785_v5  ;;  %v6061_v5 = vshll.u32 %v28974_v26, 16 }
 0x44f   :  { %23066 = vmatmul.mubr.bf16.vlgmr.msra.gmra.mrb[116].mxu0 %v5787_v40  ;;  %v6063_v40 = vrot.slane %v6061_v5, 2  ;;  %v26229_v5 = vld [vmem:[%s32844_s3 + $0x530] sm:$0xff]  }
 0x450   :  { %23069 = vmatprep.mubr.bf16.mxu0 %v28883_v58  ;;  %23086 = vmatpush3.bf16.msra.mxu0 %v26207_v9  ;;  %v26216_v9 = vld [vmem:[%s32844_s3 + $0x4c8] sm:$0xff]  }
 0x451   :  { %23087 = vmatprep.subr.bf16.mxu0 %v26208_v13 }
 0x454   :  { %23088 = vmatpush3.bf16.msra.mxu0 %v26208_v13  ;;  %v6060_v13 = vrot.slane %v6058_v47, 1 }
 0x455   :  { %23089 = vmatprep.subr.bf16.mxu0 %v26209_v6 }
 0x457   :  { %23070 = vmatmul.mubr.bf16.gmra.mrb[120].mxu0 %v28899_v10 }
 0x458   :  { %23073 = vmatprep.mubr.bf16.mxu0 %v28903_v31  ;;  %23090 = vmatpush3.bf16.msra.mxu0 %v26209_v6  ;;  %v33066_v6 = vld [vmem:[#allocation28_spill] sm:$0xff] }
 0x459   :  { %23091 = vmatprep.subr.bf16.mxu0 %v26210_v25 }
 0x45c   :  { %23092 = vmatpush3.bf16.msra.mxu0 %v26210_v25  ;;  %v6064_v25 = vor.u32 %v6063_v40, %v6060_v13  ;;  %v26230_v13 = vld [vmem:[%s32844_s3 + $0x538] sm:$0xff]  }
 0x45d   :  { %23093 = vmatprep.subr.bf16.mxu0 %v26211_v23 }
 0x45f   :  { %23074 = vmatmul.mubr.bf16.gmra.mrb[124].mxu0 %v28921_v56 }
 0x460   :  { %23077 = vmatprep.mubr.bf16.mxu0 %v28926_v19  ;;  %23094 = vmatpush3.bf16.msra.mxu0 %v26211_v23  ;;  %v6257_v23 = vld [vmem:[#allocation2 + $0x18] sm:$0xfc] }
 0x461   :  { %23095 = vmatprep.subr.bf16.mxu0 %v26212_v4 }
 0x464   :  { %23096 = vmatpush3.bf16.msra.mxu0 %v26212_v4  ;;  %v6277_v4 = vrot.slane %v6257_v23, 2 }
 0x465   :  { %23097 = vmatprep.subr.bf16.mxu0 %v26213_v21 }
 0x466   :  { %v6279_v46 = vsel %vm2565_vm5, %v6277_v4, %v6278_v32  ;;  %v26244_v4 = vld [vmem:[%s32844_s3 + $0x5a8] sm:$0xff]  }
 0x467   :  { %23078 = vmatmul.mubr.bf16.gmra.mrb[128].mxu0 %v5799_v51  ;;  %v6282_v51 = vrot.slane %v28873_v42, 2 }
 0x468   :  { %23081 = vmatprep.mubr.bf16.mxu0 %v5801_v43  ;;  %23098 = vmatpush3.bf16.msra.mxu0 %v26213_v21  ;;  %v33068_v21 = vld [vmem:[#allocation29_spill] sm:$0xff] }
 0x469   :  { %23099 = vmatprep.subr.bf16.mxu0 %v26214_v39  ;;  %v6065_v49 = vsel %vm2300_vm3, %v33068_v21, %v6064_v25  ;;  %v26224_v43 = vld [vmem:[%s32844_s3 + $0x508] sm:$0xff]   ;;  %v29128_v21 = vld [vmem:[#allocation2 + $0x70] sm:$0x1] }
 0x46c   :  { %23100 = vmatpush3.bf16.msra.mxu0 %v26214_v39  ;;  %v28995_v39 = vrot.slane %v28868_v29, 2 }
 0x46d   :  { %23121 = vmatprep.subr.bf16.mxu0 %v26215_v44 }
 0x46e   :  { %v6281_v35 = vsel %vm2565_vm5, %v6278_v32, %v28995_v39  ;;  %v29005_v52 = vsel %vm2565_vm5, %v28995_v39, %v6282_v51 }
 0x46f   :  { %23082 = vmatmul.mubr.bf16.gmra.mrb[132].mxu0 %v5803_v27  ;;  %v26226_v27 = vld [vmem:[%s32844_s3 + $0x518] sm:$0xff]  }
 0x470   :  { %23101 = vmatprep.mubr.bf16.mxu0 %v6024_v16  ;;  %v29017_v16 = vsel %vm2565_vm5, %v6282_v51, %v6284_v2  ;;  %v33072_v51 = vld [vmem:[#allocation24_spill] sm:$0xff] }
 0x477   :  { %23102 = vmatmul.mubr.bf16.vlgmr.msra.gmra.mrb[116].mxu0 %v27991_v45  ;;  %v26219_v45 = vld [vmem:[%s32844_s3 + $0x4e0] sm:$0xff]  }
 0x478   :  { %23105 = vmatprep.mubr.bf16.mxu0 %v27995_v38  ;;  %23122 = vmatpush3.bf16.msra.mxu0 %v26215_v44  ;;  %v26225_v44 = vld [vmem:[%s32844_s3 + $0x510] sm:$0xff]  }
 0x479   :  { %23123 = vmatprep.subr.bf16.mxu0 %v26216_v9 }
 0x47c   :  { %23124 = vmatpush3.bf16.msra.mxu0 %v26216_v9  ;;  %v29021_v9 = vsel %vm2565_vm5, %v6284_v2, %v6286_v41 }
 0x47d   :  { %23125 = vmatprep.subr.bf16.mxu0 %v26217_v63 }
 0x47f   :  { %23106 = vmatmul.mubr.bf16.gmra.mrb[120].mxu0 %v28003_v3 }
 0x480   :  { %23109 = vmatprep.mubr.bf16.mxu0 %v28009_v20  ;;  %23126 = vmatpush3.bf16.msra.mxu0 %v26217_v63  ;;  %v26227_v63 = vld [vmem:[%s32844_s3 + $0x520] sm:$0xff]  }
 0x481   :  { %23127 = vmatprep.subr.bf16.mxu0 %v26218_v7 }
 0x484   :  { %23128 = vmatpush3.bf16.msra.mxu0 %v26218_v7  ;;  %v6288_v7 = vrot.slane %v28909_v34, 2 }
 0x485   :  { %23129 = vmatprep.subr.bf16.mxu0 %v26219_v45 }
 0x487   :  { %23110 = vmatmul.mubr.bf16.gmra.mrb[124].mxu0 %v33064_v61 }
 0x488   :  { %23113 = vmatprep.mubr.bf16.mxu0 %v33065_v57  ;;  %23130 = vmatpush3.bf16.msra.mxu0 %v26219_v45  ;;  %v29029_v45 = vrot.slane %v28912_v18, 2 }
 0x489   :  { %23131 = vmatprep.subr.bf16.mxu0 %v26220_v36 }
 0x48a   :  { %v29040_v47 = vsel %vm2565_vm5, %v6288_v7, %v29029_v45  ;;  %v6293_v40 = vsel %vm2565_vm5, %v29029_v45, %v28718_v8 }
 0x48c   :  { %23132 = vmatpush3.bf16.msra.mxu0 %v26220_v36  ;;  %v26228_v36 = vld [vmem:[%s32844_s3 + $0x528] sm:$0xff]  }
 0x48d   :  { %23133 = vmatprep.subr.bf16.mxu0 %v26221_v59 }
 0x48f   :  { %23114 = vmatmul.mubr.bf16.gmra.mrb[128].mxu0 %v33066_v6 }
 0x490   :  { %23117 = vmatprep.mubr.bf16.mxu0 %v33067_v15  ;;  %23134 = vmatpush3.bf16.msra.mxu0 %v26221_v59  ;;  %v29035_v59 = vsel %vm2565_vm5, %v6286_v41, %v6288_v7  ;;  %v26231_v15 = vld [vmem:[%s32844_s3 + $0x540] sm:$0xff]   ;;  %v33074_v7 = vshrl.u32 %v33072_v51, 16 }
 0x491   :  { %23135 = vmatprep.subr.bf16.mxu0 %v26222_v50  ;;  %v26247_v41 = vld [vmem:[%s32844_s3 + $0x5c0] sm:$0xff]  }
 0x494   :  { %23136 = vmatpush3.bf16.msra.mxu0 %v26222_v50  ;;  %v29047_v50 = vrot.slane %v28766_v55, 2 }
 0x495   :  { %23157 = vmatprep.subr.bf16.mxu0 %v26223_v48 }
 0x496   :  { %v6295_v6 = vsel %vm2565_vm5, %v28718_v8, %v29047_v50  ;;  %v26232_v8 = vld [vmem:[%s32844_s3 + $0x548] sm:$0xff]  }
 0x497   :  { %23118 = vmatmul.mubr.bf16.gmra.mrb[132].mxu0 %v6065_v49 }
 0x498   :  { %23137 = vmatprep.mubr.bf16.mxu0 %v6279_v46 }
 0x49f   :  { %23138 = vmatmul.mubr.bf16.vlgmr.msra.gmra.mrb[116].mxu0 %v6281_v35 }
 0x4a0   :  { %23141 = vmatprep.mubr.bf16.mxu0 %v29005_v52  ;;  %23158 = vmatpush3.bf16.msra.mxu0 %v26223_v48  ;;  %v6296_v48 = vrot.slane %v28974_v26, 2  ;;  %v26233_v26 = vld [vmem:[%s32844_s3 + $0x550] sm:$0xff]  }
 0x4a1   :  { %23159 = vmatprep.subr.bf16.mxu0 %v26224_v43 }
 0x4a2   :  { %v6297_v25 = vsel %vm2565_vm5, %v29047_v50, %v6296_v48 }
 0x4a4   :  { %23160 = vmatpush3.bf16.msra.mxu0 %v26224_v43  ;;  %v33073_v43 = vshll.u32 %v33072_v51, 16 }
 0x4a5   :  { %23161 = vmatprep.subr.bf16.mxu0 %v26225_v44 }
 0x4a6   :  { %v6790_v35 = vrot.slane %v33073_v43, 1  ;;  %v33079_v43 = vld [vmem:[#allocation32_spill] sm:$0xff] }
 0x4a7   :  { %23142 = vmatmul.mubr.bf16.gmra.mrb[120].mxu0 %v29017_v16 }
 0x4a8   :  { %23145 = vmatprep.mubr.bf16.mxu0 %v29021_v9  ;;  %23162 = vmatpush3.bf16.msra.mxu0 %v26225_v44  ;;  %v6796_v44 = vshll.u32 %v29128_v21, 16  ;;  %v6791_v2 = vsel %vm1623_vm2, %v28862_v22, %v6790_v35 }
 0x4a9   :  { %23163 = vmatprep.subr.bf16.mxu0 %v26226_v27 }
 0x4ac   :  { %23164 = vmatpush3.bf16.msra.mxu0 %v26226_v27  ;;  %v6798_v27 = vrot.slane %v6796_v44, 1 }
 0x4ad   :  { %23165 = vmatprep.subr.bf16.mxu0 %v26227_v63 }
 0x4af   :  { %23146 = vmatmul.mubr.bf16.gmra.mrb[124].mxu0 %v29035_v59 }
 0x4b0   :  { %23149 = vmatprep.mubr.bf16.mxu0 %v29040_v47  ;;  %23166 = vmatpush3.bf16.msra.mxu0 %v26227_v63  ;;  %v6991_v63 = vld [vmem:[#allocation2 + $0x20] sm:$0xfe] }
 0x4b1   :  { %23167 = vmatprep.subr.bf16.mxu0 %v26228_v36 }
 0x4b4   :  { %23168 = vmatpush3.bf16.msra.mxu0 %v26228_v36  ;;  %v6794_v36 = vor.u32 %v33074_v7, %v6790_v35 }
 0x4b5   :  { %23169 = vmatprep.subr.bf16.mxu0 %v26229_v5 }
 0x4b7   :  { %23150 = vmatmul.mubr.bf16.gmra.mrb[128].mxu0 %v6293_v40  ;;  %v26249_v40 = vld [vmem:[%s32844_s3 + $0x5d0] sm:$0xff]  }
 0x4b8   :  { %23153 = vmatprep.mubr.bf16.mxu0 %v6295_v6  ;;  %23170 = vmatpush3.bf16.msra.mxu0 %v26229_v5  ;;  %v6799_v5 = vsel %vm1623_vm2, %v6794_v36, %v6798_v27 }
 0x4b9   :  { %23171 = vmatprep.subr.bf16.mxu0 %v26230_v13 }
 0x4bc   :  { %23172 = vmatpush3.bf16.msra.mxu0 %v26230_v13  ;;  %v26248_v13 = vld [vmem:[%s32844_s3 + $0x5c8] sm:$0xff]  }
 0x4bd   :  { %23193 = vmatprep.subr.bf16.mxu0 %v26231_v15 }
 0x4bf   :  { %23154 = vmatmul.mubr.bf16.gmra.mrb[132].mxu0 %v6297_v25  ;;  %v7251_v25 = vshrl.u32 %v6991_v63, 16 }
 0x4c0   :  { %23173 = vmatprep.mubr.bf16.mxu0 %v28856_v0  ;;  %v26234_v0 = vld [vmem:[%s32844_s3 + $0x558] sm:$0xff]  }
 0x4c7   :  { %23174 = vmatmul.mubr.bf16.vlgmr.msra.gmra.mrb[116].mxu0 %v28868_v29  ;;  %v26235_v29 = vld [vmem:[%s32844_s3 + $0x560] sm:$0xff]  }
 0x4c8   :  { %23177 = vmatprep.mubr.bf16.mxu0 %v28873_v42  ;;  %23194 = vmatpush3.bf16.msra.mxu0 %v26231_v15  ;;  %v26236_v42 = vld [vmem:[%s32844_s3 + $0x568] sm:$0xff]  }
 0x4c9   :  { %23195 = vmatprep.subr.bf16.mxu0 %v26232_v8  ;;  %v26252_v15 = vld [vmem:[%s32844_s3 + $0x5e8] sm:$0xff]  }
 0x4cc   :  { %23196 = vmatpush3.bf16.msra.mxu0 %v26232_v8  ;;  %v7254_v8 = vshll.u32 %v6991_v63, 16 }
 0x4cd   :  { %23197 = vmatprep.subr.bf16.mxu0 %v26233_v26 }
 0x4cf   :  { %23178 = vmatmul.mubr.bf16.gmra.mrb[120].mxu0 %v28889_v30  ;;  %v26237_v30 = vld [vmem:[%s32844_s3 + $0x570] sm:$0xff]  }
 0x4d0   :  { %23181 = vmatprep.mubr.bf16.mxu0 %v28892_v62  ;;  %23198 = vmatpush3.bf16.msra.mxu0 %v26233_v26  ;;  %v26238_v62 = vld [vmem:[%s32844_s3 + $0x578] sm:$0xff]  }
 0x4d1   :  { %23199 = vmatprep.subr.bf16.mxu0 %v26234_v0 }
 0x4d4   :  { %23200 = vmatpush3.bf16.msra.mxu0 %v26234_v0  ;;  %v7253_v0 = vrot.slane %v7251_v25, 1 }
 0x4d5   :  { %23201 = vmatprep.subr.bf16.mxu0 %v26235_v29 }
 0x4d7   :  { %23182 = vmatmul.mubr.bf16.gmra.mrb[124].mxu0 %v28909_v34  ;;  %v26239_v34 = vld [vmem:[%s32844_s3 + $0x580] sm:$0xff]  }
 0x4d8   :  { %23185 = vmatprep.mubr.bf16.mxu0 %v28912_v18  ;;  %23202 = vmatpush3.bf16.msra.mxu0 %v26235_v29  ;;  %v29097_v18 = vld [vmem:[#allocation2 + $0x68] sm:$0xff]  ;;  %v7256_v29 = vrot.slane %v7254_v8, 2 }
 0x4d9   :  { %23203 = vmatprep.subr.bf16.mxu0 %v26236_v42  ;;  %v7037_v48 = vrot.slane %v29097_v18, 1 }
 0x4db   :  { %v7038_v26 = vsel %vm2069_vm4, %v28933_v17, %v7037_v48 }
 0x4dc   :  { %23204 = vmatpush3.bf16.msra.mxu0 %v26236_v42  ;;  %v26255_v42 = vld [vmem:[%s32844_s3 + $0x600] sm:$0xff]  }
 0x4dd   :  { %23205 = vmatprep.subr.bf16.mxu0 %v26237_v30 }
 0x4df   :  { %23186 = vmatmul.mubr.bf16.gmra.mrb[128].mxu0 %v28557_v37  ;;  %v26240_v37 = vld [vmem:[%s32844_s3 + $0x588] sm:$0xff]  }
 0x4e0   :  { %23189 = vmatprep.mubr.bf16.mxu0 %v28766_v55  ;;  %23206 = vmatpush3.bf16.msra.mxu0 %v26237_v30  ;;  %v26241_v55 = vld [vmem:[%s32844_s3 + $0x590] sm:$0xff]   ;;  %v7039_v30 = vrot.slane %v29128_v21, 1  ;;  %v33078_v21 = vld [vmem:[#allocation35_spill] sm:$0xff] }
 0x4e1   :  { %23207 = vmatprep.subr.bf16.mxu0 %v26238_v62 }
 0x4e4   :  { %23208 = vmatpush3.bf16.msra.mxu0 %v26238_v62  ;;  %v7257_v62 = vor.u32 %v7256_v29, %v7253_v0 }
 0x4e5   :  { %23229 = vmatprep.subr.bf16.mxu0 %v26239_v34 }
 0x4e7   :  { %23190 = vmatmul.mubr.bf16.gmra.mrb[132].mxu0 %v29097_v18 }
 0x4e8   :  { %23209 = vmatprep.mubr.bf16.mxu0 %v28062_v12  ;;  %v26242_v12 = vld [vmem:[%s32844_s3 + $0x598] sm:$0xff]  }
 0x4ef   :  { %23210 = vmatmul.mubr.bf16.vlgmr.msra.gmra.mrb[116].mxu0 %v28781_v60  ;;  %v26243_v60 = vld [vmem:[%s32844_s3 + $0x5a0] sm:$0xff]  }
 0x4f0   :  { %23213 = vmatprep.mubr.bf16.mxu0 %v28799_v1  ;;  %23230 = vmatpush3.bf16.msra.mxu0 %v26239_v34  ;;  %v33069_v1 = vld [vmem:[#allocation31_spill] sm:$0xff]  ;;  %v7040_v34 = vsel %vm2069_vm4, %v7037_v48, %v7039_v30 }
 0x4f1   :  { %23231 = vmatprep.subr.bf16.mxu0 %v26240_v37  ;;  %v33070_v23 = vshll.u32 %v33069_v1, 16  ;;  %v33071_v49 = vshrl.u32 %v33069_v1, 16  ;;  %v7232_v1 = vld [vmem:[#allocation2 + $0x70] sm:$0x3] }
 0x4f3   :  { %v6774_v32 = vrot.slane %v33070_v23, 1  ;;  %v33076_v23 = vld [vmem:[#allocation33_spill] sm:$0xff] }
 0x4f4   :  { %23232 = vmatpush3.bf16.msra.mxu0 %v26240_v37  ;;  %v33075_v37 = vld [vmem:[#allocation25_spill] sm:$0xff] }
 0x4f5   :  { %23233 = vmatprep.subr.bf16.mxu0 %v26241_v55  ;;  %v6778_v46 = vor.u32 %v33071_v49, %v6774_v32 }
 0x4f7   :  { %23214 = vmatmul.mubr.bf16.gmra.mrb[120].mxu0 %v28803_v28  ;;  %v6775_v28 = vsel %vm1623_vm2, %v28839_v11, %v6774_v32  ;;  %v6783_v11 = vsel %vm1623_vm2, %v6778_v46, %v28833_v14  ;;  %v7020_v14 = vrot.slane %v6991_v63, 1  ;;  %v7298_v32 = vshll.u32 %v7232_v1, 16  ;;  %v7494_v46 = vld [vmem:[#allocation2 + $0x20] sm:$0xfc] }
 0x4f8   :  { %23217 = vmatprep.mubr.bf16.mxu0 %v28821_v54  ;;  %23234 = vmatpush3.bf16.msra.mxu0 %v26241_v55  ;;  %v26245_v54 = vld [vmem:[%s32844_s3 + $0x5b0] sm:$0xff]   ;;  %v26256_v55 = vld [vmem:[%s32844_s3 + $0x608] sm:$0xff]   ;;  %v7514_v51 = vrot.slane %v7494_v46, 2 }
 0x4f9   :  { %23235 = vmatprep.subr.bf16.mxu0 %v26242_v12  ;;  %v7022_v22 = vsel %vm2069_vm4, %v7020_v14, %v28871_v24  ;;  %v26250_v24 = vld [vmem:[%s32844_s3 + $0x5d8] sm:$0xff]  }
 0x4fc   :  { %23236 = vmatpush3.bf16.msra.mxu0 %v26242_v12  ;;  %v26257_v12 = vld [vmem:[%s32844_s3 + $0x610] sm:$0xff]  }
 0x4fd   :  { %23237 = vmatprep.subr.bf16.mxu0 %v26243_v60 }
 0x4ff   :  { %23218 = vmatmul.mubr.bf16.gmra.mrb[124].mxu0 %v28825_v53  ;;  %v26246_v53 = vld [vmem:[%s32844_s3 + $0x5b8] sm:$0xff]  }
 0x500   :  { %23221 = vmatprep.mubr.bf16.mxu0 %v6775_v28  ;;  %23238 = vmatpush3.bf16.msra.mxu0 %v26243_v60  ;;  %v26258_v60 = vld [vmem:[%s32844_s3 + $0x618] sm:$0xff]  }
 0x501   :  { %23239 = vmatprep.subr.bf16.mxu0 %v26244_v4 }
 0x504   :  { %23240 = vmatpush3.bf16.msra.mxu0 %v26244_v4  ;;  %v26262_v4 = vld [vmem:[%s32844_s3 + $0x638] sm:$0xff]  }
 0x505   :  { %23241 = vmatprep.subr.bf16.mxu0 %v26245_v54 }
 0x507   :  { %23222 = vmatmul.mubr.bf16.gmra.mrb[128].mxu0 %v6783_v11 }
 0x508   :  { %23225 = vmatprep.mubr.bf16.mxu0 %v6791_v2  ;;  %23242 = vmatpush3.bf16.msra.mxu0 %v26245_v54  ;;  %v7300_v54 = vrot.slane %v7298_v32, 2  ;;  %v7531_v2 = vrot.slane %v29097_v18, 2 }
 0x509   :  { %23243 = vmatprep.subr.bf16.mxu0 %v26246_v53 }
 0x50c   :  { %23244 = vmatpush3.bf16.msra.mxu0 %v26246_v53  ;;  %v7516_v53 = vsel %vm2565_vm5, %v7514_v51, %v28995_v39 }
 0x50d   :  { %23265 = vmatprep.subr.bf16.mxu0 %v26247_v41 }
 0x50f   :  { %23226 = vmatmul.mubr.bf16.gmra.mrb[132].mxu0 %v6799_v5 }
 0x510   :  { %23245 = vmatprep.mubr.bf16.mxu0 %v7022_v22 }
 0x517   :  { %23246 = vmatmul.mubr.bf16.vlgmr.msra.gmra.mrb[116].mxu0 %v28883_v58  ;;  %v26251_v58 = vld [vmem:[%s32844_s3 + $0x5e0] sm:$0xff]  }
 0x518   :  { %23249 = vmatprep.mubr.bf16.mxu0 %v28899_v10  ;;  %23266 = vmatpush3.bf16.msra.mxu0 %v26247_v41  ;;  %v29166_v10 = vld [vmem:[#allocation2 + $0x58] sm:$0xff] }
 0x519   :  { %23267 = vmatprep.subr.bf16.mxu0 %v26248_v13  ;;  %v7033_v6 = vrot.slane %v29166_v10, 1  ;;  %v7527_v11 = vrot.slane %v29166_v10, 2 }
 0x51b   :  { %v7528_v44 = vsel %vm2565_vm5, %v29029_v45, %v7527_v11  ;;  %v7530_v39 = vsel %vm2565_vm5, %v7527_v11, %v29047_v50  ;;  %v26265_v45 = vld [vmem:[%s32846_s5 + $0x4] ss:$8 sps:$4 sm:$0xff]  }
 0x51c   :  { %23268 = vmatpush3.bf16.msra.mxu0 %v26248_v13  ;;  %19463 = vmatprep.mubr.msk.bf16.mxu1 %vm171_vm1, %v26265_v45 }
 0x51d   :  { %23269 = vmatprep.subr.bf16.mxu0 %v26249_v40 }
 0x51f   :  { %23250 = vmatmul.mubr.bf16.gmra.mrb[120].mxu0 %v28903_v31  ;;  %v7034_v31 = vsel %vm2069_vm4, %v28915_v33, %v7033_v6  ;;  %v7036_v33 = vsel %vm2069_vm4, %v7033_v6, %v28933_v17  ;;  %v7261_v17 = vsel %vm2300_vm3, %v7257_v62, %v33075_v37 }
 0x520   :  { %23253 = vmatprep.mubr.bf16.mxu0 %v28921_v56  ;;  %23270 = vmatpush3.bf16.msra.mxu0 %v26249_v40  ;;  %v26253_v56 = vld [vmem:[%s32844_s3 + $0x5f0] sm:$0xff]  }
 0x521   :  { %23271 = vmatprep.subr.bf16.mxu0 %v26250_v24 }
 0x524   :  { %23272 = vmatpush3.bf16.msra.mxu0 %v26250_v24 }
 0x525   :  { %23273 = vmatprep.subr.bf16.mxu0 %v26251_v58 }
 0x527   :  { %23254 = vmatmul.mubr.bf16.gmra.mrb[124].mxu0 %v28926_v19  ;;  %v26254_v19 = vld [vmem:[%s32844_s3 + $0x5f8] sm:$0xff]  }
 0x528   :  { %23257 = vmatprep.mubr.bf16.mxu0 %v7034_v31  ;;  %23274 = vmatpush3.bf16.msra.mxu0 %v26251_v58 }
 0x529   :  { %23275 = vmatprep.subr.bf16.mxu0 %v26252_v15 }
 0x52c   :  { %23276 = vmatpush3.bf16.msra.mxu0 %v26252_v15 }
 0x52d   :  { %23277 = vmatprep.subr.bf16.mxu0 %v26253_v56 }
 0x52f   :  { %23258 = vmatmul.mubr.bf16.gmra.mrb[128].mxu0 %v7036_v33 }
 0x530   :  { %23261 = vmatprep.mubr.bf16.mxu0 %v7038_v26  ;;  %23278 = vmatpush3.bf16.msra.mxu0 %v26253_v56 }
 0x531   :  { %23279 = vmatprep.subr.bf16.mxu0 %v26254_v19 }
 0x534   :  { %23280 = vmatpush3.bf16.msra.mxu0 %v26254_v19 }
 0x535   :  { %23301 = vmatprep.subr.bf16.mxu0 %v26255_v42 }
 0x537   :  { %23262 = vmatmul.mubr.bf16.gmra.mrb[132].mxu0 %v7040_v34 }
 0x538   :  { %23281 = vmatprep.mubr.bf16.mxu0 %v7261_v17 }
 0x53f   :  { %23282 = vmatmul.mubr.bf16.vlgmr.msra.gmra.mrb[116].mxu0 %v27995_v38  ;;  %v26259_v38 = vld [vmem:[%s32844_s3 + $0x620] sm:$0xff]  }
 0x540   :  { %23285 = vmatprep.mubr.bf16.mxu0 %v28003_v3  ;;  %23302 = vmatpush3.bf16.msra.mxu0 %v26255_v42  ;;  %v26260_v3 = vld [vmem:[%s32844_s3 + $0x628] sm:$0xff]  }
 0x541   :  { %23303 = vmatprep.subr.bf16.mxu0 %v26256_v55 }
 0x544   :  { %23304 = vmatpush3.bf16.msra.mxu0 %v26256_v55 }
 0x545   :  { %23305 = vmatprep.subr.bf16.mxu0 %v26257_v12 }
 0x547   :  { %23286 = vmatmul.mubr.bf16.gmra.mrb[120].mxu0 %v28009_v20  ;;  %v26261_v20 = vld [vmem:[%s32844_s3 + $0x630] sm:$0xff]  }
 0x548   :  { %23289 = vmatprep.mubr.bf16.mxu0 %v33064_v61  ;;  %23306 = vmatpush3.bf16.msra.mxu0 %v26257_v12  ;;  %v7295_v61 = vshrl.u32 %v7232_v1, 16 }
 0x549   :  { %23307 = vmatprep.subr.bf16.mxu0 %v26258_v60 }
 0x54a   :  { %v7297_v28 = vrot.slane %v7295_v61, 1 }
 0x54c   :  { %23308 = vmatpush3.bf16.msra.mxu0 %v26258_v60  ;;  %v7301_v49 = vor.u32 %v7300_v54, %v7297_v28 }
 0x54d   :  { %23309 = vmatprep.subr.bf16.mxu0 %v26259_v38 }
 0x54e   :  { %v7302_v35 = vsel %vm2300_vm3, %v33079_v43, %v7301_v49 }
 0x54f   :  { %23290 = vmatmul.mubr.bf16.gmra.mrb[124].mxu0 %v33065_v57  ;;  %v33077_v57 = vld [vmem:[#allocation34_spill] sm:$0xff] }
 0x550   :  { %23293 = vmatprep.mubr.bf16.mxu0 %v33076_v23  ;;  %23310 = vmatpush3.bf16.msra.mxu0 %v26259_v38 }
 0x551   :  { %23311 = vmatprep.subr.bf16.mxu0 %v26260_v3 }
 0x554   :  { %23312 = vmatpush3.bf16.msra.mxu0 %v26260_v3 }
 0x555   :  { %23313 = vmatprep.subr.bf16.mxu0 %v26261_v20 }
 0x557   :  { %23294 = vmatmul.mubr.bf16.gmra.mrb[128].mxu0 %v33077_v57 }
 0x558   :  { %23297 = vmatprep.mubr.bf16.mxu0 %v33078_v21  ;;  %23314 = vmatpush3.bf16.msra.mxu0 %v26261_v20 }
 0x559   :  { %23315 = vmatprep.subr.bf16.mxu0 %v26262_v4 }
 0x55c   :  { %23316 = vmatpush3.bf16.msra.mxu0 %v26262_v4 }
 0x55f   :  { %23298 = vmatmul.mubr.bf16.gmra.mrb[132].mxu0 %v7302_v35 }
 0x560   :  { %23317 = vmatprep.mubr.bf16.mxu0 %v7516_v53 }
 0x567   :  { %23318 = vmatmul.mubr.bf16.vlgmr.msra.gmra.mrb[116].mxu0 %v29005_v52  ;;  %v7532_v52 = vsel %vm2565_vm5, %v29047_v50, %v7531_v2 }
 0x568   :  { %23321 = vmatprep.mubr.bf16.mxu0 %v29017_v16  ;;  %v7533_v16 = vrot.slane %v7232_v1, 2 }
 0x56f   :  { %23322 = vmatmul.mubr.bf16.gmra.mrb[120].mxu0 %v29021_v9  ;;  %v7534_v9 = vsel %vm2565_vm5, %v7531_v2, %v7533_v16 }
 0x570   :  { %23325 = vmatprep.mubr.bf16.mxu0 %v29035_v59  ;;  %v32910_v59 = vmov 0  }
 0x571   :  { %7811 = vmatprep.subr.bf16.mxu1 %v32910_v59  ;;  %15604 = vmatprep.subr.bf16.mxu0 %v32910_v59 }
 0x577   :  { %23326 = vmatmul.mubr.bf16.gmra.mrb[124].mxu0 %v29040_v47  ;;  %v29249_v47 = vld [vmem:[%s32845_s4] ss:$0 sm:$0xff] }
 0x578   :  { %23329 = vmatprep.mubr.bf16.mxu0 %v7528_v44 }
 0x57f   :  { %23330 = vmatmul.mubr.bf16.gmra.mrb[128].mxu0 %v7530_v39 }
 0x580   :  { %23333 = vmatprep.mubr.bf16.mxu0 %v7532_v52 }
 0x587   :  { %23334 = vmatmul.mubr.bf16.gmra.mrb[132].mxu0 %v7534_v9 }
 0x63a   :  { %v23319_v50 = vpop.f32.mrb[116].mxu0 }
 0x63b   :  { %v7735_v18 = vadd.f32 %v23319_v50, %v29249_v47  ;;  %v7627_v41 = vpop.f32.mrb[117].mxu0 }
 0x63c   :  { %v7733_v27 = vadd.f32 %v29249_v47, %v7627_v41  ;;  %v23320_v63 = vpop.f32.mrb[118].mxu0 }
 0x63d   :  { %v7736_v7 = vadd.f32 %v23320_v63, %v29249_v47  ;;  %v7630_v36 = vpop.f32.mrb[119].mxu0  ;;  %v7755_v5 = vmax.f32 %v7735_v18, 0.0 }
 0x63e   :  { %v7734_v14 = vadd.f32 %v29249_v47, %v7630_v36  ;;  %v7753_v13 = vmax.f32 %v7733_v27, 0.0 }
 0x63f   :  { %v7756_v22 = vmax.f32 %v7736_v7, 0.0 }
 0x640   :  { %v7754_v40 = vmax.f32 %v7734_v14, 0.0 }
 0x641   :  { %v7778_v24 = vpack.c.bf16 %v7756_v22, %v7755_v5  ;;  %v26263_v5 = vld [vmem:[%s32846_s5] ss:$8 sps:$4 sm:$0xff]  }
 0x642   :  { %v7777_v58 = vpack.c.bf16 %v7754_v40, %v7753_v13  ;;  %v23323_v10 = vpop.f32.mrb[120].mxu0  ;;  %v29289_v22 = vld [vmem:[%s32842_s1] sm:$0xff]   ;;  %v33080_v13 = vmov 0.0   ;;  %v29297_v40 = vld [vmem:[%s32842_s1 + $0x8] sm:$0xff]  }
 0x643   :  { %v7739_v6 = vadd.f32 %v23323_v10, %v29249_v47  ;;  %v7643_v15 = vpop.f32.mrb[121].mxu0  ;;  %v26272_v10 = vld [vmem:[%s32841_s0 + $0x1e8] sm:$0xff]  }
 0x644   :  { %v7737_v31 = vadd.f32 %v29249_v47, %v7643_v15  ;;  %v23324_v56 = vpop.f32.mrb[122].mxu0  ;;  %7812 = vmatpush1.bf16.msra.mxu1 %v7777_v58  ;;  %v26271_v58 = vld [vmem:[%s32841_s0 + $0x1e0] sm:$0xff]   ;;  %v26274_v15 = vld [vmem:[%s32841_s0 + $0x1f8] sm:$0xff]  }
 0x645   :  { %v7740_v48 = vadd.f32 %v23324_v56, %v29249_v47  ;;  %v7646_v25 = vpop.f32.mrb[123].mxu0  ;;  %7813 = vmatprep.subr.bf16.mxu1 %v32910_v59  ;;  %v7759_v19 = vmax.f32 %v7739_v6, 0.0  ;;  %v26273_v6 = vld [vmem:[%s32841_s0 + $0x1f0] sm:$0xff]   ;;  %v26276_v56 = vld [vmem:[%s32841_s0 + $0x208] sm:$0xff]  }
 0x646   :  { %v7738_v8 = vadd.f32 %v29249_v47, %v7646_v25  ;;  %v7757_v26 = vmax.f32 %v7737_v31, 0.0  ;;  %v26275_v31 = vld [vmem:[%s32841_s0 + $0x200] sm:$0xff]   ;;  %v26278_v25 = vld [vmem:[%s32841_s0 + $0x218] sm:$0xff]  }
 0x647   :  { %v7760_v33 = vmax.f32 %v7740_v48, 0.0  ;;  %v26277_v48 = vld [vmem:[%s32841_s0 + $0x210] sm:$0xff]  }
 0x648   :  { %v7758_v0 = vmax.f32 %v7738_v8, 0.0  ;;  %7814 = vmatpush1.bf16.msra.mxu1 %v7778_v24  ;;  %v26268_v24 = vld [vmem:[%s32846_s5 + $0x10] ss:$8 sps:$4 sm:$0xff]   ;;  %v26279_v8 = vld [vmem:[%s32841_s0 + $0x220] sm:$0xff]  }
 0x649   :  { %v7780_v29 = vpack.c.bf16 %v7760_v33, %v7759_v19  ;;  %7815 = vmatprep.subr.bf16.mxu1 %v32910_v59  ;;  %v26280_v19 = vld [vmem:[%s32841_s0 + $0x228] sm:$0xff]   ;;  %v26281_v33 = vld [vmem:[%s32841_s0 + $0x230] sm:$0xff]  }
 0x64a   :  { %v7779_v42 = vpack.c.bf16 %v7758_v0, %v7757_v26  ;;  %v23327_v30 = vpop.f32.mrb[124].mxu0  ;;  %v26282_v26 = vld [vmem:[%s32841_s0 + $0x238] sm:$0xff]   ;;  %v26283_v0 = vld [vmem:[%s32841_s0 + $0x240] sm:$0xff]  }
 0x64b   :  { %v7743_v62 = vadd.f32 %v23327_v30, %v29249_v47  ;;  %v7659_v34 = vpop.f32.mrb[125].mxu0  ;;  %v26286_v30 = vld [vmem:[%s32841_s0 + $0x258] sm:$0xff]  }
 0x64c   :  { %v7741_v37 = vadd.f32 %v29249_v47, %v7659_v34  ;;  %v23328_v17 = vpop.f32.mrb[126].mxu0  ;;  %7816 = vmatpush1.bf16.msra.mxu1 %v7779_v42  ;;  %v26285_v42 = vld [vmem:[%s32841_s0 + $0x250] sm:$0xff]   ;;  %v26288_v34 = vld [vmem:[%s32841_s0 + $0x268] sm:$0xff]  }
 0x64d   :  { %v7744_v55 = vadd.f32 %v23328_v17, %v29249_v47  ;;  %v7662_v12 = vpop.f32.mrb[127].mxu0  ;;  %7817 = vmatprep.subr.bf16.mxu1 %v32910_v59  ;;  %v7763_v38 = vmax.f32 %v7743_v62, 0.0  ;;  %v26287_v62 = vld [vmem:[%s32841_s0 + $0x260] sm:$0xff]   ;;  %v26290_v17 = vld [vmem:[%s32841_s0 + $0x278] sm:$0xff]  }
 0x64e   :  { %v7742_v60 = vadd.f32 %v29249_v47, %v7662_v12  ;;  %v7761_v1 = vmax.f32 %v7741_v37, 0.0  ;;  %v26289_v37 = vld [vmem:[%s32841_s0 + $0x270] sm:$0xff]   ;;  %v26292_v12 = vld [vmem:[%s32841_s0 + $0x288] sm:$0xff]  }
 0x64f   :  { %v7764_v3 = vmax.f32 %v7744_v55, 0.0  ;;  %v26291_v55 = vld [vmem:[%s32841_s0 + $0x280] sm:$0xff]  }
 0x650   :  { %v7762_v23 = vmax.f32 %v7742_v60, 0.0  ;;  %7818 = vmatpush1.bf16.msra.mxu1 %v7780_v29  ;;  %v26284_v29 = vld [vmem:[%s32841_s0 + $0x248] sm:$0xff]   ;;  %v26293_v60 = vld [vmem:[%s32841_s0 + $0x290] sm:$0xff]  }
 0x651   :  { %v7782_v20 = vpack.c.bf16 %v7764_v3, %v7763_v38  ;;  %7819 = vmatprep.subr.bf16.mxu1 %v32910_v59  ;;  %v26294_v38 = vld [vmem:[%s32841_s0 + $0x298] sm:$0xff]   ;;  %v26295_v3 = vld [vmem:[%s32841_s0 + $0x2a0] sm:$0xff]  }
 0x652   :  { %v7781_v61 = vpack.c.bf16 %v7762_v23, %v7761_v1  ;;  %v23331_v32 = vpop.f32.mrb[128].mxu0  ;;  %v26296_v23 = vld [vmem:[%s32841_s0 + $0x2a8] sm:$0xff]  }
 0x653   :  { %v7747_v4 = vadd.f32 %v23331_v32, %v29249_v47  ;;  %v7675_v28 = vpop.f32.mrb[129].mxu0 }
 0x654   :  { %v7745_v54 = vadd.f32 %v29249_v47, %v7675_v28  ;;  %v23332_v57 = vpop.f32.mrb[130].mxu0  ;;  %7820 = vmatpush1.bf16.msra.mxu1 %v7781_v61 }
 0x655   :  { %v7748_v21 = vadd.f32 %v23332_v57, %v29249_v47  ;;  %v7678_v49 = vpop.f32.mrb[131].mxu0  ;;  %7821 = vmatprep.subr.bf16.mxu1 %v32910_v59  ;;  %v7767_v51 = vmax.f32 %v7747_v4, 0.0 }
 0x656   :  { %v7746_v46 = vadd.f32 %v29249_v47, %v7678_v49  ;;  %v7765_v35 = vmax.f32 %v7745_v54, 0.0  ;;  %v26297_v54 = vld [vmem:[%s32841_s0 + $0x2b0] sm:$0xff]  }
 0x657   :  { %v7768_v43 = vmax.f32 %v7748_v21, 0.0 }
 0x658   :  { %v7766_v53 = vmax.f32 %v7746_v46, 0.0  ;;  %7822 = vmatpush1.bf16.msra.mxu1 %v7782_v20 }
 0x659   :  { %v7784_v11 = vpack.c.bf16 %v7768_v43, %v7767_v51  ;;  %7823 = vmatprep.subr.bf16.mxu1 %v32910_v59  ;;  %v26298_v43 = vld [vmem:[%s32841_s0 + $0x2b8] sm:$0xff]  }
 0x65a   :  { %v7783_v44 = vpack.c.bf16 %v7766_v53, %v7765_v35  ;;  %v23335_v2 = vpop.f32.mrb[132].mxu0 }
 0x65b   :  { %v7751_v39 = vadd.f32 %v23335_v2, %v29249_v47  ;;  %v7691_v52 = vpop.f32.mrb[133].mxu0  ;;  %v26299_v2 = vld [vmem:[%s32841_s0 + $0x2c0] sm:$0xff]  }
 0x65c   :  { %v7749_v16 = vadd.f32 %v29249_v47, %v7691_v52  ;;  %v23336_v9 = vpop.f32.mrb[134].mxu0  ;;  %7824 = vmatpush1.bf16.msra.mxu1 %v7783_v44 }
 0x65d   :  { %v7752_v45 = vadd.f32 %v23336_v9, %v29249_v47  ;;  %v7694_v50 = vpop.f32.mrb[135].mxu0  ;;  %7825 = vmatprep.subr.bf16.mxu1 %v32910_v59  ;;  %v7771_v41 = vmax.f32 %v7751_v39, 0.0 }
 0x65e   :  { %v7750_v18 = vadd.f32 %v29249_v47, %v7694_v50  ;;  %v7769_v63 = vmax.f32 %v7749_v16, 0.0  ;;  %v26266_v47 = vld [vmem:[%s32846_s5 + $0x14] ss:$8 sps:$4 sm:$0xff]  }
 0x65f   :  { %v7772_v27 = vmax.f32 %v7752_v45, 0.0  ;;  %v26300_v45 = vld [vmem:[%s32841_s0 + $0x2c8] sm:$0xff]  }
 0x660   :  { %v7770_v7 = vmax.f32 %v7750_v18, 0.0  ;;  %7826 = vmatpush1.bf16.msra.mxu1 %v7784_v11 }
 0x661   :  { %v7786_v36 = vpack.c.bf16 %v7772_v27, %v7771_v41  ;;  %7827 = vmatprep.subr.bf16.mxu1 %v32910_v59 }
 0x662   :  { %v7785_v14 = vpack.c.bf16 %v7770_v7, %v7769_v63  ;;  %v26301_v63 = vld [vmem:[%s32841_s0 + $0x2d0] sm:$0xff]  }
 0x664   :  { %7828 = vmatpush1.bf16.msra.mxu1 %v7785_v14 }
 0x665   :  { %7829 = vmatprep.subr.bf16.mxu1 %v32910_v59 }
 0x668   :  { %7830 = vmatpush1.bf16.msra.mxu1 %v7786_v36 }
 0x669   :  { %23337 = vmatprep.subr.bf16.mxu1 %v33080_v13 }
 0x66b   :  { %7844 = vmatmul.mubr.bf16.vlgmr.msra.gmra.mrb[124].mxu1 %v26263_v5 }
 0x66c   :  { %19464 = vmatprep.mubr.msk.bf16.mxu1 %vm171_vm1, %v26266_v47  ;;  %23338 = vmatpush3.bf16.msra.mxu1 %v29289_v22  ;;  %v26302_v47 = vld [vmem:[%s32841_s0 + $0x2d8] sm:$0xff]  }
 0x66d   :  { %23339 = vmatprep.subr.bf16.mxu1 %v33080_v13 }
 0x670   :  { %23340 = vmatpush3.bf16.msra.mxu1 %v29297_v40 }
 0x671   :  { %23401 = vmatprep.subr.bf16.mxu1 %v33080_v13 }
 0x673   :  { %7852 = vmatmul.mubr.bf16.gmra.mrb[128].mxu1 %v26268_v24 }
 0x674   :  { %23341 = vmatprep.mubr.msk.bf16.mxu1 %vm26838_vm0, %v33080_v13 }
 0x67b   :  { %23342 = vmatmul.mubr.msk.bf16.vlgmr.msra.gmra.mrb[132].mxu1 %vm171_vm1, %v26271_v58 }
 0x67c   :  { %23345 = vmatprep.mubr.msk.bf16.mxu1 %vm26838_vm0, %v33080_v13  ;;  %23402 = vmatpush3.bf16.msra.mxu1 %v29289_v22 }
 0x67d   :  { %23403 = vmatprep.subr.bf16.mxu1 %v33080_v13 }
 0x680   :  { %23404 = vmatpush3.bf16.msra.mxu1 %v29297_v40 }
 0x681   :  { %23465 = vmatprep.subr.bf16.mxu1 %v33080_v13 }
 0x683   :  { %23346 = vmatmul.mubr.msk.bf16.gmra.mrb[136].mxu1 %vm171_vm1, %v26272_v10 }
 0x684   :  { %23349 = vmatprep.mubr.msk.bf16.mxu1 %vm26838_vm0, %v33080_v13 }
 0x68b   :  { %23350 = vmatmul.mubr.msk.bf16.gmra.mrb[140].mxu1 %vm171_vm1, %v26273_v6  ;;  %v26303_v6 = vld [vmem:[%s32841_s0 + $0x2e0] sm:$0xff]  }
 0x68c   :  { %23353 = vmatprep.mubr.msk.bf16.mxu1 %vm26838_vm0, %v33080_v13 }
 0x693   :  { %23354 = vmatmul.mubr.msk.bf16.gmra.mrb[144].mxu1 %vm171_vm1, %v26274_v15 }
 0x694   :  { %23357 = vmatprep.mubr.msk.bf16.mxu1 %vm26838_vm0, %v33080_v13 }
 0x69b   :  { %23358 = vmatmul.mubr.msk.bf16.gmra.mrb[148].mxu1 %vm171_vm1, %v26275_v31 }
 0x69c   :  { %23361 = vmatprep.mubr.msk.bf16.mxu1 %vm26838_vm0, %v33080_v13 }
 0x6a3   :  { %23362 = vmatmul.mubr.msk.bf16.gmra.mrb[152].mxu1 %vm171_vm1, %v26276_v56 }
 0x6a4   :  { %23365 = vmatprep.mubr.msk.bf16.mxu1 %vm26838_vm0, %v33080_v13 }
 0x6ab   :  { %23366 = vmatmul.mubr.msk.bf16.gmra.mrb[156].mxu1 %vm171_vm1, %v26277_v48  ;;  %v26304_v48 = vld [vmem:[%s32841_s0 + $0x2e8] sm:$0xff]  }
 0x6ac   :  { %23369 = vmatprep.mubr.msk.bf16.mxu1 %vm26838_vm0, %v33080_v13 }
 0x6b3   :  { %23370 = vmatmul.mubr.msk.bf16.gmra.mrb[160].mxu1 %vm171_vm1, %v26278_v25 }
 0x6b4   :  { %23373 = vmatprep.mubr.msk.bf16.mxu1 %vm26838_vm0, %v33080_v13 }
 0x6bb   :  { %23374 = vmatmul.mubr.msk.bf16.gmra.mrb[164].mxu1 %vm171_vm1, %v26279_v8 }
 0x6bc   :  { %23377 = vmatprep.mubr.msk.bf16.mxu1 %vm26838_vm0, %v33080_v13 }
 0x6c3   :  { %23378 = vmatmul.mubr.msk.bf16.gmra.mrb[168].mxu1 %vm171_vm1, %v26280_v19 }
 0x6c4   :  { %23381 = vmatprep.mubr.msk.bf16.mxu1 %vm26838_vm0, %v33080_v13 }
 0x6cb   :  { %23382 = vmatmul.mubr.msk.bf16.gmra.mrb[172].mxu1 %vm171_vm1, %v26281_v33 }
 0x6cc   :  { %23385 = vmatprep.mubr.msk.bf16.mxu1 %vm26838_vm0, %v33080_v13 }
 0x6d3   :  { %23386 = vmatmul.mubr.msk.bf16.gmra.mrb[176].mxu1 %vm171_vm1, %v26282_v26  ;;  %v26305_v26 = vld [vmem:[%s32841_s0 + $0x2f0] sm:$0xff]  }
 0x6d4   :  { %23389 = vmatprep.mubr.msk.bf16.mxu1 %vm26838_vm0, %v33080_v13 }
 0x6db   :  { %23390 = vmatmul.mubr.msk.bf16.gmra.mrb[180].mxu1 %vm171_vm1, %v26283_v0 }
 0x6dc   :  { %23393 = vmatprep.mubr.msk.bf16.mxu1 %vm26838_vm0, %v33080_v13 }
 0x6e3   :  { %23394 = vmatmul.mubr.msk.bf16.gmra.mrb[184].mxu1 %vm171_vm1, %v26284_v29 }
 0x6e4   :  { %23397 = vmatprep.mubr.msk.bf16.mxu1 %vm26838_vm0, %v33080_v13 }
 0x6eb   :  { %23398 = vmatmul.mubr.msk.bf16.gmra.mrb[188].mxu1 %vm171_vm1, %v26285_v42 }
 0x6ec   :  { %23405 = vmatprep.mubr.msk.bf16.mxu1 %vm26838_vm0, %v33080_v13 }
 0x6f3   :  { %23406 = vmatmul.mubr.msk.bf16.vlgmr.msra.gmra.mrb[192].mxu1 %vm171_vm1, %v26286_v30 }
 0x6f4   :  { %23409 = vmatprep.mubr.msk.bf16.mxu1 %vm26838_vm0, %v33080_v13  ;;  %23466 = vmatpush3.bf16.msra.mxu1 %v29289_v22 }
 0x6f5   :  { %23467 = vmatprep.subr.bf16.mxu1 %v33080_v13 }
 0x6f8   :  { %23468 = vmatpush3.bf16.msra.mxu1 %v29297_v40 }
 0x6f9   :  { %23529 = vmatprep.subr.bf16.mxu1 %v33080_v13 }
 0x6fb   :  { %23410 = vmatmul.mubr.msk.bf16.gmra.mrb[196].mxu1 %vm171_vm1, %v26287_v62  ;;  %v26306_v62 = vld [vmem:[%s32841_s0 + $0x2f8] sm:$0xff]  }
 0x6fc   :  { %23413 = vmatprep.mubr.msk.bf16.mxu1 %vm26838_vm0, %v33080_v13 }
 0x703   :  { %23414 = vmatmul.mubr.msk.bf16.gmra.mrb[200].mxu1 %vm171_vm1, %v26288_v34 }
 0x704   :  { %23417 = vmatprep.mubr.msk.bf16.mxu1 %vm26838_vm0, %v33080_v13 }
 0x70b   :  { %23418 = vmatmul.mubr.msk.bf16.gmra.mrb[204].mxu1 %vm171_vm1, %v26289_v37 }
 0x70c   :  { %23421 = vmatprep.mubr.msk.bf16.mxu1 %vm26838_vm0, %v33080_v13 }
 0x713   :  { %23422 = vmatmul.mubr.msk.bf16.gmra.mrb[208].mxu1 %vm171_vm1, %v26290_v17 }
 0x714   :  { %23425 = vmatprep.mubr.msk.bf16.mxu1 %vm26838_vm0, %v33080_v13 }
 0x71b   :  { %23426 = vmatmul.mubr.msk.bf16.gmra.mrb[212].mxu1 %vm171_vm1, %v26291_v55 }
 0x71c   :  { %23429 = vmatprep.mubr.msk.bf16.mxu1 %vm26838_vm0, %v33080_v13 }
 0x723   :  { %23430 = vmatmul.mubr.msk.bf16.gmra.mrb[216].mxu1 %vm171_vm1, %v26292_v12  ;;  %v26307_v12 = vld [vmem:[%s32841_s0 + $0x300] sm:$0xff]  }
 0x724   :  { %23433 = vmatprep.mubr.msk.bf16.mxu1 %vm26838_vm0, %v33080_v13 }
 0x72b   :  { %23434 = vmatmul.mubr.msk.bf16.gmra.mrb[220].mxu1 %vm171_vm1, %v26293_v60 }
 0x72c   :  { %23437 = vmatprep.mubr.msk.bf16.mxu1 %vm26838_vm0, %v33080_v13 }
 0x733   :  { %23438 = vmatmul.mubr.msk.bf16.gmra.mrb[224].mxu1 %vm171_vm1, %v26294_v38 }
 0x734   :  { %23441 = vmatprep.mubr.msk.bf16.mxu1 %vm26838_vm0, %v33080_v13 }
 0x73b   :  { %23442 = vmatmul.mubr.msk.bf16.gmra.mrb[228].mxu1 %vm171_vm1, %v26295_v3 }
 0x73c   :  { %23445 = vmatprep.mubr.msk.bf16.mxu1 %vm26838_vm0, %v33080_v13 }
 0x73e   :  { %v7845_v1 = vpop.f32.mrb[124].mxu1 }
 0x73f   :  { %v7847_v20 = vpop.f32.mrb[125].mxu1 }
 0x740   :  { %v7848_v61 = vpop.f32.mrb[126].mxu1 }
 0x741   :  { %v7850_v32 = vpop.f32.mrb[127].mxu1  ;;  %v7860_v4 = vpack.c.bf16 %v7848_v61, %v7845_v1 }
 0x743   :  { %23446 = vmatmul.mubr.msk.bf16.gmra.mrb[232].mxu1 %vm171_vm1, %v26296_v23  ;;  %7862 = vst [vmem:[#allocation3] sm:$0xff] %v7860_v4  ;;  %v26308_v23 = vld [vmem:[%s32841_s0 + $0x308] sm:$0xff]  }
 0x744   :  { %23449 = vmatprep.mubr.msk.bf16.mxu1 %vm26838_vm0, %v33080_v13 }
 0x746   :  { %v7853_v28 = vpop.f32.mrb[128].mxu1 }
 0x747   :  { %v7855_v57 = vpop.f32.mrb[129].mxu1 }
 0x748   :  { %v7856_v21 = vpop.f32.mrb[130].mxu1 }
 0x749   :  { %v7858_v49 = vpop.f32.mrb[131].mxu1  ;;  %v7861_v46 = vpack.c.bf16 %v7856_v21, %v7853_v28  ;;  %v26309_v28 = vld [vmem:[%s32841_s0 + $0x310] sm:$0xff]  }
 0x74b   :  { %23450 = vmatmul.mubr.msk.bf16.gmra.mrb[236].mxu1 %vm171_vm1, %v26297_v54  ;;  %7863 = vst [vmem:[#allocation3 + $0x8] sm:$0xff] %v7861_v46  ;;  %v26310_v46 = vld [vmem:[%s32841_s0 + $0x318] sm:$0xff]  }
 0x74c   :  { %23453 = vmatprep.mubr.msk.bf16.mxu1 %vm26838_vm0, %v33080_v13 }
 0x74e   :  { %v29477_v51 = vpop.f32.mrb[132].mxu1 }
 0x74f   :  { %v23343_v35 = vpop.f32.mrb[133].mxu1 }
 0x750   :  { %v29482_v53 = vpop.f32.mrb[134].mxu1 }
 0x751   :  { %v23344_v11 = vpop.f32.mrb[135].mxu1 }
 0x753   :  { %23454 = vmatmul.mubr.msk.bf16.gmra.mrb[240].mxu1 %vm171_vm1, %v26298_v43 }
 0x754   :  { %23457 = vmatprep.mubr.msk.bf16.mxu1 %vm26838_vm0, %v33080_v13 }
 0x756   :  { %v29487_v44 = vpop.f32.mrb[136].mxu1 }
 0x757   :  { %v23347_v39 = vpop.f32.mrb[137].mxu1 }
 0x758   :  { %v29492_v52 = vpop.f32.mrb[138].mxu1  ;;  %v26311_v39 = vld [vmem:[%s32841_s0 + $0x320] sm:$0xff]  }
 0x759   :  { %v23348_v16 = vpop.f32.mrb[139].mxu1 }
 0x75b   :  { %23458 = vmatmul.mubr.msk.bf16.gmra.mrb[244].mxu1 %vm171_vm1, %v26299_v2 }
 0x75c   :  { %23461 = vmatprep.mubr.msk.bf16.mxu1 %vm26838_vm0, %v33080_v13 }
 0x75e   :  { %v29497_v9 = vpop.f32.mrb[140].mxu1 }
 0x75f   :  { %v23351_v50 = vpop.f32.mrb[141].mxu1 }
 0x760   :  { %v29502_v18 = vpop.f32.mrb[142].mxu1 }
 0x761   :  { %v23352_v41 = vpop.f32.mrb[143].mxu1 }
 0x763   :  { %23462 = vmatmul.mubr.msk.bf16.gmra.mrb[248].mxu1 %vm171_vm1, %v26300_v45 }
 0x764   :  { %23469 = vmatprep.mubr.msk.bf16.mxu1 %vm26838_vm0, %v33080_v13 }
 0x766   :  { %v29507_v27 = vpop.f32.mrb[144].mxu1 }
 0x767   :  { %v23355_v7 = vpop.f32.mrb[145].mxu1 }
 0x768   :  { %v29512_v36 = vpop.f32.mrb[146].mxu1  ;;  %v26312_v7 = vld [vmem:[%s32841_s0 + $0x328] sm:$0xff]  }
 0x769   :  { %v23356_v14 = vpop.f32.mrb[147].mxu1 }
 0x76b   :  { %23470 = vmatmul.mubr.msk.bf16.vlgmr.msra.gmra.mrb[252].mxu1 %vm171_vm1, %v26301_v63 }
 0x76c   :  { %23473 = vmatprep.mubr.msk.bf16.mxu1 %vm26838_vm0, %v33080_v13  ;;  %23530 = vmatpush3.bf16.msra.mxu1 %v29289_v22 }
 0x76d   :  { %23531 = vmatprep.subr.bf16.mxu1 %v33080_v13 }
 0x76e   :  { %v29519_v5 = vpop.f32.mrb[148].mxu1 }
 0x76f   :  { %v23359_v24 = vpop.f32.mrb[149].mxu1 }
 0x770   :  { %v29524_v58 = vpop.f32.mrb[150].mxu1  ;;  %23532 = vmatpush3.bf16.msra.mxu1 %v29297_v40  ;;  %v29630_v24 = vld [vmem:[%s32843_s2] ss:$0 sm:$0xff] }
 0x771   :  { %v23360_v10 = vpop.f32.mrb[151].mxu1 }
 0x772   :  { %v8073_v10 = vadd.f32 %v29630_v24, %v29477_v51 }
 0x773   :  { %23474 = vmatmul.mubr.msk.bf16.gmra.mrb[0].mxu1 %vm171_vm1, %v26302_v47 }
 0x774   :  { %23477 = vmatprep.mubr.msk.bf16.mxu1 %vm26838_vm0, %v33080_v13 }
 0x776   :  { %v29530_v22 = vpop.f32.mrb[152].mxu1 }
 0x777   :  { %v23363_v15 = vpop.f32.mrb[153].mxu1 }
 0x778   :  { %v29535_v31 = vpop.f32.mrb[154].mxu1 }
 0x779   :  { %v23364_v56 = vpop.f32.mrb[155].mxu1 }
 0x77b   :  { %23478 = vmatmul.mubr.msk.bf16.gmra.mrb[4].mxu1 %vm171_vm1, %v26303_v6 }
 0x77c   :  { %23481 = vmatprep.mubr.msk.bf16.mxu1 %vm26838_vm0, %v33080_v13 }
 0x77e   :  { %v29540_v40 = vpop.f32.mrb[156].mxu1 }
 0x77f   :  { %v23367_v25 = vpop.f32.mrb[157].mxu1 }
 0x780   :  { %v29545_v8 = vpop.f32.mrb[158].mxu1  ;;  %v26313_v25 = vld [vmem:[%s32841_s0 + $0x330] sm:$0xff]  }
 0x781   :  { %v23368_v19 = vpop.f32.mrb[159].mxu1 }
 0x783   :  { %23482 = vmatmul.mubr.msk.bf16.gmra.mrb[8].mxu1 %vm171_vm1, %v26304_v48  ;;  %v8076_v48 = vadd.f32 %v29630_v24, %v29482_v53  ;;  %v8081_v53 = vadd.f32 %v29630_v24, %v29487_v44 }
 0x784   :  { %23485 = vmatprep.mubr.msk.bf16.mxu1 %vm26838_vm0, %v33080_v13 }
 0x785   :  { %v8192_v51 = vmax.f32 %v8076_v48, 0.0 }
 0x786   :  { %v29550_v33 = vpop.f32.mrb[160].mxu1 }
 0x787   :  { %v23371_v0 = vpop.f32.mrb[161].mxu1 }
 0x788   :  { %v29555_v29 = vpop.f32.mrb[162].mxu1 }
 0x789   :  { %v23372_v42 = vpop.f32.mrb[163].mxu1 }
 0x78b   :  { %23486 = vmatmul.mubr.msk.bf16.gmra.mrb[12].mxu1 %vm171_vm1, %v26305_v26  ;;  %v8191_v26 = vmax.f32 %v8073_v10, 0.0  ;;  %v26315_v10 = vld [vmem:[%s32841_s0 + $0x340] sm:$0xff]  }
 0x78c   :  { %23489 = vmatprep.mubr.msk.bf16.mxu1 %vm26838_vm0, %v33080_v13 }
 0x78e   :  { %v29560_v30 = vpop.f32.mrb[164].mxu1 }
 0x78f   :  { %v23375_v34 = vpop.f32.mrb[165].mxu1 }
 0x790   :  { %v29565_v37 = vpop.f32.mrb[166].mxu1 }
 0x791   :  { %v23376_v17 = vpop.f32.mrb[167].mxu1 }
 0x793   :  { %23490 = vmatmul.mubr.msk.bf16.gmra.mrb[16].mxu1 %vm171_vm1, %v26306_v62 }
 0x794   :  { %23493 = vmatprep.mubr.msk.bf16.mxu1 %vm26838_vm0, %v33080_v13 }
 0x796   :  { %v29570_v55 = vpop.f32.mrb[168].mxu1 }
 0x797   :  { %v23379_v60 = vpop.f32.mrb[169].mxu1 }
 0x798   :  { %v29575_v38 = vpop.f32.mrb[170].mxu1 }
 0x799   :  { %v23380_v3 = vpop.f32.mrb[171].mxu1 }
 0x79a   :  { %v8084_v3 = vadd.f32 %v29630_v24, %v29492_v52  ;;  %v8089_v52 = vadd.f32 %v29630_v24, %v29497_v9 }
 0x79b   :  { %23494 = vmatmul.mubr.msk.bf16.gmra.mrb[20].mxu1 %vm171_vm1, %v26307_v12 }
 0x79c   :  { %23497 = vmatprep.mubr.msk.bf16.mxu1 %vm26838_vm0, %v33080_v13  ;;  %v8194_v44 = vmax.f32 %v8084_v3, 0.0 }
 0x79e   :  { %v29580_v1 = vpop.f32.mrb[172].mxu1 }
 0x79f   :  { %v23383_v20 = vpop.f32.mrb[173].mxu1 }
 0x7a0   :  { %v29585_v61 = vpop.f32.mrb[174].mxu1 }
 0x7a1   :  { %v23384_v32 = vpop.f32.mrb[175].mxu1 }
 0x7a2   :  { %v26314_v32 = vld [vmem:[%s32841_s0 + $0x338] sm:$0xff]  }
 0x7a3   :  { %23498 = vmatmul.mubr.msk.bf16.gmra.mrb[24].mxu1 %vm171_vm1, %v26308_v23 }
 0x7a4   :  { %23501 = vmatprep.mubr.msk.bf16.mxu1 %vm26838_vm0, %v33080_v13 }
 0x7a6   :  { %v29590_v4 = vpop.f32.mrb[176].mxu1 }
 0x7a7   :  { %v23387_v54 = vpop.f32.mrb[177].mxu1 }
 0x7a8   :  { %v29595_v57 = vpop.f32.mrb[178].mxu1  ;;  %v8193_v54 = vmax.f32 %v8081_v53, 0.0  ;;  %v26316_v53 = vld [vmem:[%s32841_s0 + $0x348] sm:$0xff]  }
 0x7a9   :  { %v23388_v21 = vpop.f32.mrb[179].mxu1 }
 0x7ab   :  { %23502 = vmatmul.mubr.msk.bf16.gmra.mrb[28].mxu1 %vm171_vm1, %v26309_v28 }
 0x7ac   :  { %23505 = vmatprep.mubr.msk.bf16.mxu1 %vm26838_vm0, %v33080_v13 }
 0x7ae   :  { %v29600_v49 = vpop.f32.mrb[180].mxu1 }
 0x7af   :  { %v23391_v43 = vpop.f32.mrb[181].mxu1 }
 0x7b0   :  { %v29605_v35 = vpop.f32.mrb[182].mxu1 }
 0x7b1   :  { %v23392_v11 = vpop.f32.mrb[183].mxu1 }
 0x7b3   :  { %23506 = vmatmul.mubr.msk.bf16.gmra.mrb[32].mxu1 %vm171_vm1, %v26310_v46 }
 0x7b4   :  { %23509 = vmatprep.mubr.msk.bf16.mxu1 %vm26838_vm0, %v33080_v13 }
 0x7b6   :  { %v29610_v2 = vpop.f32.mrb[184].mxu1 }
 0x7b7   :  { %v23395_v16 = vpop.f32.mrb[185].mxu1 }
 0x7b8   :  { %v29615_v45 = vpop.f32.mrb[186].mxu1 }
 0x7b9   :  { %v23396_v50 = vpop.f32.mrb[187].mxu1 }
 0x7bb   :  { %23510 = vmatmul.mubr.msk.bf16.gmra.mrb[36].mxu1 %vm171_vm1, %v26311_v39 }
 0x7bc   :  { %23513 = vmatprep.mubr.msk.bf16.mxu1 %vm26838_vm0, %v33080_v13 }
 0x7be   :  { %v29620_v41 = vpop.f32.mrb[188].mxu1 }
 0x7bf   :  { %v23399_v63 = vpop.f32.mrb[189].mxu1 }
 0x7c0   :  { %v29625_v14 = vpop.f32.mrb[190].mxu1  ;;  %v8092_v63 = vadd.f32 %v29630_v24, %v29502_v18  ;;  %v8097_v18 = vadd.f32 %v29630_v24, %v29507_v27 }
 0x7c1   :  { %v23400_v47 = vpop.f32.mrb[191].mxu1 }
 0x7c2   :  { %v8196_v9 = vmax.f32 %v8092_v63, 0.0  ;;  %v8197_v3 = vmax.f32 %v8097_v18, 0.0  ;;  %v26318_v18 = vld [vmem:[%s32841_s0 + $0x358] sm:$0xff]  }
 0x7c3   :  { %23514 = vmatmul.mubr.msk.bf16.gmra.mrb[40].mxu1 %vm171_vm1, %v26312_v7 }
 0x7c4   :  { %23517 = vmatprep.mubr.msk.bf16.mxu1 %vm26838_vm0, %v33080_v13 }
 0x7c6   :  { %v8435_v6 = vpop.f32.mrb[192].mxu1 }
 0x7c7   :  { %v8436_v15 = vadd.f32 %v29630_v24, %v8435_v6  ;;  %v23407_v56 = vpop.f32.mrb[193].mxu1 }
 0x7c8   :  { %v8438_v19 = vpop.f32.mrb[194].mxu1 }
 0x7c9   :  { %v8554_v0 = vmax.f32 %v8436_v15, 0.0  ;;  %v8439_v42 = vadd.f32 %v29630_v24, %v8438_v19  ;;  %v23408_v62 = vpop.f32.mrb[195].mxu1  ;;  %v8195_v15 = vmax.f32 %v8089_v52, 0.0  ;;  %v26317_v52 = vld [vmem:[%s32841_s0 + $0x350] sm:$0xff]  }
 0x7ca   :  { %v8100_v62 = vadd.f32 %v29630_v24, %v29512_v36  ;;  %v8105_v36 = vadd.f32 %v29630_v24, %v29519_v5 }
 0x7cb   :  { %v29644_v34 = vadd.f32 %v8554_v0, %v8191_v26  ;;  %v8555_v17 = vmax.f32 %v8439_v42, 0.0  ;;  %23518 = vmatmul.mubr.msk.bf16.gmra.mrb[44].mxu1 %vm171_vm1, %v26313_v25 }
 0x7cc   :  { %23521 = vmatprep.mubr.msk.bf16.mxu1 %vm26838_vm0, %v33080_v13  ;;  %v8198_v27 = vmax.f32 %v8100_v62, 0.0  ;;  %v8199_v63 = vmax.f32 %v8105_v36, 0.0  ;;  %v26319_v36 = vld [vmem:[%s32841_s0 + $0x360] sm:$0xff]  }
 0x7cd   :  { %v29651_v12 = vadd.f32 %v8555_v17, %v8192_v51 }
 0x7ce   :  { %v8443_v60 = vpop.f32.mrb[196].mxu1 }
 0x7cf   :  { %v8444_v23 = vadd.f32 %v29630_v24, %v8443_v60  ;;  %v23411_v20 = vpop.f32.mrb[197].mxu1 }
 0x7d0   :  { %v8446_v28 = vpop.f32.mrb[198].mxu1 }
 0x7d1   :  { %v8556_v21 = vmax.f32 %v8444_v23, 0.0  ;;  %v8447_v46 = vadd.f32 %v29630_v24, %v8446_v28  ;;  %v23412_v43 = vpop.f32.mrb[199].mxu1 }
 0x7d2   :  { %v8108_v43 = vadd.f32 %v29630_v24, %v29524_v58  ;;  %v8113_v58 = vadd.f32 %v29630_v24, %v29530_v22 }
 0x7d3   :  { %v29660_v11 = vadd.f32 %v8556_v21, %v8193_v54  ;;  %v8557_v39 = vmax.f32 %v8447_v46, 0.0  ;;  %23522 = vmatmul.mubr.msk.bf16.gmra.mrb[48].mxu1 %vm171_vm1, %v26314_v32 }
 0x7d4   :  { %23525 = vmatprep.mubr.msk.bf16.mxu1 %vm26838_vm0, %v33080_v13  ;;  %v8200_v5 = vmax.f32 %v8108_v43, 0.0  ;;  %v8201_v62 = vmax.f32 %v8113_v58, 0.0  ;;  %v26320_v58 = vld [vmem:[%s32841_s0 + $0x368] sm:$0xff]  }
 0x7d5   :  { %v29667_v16 = vadd.f32 %v8557_v39, %v8194_v44 }
 0x7d6   :  { %v8451_v50 = vpop.f32.mrb[200].mxu1 }
 0x7d7   :  { %v8452_v7 = vadd.f32 %v29630_v24, %v8451_v50  ;;  %v23415_v47 = vpop.f32.mrb[201].mxu1 }
 0x7d8   :  { %v8454_v6 = vpop.f32.mrb[202].mxu1 }
 0x7d9   :  { %v8558_v56 = vmax.f32 %v8452_v7, 0.0  ;;  %v8455_v48 = vadd.f32 %v29630_v24, %v8454_v6  ;;  %v23416_v25 = vpop.f32.mrb[203].mxu1 }
 0x7da   :  { %v8116_v25 = vadd.f32 %v29630_v24, %v29535_v31  ;;  %v8121_v31 = vadd.f32 %v29630_v24, %v29540_v40 }
 0x7db   :  { %v29676_v19 = vadd.f32 %v8558_v56, %v8195_v15  ;;  %v8559_v26 = vmax.f32 %v8455_v48, 0.0  ;;  %23526 = vmatmul.mubr.msk.bf16.gmra.mrb[52].mxu1 %vm171_vm1, %v26315_v10 }
 0x7dc   :  { %23533 = vmatprep.mubr.msk.bf16.mxu1 %vm26838_vm0, %v33080_v13  ;;  %v8202_v22 = vmax.f32 %v8116_v25, 0.0  ;;  %v8203_v43 = vmax.f32 %v8121_v31, 0.0  ;;  %v26321_v31 = vld [vmem:[%s32841_s0 + $0x370] sm:$0xff]  }
 0x7dd   :  { %v29683_v0 = vadd.f32 %v8559_v26, %v8196_v9 }
 0x7de   :  { %v8459_v42 = vpop.f32.mrb[204].mxu1 }
 0x7df   :  { %v8460_v51 = vadd.f32 %v29630_v24, %v8459_v42  ;;  %v23419_v17 = vpop.f32.mrb[205].mxu1 }
 0x7e0   :  { %v8462_v60 = vpop.f32.mrb[206].mxu1 }
 0x7e1   :  { %v8560_v23 = vmax.f32 %v8460_v51, 0.0  ;;  %v8463_v20 = vadd.f32 %v29630_v24, %v8462_v60  ;;  %v23420_v32 = vpop.f32.mrb[207].mxu1 }
 0x7e2   :  { %v8124_v32 = vadd.f32 %v29630_v24, %v29545_v8  ;;  %v8129_v8 = vadd.f32 %v29630_v24, %v29550_v33 }
 0x7e3   :  { %v29692_v28 = vadd.f32 %v8560_v23, %v8197_v3  ;;  %v8561_v54 = vmax.f32 %v8463_v20, 0.0  ;;  %23534 = vmatmul.mubr.msk.bf16.vlgmr.msra.gmra.mrb[56].mxu1 %vm171_vm1, %v26316_v53 }
 0x7e4   :  { %23537 = vmatprep.mubr.msk.bf16.mxu1 %vm26838_vm0, %v33080_v13  ;;  %v8204_v40 = vmax.f32 %v8124_v32, 0.0  ;;  %v8205_v25 = vmax.f32 %v8129_v8, 0.0  ;;  %v26322_v8 = vld [vmem:[%s32841_s0 + $0x378] sm:$0xff]  }
 0x7e5   :  { %v29699_v21 = vadd.f32 %v8561_v54, %v8198_v27 }
 0x7e6   :  { %v8467_v46 = vpop.f32.mrb[208].mxu1 }
 0x7e7   :  { %v8468_v44 = vadd.f32 %v29630_v24, %v8467_v46  ;;  %v23423_v39 = vpop.f32.mrb[209].mxu1 }
 0x7e8   :  { %v8470_v50 = vpop.f32.mrb[210].mxu1 }
 0x7e9   :  { %v8562_v7 = vmax.f32 %v8468_v44, 0.0  ;;  %v8471_v47 = vadd.f32 %v29630_v24, %v8470_v50  ;;  %v23424_v10 = vpop.f32.mrb[211].mxu1 }
 0x7ea   :  { %v8132_v10 = vadd.f32 %v29630_v24, %v29555_v29  ;;  %v8137_v29 = vadd.f32 %v29630_v24, %v29560_v30 }
 0x7eb   :  { %v29708_v6 = vadd.f32 %v8562_v7, %v8199_v63  ;;  %v8563_v15 = vmax.f32 %v8471_v47, 0.0  ;;  %23538 = vmatmul.mubr.msk.bf16.gmra.mrb[60].mxu1 %vm171_vm1, %v26317_v52 }
 0x7ec   :  { %23541 = vmatprep.mubr.msk.bf16.mxu1 %vm26838_vm0, %v33080_v13  ;;  %v8206_v33 = vmax.f32 %v8132_v10, 0.0  ;;  %v8207_v32 = vmax.f32 %v8137_v29, 0.0  ;;  %v26323_v29 = vld [vmem:[%s32841_s0 + $0x380] sm:$0xff]  }
 0x7ed   :  { %v29715_v56 = vadd.f32 %v8563_v15, %v8200_v5 }
 0x7ee   :  { %v8475_v48 = vpop.f32.mrb[212].mxu1 }
 0x7ef   :  { %v8476_v9 = vadd.f32 %v29630_v24, %v8475_v48  ;;  %v23427_v26 = vpop.f32.mrb[213].mxu1 }
 0x7f0   :  { %v8478_v42 = vpop.f32.mrb[214].mxu1 }
 0x7f1   :  { %v8564_v51 = vmax.f32 %v8476_v9, 0.0  ;;  %v8479_v17 = vadd.f32 %v29630_v24, %v8478_v42  ;;  %v23428_v53 = vpop.f32.mrb[215].mxu1 }
 0x7f2   :  { %v8140_v53 = vadd.f32 %v29630_v24, %v29565_v37  ;;  %v8145_v37 = vadd.f32 %v29630_v24, %v29570_v55 }
 0x7f3   :  { %v29724_v60 = vadd.f32 %v8564_v51, %v8201_v62  ;;  %v8565_v3 = vmax.f32 %v8479_v17, 0.0  ;;  %23542 = vmatmul.mubr.msk.bf16.gmra.mrb[64].mxu1 %vm171_vm1, %v26318_v18 }
 0x7f4   :  { %23545 = vmatprep.mubr.msk.bf16.mxu1 %vm26838_vm0, %v33080_v13  ;;  %v8208_v30 = vmax.f32 %v8140_v53, 0.0  ;;  %v8209_v10 = vmax.f32 %v8145_v37, 0.0  ;;  %v26324_v37 = vld [vmem:[%s32841_s0 + $0x388] sm:$0xff]  }
 0x7f5   :  { %v29731_v23 = vadd.f32 %v8565_v3, %v8202_v22 }
 0x7f6   :  { %v8483_v20 = vpop.f32.mrb[216].mxu1 }
 0x7f7   :  { %v8484_v27 = vadd.f32 %v29630_v24, %v8483_v20  ;;  %v23431_v54 = vpop.f32.mrb[217].mxu1 }
 0x7f8   :  { %v8486_v46 = vpop.f32.mrb[218].mxu1 }
 0x7f9   :  { %v8566_v44 = vmax.f32 %v8484_v27, 0.0  ;;  %v8487_v39 = vadd.f32 %v29630_v24, %v8486_v46  ;;  %v23432_v52 = vpop.f32.mrb[219].mxu1 }
 0x7fa   :  { %v8148_v52 = vadd.f32 %v29630_v24, %v29575_v38  ;;  %v8153_v38 = vadd.f32 %v29630_v24, %v29580_v1 }
 0x7fb   :  { %v29740_v50 = vadd.f32 %v8566_v44, %v8203_v43  ;;  %v8567_v63 = vmax.f32 %v8487_v39, 0.0  ;;  %23546 = vmatmul.mubr.msk.bf16.gmra.mrb[68].mxu1 %vm171_vm1, %v26319_v36 }
 0x7fc   :  { %23549 = vmatprep.mubr.msk.bf16.mxu1 %vm26838_vm0, %v33080_v13  ;;  %v8210_v55 = vmax.f32 %v8148_v52, 0.0  ;;  %v8211_v53 = vmax.f32 %v8153_v38, 0.0  ;;  %v26325_v38 = vld [vmem:[%s32841_s0 + $0x390] sm:$0xff]  }
 0x7fd   :  { %v29747_v7 = vadd.f32 %v8567_v63, %v8204_v40 }
 0x7fe   :  { %v8491_v47 = vpop.f32.mrb[220].mxu1 }
 0x7ff   :  { %v8492_v5 = vadd.f32 %v29630_v24, %v8491_v47  ;;  %v23435_v15 = vpop.f32.mrb[221].mxu1 }
 0x800   :  { %v8494_v48 = vpop.f32.mrb[222].mxu1 }
 0x801   :  { %v8568_v9 = vmax.f32 %v8492_v5, 0.0  ;;  %v8495_v26 = vadd.f32 %v29630_v24, %v8494_v48  ;;  %v23436_v18 = vpop.f32.mrb[223].mxu1 }
 0x802   :  { %v8156_v18 = vadd.f32 %v29630_v24, %v29585_v61  ;;  %v8161_v61 = vadd.f32 %v29630_v24, %v29590_v4 }
 0x803   :  { %v29756_v42 = vadd.f32 %v8568_v9, %v8205_v25  ;;  %v8569_v62 = vmax.f32 %v8495_v26, 0.0  ;;  %23550 = vmatmul.mubr.msk.bf16.gmra.mrb[72].mxu1 %vm171_vm1, %v26320_v58 }
 0x804   :  { %23553 = vmatprep.mubr.msk.bf16.mxu1 %vm26838_vm0, %v33080_v13  ;;  %v8212_v1 = vmax.f32 %v8156_v18, 0.0  ;;  %v8213_v52 = vmax.f32 %v8161_v61, 0.0  ;;  %v26326_v61 = vld [vmem:[%s32841_s0 + $0x398] sm:$0xff]  }
 0x805   :  { %v29763_v51 = vadd.f32 %v8569_v62, %v8206_v33 }
 0x806   :  { %v8499_v17 = vpop.f32.mrb[224].mxu1 }
 0x807   :  { %v8500_v22 = vadd.f32 %v29630_v24, %v8499_v17  ;;  %v23439_v3 = vpop.f32.mrb[225].mxu1 }
 0x808   :  { %v8502_v20 = vpop.f32.mrb[226].mxu1 }
 0x809   :  { %v8570_v27 = vmax.f32 %v8500_v22, 0.0  ;;  %v8503_v54 = vadd.f32 %v29630_v24, %v8502_v20  ;;  %v23440_v36 = vpop.f32.mrb[227].mxu1 }
 0x80a   :  { %v8164_v36 = vadd.f32 %v29630_v24, %v29595_v57  ;;  %v8169_v57 = vadd.f32 %v29630_v24, %v29600_v49 }
 0x80b   :  { %v29772_v46 = vadd.f32 %v8570_v27, %v8207_v32  ;;  %v8571_v43 = vmax.f32 %v8503_v54, 0.0  ;;  %23554 = vmatmul.mubr.msk.bf16.gmra.mrb[76].mxu1 %vm171_vm1, %v26321_v31 }
 0x80c   :  { %23557 = vmatprep.mubr.msk.bf16.mxu1 %vm26838_vm0, %v33080_v13  ;;  %v8214_v4 = vmax.f32 %v8164_v36, 0.0  ;;  %v8215_v18 = vmax.f32 %v8169_v57, 0.0  ;;  %v26327_v57 = vld [vmem:[%s32841_s0 + $0x3a0] sm:$0xff]  }
 0x80d   :  { %v29779_v44 = vadd.f32 %v8571_v43, %v8208_v30 }
 0x80e   :  { %v8507_v39 = vpop.f32.mrb[228].mxu1 }
 0x80f   :  { %v8508_v40 = vadd.f32 %v29630_v24, %v8507_v39  ;;  %v23443_v63 = vpop.f32.mrb[229].mxu1 }
 0x810   :  { %v8510_v47 = vpop.f32.mrb[230].mxu1 }
 0x811   :  { %v8572_v5 = vmax.f32 %v8508_v40, 0.0  ;;  %v8511_v15 = vadd.f32 %v29630_v24, %v8510_v47  ;;  %v23444_v58 = vpop.f32.mrb[231].mxu1 }
 0x812   :  { %v8172_v58 = vadd.f32 %v29630_v24, %v29605_v35  ;;  %v8177_v35 = vadd.f32 %v29630_v24, %v29610_v2 }
 0x813   :  { %v29788_v48 = vadd.f32 %v8572_v5, %v8209_v10  ;;  %v8573_v25 = vmax.f32 %v8511_v15, 0.0  ;;  %23558 = vmatmul.mubr.msk.bf16.gmra.mrb[80].mxu1 %vm171_vm1, %v26322_v8 }
 0x814   :  { %23561 = vmatprep.mubr.msk.bf16.mxu1 %vm26838_vm0, %v33080_v13  ;;  %v8216_v49 = vmax.f32 %v8172_v58, 0.0  ;;  %v8217_v36 = vmax.f32 %v8177_v35, 0.0 }
 0x815   :  { %v29795_v9 = vadd.f32 %v8573_v25, %v8210_v55 }
 0x816   :  { %v8515_v26 = vpop.f32.mrb[232].mxu1 }
 0x817   :  { %v8516_v33 = vadd.f32 %v29630_v24, %v8515_v26  ;;  %v23447_v62 = vpop.f32.mrb[233].mxu1 }
 0x818   :  { %v8518_v17 = vpop.f32.mrb[234].mxu1 }
 0x819   :  { %v8574_v22 = vmax.f32 %v8516_v33, 0.0  ;;  %v8519_v3 = vadd.f32 %v29630_v24, %v8518_v17  ;;  %v23448_v31 = vpop.f32.mrb[235].mxu1 }
 0x81a   :  { %v8180_v31 = vadd.f32 %v29630_v24, %v29615_v45  ;;  %v8185_v45 = vadd.f32 %v29630_v24, %v29620_v41 }
 0x81b   :  { %v29804_v20 = vadd.f32 %v8574_v22, %v8211_v53  ;;  %v8575_v32 = vmax.f32 %v8519_v3, 0.0  ;;  %23562 = vmatmul.mubr.msk.bf16.gmra.mrb[84].mxu1 %vm171_vm1, %v26323_v29 }
 0x81c   :  { %23565 = vmatprep.mubr.msk.bf16.mxu1 %vm26838_vm0, %v33080_v13  ;;  %v8218_v2 = vmax.f32 %v8180_v31, 0.0  ;;  %v8219_v58 = vmax.f32 %v8185_v45, 0.0 }
 0x81d   :  { %v29811_v27 = vadd.f32 %v8575_v32, %v8212_v1 }
 0x81e   :  { %v8523_v54 = vpop.f32.mrb[236].mxu1 }
 0x81f   :  { %v8524_v30 = vadd.f32 %v29630_v24, %v8523_v54  ;;  %v23451_v43 = vpop.f32.mrb[237].mxu1 }
 0x820   :  { %v8526_v39 = vpop.f32.mrb[238].mxu1 }
 0x821   :  { %v8576_v40 = vmax.f32 %v8524_v30, 0.0  ;;  %v8527_v63 = vadd.f32 %v29630_v24, %v8526_v39  ;;  %v23452_v8 = vpop.f32.mrb[239].mxu1 }
 0x822   :  { %v8188_v8 = vadd.f32 %v29630_v24, %v29625_v14 }
 0x823   :  { %v29820_v47 = vadd.f32 %v8576_v40, %v8213_v52  ;;  %v8577_v10 = vmax.f32 %v8527_v63, 0.0  ;;  %23566 = vmatmul.mubr.msk.bf16.gmra.mrb[88].mxu1 %vm171_vm1, %v26324_v37 }
 0x824   :  { %23569 = vmatprep.mubr.msk.bf16.mxu1 %vm26838_vm0, %v33080_v13  ;;  %v8220_v41 = vmax.f32 %v8188_v8, 0.0  ;;  %v26332_v8 = vld [vmem:[%s32844_s3 + $0x48] sm:$0xff]  }
 0x825   :  { %v29827_v5 = vadd.f32 %v8577_v10, %v8214_v4 }
 0x826   :  { %v8531_v15 = vpop.f32.mrb[240].mxu1 }
 0x827   :  { %v8532_v55 = vadd.f32 %v29630_v24, %v8531_v15  ;;  %v23455_v25 = vpop.f32.mrb[241].mxu1 }
 0x828   :  { %v8534_v26 = vpop.f32.mrb[242].mxu1 }
 0x829   :  { %v8578_v33 = vmax.f32 %v8532_v55, 0.0  ;;  %v8535_v62 = vadd.f32 %v29630_v24, %v8534_v26  ;;  %v23456_v29 = vpop.f32.mrb[243].mxu1 }
 0x82b   :  { %v29836_v17 = vadd.f32 %v8578_v33, %v8215_v18  ;;  %v8579_v53 = vmax.f32 %v8535_v62, 0.0  ;;  %23570 = vmatmul.mubr.msk.bf16.gmra.mrb[92].mxu1 %vm171_vm1, %v26325_v38 }
 0x82c   :  { %23573 = vmatprep.mubr.msk.bf16.mxu1 %vm26838_vm0, %v33080_v13 }
 0x82d   :  { %v29843_v22 = vadd.f32 %v8579_v53, %v8216_v49  ;;  %v26328_v49 = vld [vmem:[%s32841_s0 + $0x3a8] sm:$0xff]  }
 0x82e   :  { %v8539_v3 = vpop.f32.mrb[244].mxu1 }
 0x82f   :  { %v8540_v1 = vadd.f32 %v29630_v24, %v8539_v3  ;;  %v23459_v32 = vpop.f32.mrb[245].mxu1 }
 0x830   :  { %v8542_v54 = vpop.f32.mrb[246].mxu1 }
 0x831   :  { %v8580_v30 = vmax.f32 %v8540_v1, 0.0  ;;  %v8543_v43 = vadd.f32 %v29630_v24, %v8542_v54  ;;  %v23460_v37 = vpop.f32.mrb[247].mxu1 }
 0x833   :  { %v29852_v39 = vadd.f32 %v8580_v30, %v8217_v36  ;;  %v8581_v52 = vmax.f32 %v8543_v43, 0.0  ;;  %23574 = vmatmul.mubr.msk.bf16.gmra.mrb[96].mxu1 %vm171_vm1, %v26326_v61  ;;  %v26329_v43 = vld [vmem:[%s32841_s0 + $0x3b0] sm:$0xff]  }
 0x834   :  { %23577 = vmatprep.mubr.msk.bf16.mxu1 %vm26838_vm0, %v33080_v13 }
 0x835   :  { %v29859_v40 = vadd.f32 %v8581_v52, %v8218_v2 }
 0x836   :  { %v8547_v63 = vpop.f32.mrb[248].mxu1 }
 0x837   :  { %v8548_v4 = vadd.f32 %v29630_v24, %v8547_v63  ;;  %v23463_v10 = vpop.f32.mrb[249].mxu1 }
 0x838   :  { %v8550_v15 = vpop.f32.mrb[250].mxu1 }
 0x839   :  { %v8582_v55 = vmax.f32 %v8548_v4, 0.0  ;;  %v8551_v25 = vadd.f32 %v29630_v24, %v8550_v15  ;;  %v23464_v38 = vpop.f32.mrb[251].mxu1  ;;  %v26330_v15 = vld [vmem:[%s32841_s0 + $0x3b8] sm:$0xff]  }
 0x83b   :  { %v29868_v26 = vadd.f32 %v8582_v55, %v8219_v58  ;;  %v8583_v18 = vmax.f32 %v8551_v25, 0.0  ;;  %23578 = vmatmul.mubr.msk.bf16.gmra.mrb[100].mxu1 %vm171_vm1, %v26327_v57 }
 0x83c   :  { %23581 = vmatprep.mubr.msk.bf16.mxu1 %vm26838_vm0, %v33080_v13 }
 0x83d   :  { %v29873_v14 = vadd.f32 %v8583_v18, %v8220_v41  ;;  %v26333_v18 = vld [vmem:[%s32844_s3 + $0x50] sm:$0xff]  }
 0x83e   :  { %v8798_v33 = vpop.f32.mrb[252].mxu1 }
 0x83f   :  { %v8799_v62 = vadd.f32 %v29630_v24, %v8798_v33  ;;  %v23471_v29 = vpop.f32.mrb[253].mxu1  ;;  %v26334_v33 = vld [vmem:[%s32844_s3 + $0x58] sm:$0xff]  }
 0x840   :  { %v8801_v53 = vpop.f32.mrb[254].mxu1 }
 0x841   :  { %v8917_v35 = vmax.f32 %v8799_v62, 0.0  ;;  %v8802_v3 = vadd.f32 %v29630_v24, %v8801_v53  ;;  %v23472_v31 = vpop.f32.mrb[255].mxu1 }
 0x843   :  { %v29881_v1 = vadd.f32 %v8917_v35, %v29644_v34  ;;  %v8918_v32 = vmax.f32 %v8802_v3, 0.0  ;;  %23582 = vmatmul.mubr.msk.bf16.gmra.mrb[104].mxu1 %vm171_vm1, %v26328_v49 }
 0x844   :  { %23585 = vmatprep.mubr.msk.bf16.mxu1 %vm26838_vm0, %v33080_v13 }
 0x845   :  { %v29887_v61 = vadd.f32 %v8918_v32, %v29651_v12  ;;  %v26331_v12 = vld [vmem:[%s32844_s3 + $0x40] sm:$0xff]  }
 0x846   :  { %v8806_v54 = vpop.f32.mrb[0].mxu1  ;;  %23593 = vmatprep.subr.bf16.mxu1 %v26331_v12 }
 0x847   :  { %v8807_v36 = vadd.f32 %v29630_v24, %v8806_v54  ;;  %v23475_v30 = vpop.f32.mrb[1].mxu1  ;;  %23594 = vmatpush3.bf16.msra.mxu1 %v26331_v12 }
 0x848   :  { %v8809_v37 = vpop.f32.mrb[2].mxu1  ;;  %23595 = vmatprep.subr.bf16.mxu1 %v26332_v8 }
 0x849   :  { %v8919_v34 = vmax.f32 %v8807_v36, 0.0  ;;  %v8810_v2 = vadd.f32 %v29630_v24, %v8809_v37  ;;  %v23476_v52 = vpop.f32.mrb[3].mxu1  ;;  %v26336_v36 = vld [vmem:[%s32844_s3 + $0x68] sm:$0xff]  }
 0x84b   :  { %v29895_v45 = vadd.f32 %v8919_v34, %v29660_v11  ;;  %v8920_v63 = vmax.f32 %v8810_v2, 0.0  ;;  %23586 = vmatmul.mubr.msk.bf16.gmra.mrb[108].mxu1 %vm171_vm1, %v26329_v43 }
 0x84c   :  { %23589 = vmatprep.mubr.msk.bf16.mxu1 %vm26838_vm0, %v33080_v13  ;;  %23596 = vmatpush3.bf16.msra.mxu1 %v26332_v8 }
 0x84d   :  { %v29907_v4 = vadd.f32 %v8920_v63, %v29667_v16  ;;  %23597 = vmatprep.subr.bf16.mxu1 %v26333_v18 }
 0x84e   :  { %v8814_v11 = vpop.f32.mrb[4].mxu1 }
 0x84f   :  { %v8815_v10 = vadd.f32 %v29630_v24, %v8814_v11  ;;  %v23479_v57 = vpop.f32.mrb[5].mxu1  ;;  %v26338_v11 = vld [vmem:[%s32844_s3 + $0x78] sm:$0xff]  }
 0x850   :  { %v8817_v58 = vpop.f32.mrb[6].mxu1  ;;  %23598 = vmatpush3.bf16.msra.mxu1 %v26333_v18 }
 0x851   :  { %v8921_v55 = vmax.f32 %v8815_v10, 0.0  ;;  %v8818_v25 = vadd.f32 %v29630_v24, %v8817_v58  ;;  %v23480_v38 = vpop.f32.mrb[7].mxu1  ;;  %23599 = vmatprep.subr.bf16.mxu1 %v26334_v33 }
 0x853   :  { %v29915_v16 = vadd.f32 %v8921_v55, %v29676_v19  ;;  %v8922_v41 = vmax.f32 %v8818_v25, 0.0  ;;  %23590 = vmatmul.mubr.msk.bf16.gmra.mrb[112].mxu1 %vm171_vm1, %v26330_v15 }
 0x854   :  { %23600 = vmatpush3.bf16.msra.mxu1 %v26334_v33 }
 0x855   :  { %v29925_v62 = vadd.f32 %v8922_v41, %v29683_v0  ;;  %v26335_v0 = vld [vmem:[%s32844_s3 + $0x60] sm:$0xff]  }
 0x856   :  { %v8822_v29 = vpop.f32.mrb[8].mxu1  ;;  %23601 = vmatprep.subr.bf16.mxu1 %v26335_v0 }
 0x857   :  { %v8823_v19 = vadd.f32 %v29630_v24, %v8822_v29  ;;  %v23483_v49 = vpop.f32.mrb[9].mxu1 }
 0x858   :  { %v8825_v53 = vpop.f32.mrb[10].mxu1  ;;  %23602 = vmatpush3.bf16.msra.mxu1 %v26335_v0 }
 0x859   :  { %v8923_v35 = vmax.f32 %v8823_v19, 0.0  ;;  %v8826_v3 = vadd.f32 %v29630_v24, %v8825_v53  ;;  %v23484_v31 = vpop.f32.mrb[11].mxu1  ;;  %23603 = vmatprep.subr.bf16.mxu1 %v26336_v36 }
 0x85b   :  { %v29930_v32 = vadd.f32 %v8923_v35, %v29692_v28  ;;  %v8924_v54 = vmax.f32 %v8826_v3, 0.0 }
 0x85c   :  { %23604 = vmatpush3.bf16.msra.mxu1 %v26336_v36 }
 0x85d   :  { %v29939_v30 = vadd.f32 %v8924_v54, %v29699_v21  ;;  %v26337_v21 = vld [vmem:[%s32844_s3 + $0x70] sm:$0xff]  }
 0x85e   :  { %v8830_v43 = vpop.f32.mrb[12].mxu1  ;;  %23605 = vmatprep.subr.bf16.mxu1 %v26337_v21 }
 0x85f   :  { %v8831_v37 = vadd.f32 %v29630_v24, %v8830_v43  ;;  %v23487_v34 = vpop.f32.mrb[13].mxu1 }
 0x860   :  { %v8833_v28 = vpop.f32.mrb[14].mxu1  ;;  %23606 = vmatpush3.bf16.msra.mxu1 %v26337_v21 }
 0x861   :  { %v8925_v2 = vmax.f32 %v8831_v37, 0.0  ;;  %v8834_v52 = vadd.f32 %v29630_v24, %v8833_v28  ;;  %v23488_v63 = vpop.f32.mrb[15].mxu1  ;;  %23607 = vmatprep.subr.bf16.mxu1 %v26338_v11 }
 0x863   :  { %v29944_v12 = vadd.f32 %v8925_v2, %v29708_v6  ;;  %v8926_v8 = vmax.f32 %v8834_v52, 0.0 }
 0x864   :  { %23608 = vmatpush3.bf16.msra.mxu1 %v26338_v11 }
 0x865   :  { %v29953_v10 = vadd.f32 %v8926_v8, %v29715_v56 }
 0x866   :  { %v8838_v57 = vpop.f32.mrb[16].mxu1 }
 0x867   :  { %v8839_v15 = vadd.f32 %v29630_v24, %v8838_v57  ;;  %v23491_v58 = vpop.f32.mrb[17].mxu1 }
 0x868   :  { %v8841_v6 = vpop.f32.mrb[18].mxu1 }
 0x869   :  { %v8927_v55 = vmax.f32 %v8839_v15, 0.0  ;;  %v8842_v25 = vadd.f32 %v29630_v24, %v8841_v6  ;;  %v23492_v38 = vpop.f32.mrb[19].mxu1 }
 0x86b   :  { %v29958_v41 = vadd.f32 %v8927_v55, %v29724_v60  ;;  %v8928_v18 = vmax.f32 %v8842_v25, 0.0 }
 0x86d   :  { %v29961_v56 = vadd.f32 %v8928_v18, %v29731_v23 }
 0x86e   :  { %v8846_v33 = vpop.f32.mrb[20].mxu1 }
 0x86f   :  { %v8847_v29 = vadd.f32 %v29630_v24, %v8846_v33  ;;  %v23495_v19 = vpop.f32.mrb[21].mxu1 }
 0x870   :  { %v8849_v49 = vpop.f32.mrb[22].mxu1 }
 0x871   :  { %v8929_v53 = vmax.f32 %v8847_v29, 0.0  ;;  %v8850_v35 = vadd.f32 %v29630_v24, %v8849_v49  ;;  %v23496_v3 = vpop.f32.mrb[23].mxu1 }
 0x873   :  { %v29966_v31 = vadd.f32 %v8929_v53, %v29740_v50  ;;  %v8930_v54 = vmax.f32 %v8850_v35, 0.0 }
 0x875   :  { %v29969_v60 = vadd.f32 %v8930_v54, %v29747_v7 }
 0x876   :  { %v8854_v0 = vpop.f32.mrb[24].mxu1 }
 0x877   :  { %v8855_v23 = vadd.f32 %v29630_v24, %v8854_v0  ;;  %v23499_v36 = vpop.f32.mrb[25].mxu1 }
 0x878   :  { %v8857_v43 = vpop.f32.mrb[26].mxu1 }
 0x879   :  { %v8931_v37 = vmax.f32 %v8855_v23, 0.0  ;;  %v8858_v34 = vadd.f32 %v29630_v24, %v8857_v43  ;;  %v23500_v28 = vpop.f32.mrb[27].mxu1 }
 0x87b   :  { %v29974_v2 = vadd.f32 %v8931_v37, %v29756_v42  ;;  %v8932_v52 = vmax.f32 %v8858_v34, 0.0 }
 0x87d   :  { %v29977_v50 = vadd.f32 %v8932_v52, %v29763_v51 }
 0x87e   :  { %v8862_v63 = vpop.f32.mrb[28].mxu1 }
 0x87f   :  { %v8863_v7 = vadd.f32 %v29630_v24, %v8862_v63  ;;  %v23503_v8 = vpop.f32.mrb[29].mxu1 }
 0x880   :  { %v8865_v21 = vpop.f32.mrb[30].mxu1 }
 0x881   :  { %v8933_v11 = vmax.f32 %v8863_v7, 0.0  ;;  %v8866_v57 = vadd.f32 %v29630_v24, %v8865_v21  ;;  %v23504_v15 = vpop.f32.mrb[31].mxu1 }
 0x883   :  { %v29982_v58 = vadd.f32 %v8933_v11, %v29772_v46  ;;  %v8934_v6 = vmax.f32 %v8866_v57, 0.0 }
 0x885   :  { %v29985_v42 = vadd.f32 %v8934_v6, %v29779_v44 }
 0x886   :  { %v8870_v55 = vpop.f32.mrb[32].mxu1 }
 0x887   :  { %v8871_v51 = vadd.f32 %v29630_v24, %v8870_v55  ;;  %v23507_v25 = vpop.f32.mrb[33].mxu1 }
 0x888   :  { %v8873_v38 = vpop.f32.mrb[34].mxu1 }
 0x889   :  { %v8935_v18 = vmax.f32 %v8871_v51, 0.0  ;;  %v8874_v33 = vadd.f32 %v29630_v24, %v8873_v38  ;;  %v23508_v29 = vpop.f32.mrb[35].mxu1 }
 0x88b   :  { %v29990_v19 = vadd.f32 %v8935_v18, %v29788_v48  ;;  %v8936_v49 = vmax.f32 %v8874_v33, 0.0  ;;  %v30003_v48 = vld [vmem:[%s32844_s3] sm:$0xff]  }
 0x88c   :  { %23629 = vmatprep.subr.bf16.mxu1 %v30003_v48 }
 0x88d   :  { %v29993_v46 = vadd.f32 %v8936_v49, %v29795_v9 }
 0x88e   :  { %v8878_v53 = vpop.f32.mrb[36].mxu1 }
 0x88f   :  { %v8879_v44 = vadd.f32 %v29630_v24, %v8878_v53  ;;  %v23511_v35 = vpop.f32.mrb[37].mxu1 }
 0x890   :  { %v8881_v3 = vpop.f32.mrb[38].mxu1 }
 0x891   :  { %v8937_v54 = vmax.f32 %v8879_v44, 0.0  ;;  %v8882_v0 = vadd.f32 %v29630_v24, %v8881_v3  ;;  %v23512_v23 = vpop.f32.mrb[39].mxu1 }
 0x893   :  { %v29998_v36 = vadd.f32 %v8937_v54, %v29804_v20  ;;  %v8938_v43 = vmax.f32 %v8882_v0, 0.0 }
 0x895   :  { %v30006_v9 = vadd.f32 %v8938_v43, %v29811_v27 }
 0x896   :  { %v8886_v37 = vpop.f32.mrb[40].mxu1 }
 0x897   :  { %v8887_v34 = vadd.f32 %v29630_v24, %v8886_v37  ;;  %v23515_v28 = vpop.f32.mrb[41].mxu1 }
 0x898   :  { %v8889_v52 = vpop.f32.mrb[42].mxu1 }
 0x899   :  { %v8939_v63 = vmax.f32 %v8887_v34, 0.0  ;;  %v8890_v20 = vadd.f32 %v29630_v24, %v8889_v52  ;;  %v23516_v7 = vpop.f32.mrb[43].mxu1 }
 0x89b   :  { %v30012_v8 = vadd.f32 %v8939_v63, %v29820_v47  ;;  %v8940_v21 = vmax.f32 %v8890_v20, 0.0 }
 0x89d   :  { %v30015_v11 = vadd.f32 %v8940_v21, %v29827_v5 }
 0x89e   :  { %v8894_v27 = vpop.f32.mrb[44].mxu1 }
 0x89f   :  { %v8895_v57 = vadd.f32 %v29630_v24, %v8894_v27  ;;  %v23519_v15 = vpop.f32.mrb[45].mxu1 }
 0x8a0   :  { %v8897_v6 = vpop.f32.mrb[46].mxu1 }
 0x8a1   :  { %v8941_v55 = vmax.f32 %v8895_v57, 0.0  ;;  %v8898_v51 = vadd.f32 %v29630_v24, %v8897_v6  ;;  %v23520_v25 = vpop.f32.mrb[47].mxu1 }
 0x8a3   :  { %v30020_v38 = vadd.f32 %v8941_v55, %v29836_v17  ;;  %v8942_v18 = vmax.f32 %v8898_v51, 0.0 }
 0x8a5   :  { %v30023_v47 = vadd.f32 %v8942_v18, %v29843_v22 }
 0x8a6   :  { %v8902_v33 = vpop.f32.mrb[48].mxu1 }
 0x8a7   :  { %v8903_v5 = vadd.f32 %v29630_v24, %v8902_v33  ;;  %v23523_v29 = vpop.f32.mrb[49].mxu1 }
 0x8a8   :  { %v8905_v49 = vpop.f32.mrb[50].mxu1 }
 0x8a9   :  { %v8943_v53 = vmax.f32 %v8903_v5, 0.0  ;;  %v8906_v44 = vadd.f32 %v29630_v24, %v8905_v49  ;;  %v23524_v35 = vpop.f32.mrb[51].mxu1 }
 0x8ab   :  { %v30028_v3 = vadd.f32 %v8943_v53, %v29852_v39  ;;  %v8944_v54 = vmax.f32 %v8906_v44, 0.0 }
 0x8ad   :  { %v30031_v17 = vadd.f32 %v8944_v54, %v29859_v40 }
 0x8ae   :  { %v8910_v0 = vpop.f32.mrb[52].mxu1 }
 0x8af   :  { %v8911_v22 = vadd.f32 %v29630_v24, %v8910_v0  ;;  %v23527_v23 = vpop.f32.mrb[53].mxu1 }
 0x8b0   :  { %v8913_v43 = vpop.f32.mrb[54].mxu1 }
 0x8b1   :  { %v8945_v37 = vmax.f32 %v8911_v22, 0.0  ;;  %v8914_v34 = vadd.f32 %v29630_v24, %v8913_v43  ;;  %v23528_v28 = vpop.f32.mrb[55].mxu1 }
 0x8b3   :  { %v30036_v52 = vadd.f32 %v8945_v37, %v29868_v26  ;;  %v8946_v63 = vmax.f32 %v8914_v34, 0.0 }
 0x8b5   :  { %v30039_v39 = vadd.f32 %v8946_v63, %v29873_v14 }
 0x8b6   :  { %v9161_v20 = vpop.f32.mrb[56].mxu1 }
 0x8b7   :  { %v9162_v40 = vadd.f32 %v29630_v24, %v9161_v20  ;;  %v23535_v7 = vpop.f32.mrb[57].mxu1 }
 0x8b8   :  { %v9164_v21 = vpop.f32.mrb[58].mxu1 }
 0x8b9   :  { %v9280_v27 = vmax.f32 %v9162_v40, 0.0  ;;  %v9165_v57 = vadd.f32 %v29630_v24, %v9164_v21  ;;  %v23536_v15 = vpop.f32.mrb[59].mxu1 }
 0x8bb   :  { %v9310_v6 = vadd.f32 %v9280_v27, %v29881_v1  ;;  %v9281_v55 = vmax.f32 %v9165_v57, 0.0 }
 0x8bd   :  { %v9311_v51 = vadd.f32 %v9281_v55, %v29887_v61  ;;  %v9340_v25 = vmul.f32 0.25, %v9310_v6 }
 0x8be   :  { %v9169_v26 = vpop.f32.mrb[60].mxu1 }
 0x8bf   :  { %v9341_v18 = vmul.f32 0.25, %v9311_v51  ;;  %v9170_v14 = vadd.f32 %v29630_v24, %v9169_v26  ;;  %v23539_v33 = vpop.f32.mrb[61].mxu1 }
 0x8c0   :  { %v9172_v5 = vpop.f32.mrb[62].mxu1 }
 0x8c1   :  { %v30046_v29 = vpack.c.bf16 %v9341_v18, %v9340_v25  ;;  %v9282_v49 = vmax.f32 %v9170_v14, 0.0  ;;  %v9173_v53 = vadd.f32 %v29630_v24, %v9172_v5  ;;  %v23540_v44 = vpop.f32.mrb[63].mxu1 }
 0x8c3   :  { %9385 = vst [vmem:[#allocation2] sm:$0xff] %v30046_v29  ;;  %v9312_v1 = vadd.f32 %v9282_v49, %v29895_v45  ;;  %v9283_v35 = vmax.f32 %v9173_v53, 0.0  ;;  %v9446_v54 = vshll.u32 %v30046_v29, 16  ;;  %v9444_v21 = vshrl.u32 %v30046_v29, 16 }
 0x8c5   :  { %v9313_v61 = vadd.f32 %v9283_v35, %v29907_v4  ;;  %v9342_v22 = vmul.f32 0.25, %v9312_v1  ;;  %v9448_v7 = vrot.slane %v9446_v54, 1 }
 0x8c6   :  { %v9177_v0 = vpop.f32.mrb[64].mxu1 }
 0x8c7   :  { %v9343_v23 = vmul.f32 0.25, %v9313_v61  ;;  %v9178_v43 = vadd.f32 %v29630_v24, %v9177_v0  ;;  %v23543_v37 = vpop.f32.mrb[65].mxu1  ;;  %v9449_v6 = vor.u32 %v9448_v7, %v9444_v21 }
 0x8c8   :  { %v9180_v34 = vpop.f32.mrb[66].mxu1 }
 0x8c9   :  { %v30054_v28 = vpack.c.bf16 %v9343_v23, %v9342_v22  ;;  %v9284_v63 = vmax.f32 %v9178_v43, 0.0  ;;  %v9181_v20 = vadd.f32 %v29630_v24, %v9180_v34  ;;  %v23544_v40 = vpop.f32.mrb[67].mxu1 }
 0x8cb   :  { %9386 = vst [vmem:[#allocation2 + $0x8] sm:$0xff] %v30054_v28  ;;  %v9314_v45 = vadd.f32 %v9284_v63, %v29915_v16  ;;  %v9285_v4 = vmax.f32 %v9181_v20, 0.0  ;;  %v9451_v27 = vshll.u32 %v30054_v28, 16  ;;  %v9455_v57 = vshrl.u32 %v30054_v28, 16 }
 0x8cd   :  { %v9315_v15 = vadd.f32 %v9285_v4, %v29925_v62  ;;  %v9453_v55 = vrot.slane %v9451_v27, 1  ;;  %v9344_v26 = vmul.f32 0.25, %v9314_v45  ;;  %v10124_v5 = vrot.slane %v9455_v57, 1 }
 0x8ce   :  { %v9185_v51 = vpop.f32.mrb[68].mxu1  ;;  %v10125_v49 = vrot.slane %v9451_v27, 2 }
 0x8cf   :  { %v9345_v25 = vmul.f32 0.25, %v9315_v15  ;;  %v9186_v18 = vadd.f32 %v29630_v24, %v9185_v51  ;;  %v23547_v14 = vpop.f32.mrb[69].mxu1  ;;  %v9454_v33 = vsel %vm1623_vm2, %v9449_v6, %v9453_v55  ;;  %v9457_v43 = vor.u32 %v9455_v57, %v9453_v55  ;;  %v26341_v51 = vld [vmem:[%s32844_s3 + $0x10] sm:$0xff]  }
 0x8d0   :  { %v9188_v16 = vpop.f32.mrb[70].mxu1  ;;  %23609 = vmatprep.mubr.bf16.mxu1 %v9454_v33  ;;  %v30068_v35 = vor.u32 %v10125_v49, %v10124_v5 }
 0x8d1   :  { %v30065_v53 = vpack.c.bf16 %v9345_v25, %v9344_v26  ;;  %v9286_v44 = vmax.f32 %v9186_v18, 0.0  ;;  %v9189_v1 = vadd.f32 %v29630_v24, %v9188_v16  ;;  %v23548_v62 = vpop.f32.mrb[71].mxu1  ;;  %v26340_v24 = vld [vmem:[%s32844_s3 + $0x8] sm:$0xff]  }
 0x8d3   :  { %9387 = vst [vmem:[#allocation2 + $0x10] sm:$0xff] %v30065_v53  ;;  %v9316_v61 = vadd.f32 %v9286_v44, %v29930_v32  ;;  %v9287_v54 = vmax.f32 %v9189_v1, 0.0  ;;  %v9459_v0 = vshll.u32 %v30065_v53, 16  ;;  %v9463_v22 = vshrl.u32 %v30065_v53, 16  ;;  %v30081_v32 = vld [vmem:[%s32843_s2] ss:$0 sm:$0xff] }
 0x8d5   :  { %v9317_v23 = vadd.f32 %v9287_v54, %v29939_v30  ;;  %v9461_v37 = vrot.slane %v9459_v0, 1  ;;  %v10128_v34 = vrot.slane %v9463_v22, 1  ;;  %v10129_v20 = vrot.slane %v9459_v0, 2 }
 0x8d6   :  { %v9193_v63 = vpop.f32.mrb[72].mxu1  ;;  %v9346_v40 = vmul.f32 0.25, %v9316_v61 }
 0x8d7   :  { %v9347_v7 = vmul.f32 0.25, %v9317_v23  ;;  %v9194_v45 = vadd.f32 %v30081_v32, %v9193_v63  ;;  %v23551_v4 = vpop.f32.mrb[73].mxu1  ;;  %v9462_v30 = vsel %vm1623_vm2, %v9457_v43, %v9461_v37  ;;  %v10130_v27 = vor.u32 %v10129_v20, %v10128_v34  ;;  %v26343_v63 = vld [vmem:[%s32844_s3 + $0x20] sm:$0xff]  }
 0x8d8   :  { %v9196_v21 = vpop.f32.mrb[74].mxu1  ;;  %23610 = vmatmul.mubr.bf16.vlgmr.msra.gmra.mrb[116].mxu1 %v9462_v30  ;;  %v9465_v16 = vor.u32 %v9463_v22, %v9461_v37 }
 0x8d9   :  { %v30085_v57 = vpack.c.bf16 %v9347_v7, %v9346_v40  ;;  %v9288_v15 = vmax.f32 %v9194_v45, 0.0  ;;  %v9197_v6 = vadd.f32 %v30081_v32, %v9196_v21  ;;  %v23552_v55 = vpop.f32.mrb[75].mxu1  ;;  %23630 = vmatpush3.bf16.msra.mxu1 %v30003_v48  ;;  %v30098_v33 = vsel %vm2300_vm3, %v30068_v35, %v10130_v27 }
 0x8da   :  { %23631 = vmatprep.subr.bf16.mxu1 %v26340_v24 }
 0x8db   :  { %9388 = vst [vmem:[#allocation2 + $0x18] sm:$0xff] %v30085_v57  ;;  %v9318_v26 = vadd.f32 %v9288_v15, %v29944_v12  ;;  %v9289_v25 = vmax.f32 %v9197_v6, 0.0  ;;  %v9467_v18 = vshll.u32 %v30085_v57, 16  ;;  %v9471_v14 = vshrl.u32 %v30085_v57, 16  ;;  %v26342_v12 = vld [vmem:[%s32844_s3 + $0x18] sm:$0xff]  }
 0x8dd   :  { %v9319_v48 = vadd.f32 %v9289_v25, %v29953_v10  ;;  %v9469_v5 = vrot.slane %v9467_v18, 1  ;;  %23632 = vmatpush3.bf16.msra.mxu1 %v26340_v24  ;;  %v9348_v44 = vmul.f32 0.25, %v9318_v26  ;;  %v10132_v23 = vrot.slane %v9471_v14, 1 }
 0x8de   :  { %v9201_v49 = vpop.f32.mrb[76].mxu1  ;;  %23633 = vmatprep.subr.bf16.mxu1 %v26341_v51  ;;  %v10133_v10 = vrot.slane %v9467_v18, 2 }
 0x8df   :  { %v9349_v1 = vmul.f32 0.25, %v9319_v48  ;;  %v9202_v62 = vadd.f32 %v30081_v32, %v9201_v49  ;;  %v23555_v61 = vpop.f32.mrb[77].mxu1  ;;  %v9470_v54 = vsel %vm1623_vm2, %v9465_v16, %v9469_v5  ;;  %v9473_v21 = vor.u32 %v9471_v14, %v9469_v5 }
 0x8e0   :  { %v9204_v0 = vpop.f32.mrb[78].mxu1  ;;  %23613 = vmatprep.mubr.bf16.mxu1 %v9470_v54  ;;  %v10134_v20 = vor.u32 %v10133_v10, %v10132_v23 }
 0x8e1   :  { %v30106_v22 = vpack.c.bf16 %v9349_v1, %v9348_v44  ;;  %v9290_v43 = vmax.f32 %v9202_v62, 0.0  ;;  %v9205_v37 = vadd.f32 %v30081_v32, %v9204_v0  ;;  %v23556_v34 = vpop.f32.mrb[79].mxu1  ;;  %23634 = vmatpush3.bf16.msra.mxu1 %v26341_v51  ;;  %v26345_v44 = vld [vmem:[%s32844_s3 + $0x30] sm:$0xff]  }
 0x8e2   :  { %23635 = vmatprep.subr.bf16.mxu1 %v26342_v12  ;;  %v30117_v4 = vsel %vm2300_vm3, %v10130_v27, %v10134_v20  ;;  %v26346_v34 = vld [vmem:[%s32844_s3 + $0x38] sm:$0xff]  }
 0x8e3   :  { %9389 = vst [vmem:[#allocation2 + $0x20] sm:$0xff] %v30106_v22  ;;  %v9320_v24 = vadd.f32 %v9290_v43, %v29958_v41  ;;  %v9291_v40 = vmax.f32 %v9205_v37, 0.0  ;;  %v9475_v7 = vshll.u32 %v30106_v22, 16  ;;  %v9479_v45 = vshrl.u32 %v30106_v22, 16  ;;  %v26344_v41 = vld [vmem:[%s32844_s3 + $0x28] sm:$0xff]  }
 0x8e5   :  { %v9321_v30 = vadd.f32 %v9291_v40, %v29961_v56  ;;  %v9477_v15 = vrot.slane %v9475_v7, 1  ;;  %v10136_v6 = vrot.slane %v9479_v45, 1  ;;  %23636 = vmatpush3.bf16.msra.mxu1 %v26342_v12  ;;  %v10137_v51 = vrot.slane %v9475_v7, 2 }
 0x8e6   :  { %v9209_v55 = vpop.f32.mrb[80].mxu1  ;;  %23637 = vmatprep.subr.bf16.mxu1 %v26343_v63  ;;  %v9350_v26 = vmul.f32 0.25, %v9320_v24 }
 0x8e7   :  { %v9351_v25 = vmul.f32 0.25, %v9321_v30  ;;  %v9210_v18 = vadd.f32 %v30081_v32, %v9209_v55  ;;  %v23559_v48 = vpop.f32.mrb[81].mxu1  ;;  %v9478_v27 = vsel %vm1623_vm2, %v9473_v21, %v9477_v15  ;;  %v10138_v56 = vor.u32 %v10137_v51, %v10136_v6  ;;  %v30150_v55 = vld [vmem:[%s32844_s3 + $0x80] sm:$0xff]  }
 0x8e8   :  { %v9212_v16 = vpop.f32.mrb[82].mxu1  ;;  %23614 = vmatmul.mubr.bf16.gmra.mrb[120].mxu1 %v9478_v27  ;;  %v9481_v10 = vor.u32 %v9479_v45, %v9477_v15 }
 0x8e9   :  { %v30125_v14 = vpack.c.bf16 %v9351_v25, %v9350_v26  ;;  %v9292_v5 = vmax.f32 %v9210_v18, 0.0  ;;  %v9213_v49 = vadd.f32 %v30081_v32, %v9212_v16  ;;  %v23560_v12 = vpop.f32.mrb[83].mxu1  ;;  %23638 = vmatpush3.bf16.msra.mxu1 %v26343_v63  ;;  %v30136_v0 = vsel %vm2300_vm3, %v10134_v20, %v10138_v56 }
 0x8ea   :  { %23639 = vmatprep.subr.bf16.mxu1 %v26344_v41 }
 0x8eb   :  { %9390 = vst [vmem:[#allocation2 + $0x28] sm:$0xff] %v30125_v14  ;;  %v9322_v1 = vadd.f32 %v9292_v5, %v29966_v31  ;;  %v9293_v62 = vmax.f32 %v9213_v49, 0.0  ;;  %v9483_v61 = vshll.u32 %v30125_v14, 16  ;;  %v9487_v54 = vshrl.u32 %v30125_v14, 16 }
 0x8ed   :  { %v9323_v23 = vadd.f32 %v9293_v62, %v29969_v60  ;;  %v9485_v43 = vrot.slane %v9483_v61, 1  ;;  %23640 = vmatpush3.bf16.msra.mxu1 %v26344_v41  ;;  %v9352_v31 = vmul.f32 0.25, %v9322_v1  ;;  %v10140_v30 = vrot.slane %v9487_v54, 1 }
 0x8ee   :  { %v9217_v37 = vpop.f32.mrb[84].mxu1  ;;  %23641 = vmatprep.subr.bf16.mxu1 %v26345_v44  ;;  %v10141_v60 = vrot.slane %v9483_v61, 2 }
 0x8ef   :  { %v9353_v63 = vmul.f32 0.25, %v9323_v23  ;;  %v9218_v24 = vadd.f32 %v30081_v32, %v9217_v37  ;;  %v23563_v40 = vpop.f32.mrb[85].mxu1  ;;  %v9486_v7 = vsel %vm1623_vm2, %v9481_v10, %v9485_v43  ;;  %v9489_v16 = vor.u32 %v9487_v54, %v9485_v43 }
 0x8f0   :  { %v9220_v20 = vpop.f32.mrb[86].mxu1  ;;  %23617 = vmatprep.mubr.bf16.mxu1 %v9486_v7  ;;  %v10142_v51 = vor.u32 %v10141_v60, %v10140_v30 }
 0x8f1   :  { %v30144_v45 = vpack.c.bf16 %v9353_v63, %v9352_v31  ;;  %v9294_v21 = vmax.f32 %v9218_v24, 0.0  ;;  %v9221_v15 = vadd.f32 %v30081_v32, %v9220_v20  ;;  %v23564_v6 = vpop.f32.mrb[87].mxu1  ;;  %23642 = vmatpush3.bf16.msra.mxu1 %v26345_v44 }
 0x8f2   :  { %23643 = vmatprep.subr.bf16.mxu1 %v26346_v34  ;;  %v30157_v48 = vsel %vm2300_vm3, %v10138_v56, %v10142_v51  ;;  %v30160_v12 = vld [vmem:[#allocation2 + $0x28] sm:$0xff] }
 0x8f3   :  { %9391 = vst [vmem:[#allocation2 + $0x30] sm:$0xff] %v30144_v45  ;;  %v9324_v41 = vadd.f32 %v9294_v21, %v29974_v2  ;;  %v9295_v26 = vmax.f32 %v9221_v15, 0.0  ;;  %v9491_v25 = vshll.u32 %v30144_v45, 16  ;;  %v9495_v18 = vshrl.u32 %v30144_v45, 16 }
 0x8f4   :  { %v32920_v2 = vshll.u32 %v30160_v12, 16  ;;  %v32915_v43 = vshrl.u32 %v30160_v12, 16 }
 0x8f5   :  { %v9325_v27 = vadd.f32 %v9295_v26, %v29977_v50  ;;  %v9493_v5 = vrot.slane %v9491_v25, 1  ;;  %v10144_v49 = vrot.slane %v9495_v18, 1  ;;  %23644 = vmatpush3.bf16.msra.mxu1 %v26346_v34  ;;  %v10145_v1 = vrot.slane %v9491_v25, 2 }
 0x8f6   :  { %v9225_v44 = vpop.f32.mrb[88].mxu1  ;;  %23665 = vmatprep.subr.bf16.mxu1 %v30150_v55  ;;  %v9354_v62 = vmul.f32 0.25, %v9324_v41  ;;  %v11369_v24 = vrot.slane %v32920_v2, 2  ;;  %v11368_v40 = vrot.slane %v32915_v43, 1 }
 0x8f7   :  { %v9355_v61 = vmul.f32 0.25, %v9325_v27  ;;  %v9226_v23 = vadd.f32 %v30081_v32, %v9225_v44  ;;  %v23567_v56 = vpop.f32.mrb[89].mxu1  ;;  %v9494_v10 = vsel %vm1623_vm2, %v9489_v16, %v9493_v5  ;;  %v10146_v54 = vor.u32 %v10145_v1, %v10144_v49 }
 0x8f8   :  { %v9228_v50 = vpop.f32.mrb[90].mxu1  ;;  %23618 = vmatmul.mubr.bf16.gmra.mrb[124].mxu1 %v9494_v10  ;;  %v30181_v15 = vor.u32 %v11369_v24, %v11368_v40  ;;  %v9497_v41 = vor.u32 %v9495_v18, %v9493_v5  ;;  %v30189_v18 = vld [vmem:[#allocation2 + $0x20] sm:$0xff] }
 0x8f9   :  { %v30167_v37 = vpack.c.bf16 %v9355_v61, %v9354_v62  ;;  %v9296_v34 = vmax.f32 %v9226_v23, 0.0  ;;  %v9229_v31 = vadd.f32 %v30081_v32, %v9228_v50  ;;  %v23568_v63 = vpop.f32.mrb[91].mxu1  ;;  %v30179_v21 = vsel %vm2300_vm3, %v10142_v51, %v10146_v54 }
 0x8fa   :  { %v32921_v24 = vshll.u32 %v30189_v18, 16  ;;  %v32916_v40 = vshrl.u32 %v30189_v18, 16 }
 0x8fb   :  { %9392 = vst [vmem:[#allocation2 + $0x38] sm:$0xff] %v30167_v37  ;;  %v9326_v7 = vadd.f32 %v9296_v34, %v29982_v58  ;;  %v9297_v20 = vmax.f32 %v9229_v31, 0.0  ;;  %v9499_v30 = vshll.u32 %v30167_v37, 16  ;;  %v9503_v60 = vshrl.u32 %v30167_v37, 16 }
 0x8fd   :  { %v9327_v6 = vadd.f32 %v9297_v20, %v29985_v42  ;;  %v9501_v26 = vrot.slane %v9499_v30, 1  ;;  %v9356_v27 = vmul.f32 0.25, %v9326_v7  ;;  %v10148_v62 = vrot.slane %v9503_v60, 1 }
 0x8fe   :  { %v9233_v25 = vpop.f32.mrb[92].mxu1  ;;  %v10149_v61 = vrot.slane %v9499_v30, 2 }
 0x8ff   :  { %v9357_v16 = vmul.f32 0.25, %v9327_v6  ;;  %v9234_v49 = vadd.f32 %v30081_v32, %v9233_v25  ;;  %v23571_v58 = vpop.f32.mrb[93].mxu1  ;;  %v9502_v44 = vsel %vm1623_vm2, %v9497_v41, %v9501_v26  ;;  %v9505_v20 = vor.u32 %v9503_v60, %v9501_v26 }
 0x900   :  { %v9236_v1 = vpop.f32.mrb[94].mxu1  ;;  %23621 = vmatprep.mubr.bf16.mxu1 %v9502_v44  ;;  %v10150_v5 = vor.u32 %v10149_v61, %v10148_v62  ;;  %v11364_v60 = vrot.slane %v32916_v40, 1  ;;  %v11365_v26 = vrot.slane %v32921_v24, 2 }
 0x901   :  { %v30186_v51 = vpack.c.bf16 %v9357_v16, %v9356_v27  ;;  %v9298_v23 = vmax.f32 %v9234_v49, 0.0  ;;  %v9237_v56 = vadd.f32 %v30081_v32, %v9236_v1  ;;  %v23572_v42 = vpop.f32.mrb[95].mxu1 }
 0x902   :  { %v30196_v63 = vsel %vm2300_vm3, %v10146_v54, %v10150_v5  ;;  %v30201_v41 = vld [vmem:[#allocation2 + $0x38] sm:$0xff] }
 0x903   :  { %9393 = vst [vmem:[#allocation2 + $0x40] sm:$0xff] %v30186_v51  ;;  %v9328_v10 = vadd.f32 %v9298_v23, %v29990_v19  ;;  %v9299_v50 = vmax.f32 %v9237_v56, 0.0  ;;  %v9507_v34 = vshll.u32 %v30186_v51, 16  ;;  %v9511_v31 = vshrl.u32 %v30186_v51, 16 }
 0x904   :  { %v32913_v27 = vshll.u32 %v30201_v41, 16 }
 0x905   :  { %v9329_v7 = vadd.f32 %v9299_v50, %v29993_v46  ;;  %v9509_v30 = vrot.slane %v9507_v34, 1  ;;  %v10152_v6 = vrot.slane %v9511_v31, 1  ;;  %v10153_v25 = vrot.slane %v9507_v34, 2 }
 0x906   :  { %v9241_v19 = vpop.f32.mrb[96].mxu1  ;;  %v9358_v16 = vmul.f32 0.25, %v9328_v10  ;;  %v32912_v46 = vshrl.u32 %v30201_v41, 16  ;;  %v11377_v10 = vrot.slane %v32913_v27, 2 }
 0x907   :  { %v9359_v49 = vmul.f32 0.25, %v9329_v7  ;;  %v9242_v54 = vadd.f32 %v30081_v32, %v9241_v19  ;;  %v23575_v58 = vpop.f32.mrb[97].mxu1  ;;  %v9510_v44 = vsel %vm1623_vm2, %v9505_v20, %v9509_v30  ;;  %v10154_v62 = vor.u32 %v10153_v25, %v10152_v6  ;;  %v30224_v19 = vld [vmem:[#allocation2 + $0x30] sm:$0xff] }
 0x908   :  { %v9244_v1 = vpop.f32.mrb[98].mxu1  ;;  %23622 = vmatmul.mubr.bf16.gmra.mrb[128].mxu1 %v9510_v44  ;;  %v11376_v34 = vrot.slane %v32912_v46, 1 }
 0x909   :  { %v30211_v61 = vpack.c.bf16 %v9359_v49, %v9358_v16  ;;  %v9300_v23 = vmax.f32 %v9242_v54, 0.0  ;;  %v9245_v56 = vadd.f32 %v30081_v32, %v9244_v1  ;;  %v23576_v42 = vpop.f32.mrb[99].mxu1  ;;  %v30217_v50 = vsel %vm2300_vm3, %v10150_v5, %v10154_v62 }
 0x90a   :  { %v11378_v16 = vor.u32 %v11377_v10, %v11376_v34  ;;  %v30227_v49 = vor.u32 %v11365_v26, %v11364_v60  ;;  %v9513_v54 = vor.u32 %v9511_v31, %v9509_v30  ;;  %v30230_v44 = vld [vmem:[#allocation2 + $0x40] sm:$0xff]  ;;  %v32914_v42 = vshrl.u32 %v30224_v19, 16 }
 0x90b   :  { %9394 = vst [vmem:[#allocation2 + $0x48] sm:$0xff] %v30211_v61  ;;  %v9330_v7 = vadd.f32 %v9300_v23, %v29998_v36  ;;  %v9301_v20 = vmax.f32 %v9245_v56, 0.0  ;;  %v9515_v6 = vshll.u32 %v30211_v61, 16  ;;  %v9519_v25 = vshrl.u32 %v30211_v61, 16 }
 0x90c   :  { %v32919_v31 = vshll.u32 %v30224_v19, 16  ;;  %v32917_v30 = vshrl.u32 %v30230_v44, 16 }
 0x90d   :  { %v9331_v5 = vadd.f32 %v9301_v20, %v30006_v9  ;;  %v9517_v58 = vrot.slane %v9515_v6, 1  ;;  %v9360_v36 = vmul.f32 0.25, %v9330_v7  ;;  %v10156_v60 = vrot.slane %v9519_v25, 1 }
 0x90e   :  { %v9249_v1 = vpop.f32.mrb[100].mxu1  ;;  %v10157_v9 = vrot.slane %v9515_v6, 2 }
 0x90f   :  { %v9361_v23 = vmul.f32 0.25, %v9331_v5  ;;  %v9250_v56 = vadd.f32 %v30081_v32, %v9249_v1  ;;  %v23579_v59 = vpop.f32.mrb[101].mxu1  ;;  %v9518_v46 = vsel %vm1623_vm2, %v9513_v54, %v9517_v58  ;;  %v30252_v54 = vsel %vm2300_vm3, %v30227_v49, %v30181_v15 }
 0x910   :  { %v9252_v27 = vpop.f32.mrb[102].mxu1  ;;  %23625 = vmatprep.mubr.bf16.mxu1 %v9518_v46  ;;  %v32918_v59 = vshll.u32 %v30230_v44, 16  ;;  %v30243_v20 = vor.u32 %v10157_v9, %v10156_v60  ;;  %v11372_v46 = vrot.slane %v32914_v42, 1  ;;  %v11373_v1 = vrot.slane %v32919_v31, 2 }
 0x911   :  { %v30239_v26 = vpack.c.bf16 %v9361_v23, %v9360_v36  ;;  %v9302_v10 = vmax.f32 %v9250_v56, 0.0  ;;  %v9253_v34 = vadd.f32 %v30081_v32, %v9252_v27  ;;  %v23580_v7 = vpop.f32.mrb[103].mxu1  ;;  %v11380_v36 = vrot.slane %v32917_v30, 1 }
 0x912   :  { %v30256_v27 = vsel %vm2300_vm3, %v10154_v62, %v30243_v20  ;;  %v30263_v56 = vld [vmem:[#allocation2 + $0x48] sm:$0xff]  ;;  %v11374_v62 = vor.u32 %v11373_v1, %v11372_v46 }
 0x913   :  { %9395 = vst [vmem:[#allocation2 + $0x50] sm:$0xff] %v30239_v26  ;;  %v9332_v6 = vadd.f32 %v9302_v10, %v30012_v8  ;;  %v9303_v5 = vmax.f32 %v9253_v34, 0.0  ;;  %v11381_v8 = vrot.slane %v32918_v59, 2  ;;  %v32932_v9 = vshll.u32 %v30263_v56, 16 }
 0x914   :  { %v32930_v10 = vshrl.u32 %v30263_v56, 16  ;;  %v30277_v46 = vsel %vm2300_vm3, %v30181_v15, %v11374_v62  ;;  %v30282_v1 = vsel %vm2300_vm3, %v11374_v62, %v11378_v16 }
 0x915   :  { %v9333_v23 = vadd.f32 %v9303_v5, %v30015_v11  ;;  %v9362_v34 = vmul.f32 0.25, %v9332_v6  ;;  %v11382_v40 = vor.u32 %v11381_v8, %v11380_v36  ;;  %v11385_v5 = vrot.slane %v32932_v9, 2 }
 0x916   :  { %v9257_v60 = vpop.f32.mrb[104].mxu1  ;;  %v11384_v11 = vrot.slane %v32930_v10, 1 }
 0x917   :  { %v9363_v7 = vmul.f32 0.25, %v9333_v23  ;;  %v9258_v42 = vadd.f32 %v30081_v32, %v9257_v60  ;;  %v23583_v43 = vpop.f32.mrb[105].mxu1 }
 0x918   :  { %v9260_v30 = vpop.f32.mrb[106].mxu1  ;;  %v11386_v43 = vor.u32 %v11385_v5, %v11384_v11 }
 0x919   :  { %v9381_v59 = vpack.c.bf16 %v9363_v7, %v9362_v34  ;;  %v9304_v31 = vmax.f32 %v9258_v42, 0.0  ;;  %v9261_v2 = vadd.f32 %v30081_v32, %v9260_v30  ;;  %v23584_v24 = vpop.f32.mrb[107].mxu1  ;;  %v30287_v42 = vsel %vm2300_vm3, %v11378_v16, %v11382_v40 }
 0x91a   :  { %v30279_v6 = vld [vmem:[#allocation2 + $0x50] sm:$0x1]  ;;  %v30290_v24 = vsel %vm2300_vm3, %v11382_v40, %v11386_v43  ;;  %v9521_v30 = vor.u32 %v9519_v25, %v9517_v58 }
 0x91b   :  { %9396 = vst [vmem:[#allocation2 + $0x58] sm:$0xff] %v9381_v59  ;;  %v9334_v36 = vadd.f32 %v9304_v31, %v30020_v38  ;;  %v9305_v23 = vmax.f32 %v9261_v2, 0.0  ;;  %v9523_v8 = vshll.u32 %v30279_v6, 16  ;;  %v30295_v62 = vld [vmem:[#allocation2 + $0x50] sm:$0xff] }
 0x91c   :  { %v32931_v38 = vshll.u32 %v30295_v62, 16  ;;  %v32927_v40 = vshrl.u32 %v30295_v62, 16 }
 0x91d   :  { %v9335_v15 = vadd.f32 %v9305_v23, %v30023_v47  ;;  %v9525_v60 = vrot.slane %v9523_v8, 1  ;;  %v9364_v59 = vmul.f32 0.25, %v9334_v36 }
 0x91e   :  { %v9265_v34 = vpop.f32.mrb[108].mxu1  ;;  %v11388_v36 = vrot.slane %v32927_v40, 1  ;;  %v30404_v40 = vld [vmem:[#allocation2 + $0x40] sm:$0xff] }
 0x91f   :  { %v9365_v2 = vmul.f32 0.25, %v9335_v15  ;;  %v9266_v31 = vadd.f32 %v30081_v32, %v9265_v34  ;;  %v23587_v16 = vpop.f32.mrb[109].mxu1  ;;  %v9526_v7 = vsel %vm1623_vm2, %v9521_v30, %v9525_v60  ;;  %v11389_v15 = vrot.slane %v32931_v38, 2 }
 0x920   :  { %v9268_v11 = vpop.f32.mrb[110].mxu1  ;;  %23626 = vmatmul.mubr.bf16.gmra.mrb[132].mxu1 %v9526_v7 }
 0x921   :  { %v9382_v47 = vpack.c.bf16 %v9365_v2, %v9364_v59  ;;  %v9306_v5 = vmax.f32 %v9266_v31, 0.0  ;;  %v9269_v25 = vadd.f32 %v30081_v32, %v9268_v11  ;;  %23645 = vmatprep.mubr.bf16.mxu1 %v30046_v29  ;;  %v23588_v58 = vpop.f32.mrb[111].mxu1  ;;  %v30309_v60 = vor.u32 %v11389_v15, %v11388_v36  ;;  %v26348_v29 = vld [vmem:[%s32844_s3 + $0x88] sm:$0xff]  }
 0x923   :  { %9397 = vst [vmem:[#allocation2 + $0x60] sm:$0xff] %v9382_v47  ;;  %v9336_v23 = vadd.f32 %v9306_v5, %v30028_v3  ;;  %v9307_v8 = vmax.f32 %v9269_v25, 0.0  ;;  %33081 = vst [vmem:[#allocation7_spill] sm:$0xff] %v30309_v60  ;;  %v30317_v3 = vsel %vm2300_vm3, %v11386_v43, %v30309_v60  ;;  %v26349_v25 = vld [vmem:[%s32844_s3 + $0x90] sm:$0xff]  }
 0x924   :  { %33082 = vst [vmem:[#allocation8_spill] sm:$0xff] %v30317_v3 }
 0x925   :  { %v9337_v30 = vadd.f32 %v9307_v8, %v30031_v17  ;;  %v9366_v34 = vmul.f32 0.25, %v9336_v23  ;;  %v30331_v8 = vld [vmem:[#allocation2 + $0x58] sm:$0xff] }
 0x926   :  { %v9273_v59 = vpop.f32.mrb[112].mxu1  ;;  %33083 = vst [vmem:[#allocation9_spill] sm:$0xff] %v30331_v8 }
 0x927   :  { %v9367_v2 = vmul.f32 0.25, %v9337_v30  ;;  %v9274_v31 = vadd.f32 %v30081_v32, %v9273_v59  ;;  %v23591_v16 = vpop.f32.mrb[113].mxu1  ;;  %v32923_v30 = vshrl.u32 %v30331_v8, 16  ;;  %v26352_v59 = vld [vmem:[%s32844_s3 + $0xa8] sm:$0xff]  }
 0x928   :  { %v9276_v7 = vpop.f32.mrb[114].mxu1  ;;  %23646 = vmatmul.mubr.bf16.vlgmr.msra.gmra.mrb[116].mxu1 %v30054_v28 }
 0x929   :  { %v9383_v17 = vpack.c.bf16 %v9367_v2, %v9366_v34  ;;  %v9308_v11 = vmax.f32 %v9274_v31, 0.0  ;;  %v9277_v47 = vadd.f32 %v30081_v32, %v9276_v7  ;;  %23649 = vmatprep.mubr.bf16.mxu1 %v30065_v53  ;;  %23666 = vmatpush3.bf16.msra.mxu1 %v30150_v55  ;;  %v23592_v5 = vpop.f32.mrb[115].mxu1  ;;  %v26350_v32 = vld [vmem:[%s32844_s3 + $0x98] sm:$0xff]   ;;  %v26353_v31 = vld [vmem:[%s32844_s3 + $0xb0] sm:$0xff]   ;;  %v30359_v7 = vld [vmem:[#allocation2 + $0x28] sm:$0xff] }
 0x92a   :  { %23667 = vmatprep.subr.bf16.mxu1 %v26348_v29  ;;  %v30366_v5 = vld [vmem:[#allocation2 + $0x38] sm:$0xff] }
 0x92b   :  { %9398 = vst [vmem:[#allocation2 + $0x68] sm:$0xff] %v9383_v17  ;;  %v9338_v43 = vadd.f32 %v9308_v11, %v30036_v52  ;;  %v9309_v58 = vmax.f32 %v9277_v47, 0.0  ;;  %v26351_v52 = vld [vmem:[%s32844_s3 + $0xa0] sm:$0xff]   ;;  %v32933_v17 = vshll.u32 %v30359_v7, 16  ;;  %v26354_v11 = vld [vmem:[%s32844_s3 + $0xb8] sm:$0xff]   ;;  %v32922_v47 = vshrl.u32 %v30359_v7, 16 }
 0x92c   :  { %33085 = vst [vmem:[#allocation12_spill] sm:$0xff] %v30366_v5 }
 0x92d   :  { %v9339_v36 = vadd.f32 %v9309_v58, %v30039_v39  ;;  %23668 = vmatpush3.bf16.msra.mxu1 %v26348_v29  ;;  %v9368_v23 = vmul.f32 0.25, %v9338_v43  ;;  %v32926_v39 = vshll.u32 %v30331_v8, 16  ;;  %v12620_v29 = vrot.slane %v32923_v30, 1  ;;  %v30371_v43 = vld [vmem:[#allocation2] sm:$0xfe] }
 0x92e   :  { %23669 = vmatprep.subr.bf16.mxu1 %v26349_v25  ;;  %v13824_v58 = vrot.slane %v32922_v47, 1  ;;  %v9896_v8 = vrot.slane %v30125_v14, 1 }
 0x92f   :  { %v9369_v55 = vmul.f32 0.25, %v9339_v36  ;;  %v12621_v34 = vrot.slane %v32926_v39, 2  ;;  %v32925_v36 = vshll.u32 %v30366_v5, 16  ;;  %v30401_v39 = vld [vmem:[#allocation2 + $0x30] sm:$0xff] }
 0x930   :  { %23650 = vmatmul.mubr.bf16.gmra.mrb[120].mxu1 %v30085_v57  ;;  %33088 = vst [vmem:[#allocation15_spill] sm:$0xff] %v30401_v39 }
 0x931   :  { %v9384_v15 = vpack.c.bf16 %v9369_v55, %v9368_v23  ;;  %23653 = vmatprep.mubr.bf16.mxu1 %v30106_v22  ;;  %23670 = vmatpush3.bf16.msra.mxu1 %v26349_v25  ;;  %v30348_v2 = vor.u32 %v12621_v34, %v12620_v29  ;;  %v13825_v25 = vrot.slane %v32933_v17, 2  ;;  %v30378_v23 = vld [vmem:[#allocation2 + $0x48] sm:$0xff]  ;;  %v26355_v55 = vld [vmem:[%s32844_s3 + $0xc0] sm:$0xff]   ;;  %v13833_v34 = vrot.slane %v32925_v36, 2 }
 0x932   :  { %23671 = vmatprep.subr.bf16.mxu1 %v26350_v32  ;;  %33086 = vst [vmem:[#allocation13_spill] sm:$0xff] %v30378_v23  ;;  %v32928_v47 = vshrl.u32 %v30378_v23, 16 }
 0x933   :  { %9399 = vst [vmem:[#allocation2 + $0x70] sm:$0xff] %v9384_v15  ;;  %v30357_v16 = vsel %vm2300_vm3, %v30309_v60, %v30348_v2  ;;  %v30383_v15 = vor.u32 %v13825_v25, %v13824_v58 }
 0x934   :  { %33084 = vst [vmem:[#allocation11_spill] sm:$0xff] %v30357_v16  ;;  %v13840_v25 = vrot.slane %v32928_v47, 1  ;;  %v30409_v47 = vld [vmem:[#allocation2 + $0x60] sm:$0xff] }
 0x935   :  { %23672 = vmatpush3.bf16.msra.mxu1 %v26350_v32  ;;  %v32924_v32 = vshrl.u32 %v30366_v5, 16  ;;  %33087 = vst [vmem:[#allocation14_spill] sm:$0xff] %v30383_v15 }
 0x936   :  { %23673 = vmatprep.subr.bf16.mxu1 %v26351_v52 }
 0x937   :  { %v13832_v29 = vrot.slane %v32924_v32, 1  ;;  %v30399_v32 = vld [vmem:[#allocation2 + $0x20] sm:$0xff] }
 0x938   :  { %23654 = vmatmul.mubr.bf16.gmra.mrb[124].mxu1 %v30125_v14 }
 0x939   :  { %23657 = vmatprep.mubr.bf16.mxu1 %v30144_v45  ;;  %23674 = vmatpush3.bf16.msra.mxu1 %v26351_v52  ;;  %v9887_v52 = vrot.slane %v30371_v43, 1  ;;  %v13834_v30 = vor.u32 %v13833_v34, %v13832_v29  ;;  %v30406_v29 = vld [vmem:[#allocation2 + $0x50] sm:$0xff]  ;;  %v9892_v34 = vrot.slane %v30085_v57, 1  ;;  %v33090_v57 = vshll.u32 %v30401_v39, 16 }
 0x93a   :  { %23675 = vmatprep.subr.bf16.mxu1 %v26352_v59 }
 0x93d   :  { %23676 = vmatpush3.bf16.msra.mxu1 %v26352_v59  ;;  %v9888_v59 = vrot.slane %v30054_v28, 1 }
 0x93e   :  { %23677 = vmatprep.subr.bf16.mxu1 %v26353_v31 }
 0x93f   :  { %v9889_v28 = vsel %vm2069_vm4, %v9887_v52, %v9888_v59  ;;  %v13288_v52 = vshll.u32 %v30399_v32, 16 }
 0x940   :  { %23658 = vmatmul.mubr.bf16.gmra.mrb[128].mxu1 %v30167_v37 }
 0x941   :  { %23661 = vmatprep.mubr.bf16.mxu1 %v30186_v51  ;;  %23678 = vmatpush3.bf16.msra.mxu1 %v26353_v31  ;;  %v32929_v31 = vshll.u32 %v30378_v23, 16  ;;  %v13821_v13 = vrot.slane %v13288_v52, 2  ;;  %v13829_v23 = vrot.slane %v33090_v57, 2  ;;  %v33094_v57 = vshll.u32 %v30406_v29, 16 }
 0x942   :  { %23679 = vmatprep.subr.bf16.mxu1 %v26354_v11 }
 0x943   :  { %v13841_v58 = vrot.slane %v32929_v31, 2  ;;  %v13292_v31 = vshrl.u32 %v30399_v32, 16  ;;  %v33093_v32 = vshrl.u32 %v30406_v29, 16 }
 0x945   :  { %23680 = vmatpush3.bf16.msra.mxu1 %v26354_v11  ;;  %v13842_v36 = vor.u32 %v13841_v58, %v13840_v25  ;;  %v9890_v11 = vrot.slane %v30065_v53, 1  ;;  %v26356_v53 = vld [vmem:[%s32844_s3 + $0xc8] sm:$0xff]   ;;  %v13820_v25 = vrot.slane %v13292_v31, 1  ;;  %v33089_v58 = vshrl.u32 %v30401_v39, 16 }
 0x946   :  { %23701 = vmatprep.subr.bf16.mxu1 %v26355_v55  ;;  %v13844_v9 = vrot.slane %v33093_v32, 1  ;;  %v33095_v39 = vshrl.u32 %v30409_v47, 16 }
 0x947   :  { %v9891_v38 = vsel %vm2069_vm4, %v9888_v59, %v9890_v11  ;;  %v9893_v17 = vsel %vm2069_vm4, %v9890_v11, %v9892_v34  ;;  %v13828_v10 = vrot.slane %v33089_v58, 1  ;;  %v9894_v59 = vrot.slane %v30106_v22, 1 }
 0x948   :  { %23662 = vmatmul.mubr.bf16.gmra.mrb[132].mxu1 %v30211_v61  ;;  %v33091_v11 = vshrl.u32 %v30404_v40, 16  ;;  %v30440_v58 = vor.u32 %v13821_v13, %v13820_v25  ;;  %v13845_v22 = vrot.slane %v33094_v57, 2  ;;  %v13852_v16 = vrot.slane %v33095_v39, 1 }
 0x949   :  { %23681 = vmatprep.mubr.bf16.mxu1 %v9889_v28  ;;  %v13830_v5 = vor.u32 %v13829_v23, %v13828_v10  ;;  %v26358_v23 = vld [vmem:[%s32844_s3 + $0xd8] sm:$0xff]  }
 0x94a   :  { %v13836_v28 = vrot.slane %v33091_v11, 1  ;;  %v33096_v11 = vshll.u32 %v30409_v47, 16  ;;  %v30452_v32 = vsel %vm2300_vm3, %v30440_v58, %v30383_v15  ;;  %v30461_v39 = vor.u32 %v13845_v22, %v13844_v9 }
 0x94b   :  { %v30456_v13 = vsel %vm2300_vm3, %v30383_v15, %v13830_v5  ;;  %v30459_v10 = vsel %vm2300_vm3, %v13830_v5, %v13834_v30  ;;  %v9904_v15 = vrot.slane %v30211_v61, 1 }
 0x94c   :  { %v13853_v3 = vrot.slane %v33096_v11, 2  ;;  %v30477_v5 = vsel %vm2300_vm3, %v13842_v36, %v30461_v39  ;;  %v30482_v9 = vsel %vm2300_vm3, %v30461_v39, %v30348_v2  ;;  %v30510_v11 = vld [vmem:[#allocation2 + $0x58] sm:$0xff] }
 0x94d   :  { %33099 = vst [vmem:[#allocation19_spill] sm:$0xff] %v30477_v5  ;;  %33100 = vst [vmem:[#allocation17_spill] sm:$0xff] %v30482_v9 }
 0x94e   :  { %33103 = vst [vmem:[#allocation10_spill] sm:$0xff] %v30510_v11 }
 0x950   :  { %23682 = vmatmul.mubr.bf16.vlgmr.msra.gmra.mrb[116].mxu1 %v9891_v38  ;;  %v26357_v38 = vld [vmem:[%s32844_s3 + $0xd0] sm:$0xff]  }
 0x951   :  { %23685 = vmatprep.mubr.bf16.mxu1 %v9893_v17  ;;  %23702 = vmatpush3.bf16.msra.mxu1 %v26355_v55  ;;  %v33092_v17 = vshll.u32 %v30404_v40, 16 }
 0x952   :  { %23703 = vmatprep.subr.bf16.mxu1 %v26356_v53 }
 0x953   :  { %v13837_v55 = vrot.slane %v33092_v17, 2  ;;  %v9895_v17 = vsel %vm2069_vm4, %v9892_v34, %v9894_v59  ;;  %v33102_v34 = vshll.u32 %v30359_v7, 16 }
 0x955   :  { %v13838_v60 = vor.u32 %v13837_v55, %v13836_v28  ;;  %23704 = vmatpush3.bf16.msra.mxu1 %v26356_v53  ;;  %v30472_v53 = vor.u32 %v13853_v3, %v13852_v16  ;;  %v30490_v3 = vrot.slane %v13288_v52, 1  ;;  %v26359_v16 = vld [vmem:[%s32844_s3 + $0xe0] sm:$0xff]   ;;  %v30498_v55 = vrot.slane %v33102_v34, 1  ;;  %v26360_v52 = vld [vmem:[%s32844_s3 + $0xe8] sm:$0xff]  }
 0x956   :  { %23705 = vmatprep.subr.bf16.mxu1 %v26357_v38  ;;  %v10120_v34 = vshll.u32 %v30371_v43, 16 }
 0x957   :  { %v30467_v28 = vsel %vm2300_vm3, %v13834_v30, %v13838_v60  ;;  %v30470_v25 = vsel %vm2300_vm3, %v13838_v60, %v13842_v36  ;;  %v9897_v30 = vsel %vm2069_vm4, %v9894_v59, %v9896_v8  ;;  %v30488_v60 = vsel %vm2300_vm3, %v30348_v2, %v30472_v53 }
 0x958   :  { %33097 = vst [vmem:[#allocation16_spill] sm:$0xff] %v30467_v28  ;;  %33098 = vst [vmem:[#allocation18_spill] sm:$0xff] %v30470_v25  ;;  %23686 = vmatmul.mubr.bf16.gmra.mrb[120].mxu1 %v9895_v17  ;;  %v9898_v36 = vrot.slane %v30144_v45, 1  ;;  %v9900_v59 = vrot.slane %v30167_v37, 1  ;;  %v14518_v57 = vor.u32 %v13292_v31, %v30490_v3  ;;  %v9902_v31 = vrot.slane %v30186_v51, 1 }
 0x959   :  { %33101 = vst [vmem:[#allocation20_spill] sm:$0xff] %v30488_v60  ;;  %23689 = vmatprep.mubr.bf16.mxu1 %v9897_v30  ;;  %23706 = vmatpush3.bf16.msra.mxu1 %v26357_v38  ;;  %v30514_v30 = vld [vmem:[#allocation2 + $0x68] sm:$0xff]  ;;  %v10122_v9 = vrot.slane %v10120_v34, 2  ;;  %v26363_v34 = vld [vmem:[%s32844_s3 + $0x100] sm:$0xff]   ;;  %v9906_v28 = vrot.slane %v30279_v6, 1 }
 0x95a   :  { %23707 = vmatprep.subr.bf16.mxu1 %v26358_v23  ;;  %v9899_v38 = vsel %vm2069_vm4, %v9896_v8, %v9898_v36  ;;  %v30508_v22 = vsel %vm1623_vm2, %v14518_v57, %v30498_v55  ;;  %v9901_v17 = vsel %vm2069_vm4, %v9898_v36, %v9900_v59  ;;  %33104 = vst [vmem:[#allocation21_spill] sm:$0xff] %v30514_v30  ;;  %v26361_v8 = vld [vmem:[%s32844_s3 + $0xf0] sm:$0xff]   ;;  %v32948_v57 = vshrl.u32 %v30510_v11, 16 }
 0x95b   :  { %v33105_v25 = vshrl.u32 %v30514_v30, 16 }
 0x95c   :  { %v15076_v5 = vrot.slane %v32948_v57, 1  ;;  %v30543_v57 = vrot.slane %v30409_v47, 2 }
 0x95d   :  { %23708 = vmatpush3.bf16.msra.mxu1 %v26358_v23  ;;  %v10117_v23 = vshrl.u32 %v30371_v43, 16  ;;  %v26362_v43 = vld [vmem:[%s32844_s3 + $0xf8] sm:$0xff]  }
 0x95e   :  { %23709 = vmatprep.subr.bf16.mxu1 %v26359_v16  ;;  %33106 = vst [vmem:[#allocation22_spill] sm:$0xff] %v30543_v57 }
 0x95f   :  { %v10119_v60 = vrot.slane %v10117_v23, 1  ;;  %v15084_v23 = vrot.slane %v33105_v25, 1 }
 0x960   :  { %23690 = vmatmul.mubr.bf16.gmra.mrb[124].mxu1 %v9899_v38  ;;  %v32949_v38 = vshll.u32 %v30510_v11, 16 }
 0x961   :  { %23693 = vmatprep.mubr.bf16.mxu1 %v9901_v17  ;;  %23710 = vmatpush3.bf16.msra.mxu1 %v26359_v16  ;;  %v32951_v16 = vshll.u32 %v30514_v30, 16  ;;  %v9903_v17 = vsel %vm2069_vm4, %v9900_v59, %v9902_v31  ;;  %v10123_v25 = vor.u32 %v10122_v9, %v10119_v60  ;;  %v9907_v9 = vsel %vm2069_vm4, %v9904_v15, %v9906_v28 }
 0x962   :  { %23711 = vmatprep.subr.bf16.mxu1 %v26360_v52  ;;  %v15077_v36 = vrot.slane %v32949_v38, 2 }
 0x963   :  { %v15085_v59 = vrot.slane %v32951_v16, 2  ;;  %v15320_v16 = vrot.slane %v30510_v11, 2  ;;  %v10127_v60 = vsel %vm2300_vm3, %v10123_v25, %v30068_v35  ;;  %v26366_v35 = vld [vmem:[%s32844_s3 + $0x118] sm:$0xff]   ;;  %v26789_v25 = vld [vmem:[#allocation2 + $0x8] sm:$0xff] }
 0x964   :  { %v15078_v38 = vor.u32 %v15077_v36, %v15076_v5  ;;  %v26365_v36 = vld [vmem:[%s32844_s3 + $0x110] sm:$0xff]  }
 0x965   :  { %23712 = vmatpush3.bf16.msra.mxu1 %v26360_v52  ;;  %v9905_v52 = vsel %vm2069_vm4, %v9902_v31, %v9904_v15  ;;  %v30549_v31 = vrot.slane %v30406_v29, 2  ;;  %v30596_v15 = vld [vmem:[#allocation2 + $0x50] sm:$0x3] }
 0x966   :  { %23713 = vmatprep.subr.bf16.mxu1 %v26361_v8  ;;  %v10164_v28 = vshll.u32 %v30596_v15, 16 }
 0x967   :  { %33108 = vst [vmem:[#allocation26_spill] sm:$0xff] %v30549_v31  ;;  %v30567_v5 = vsel %vm2565_vm5, %v30549_v31, %v15320_v16 }
 0x968   :  { %23694 = vmatmul.mubr.bf16.gmra.mrb[128].mxu1 %v9903_v17  ;;  %v30546_v17 = vor.u32 %v15085_v59, %v15084_v23  ;;  %33112 = vst [vmem:[#allocation29_spill] sm:$0xff] %v30567_v5  ;;  %v26371_v23 = vld [vmem:[%s32844_s3 + $0x140] sm:$0xff]  }
 0x969   :  { %23697 = vmatprep.mubr.bf16.mxu1 %v9905_v52  ;;  %23714 = vmatpush3.bf16.msra.mxu1 %v26361_v8  ;;  %v30553_v8 = vsel %vm2300_vm3, %v30461_v39, %v15078_v38  ;;  %v30557_v52 = vsel %vm2300_vm3, %v15078_v38, %v30472_v53  ;;  %v30571_v39 = vsel %vm2565_vm5, %v15320_v16, %v30543_v57  ;;  %v26364_v38 = vld [vmem:[%s32844_s3 + $0x108] sm:$0xff]  }
 0x96a   :  { %23715 = vmatprep.subr.bf16.mxu1 %v26362_v43  ;;  %33107 = vst [vmem:[#allocation23_spill] sm:$0xff] %v30546_v17  ;;  %33109 = vst [vmem:[#allocation27_spill] sm:$0xff] %v30553_v8  ;;  %v30563_v6 = vsel %vm2300_vm3, %v30472_v53, %v30546_v17 }
 0x96b   :  { %33110 = vst [vmem:[#allocation28_spill] sm:$0xff] %v30557_v52  ;;  %33111 = vst [vmem:[#allocation30_spill] sm:$0xff] %v30563_v6 }
 0x96c   :  { %33113 = vst [vmem:[#allocation31_spill] sm:$0xff] %v30571_v39 }
 0x96d   :  { %23716 = vmatpush3.bf16.msra.mxu1 %v26362_v43  ;;  %v10166_v43 = vrot.slane %v10164_v28, 2 }
 0x96e   :  { %23737 = vmatprep.subr.bf16.mxu1 %v26363_v34 }
 0x970   :  { %23698 = vmatmul.mubr.bf16.gmra.mrb[132].mxu1 %v9907_v9  ;;  %v10380_v9 = vrot.slane %v26789_v25, 2 }
 0x971   :  { %23717 = vmatprep.mubr.bf16.mxu1 %v10127_v60 }
 0x978   :  { %23718 = vmatmul.mubr.bf16.vlgmr.msra.gmra.mrb[116].mxu1 %v30098_v33  ;;  %v26367_v33 = vld [vmem:[%s32844_s3 + $0x120] sm:$0xff]  }
 0x979   :  { %23721 = vmatprep.mubr.bf16.mxu1 %v30117_v4  ;;  %23738 = vmatpush3.bf16.msra.mxu1 %v26363_v34  ;;  %v26368_v4 = vld [vmem:[%s32844_s3 + $0x128] sm:$0xff]  }
 0x97a   :  { %23739 = vmatprep.subr.bf16.mxu1 %v26364_v38 }
 0x97d   :  { %23740 = vmatpush3.bf16.msra.mxu1 %v26364_v38 }
 0x97e   :  { %23741 = vmatprep.subr.bf16.mxu1 %v26365_v36 }
 0x980   :  { %23722 = vmatmul.mubr.bf16.gmra.mrb[120].mxu1 %v30136_v0  ;;  %v26369_v0 = vld [vmem:[%s32844_s3 + $0x130] sm:$0xff]  }
 0x981   :  { %23725 = vmatprep.mubr.bf16.mxu1 %v30157_v48  ;;  %23742 = vmatpush3.bf16.msra.mxu1 %v26365_v36  ;;  %v10161_v48 = vshrl.u32 %v30596_v15, 16  ;;  %v26791_v36 = vld [vmem:[#allocation2 + $0x18] sm:$0xff] }
 0x982   :  { %23743 = vmatprep.subr.bf16.mxu1 %v26366_v35 }
 0x983   :  { %v10163_v16 = vrot.slane %v10161_v48, 1  ;;  %v26792_v48 = vld [vmem:[#allocation2 + $0x20] sm:$0xff] }
 0x984   :  { %v10386_v28 = vrot.slane %v26792_v48, 2 }
 0x985   :  { %23744 = vmatpush3.bf16.msra.mxu1 %v26366_v35  ;;  %v10167_v59 = vor.u32 %v10166_v43, %v10163_v16  ;;  %v10384_v35 = vrot.slane %v26791_v36, 2  ;;  %v26374_v16 = vld [vmem:[%s32844_s3 + $0x158] sm:$0xff]  }
 0x986   :  { %23745 = vmatprep.subr.bf16.mxu1 %v26367_v33 }
 0x987   :  { %v10168_v60 = vsel %vm2300_vm3, %v30243_v20, %v10167_v59  ;;  %v26373_v20 = vld [vmem:[%s32844_s3 + $0x150] sm:$0xff]   ;;  %v10387_v43 = vsel %vm2565_vm5, %v10384_v35, %v10386_v28  ;;  %v10392_v59 = vrot.slane %v30167_v37, 2 }
 0x988   :  { %23726 = vmatmul.mubr.bf16.gmra.mrb[124].mxu1 %v30179_v21  ;;  %v26370_v21 = vld [vmem:[%s32844_s3 + $0x138] sm:$0xff]  }
 0x989   :  { %23729 = vmatprep.mubr.bf16.mxu1 %v30196_v63  ;;  %23746 = vmatpush3.bf16.msra.mxu1 %v26367_v33  ;;  %v10360_v63 = vld [vmem:[#allocation2] sm:$0xfc]  ;;  %v26372_v33 = vld [vmem:[%s32844_s3 + $0x148] sm:$0xff]  }
 0x98a   :  { %23747 = vmatprep.subr.bf16.mxu1 %v26368_v4  ;;  %v10379_v34 = vrot.slane %v10360_v63, 2 }
 0x98d   :  { %23748 = vmatpush3.bf16.msra.mxu1 %v26368_v4 }
 0x98e   :  { %23749 = vmatprep.subr.bf16.mxu1 %v26369_v0 }
 0x990   :  { %23730 = vmatmul.mubr.bf16.gmra.mrb[128].mxu1 %v30217_v50  ;;  %v10381_v50 = vsel %vm2565_vm5, %v10379_v34, %v10380_v9  ;;  %v26376_v34 = vld [vmem:[%s32844_s3 + $0x168] sm:$0xff]  }
 0x991   :  { %23733 = vmatprep.mubr.bf16.mxu1 %v30256_v27  ;;  %23750 = vmatpush3.bf16.msra.mxu1 %v26369_v0  ;;  %v26790_v27 = vld [vmem:[#allocation2 + $0x10] sm:$0xff] }
 0x992   :  { %23751 = vmatprep.subr.bf16.mxu1 %v26370_v21  ;;  %v10382_v38 = vrot.slane %v26790_v27, 2 }
 0x994   :  { %v10383_v4 = vsel %vm2565_vm5, %v10380_v9, %v10382_v38  ;;  %v10385_v0 = vsel %vm2565_vm5, %v10382_v38, %v10384_v35  ;;  %v10396_v38 = vrot.slane %v30211_v61, 2  ;;  %v26378_v35 = vld [vmem:[%s32844_s3 + $0x178] sm:$0xff]  }
 0x995   :  { %23752 = vmatpush3.bf16.msra.mxu1 %v26370_v21  ;;  %v10388_v21 = vrot.slane %v30125_v14, 2  ;;  %v10390_v14 = vrot.slane %v30144_v45, 2  ;;  %v26377_v45 = vld [vmem:[%s32844_s3 + $0x170] sm:$0xff]  }
 0x996   :  { %23773 = vmatprep.subr.bf16.mxu1 %v26371_v23 }
 0x997   :  { %v10389_v63 = vsel %vm2565_vm5, %v10386_v28, %v10388_v21  ;;  %v10391_v9 = vsel %vm2565_vm5, %v10388_v21, %v10390_v14  ;;  %v26380_v21 = vld [vmem:[%s32844_s3 + $0x188] sm:$0xff]  }
 0x998   :  { %23734 = vmatmul.mubr.bf16.gmra.mrb[132].mxu1 %v10168_v60  ;;  %v10393_v60 = vsel %vm2565_vm5, %v10390_v14, %v10392_v59 }
 0x999   :  { %23753 = vmatprep.mubr.bf16.mxu1 %v10381_v50  ;;  %v10394_v50 = vrot.slane %v30186_v51, 2 }
 0x9a0   :  { %23754 = vmatmul.mubr.bf16.vlgmr.msra.gmra.mrb[116].mxu1 %v10383_v4  ;;  %v10397_v4 = vsel %vm2565_vm5, %v10394_v50, %v10396_v38 }
 0x9a1   :  { %23757 = vmatprep.mubr.bf16.mxu1 %v10385_v0  ;;  %23774 = vmatpush3.bf16.msra.mxu1 %v26371_v23  ;;  %v26375_v23 = vld [vmem:[%s32844_s3 + $0x160] sm:$0xff]  }
 0x9a2   :  { %23775 = vmatprep.subr.bf16.mxu1 %v26372_v33  ;;  %v26379_v0 = vld [vmem:[%s32844_s3 + $0x180] sm:$0xff]  }
 0x9a5   :  { %23776 = vmatpush3.bf16.msra.mxu1 %v26372_v33  ;;  %v10395_v33 = vsel %vm2565_vm5, %v10392_v59, %v10394_v50  ;;  %v26386_v59 = vld [vmem:[%s32844_s3 + $0x1b8] sm:$0xff]  }
 0x9a6   :  { %23777 = vmatprep.subr.bf16.mxu1 %v26373_v20 }
 0x9a8   :  { %23758 = vmatmul.mubr.bf16.gmra.mrb[120].mxu1 %v10387_v43  ;;  %v26794_v43 = vld [vmem:[#allocation2 + $0x30] sm:$0xff] }
 0x9a9   :  { %23761 = vmatprep.mubr.bf16.mxu1 %v10389_v63  ;;  %23778 = vmatpush3.bf16.msra.mxu1 %v26373_v20  ;;  %v10398_v20 = vrot.slane %v30596_v15, 2  ;;  %v26382_v15 = vld [vmem:[%s32844_s3 + $0x198] sm:$0xff]   ;;  %v10789_v63 = vld [vmem:[#allocation2 + $0x8] sm:$0xff] }
 0x9aa   :  { %23779 = vmatprep.subr.bf16.mxu1 %v26374_v16  ;;  %v10819_v14 = vshll.u32 %v10789_v63, 16 }
 0x9ab   :  { %v10399_v28 = vsel %vm2565_vm5, %v10396_v38, %v10398_v20 }
 0x9ad   :  { %23780 = vmatpush3.bf16.msra.mxu1 %v26374_v16  ;;  %v26381_v16 = vld [vmem:[%s32844_s3 + $0x190] sm:$0xff]  }
 0x9ae   :  { %23781 = vmatprep.subr.bf16.mxu1 %v26375_v23 }
 0x9b0   :  { %23762 = vmatmul.mubr.bf16.gmra.mrb[124].mxu1 %v10391_v9  ;;  %v26387_v9 = vld [vmem:[%s32844_s3 + $0x1c0] sm:$0xff]  }
 0x9b1   :  { %23765 = vmatprep.mubr.bf16.mxu1 %v10393_v60  ;;  %23782 = vmatpush3.bf16.msra.mxu1 %v26375_v23  ;;  %v30673_v23 = vld [vmem:[#allocation2 + $0x10] sm:$0xff]  ;;  %v30684_v60 = vld [vmem:[#allocation2 + $0x18] sm:$0xff] }
 0x9b2   :  { %23783 = vmatprep.subr.bf16.mxu1 %v26376_v34  ;;  %v33129_v5 = vshll.u32 %v30673_v23, 16 }
 0x9b4   :  { %v11357_v17 = vrot.slane %v33129_v5, 2  ;;  %v33131_v5 = vshll.u32 %v30684_v60, 16 }
 0x9b5   :  { %23784 = vmatpush3.bf16.msra.mxu1 %v26376_v34  ;;  %v10821_v34 = vrot.slane %v10819_v14, 1 }
 0x9b6   :  { %23785 = vmatprep.subr.bf16.mxu1 %v26377_v45  ;;  %v11361_v11 = vrot.slane %v33131_v5, 2  ;;  %v33132_v5 = vld [vmem:[#allocation8_spill] sm:$0xff] }
 0x9b8   :  { %23766 = vmatmul.mubr.bf16.gmra.mrb[128].mxu1 %v10395_v33  ;;  %v32955_v33 = vshrl.u32 %v30673_v23, 16 }
 0x9b9   :  { %23769 = vmatprep.mubr.bf16.mxu1 %v10397_v4  ;;  %23786 = vmatpush3.bf16.msra.mxu1 %v26377_v45  ;;  %v10817_v45 = vshrl.u32 %v10789_v63, 16  ;;  %v32953_v4 = vshrl.u32 %v30684_v60, 16  ;;  %v33117_v63 = vshrl.u32 %v30189_v18, 16 }
 0x9ba   :  { %23787 = vmatprep.subr.bf16.mxu1 %v26378_v35 }
 0x9bb   :  { %v10822_v38 = vor.u32 %v10821_v34, %v10817_v45 }
 0x9bd   :  { %23788 = vmatpush3.bf16.msra.mxu1 %v26378_v35 }
 0x9be   :  { %23809 = vmatprep.subr.bf16.mxu1 %v26379_v0 }
 0x9c0   :  { %23770 = vmatmul.mubr.bf16.gmra.mrb[132].mxu1 %v10399_v28 }
 0x9c1   :  { %23789 = vmatprep.mubr.bf16.mxu1 %v26789_v25  ;;  %v26793_v25 = vld [vmem:[#allocation2 + $0x28] sm:$0xff] }
 0x9c8   :  { %23790 = vmatmul.mubr.bf16.vlgmr.msra.gmra.mrb[116].mxu1 %v26790_v27  ;;  %v26383_v27 = vld [vmem:[%s32844_s3 + $0x1a0] sm:$0xff]  }
 0x9c9   :  { %23793 = vmatprep.mubr.bf16.mxu1 %v26791_v36  ;;  %23810 = vmatpush3.bf16.msra.mxu1 %v26379_v0  ;;  %v26384_v36 = vld [vmem:[%s32844_s3 + $0x1a8] sm:$0xff]   ;;  %v33114_v0 = vshll.u32 %v30189_v18, 16  ;;  %v33119_v18 = vshll.u32 %v30201_v41, 16 }
 0x9ca   :  { %23811 = vmatprep.subr.bf16.mxu1 %v26380_v21 }
 0x9cb   :  { %v10842_v20 = vrot.slane %v33114_v0, 1  ;;  %v33121_v0 = vshrl.u32 %v30224_v19, 16 }
 0x9cd   :  { %23812 = vmatpush3.bf16.msra.mxu1 %v26380_v21  ;;  %v10846_v14 = vor.u32 %v33117_v63, %v10842_v20  ;;  %v30763_v63 = vld [vmem:[#allocation2 + $0x58] sm:$0x1] }
 0x9ce   :  { %23813 = vmatprep.subr.bf16.mxu1 %v26381_v16  ;;  %v11138_v52 = vrot.slane %v30763_v63, 1 }
 0x9d0   :  { %23794 = vmatmul.mubr.bf16.gmra.mrb[120].mxu1 %v26792_v48  ;;  %v26385_v48 = vld [vmem:[%s32844_s3 + $0x1b0] sm:$0xff]  }
 0x9d1   :  { %23797 = vmatprep.mubr.bf16.mxu1 %v26793_v25  ;;  %23814 = vmatpush3.bf16.msra.mxu1 %v26381_v16  ;;  %v33115_v25 = vshll.u32 %v30160_v12, 16 }
 0x9d2   :  { %23815 = vmatprep.subr.bf16.mxu1 %v26382_v15 }
 0x9d5   :  { %23816 = vmatpush3.bf16.msra.mxu1 %v26382_v15 }
 0x9d6   :  { %23817 = vmatprep.subr.bf16.mxu1 %v26383_v27 }
 0x9d8   :  { %23798 = vmatmul.mubr.bf16.gmra.mrb[124].mxu1 %v26794_v43  ;;  %v33116_v43 = vshll.u32 %v30224_v19, 16  ;;  %v33123_v19 = vshll.u32 %v30263_v56, 16 }
 0x9d9   :  { %23801 = vmatprep.mubr.bf16.mxu1 %v30167_v37  ;;  %23818 = vmatpush3.bf16.msra.mxu1 %v26383_v27  ;;  %v32954_v37 = vshll.u32 %v30673_v23, 16  ;;  %v10850_v27 = vrot.slane %v33115_v25, 1 }
 0x9da   :  { %23819 = vmatprep.subr.bf16.mxu1 %v26384_v36 }
 0x9db   :  { %v10826_v50 = vrot.slane %v32954_v37, 1  ;;  %v30727_v45 = vsel %vm1623_vm2, %v10846_v14, %v10850_v27  ;;  %v33125_v14 = vshrl.u32 %v30230_v44, 16 }
 0x9dd   :  { %23820 = vmatpush3.bf16.msra.mxu1 %v26384_v36  ;;  %v10830_v28 = vor.u32 %v32955_v33, %v10826_v50  ;;  %v26389_v36 = vld [vmem:[%s32844_s3 + $0x1d0] sm:$0xff]  }
 0x9de   :  { %23821 = vmatprep.subr.bf16.mxu1 %v26385_v48 }
 0x9e0   :  { %23802 = vmatmul.mubr.bf16.gmra.mrb[128].mxu1 %v30186_v51  ;;  %v32952_v51 = vshll.u32 %v30684_v60, 16 }
 0x9e1   :  { %23805 = vmatprep.mubr.bf16.mxu1 %v30211_v61  ;;  %23822 = vmatpush3.bf16.msra.mxu1 %v26385_v48  ;;  %v10827_v61 = vsel %vm1623_vm2, %v10822_v38, %v10826_v50  ;;  %v10858_v48 = vrot.slane %v33116_v43, 1  ;;  %v26391_v38 = vld [vmem:[%s32844_s3 + $0x1e0] sm:$0xff]   ;;  %v33124_v43 = vshll.u32 %v30295_v62, 16 }
 0x9e2   :  { %23823 = vmatprep.subr.bf16.mxu1 %v26386_v59  ;;  %v10834_v35 = vrot.slane %v32952_v51, 1  ;;  %v30854_v51 = vld [vmem:[#allocation2 + $0x48] sm:$0xff] }
 0x9e4   :  { %v10838_v21 = vor.u32 %v32953_v4, %v10834_v35  ;;  %v30705_v16 = vsel %vm1623_vm2, %v10830_v28, %v10834_v35  ;;  %v33122_v28 = vshrl.u32 %v30201_v41, 16  ;;  %v10882_v41 = vrot.slane %v33123_v19, 1 }
 0x9e5   :  { %23824 = vmatpush3.bf16.msra.mxu1 %v26386_v59  ;;  %v33118_v59 = vshrl.u32 %v30160_v12, 16  ;;  %v10866_v12 = vrot.slane %v33119_v18, 1  ;;  %v26394_v18 = vld [vmem:[%s32844_s3 + $0x1f8] sm:$0xff]   ;;  %v11134_v4 = vrot.slane %v30854_v51, 1 }
 0x9e6   :  { %23845 = vmatprep.subr.bf16.mxu1 %v26387_v9  ;;  %v30709_v15 = vsel %vm1623_vm2, %v10838_v21, %v10842_v20  ;;  %v10862_v20 = vor.u32 %v33121_v0, %v10858_v48  ;;  %v11120_v0 = vrot.slane %v30673_v23, 1 }
 0x9e7   :  { %v10854_v34 = vor.u32 %v33118_v59, %v10850_v27  ;;  %v10870_v21 = vor.u32 %v33122_v28, %v10866_v12 }
 0x9e8   :  { %23806 = vmatmul.mubr.bf16.gmra.mrb[132].mxu1 %v30239_v26  ;;  %v26388_v26 = vld [vmem:[%s32844_s3 + $0x1c8] sm:$0xff]   ;;  %v30749_v25 = vsel %vm1623_vm2, %v10862_v20, %v10866_v12  ;;  %v33127_v20 = vshrl.u32 %v30295_v62, 16 }
 0x9e9   :  { %23825 = vmatprep.mubr.bf16.mxu1 %v10827_v61  ;;  %v30731_v50 = vsel %vm1623_vm2, %v10854_v34, %v10858_v48  ;;  %v33120_v61 = vshll.u32 %v30230_v44, 16  ;;  %v10890_v48 = vrot.slane %v33124_v43, 1  ;;  %v33126_v34 = vshrl.u32 %v30263_v56, 16  ;;  %v26395_v44 = vld [vmem:[%s32844_s3 + $0x200] sm:$0xff]  }
 0x9eb   :  { %v10874_v35 = vrot.slane %v33120_v61, 1  ;;  %v30789_v28 = vor.u32 %v33127_v20, %v10890_v48 }
 0x9ed   :  { %v30753_v27 = vsel %vm1623_vm2, %v10870_v21, %v10874_v35  ;;  %v10878_v59 = vor.u32 %v33125_v14, %v10874_v35  ;;  %v30784_v35 = vld [vmem:[#allocation2 + $0x8] sm:$0xfe] }
 0x9ee   :  { %v11119_v21 = vrot.slane %v30784_v35, 1  ;;  %v11352_v37 = vshll.u32 %v30784_v35, 16 }
 0x9ef   :  { %v30773_v12 = vsel %vm1623_vm2, %v10878_v59, %v10882_v41 }
 0x9f0   :  { %23826 = vmatmul.mubr.bf16.vlgmr.msra.gmra.mrb[116].mxu1 %v30705_v16  ;;  %v11121_v19 = vsel %vm2069_vm4, %v11119_v21, %v11120_v0  ;;  %v26399_v21 = vld [vmem:[%s32844_s3 + $0x220] sm:$0xff]   ;;  %v11354_v6 = vrot.slane %v11352_v37, 2 }
 0x9f1   :  { %23829 = vmatprep.mubr.bf16.mxu1 %v30709_v15  ;;  %23846 = vmatpush3.bf16.msra.mxu1 %v26387_v9  ;;  %v26390_v9 = vld [vmem:[%s32844_s3 + $0x1d8] sm:$0xff]  }
 0x9f2   :  { %23847 = vmatprep.subr.bf16.mxu1 %v26388_v26 }
 0x9f5   :  { %23848 = vmatpush3.bf16.msra.mxu1 %v26388_v26  ;;  %v26392_v26 = vld [vmem:[%s32844_s3 + $0x1e8] sm:$0xff]  }
 0x9f6   :  { %23849 = vmatprep.subr.bf16.mxu1 %v26389_v36 }
 0x9f8   :  { %23830 = vmatmul.mubr.bf16.gmra.mrb[120].mxu1 %v30727_v45 }
 0x9f9   :  { %23833 = vmatprep.mubr.bf16.mxu1 %v30731_v50  ;;  %23850 = vmatpush3.bf16.msra.mxu1 %v26389_v36  ;;  %v26393_v36 = vld [vmem:[%s32844_s3 + $0x1f0] sm:$0xff]  }
 0x9fa   :  { %23851 = vmatprep.subr.bf16.mxu1 %v26390_v9 }
 0x9fd   :  { %23852 = vmatpush3.bf16.msra.mxu1 %v26390_v9  ;;  %v10886_v9 = vor.u32 %v33126_v34, %v10882_v41  ;;  %v30796_v41 = vrot.slane %v30684_v60, 1  ;;  %v26397_v34 = vld [vmem:[%s32844_s3 + $0x210] sm:$0xff]  }
 0x9fe   :  { %23853 = vmatprep.subr.bf16.mxu1 %v26391_v38 }
 0x9ff   :  { %v30778_v61 = vsel %vm1623_vm2, %v10886_v9, %v10890_v48  ;;  %v26396_v48 = vld [vmem:[%s32844_s3 + $0x208] sm:$0xff]   ;;  %v11123_v14 = vsel %vm2069_vm4, %v11120_v0, %v30796_v41  ;;  %v26398_v0 = vld [vmem:[%s32844_s3 + $0x218] sm:$0xff]  }
 0xa00   :  { %23834 = vmatmul.mubr.bf16.gmra.mrb[124].mxu1 %v30749_v25  ;;  %v30814_v9 = vld [vmem:[#allocation2 + $0x28] sm:$0xff] }
 0xa01   :  { %23837 = vmatprep.mubr.bf16.mxu1 %v30753_v27  ;;  %23854 = vmatpush3.bf16.msra.mxu1 %v26391_v38  ;;  %v10896_v38 = vshll.u32 %v30763_v63, 16 }
 0xa02   :  { %23855 = vmatprep.subr.bf16.mxu1 %v26392_v26 }
 0xa03   :  { %v10898_v56 = vrot.slane %v10896_v38, 1  ;;  %v30817_v38 = vld [vmem:[#allocation2 + $0x30] sm:$0xff] }
 0xa05   :  { %23856 = vmatpush3.bf16.msra.mxu1 %v26392_v26  ;;  %v10899_v26 = vsel %vm1623_vm2, %v30789_v28, %v10898_v56  ;;  %v11128_v56 = vrot.slane %v30817_v38, 1 }
 0xa06   :  { %23857 = vmatprep.subr.bf16.mxu1 %v26393_v36 }
 0xa08   :  { %23838 = vmatmul.mubr.bf16.gmra.mrb[128].mxu1 %v30773_v12 }
 0xa09   :  { %23841 = vmatprep.mubr.bf16.mxu1 %v30778_v61  ;;  %23858 = vmatpush3.bf16.msra.mxu1 %v26393_v36  ;;  %v30798_v36 = vld [vmem:[#allocation2 + $0x20] sm:$0xff] }
 0xa0a   :  { %23859 = vmatprep.subr.bf16.mxu1 %v26394_v18  ;;  %v11124_v43 = vrot.slane %v30798_v36, 1 }
 0xa0c   :  { %v30808_v59 = vsel %vm2069_vm4, %v30796_v41, %v11124_v43 }
 0xa0d   :  { %23860 = vmatpush3.bf16.msra.mxu1 %v26394_v18  ;;  %v11126_v18 = vrot.slane %v30814_v9, 1 }
 0xa0e   :  { %23881 = vmatprep.subr.bf16.mxu1 %v26395_v44 }
 0xa0f   :  { %v30828_v20 = vsel %vm2069_vm4, %v11126_v18, %v11128_v56 }
 0xa10   :  { %23842 = vmatmul.mubr.bf16.gmra.mrb[132].mxu1 %v10899_v26  ;;  %v30834_v26 = vld [vmem:[#allocation2 + $0x38] sm:$0xff] }
 0xa11   :  { %23861 = vmatprep.mubr.bf16.mxu1 %v11121_v19  ;;  %v11130_v19 = vrot.slane %v30834_v26, 1 }
 0xa18   :  { %23862 = vmatmul.mubr.bf16.vlgmr.msra.gmra.mrb[116].mxu1 %v11123_v14  ;;  %v26400_v14 = vld [vmem:[%s32844_s3 + $0x228] sm:$0xff]  }
 0xa19   :  { %23865 = vmatprep.mubr.bf16.mxu1 %v30808_v59  ;;  %23882 = vmatpush3.bf16.msra.mxu1 %v26395_v44  ;;  %v30824_v44 = vsel %vm2069_vm4, %v11124_v43, %v11126_v18 }
 0xa1a   :  { %23883 = vmatprep.subr.bf16.mxu1 %v26396_v48 }
 0xa1d   :  { %23884 = vmatpush3.bf16.msra.mxu1 %v26396_v48  ;;  %v30837_v48 = vld [vmem:[#allocation2 + $0x40] sm:$0xff] }
 0xa1e   :  { %23885 = vmatprep.subr.bf16.mxu1 %v26397_v34  ;;  %v11132_v43 = vrot.slane %v30837_v48, 1 }
 0xa20   :  { %23866 = vmatmul.mubr.bf16.gmra.mrb[120].mxu1 %v30824_v44  ;;  %v30848_v18 = vsel %vm2069_vm4, %v11130_v19, %v11132_v43  ;;  %v30866_v33 = vsel %vm2069_vm4, %v11132_v43, %v11134_v4  ;;  %v26403_v43 = vld [vmem:[%s32844_s3 + $0x240] sm:$0xff]  }
 0xa21   :  { %23869 = vmatprep.mubr.bf16.mxu1 %v30828_v20  ;;  %23886 = vmatpush3.bf16.msra.mxu1 %v26397_v34  ;;  %v30844_v34 = vsel %vm2069_vm4, %v11128_v56, %v11130_v19  ;;  %v30858_v56 = vrot.slane %v30295_v62, 1  ;;  %v11349_v19 = vshrl.u32 %v30784_v35, 16  ;;  %v33128_v62 = vshrl.u32 %v30673_v23, 16 }
 0xa22   :  { %23887 = vmatprep.subr.bf16.mxu1 %v26398_v0 }
 0xa23   :  { %v30871_v39 = vsel %vm2069_vm4, %v11134_v4, %v30858_v56  ;;  %v11351_v35 = vrot.slane %v11349_v19, 1  ;;  %v11139_v37 = vsel %vm2069_vm4, %v30858_v56, %v11138_v52  ;;  %v30917_v52 = vld [vmem:[#allocation2 + $0x58] sm:$0x3] }
 0xa24   :  { %v11630_v31 = vrot.slane %v30917_v52, 2 }
 0xa25   :  { %23888 = vmatpush3.bf16.msra.mxu1 %v26398_v0  ;;  %v26401_v0 = vld [vmem:[%s32844_s3 + $0x230] sm:$0xff]   ;;  %v11355_v8 = vor.u32 %v11354_v6, %v11351_v35  ;;  %v11396_v35 = vshll.u32 %v30917_v52, 16 }
 0xa26   :  { %23889 = vmatprep.subr.bf16.mxu1 %v26399_v21 }
 0xa28   :  { %23870 = vmatmul.mubr.bf16.gmra.mrb[124].mxu1 %v30844_v34 }
 0xa29   :  { %23873 = vmatprep.mubr.bf16.mxu1 %v30848_v18  ;;  %23890 = vmatpush3.bf16.msra.mxu1 %v26399_v21  ;;  %v26402_v21 = vld [vmem:[%s32844_s3 + $0x238] sm:$0xff]  }
 0xa2a   :  { %23891 = vmatprep.subr.bf16.mxu1 %v26400_v14 }
 0xa2d   :  { %23892 = vmatpush3.bf16.msra.mxu1 %v26400_v14  ;;  %v11356_v14 = vrot.slane %v33128_v62, 1  ;;  %v33130_v62 = vshrl.u32 %v30684_v60, 16 }
 0xa2e   :  { %23893 = vmatprep.subr.bf16.mxu1 %v26401_v0 }
 0xa2f   :  { %v11358_v4 = vor.u32 %v11357_v17, %v11356_v14  ;;  %v11360_v30 = vrot.slane %v33130_v62, 1  ;;  %v26404_v17 = vld [vmem:[%s32844_s3 + $0x248] sm:$0xff]   ;;  %v11393_v14 = vshrl.u32 %v30917_v52, 16  ;;  %v11398_v62 = vrot.slane %v11396_v35, 2  ;;  %v26421_v52 = vld [vmem:[%s32844_s3 + $0x2d0] sm:$0xff]  }
 0xa30   :  { %23874 = vmatmul.mubr.bf16.gmra.mrb[128].mxu1 %v30866_v33  ;;  %v26412_v35 = vld [vmem:[%s32844_s3 + $0x288] sm:$0xff]  }
 0xa31   :  { %23877 = vmatprep.mubr.bf16.mxu1 %v30871_v39  ;;  %23894 = vmatpush3.bf16.msra.mxu1 %v26401_v0  ;;  %v11359_v0 = vsel %vm2300_vm3, %v11355_v8, %v11358_v4  ;;  %v30889_v19 = vor.u32 %v11361_v11, %v11360_v30  ;;  %v26405_v11 = vld [vmem:[%s32844_s3 + $0x250] sm:$0xff]   ;;  %v26406_v30 = vld [vmem:[%s32844_s3 + $0x258] sm:$0xff]   ;;  %v26408_v8 = vld [vmem:[%s32844_s3 + $0x268] sm:$0xff]  }
 0xa32   :  { %23895 = vmatprep.subr.bf16.mxu1 %v26402_v21 }
 0xa33   :  { %v11363_v6 = vsel %vm2300_vm3, %v11358_v4, %v30889_v19  ;;  %v30899_v63 = vsel %vm2300_vm3, %v30889_v19, %v30227_v49  ;;  %v26407_v49 = vld [vmem:[%s32844_s3 + $0x260] sm:$0xff]   ;;  %v11395_v4 = vrot.slane %v11393_v14, 1  ;;  %v11616_v14 = vrot.slane %v30798_v36, 2 }
 0xa35   :  { %23896 = vmatpush3.bf16.msra.mxu1 %v26402_v21  ;;  %v26409_v21 = vld [vmem:[%s32844_s3 + $0x270] sm:$0xff]  }
 0xa36   :  { %23917 = vmatprep.subr.bf16.mxu1 %v26403_v43 }
 0xa38   :  { %23878 = vmatmul.mubr.bf16.gmra.mrb[132].mxu1 %v11139_v37  ;;  %v26411_v37 = vld [vmem:[%s32844_s3 + $0x280] sm:$0xff]  }
 0xa39   :  { %23897 = vmatprep.mubr.bf16.mxu1 %v11359_v0  ;;  %v11399_v0 = vor.u32 %v11398_v62, %v11395_v4  ;;  %v26413_v62 = vld [vmem:[%s32844_s3 + $0x290] sm:$0xff]  }
 0xa40   :  { %23898 = vmatmul.mubr.bf16.vlgmr.msra.gmra.mrb[116].mxu1 %v11363_v6  ;;  %v11612_v6 = vrot.slane %v30673_v23, 2 }
 0xa41   :  { %23901 = vmatprep.mubr.bf16.mxu1 %v30899_v63  ;;  %23918 = vmatpush3.bf16.msra.mxu1 %v26403_v43  ;;  %v26410_v43 = vld [vmem:[%s32844_s3 + $0x278] sm:$0xff]  }
 0xa42   :  { %23919 = vmatprep.subr.bf16.mxu1 %v26404_v17 }
 0xa45   :  { %23920 = vmatpush3.bf16.msra.mxu1 %v26404_v17  ;;  %v11592_v17 = vld [vmem:[#allocation2 + $0x8] sm:$0xfc] }
 0xa46   :  { %23921 = vmatprep.subr.bf16.mxu1 %v26405_v11 }
 0xa48   :  { %23902 = vmatmul.mubr.bf16.gmra.mrb[120].mxu1 %v30252_v54 }
 0xa49   :  { %23905 = vmatprep.mubr.bf16.mxu1 %v30277_v46  ;;  %23922 = vmatpush3.bf16.msra.mxu1 %v26405_v11  ;;  %v11611_v11 = vrot.slane %v11592_v17, 2  ;;  %v11620_v17 = vrot.slane %v30817_v38, 2 }
 0xa4a   :  { %23923 = vmatprep.subr.bf16.mxu1 %v26406_v30 }
 0xa4d   :  { %23924 = vmatpush3.bf16.msra.mxu1 %v26406_v30  ;;  %v33133_v30 = vld [vmem:[#allocation7_spill] sm:$0xff] }
 0xa4e   :  { %23925 = vmatprep.subr.bf16.mxu1 %v26407_v49 }
 0xa50   :  { %23906 = vmatmul.mubr.bf16.gmra.mrb[124].mxu1 %v30282_v1 }
 0xa51   :  { %23909 = vmatprep.mubr.bf16.mxu1 %v30287_v42  ;;  %23926 = vmatpush3.bf16.msra.mxu1 %v26407_v49  ;;  %v11400_v49 = vsel %vm2300_vm3, %v33133_v30, %v11399_v0  ;;  %v11618_v0 = vrot.slane %v30814_v9, 2  ;;  %v26415_v30 = vld [vmem:[%s32844_s3 + $0x2a0] sm:$0xff]  }
 0xa52   :  { %23927 = vmatprep.subr.bf16.mxu1 %v26408_v8 }
 0xa55   :  { %23928 = vmatpush3.bf16.msra.mxu1 %v26408_v8  ;;  %v11613_v8 = vsel %vm2565_vm5, %v11611_v11, %v11612_v6  ;;  %v30960_v11 = vsel %vm2565_vm5, %v11616_v14, %v11618_v0 }
 0xa56   :  { %23929 = vmatprep.subr.bf16.mxu1 %v26409_v21 }
 0xa58   :  { %23910 = vmatmul.mubr.bf16.gmra.mrb[128].mxu1 %v30290_v24 }
 0xa59   :  { %23913 = vmatprep.mubr.bf16.mxu1 %v33132_v5  ;;  %23930 = vmatpush3.bf16.msra.mxu1 %v26409_v21  ;;  %v30938_v21 = vrot.slane %v30684_v60, 2 }
 0xa5a   :  { %23931 = vmatprep.subr.bf16.mxu1 %v26410_v43 }
 0xa5b   :  { %v30948_v4 = vsel %vm2565_vm5, %v30938_v21, %v11616_v14  ;;  %v26416_v14 = vld [vmem:[%s32844_s3 + $0x2a8] sm:$0xff]  }
 0xa5d   :  { %23932 = vmatpush3.bf16.msra.mxu1 %v26410_v43  ;;  %v11615_v43 = vsel %vm2565_vm5, %v11612_v6, %v30938_v21  ;;  %v26414_v6 = vld [vmem:[%s32844_s3 + $0x298] sm:$0xff]  }
 0xa5e   :  { %23953 = vmatprep.subr.bf16.mxu1 %v26411_v37 }
 0xa60   :  { %23914 = vmatmul.mubr.bf16.gmra.mrb[132].mxu1 %v11400_v49  ;;  %v11622_v49 = vrot.slane %v30834_v26, 2 }
 0xa61   :  { %23933 = vmatprep.mubr.bf16.mxu1 %v11613_v8  ;;  %v11624_v8 = vrot.slane %v30837_v48, 2 }
 0xa68   :  { %23934 = vmatmul.mubr.bf16.vlgmr.msra.gmra.mrb[116].mxu1 %v11615_v43  ;;  %v30980_v43 = vsel %vm2565_vm5, %v11622_v49, %v11624_v8 }
 0xa69   :  { %23937 = vmatprep.mubr.bf16.mxu1 %v30948_v4  ;;  %23954 = vmatpush3.bf16.msra.mxu1 %v26411_v37  ;;  %v30964_v37 = vsel %vm2565_vm5, %v11618_v0, %v11620_v17  ;;  %v11626_v0 = vrot.slane %v30854_v51, 2 }
 0xa6a   :  { %23955 = vmatprep.subr.bf16.mxu1 %v26412_v35 }
 0xa6d   :  { %23956 = vmatpush3.bf16.msra.mxu1 %v26412_v35  ;;  %v30976_v35 = vsel %vm2565_vm5, %v11620_v17, %v11622_v49  ;;  %v26418_v49 = vld [vmem:[%s32844_s3 + $0x2b8] sm:$0xff]  }
 0xa6e   :  { %23957 = vmatprep.subr.bf16.mxu1 %v26413_v62 }
 0xa70   :  { %23938 = vmatmul.mubr.bf16.gmra.mrb[120].mxu1 %v30960_v11 }
 0xa71   :  { %23941 = vmatprep.mubr.bf16.mxu1 %v30964_v37  ;;  %23958 = vmatpush3.bf16.msra.mxu1 %v26413_v62  ;;  %v26417_v62 = vld [vmem:[%s32844_s3 + $0x2b0] sm:$0xff]  }
 0xa72   :  { %23959 = vmatprep.subr.bf16.mxu1 %v26414_v6 }
 0xa75   :  { %23960 = vmatpush3.bf16.msra.mxu1 %v26414_v6  ;;  %v30987_v6 = vld [vmem:[#allocation2 + $0x50] sm:$0xff] }
 0xa76   :  { %23961 = vmatprep.subr.bf16.mxu1 %v26415_v30  ;;  %v30990_v17 = vrot.slane %v30987_v6, 2 }
 0xa78   :  { %23942 = vmatmul.mubr.bf16.gmra.mrb[124].mxu1 %v30976_v35  ;;  %v31001_v57 = vsel %vm2565_vm5, %v11626_v0, %v30990_v17 }
 0xa79   :  { %23945 = vmatprep.mubr.bf16.mxu1 %v30980_v43  ;;  %23962 = vmatpush3.bf16.msra.mxu1 %v26415_v30  ;;  %v30996_v30 = vsel %vm2565_vm5, %v11624_v8, %v11626_v0  ;;  %v11631_v8 = vsel %vm2565_vm5, %v30990_v17, %v11630_v31  ;;  %v26420_v0 = vld [vmem:[%s32844_s3 + $0x2c8] sm:$0xff]   ;;  %v26422_v31 = vld [vmem:[%s32844_s3 + $0x2d8] sm:$0xff]  }
 0xa7a   :  { %23963 = vmatprep.subr.bf16.mxu1 %v26416_v14 }
 0xa7d   :  { %23964 = vmatpush3.bf16.msra.mxu1 %v26416_v14  ;;  %v26419_v14 = vld [vmem:[%s32844_s3 + $0x2c0] sm:$0xff]  }
 0xa7e   :  { %23965 = vmatprep.subr.bf16.mxu1 %v26417_v62 }
 0xa80   :  { %23946 = vmatmul.mubr.bf16.gmra.mrb[128].mxu1 %v30996_v30 }
 0xa81   :  { %23949 = vmatprep.mubr.bf16.mxu1 %v31001_v57  ;;  %23966 = vmatpush3.bf16.msra.mxu1 %v26417_v62  ;;  %v26424_v62 = vld [vmem:[%s32844_s3 + $0x2e8] sm:$0xff]  }
 0xa82   :  { %23967 = vmatprep.subr.bf16.mxu1 %v26418_v49 }
 0xa85   :  { %23968 = vmatpush3.bf16.msra.mxu1 %v26418_v49  ;;  %v26425_v49 = vld [vmem:[%s32844_s3 + $0x2f0] sm:$0xff]  }
 0xa86   :  { %23989 = vmatprep.subr.bf16.mxu1 %v26419_v14 }
 0xa88   :  { %23950 = vmatmul.mubr.bf16.gmra.mrb[132].mxu1 %v11631_v8  ;;  %v26427_v8 = vld [vmem:[%s32844_s3 + $0x300] sm:$0xff]  }
 0xa89   :  { %23969 = vmatprep.mubr.bf16.mxu1 %v30673_v23  ;;  %v26423_v23 = vld [vmem:[%s32844_s3 + $0x2e0] sm:$0xff]  }
 0xa90   :  { %23970 = vmatmul.mubr.bf16.vlgmr.msra.gmra.mrb[116].mxu1 %v30684_v60 }
 0xa91   :  { %23973 = vmatprep.mubr.bf16.mxu1 %v30798_v36  ;;  %23990 = vmatpush3.bf16.msra.mxu1 %v26419_v14  ;;  %v26426_v14 = vld [vmem:[%s32844_s3 + $0x2f8] sm:$0xff]  }
 0xa92   :  { %23991 = vmatprep.subr.bf16.mxu1 %v26420_v0 }
 0xa95   :  { %23992 = vmatpush3.bf16.msra.mxu1 %v26420_v0  ;;  %v31043_v0 = vld [vmem:[#allocation2 + $0x58] sm:$0xff] }
 0xa96   :  { %23993 = vmatprep.subr.bf16.mxu1 %v26421_v52 }
 0xa98   :  { %23974 = vmatmul.mubr.bf16.gmra.mrb[120].mxu1 %v30814_v9 }
 0xa99   :  { %23977 = vmatprep.mubr.bf16.mxu1 %v30817_v38  ;;  %23994 = vmatpush3.bf16.msra.mxu1 %v26421_v52  ;;  %v26428_v52 = vld [vmem:[%s32844_s3 + $0x308] sm:$0xff]  }
 0xa9a   :  { %23995 = vmatprep.subr.bf16.mxu1 %v26422_v31 }
 0xa9d   :  { %23996 = vmatpush3.bf16.msra.mxu1 %v26422_v31  ;;  %v26429_v31 = vld [vmem:[%s32844_s3 + $0x310] sm:$0xff]  }
 0xa9e   :  { %23997 = vmatprep.subr.bf16.mxu1 %v26423_v23 }
 0xaa0   :  { %23978 = vmatmul.mubr.bf16.gmra.mrb[124].mxu1 %v30834_v26 }
 0xaa1   :  { %23981 = vmatprep.mubr.bf16.mxu1 %v30837_v48  ;;  %23998 = vmatpush3.bf16.msra.mxu1 %v26423_v23 }
 0xaa2   :  { %23999 = vmatprep.subr.bf16.mxu1 %v26424_v62 }
 0xaa5   :  { %24000 = vmatpush3.bf16.msra.mxu1 %v26424_v62 }
 0xaa6   :  { %24001 = vmatprep.subr.bf16.mxu1 %v26425_v49 }
 0xaa8   :  { %23982 = vmatmul.mubr.bf16.gmra.mrb[128].mxu1 %v30854_v51 }
 0xaa9   :  { %23985 = vmatprep.mubr.bf16.mxu1 %v30987_v6  ;;  %24002 = vmatpush3.bf16.msra.mxu1 %v26425_v49  ;;  %v31075_v49 = vld [vmem:[#allocation2 + $0x60] sm:$0x1] }
 0xaaa   :  { %24003 = vmatprep.subr.bf16.mxu1 %v26426_v14 }
 0xaad   :  { %24004 = vmatpush3.bf16.msra.mxu1 %v26426_v14 }
 0xaae   :  { %24025 = vmatprep.subr.bf16.mxu1 %v26427_v8 }
 0xab0   :  { %23986 = vmatmul.mubr.bf16.gmra.mrb[132].mxu1 %v31043_v0 }
 0xab1   :  { %24005 = vmatprep.mubr.bf16.mxu1 %v30705_v16  ;;  %v26430_v16 = vld [vmem:[%s32844_s3 + $0x318] sm:$0xff]  }
 0xab8   :  { %24006 = vmatmul.mubr.bf16.vlgmr.msra.gmra.mrb[116].mxu1 %v30709_v15  ;;  %v26431_v15 = vld [vmem:[%s32844_s3 + $0x320] sm:$0xff]  }
 0xab9   :  { %24009 = vmatprep.mubr.bf16.mxu1 %v30727_v45  ;;  %24026 = vmatpush3.bf16.msra.mxu1 %v26427_v8  ;;  %v26432_v45 = vld [vmem:[%s32844_s3 + $0x328] sm:$0xff]   ;;  %v26435_v8 = vld [vmem:[%s32844_s3 + $0x340] sm:$0xff]  }
 0xaba   :  { %24027 = vmatprep.subr.bf16.mxu1 %v26428_v52 }
 0xabd   :  { %24028 = vmatpush3.bf16.msra.mxu1 %v26428_v52 }
 0xabe   :  { %24029 = vmatprep.subr.bf16.mxu1 %v26429_v31 }
 0xac0   :  { %24010 = vmatmul.mubr.bf16.gmra.mrb[120].mxu1 %v30731_v50  ;;  %v26433_v50 = vld [vmem:[%s32844_s3 + $0x330] sm:$0xff]  }
 0xac1   :  { %24013 = vmatprep.mubr.bf16.mxu1 %v30749_v25  ;;  %24030 = vmatpush3.bf16.msra.mxu1 %v26429_v31  ;;  %v33134_v25 = vld [vmem:[#allocation9_spill] sm:$0xff] }
 0xac2   :  { %24031 = vmatprep.subr.bf16.mxu1 %v26430_v16  ;;  %v33135_v23 = vshll.u32 %v33134_v25, 16  ;;  %v12323_v31 = vld [vmem:[#allocation2 + $0x10] sm:$0xfe] }
 0xac4   :  { %v31073_v62 = vrot.slane %v33135_v23, 1  ;;  %v12581_v23 = vshrl.u32 %v12323_v31, 16 }
 0xac5   :  { %24032 = vmatpush3.bf16.msra.mxu1 %v26430_v16  ;;  %v33136_v16 = vshrl.u32 %v33134_v25, 16  ;;  %v26437_v25 = vld [vmem:[%s32844_s3 + $0x350] sm:$0xff]  }
 0xac6   :  { %24033 = vmatprep.subr.bf16.mxu1 %v26431_v15  ;;  %v12123_v14 = vsel %vm1623_vm2, %v30789_v28, %v31073_v62 }
 0xac8   :  { %24014 = vmatmul.mubr.bf16.gmra.mrb[124].mxu1 %v30753_v27  ;;  %v26434_v27 = vld [vmem:[%s32844_s3 + $0x338] sm:$0xff]  }
 0xac9   :  { %24017 = vmatprep.mubr.bf16.mxu1 %v30773_v12  ;;  %24034 = vmatpush3.bf16.msra.mxu1 %v26431_v15  ;;  %v12128_v12 = vshll.u32 %v31075_v49, 16  ;;  %v31091_v15 = vor.u32 %v33136_v16, %v31073_v62  ;;  %v26444_v16 = vld [vmem:[%s32844_s3 + $0x388] sm:$0xff]  }
 0xaca   :  { %24035 = vmatprep.subr.bf16.mxu1 %v26432_v45 }
 0xacb   :  { %v12130_v52 = vrot.slane %v12128_v12, 1  ;;  %v26442_v12 = vld [vmem:[%s32844_s3 + $0x378] sm:$0xff]  }
 0xacd   :  { %24036 = vmatpush3.bf16.msra.mxu1 %v26432_v45  ;;  %v12131_v28 = vsel %vm1623_vm2, %v31091_v15, %v12130_v52  ;;  %v12370_v52 = vrot.slane %v31075_v49, 1  ;;  %v26445_v49 = vld [vmem:[%s32844_s3 + $0x390] sm:$0xff]  }
 0xace   :  { %24037 = vmatprep.subr.bf16.mxu1 %v26433_v50 }
 0xad0   :  { %24018 = vmatmul.mubr.bf16.gmra.mrb[128].mxu1 %v30778_v61  ;;  %v12351_v61 = vrot.slane %v12323_v31, 1 }
 0xad1   :  { %24021 = vmatprep.mubr.bf16.mxu1 %v12123_v14  ;;  %24038 = vmatpush3.bf16.msra.mxu1 %v26433_v50  ;;  %v26436_v50 = vld [vmem:[%s32844_s3 + $0x348] sm:$0xff]  }
 0xad2   :  { %24039 = vmatprep.subr.bf16.mxu1 %v26434_v27  ;;  %v12353_v45 = vsel %vm2069_vm4, %v12351_v61, %v30796_v41  ;;  %v26438_v41 = vld [vmem:[%s32844_s3 + $0x358] sm:$0xff]   ;;  %v31159_v61 = vld [vmem:[#allocation2 + $0x60] sm:$0x3] }
 0xad5   :  { %24040 = vmatpush3.bf16.msra.mxu1 %v26434_v27  ;;  %v12584_v27 = vshll.u32 %v12323_v31, 16 }
 0xad6   :  { %24061 = vmatprep.subr.bf16.mxu1 %v26435_v8 }
 0xad7   :  { %v12586_v14 = vrot.slane %v12584_v27, 2  ;;  %v26453_v27 = vld [vmem:[%s32844_s3 + $0x3d0] sm:$0xff]  }
 0xad8   :  { %24022 = vmatmul.mubr.bf16.gmra.mrb[132].mxu1 %v12131_v28  ;;  %v12628_v28 = vshll.u32 %v31159_v61, 16 }
 0xad9   :  { %24041 = vmatprep.mubr.bf16.mxu1 %v12353_v45 }
 0xae0   :  { %24042 = vmatmul.mubr.bf16.vlgmr.msra.gmra.mrb[116].mxu1 %v30808_v59  ;;  %v26439_v59 = vld [vmem:[%s32844_s3 + $0x360] sm:$0xff]  }
 0xae1   :  { %24045 = vmatprep.mubr.bf16.mxu1 %v30824_v44  ;;  %24062 = vmatpush3.bf16.msra.mxu1 %v26435_v8  ;;  %v26440_v44 = vld [vmem:[%s32844_s3 + $0x368] sm:$0xff]   ;;  %v26443_v8 = vld [vmem:[%s32844_s3 + $0x380] sm:$0xff]  }
 0xae2   :  { %24063 = vmatprep.subr.bf16.mxu1 %v26436_v50 }
 0xae5   :  { %24064 = vmatpush3.bf16.msra.mxu1 %v26436_v50  ;;  %v12630_v50 = vrot.slane %v12628_v28, 2 }
 0xae6   :  { %24065 = vmatprep.subr.bf16.mxu1 %v26437_v25 }
 0xae8   :  { %24046 = vmatmul.mubr.bf16.gmra.mrb[120].mxu1 %v30828_v20  ;;  %v26441_v20 = vld [vmem:[%s32844_s3 + $0x370] sm:$0xff]  }
 0xae9   :  { %24049 = vmatprep.mubr.bf16.mxu1 %v30844_v34  ;;  %24066 = vmatpush3.bf16.msra.mxu1 %v26437_v25  ;;  %v31122_v34 = vrot.slane %v31043_v0, 1  ;;  %v26451_v25 = vld [vmem:[%s32844_s3 + $0x3c0] sm:$0xff]  }
 0xaea   :  { %24067 = vmatprep.subr.bf16.mxu1 %v26438_v41 }
 0xaed   :  { %24068 = vmatpush3.bf16.msra.mxu1 %v26438_v41 }
 0xaee   :  { %24069 = vmatprep.subr.bf16.mxu1 %v26439_v59 }
 0xaf0   :  { %24050 = vmatmul.mubr.bf16.gmra.mrb[124].mxu1 %v30848_v18  ;;  %v12583_v18 = vrot.slane %v12581_v23, 1  ;;  %v26452_v23 = vld [vmem:[%s32844_s3 + $0x3c8] sm:$0xff]  }
 0xaf1   :  { %24053 = vmatprep.mubr.bf16.mxu1 %v30866_v33  ;;  %24070 = vmatpush3.bf16.msra.mxu1 %v26439_v59  ;;  %v12369_v33 = vsel %vm2069_vm4, %v30858_v56, %v31122_v34  ;;  %v12824_v59 = vld [vmem:[#allocation2 + $0x10] sm:$0xfc] }
 0xaf2   :  { %24071 = vmatprep.subr.bf16.mxu1 %v26440_v44  ;;  %v12587_v31 = vor.u32 %v12586_v14, %v12583_v18  ;;  %v26466_v14 = vld [vmem:[%s32844_s3 + $0x438] sm:$0xff]  }
 0xaf4   :  { %v12591_v56 = vsel %vm2300_vm3, %v12587_v31, %v30889_v19  ;;  %v26446_v19 = vld [vmem:[%s32844_s3 + $0x398] sm:$0xff]   ;;  %v31252_v31 = vld [vmem:[#allocation2 + $0x60] sm:$0xff] }
 0xaf5   :  { %24072 = vmatpush3.bf16.msra.mxu1 %v26440_v44  ;;  %v12843_v44 = vrot.slane %v12824_v59, 2  ;;  %v33146_v59 = vld [vmem:[#allocation13_spill] sm:$0xff] }
 0xaf6   :  { %24073 = vmatprep.subr.bf16.mxu1 %v26441_v20 }
 0xaf8   :  { %24054 = vmatmul.mubr.bf16.gmra.mrb[128].mxu1 %v30871_v39  ;;  %v12371_v39 = vsel %vm2069_vm4, %v31122_v34, %v12370_v52 }
 0xaf9   :  { %24057 = vmatprep.mubr.bf16.mxu1 %v12369_v33  ;;  %24074 = vmatpush3.bf16.msra.mxu1 %v26441_v20 }
 0xafa   :  { %24075 = vmatprep.subr.bf16.mxu1 %v26442_v12 }
 0xafd   :  { %24076 = vmatpush3.bf16.msra.mxu1 %v26442_v12  ;;  %v12862_v12 = vrot.slane %v31159_v61, 2 }
 0xafe   :  { %24097 = vmatprep.subr.bf16.mxu1 %v26443_v8 }
 0xb00   :  { %24058 = vmatmul.mubr.bf16.gmra.mrb[132].mxu1 %v12371_v39  ;;  %v33138_v39 = vld [vmem:[#allocation15_spill] sm:$0xff] }
 0xb01   :  { %24077 = vmatprep.mubr.bf16.mxu1 %v12591_v56  ;;  %v33139_v56 = vshll.u32 %v33138_v39, 16  ;;  %v33144_v28 = vshrl.u32 %v33138_v39, 16  ;;  %v31354_v39 = vld [vmem:[#allocation2 + $0x28] sm:$0xff] }
 0xb08   :  { %24078 = vmatmul.mubr.bf16.vlgmr.msra.gmra.mrb[116].mxu1 %v30899_v63  ;;  %v26448_v63 = vld [vmem:[%s32844_s3 + $0x3a8] sm:$0xff]  }
 0xb09   :  { %24081 = vmatprep.mubr.bf16.mxu1 %v30252_v54  ;;  %24098 = vmatpush3.bf16.msra.mxu1 %v26443_v8  ;;  %v26447_v54 = vld [vmem:[%s32844_s3 + $0x3a0] sm:$0xff]  }
 0xb0a   :  { %24099 = vmatprep.subr.bf16.mxu1 %v26444_v16 }
 0xb0d   :  { %24100 = vmatpush3.bf16.msra.mxu1 %v26444_v16  ;;  %v13306_v16 = vrot.slane %v33139_v56, 1  ;;  %v31357_v56 = vrot.slane %v31354_v39, 1 }
 0xb0e   :  { %24101 = vmatprep.subr.bf16.mxu1 %v26445_v49 }
 0xb10   :  { %24082 = vmatmul.mubr.bf16.gmra.mrb[120].mxu1 %v30277_v46  ;;  %v26449_v46 = vld [vmem:[%s32844_s3 + $0x3b0] sm:$0xff]  }
 0xb11   :  { %24085 = vmatprep.mubr.bf16.mxu1 %v30282_v1  ;;  %24102 = vmatpush3.bf16.msra.mxu1 %v26445_v49  ;;  %v12625_v1 = vshrl.u32 %v31159_v61, 16  ;;  %v33140_v49 = vshrl.u32 %v30359_v7, 16  ;;  %v26469_v7 = vld [vmem:[%s32844_s3 + $0x450] sm:$0xff]  }
 0xb12   :  { %24103 = vmatprep.subr.bf16.mxu1 %v26446_v19 }
 0xb13   :  { %v12627_v45 = vrot.slane %v12625_v1, 1 }
 0xb15   :  { %24104 = vmatpush3.bf16.msra.mxu1 %v26446_v19  ;;  %v12631_v41 = vor.u32 %v12630_v50, %v12627_v45  ;;  %v13302_v19 = vor.u32 %v33140_v49, %v30498_v55  ;;  %v33143_v55 = vshll.u32 %v30404_v40, 16  ;;  %v26476_v49 = vld [vmem:[%s32844_s3 + $0x488] sm:$0xff]  }
 0xb16   :  { %24105 = vmatprep.subr.bf16.mxu1 %v26447_v54 }
 0xb17   :  { %v12632_v20 = vsel %vm2300_vm3, %v30348_v2, %v12631_v41  ;;  %v26454_v2 = vld [vmem:[%s32844_s3 + $0x3d8] sm:$0xff]   ;;  %v13322_v1 = vrot.slane %v33143_v55, 1 }
 0xb18   :  { %24086 = vmatmul.mubr.bf16.gmra.mrb[124].mxu1 %v30287_v42  ;;  %v26450_v42 = vld [vmem:[%s32844_s3 + $0x3b8] sm:$0xff]  }
 0xb19   :  { %24089 = vmatprep.mubr.bf16.mxu1 %v30290_v24  ;;  %24106 = vmatpush3.bf16.msra.mxu1 %v26447_v54  ;;  %v33137_v24 = vld [vmem:[#allocation11_spill] sm:$0xff]  ;;  %v26468_v54 = vld [vmem:[%s32844_s3 + $0x448] sm:$0xff]  }
 0xb1a   :  { %24107 = vmatprep.subr.bf16.mxu1 %v26448_v63 }
 0xb1d   :  { %24108 = vmatpush3.bf16.msra.mxu1 %v26448_v63  ;;  %v31267_v63 = vsel %vm1623_vm2, %v13302_v19, %v13306_v16 }
 0xb1e   :  { %24109 = vmatprep.subr.bf16.mxu1 %v26449_v46 }
 0xb20   :  { %24090 = vmatmul.mubr.bf16.gmra.mrb[128].mxu1 %v33132_v5  ;;  %v12845_v5 = vsel %vm2565_vm5, %v12843_v44, %v30938_v21  ;;  %v26455_v21 = vld [vmem:[%s32844_s3 + $0x3e0] sm:$0xff]   ;;  %v33147_v44 = vshll.u32 %v33146_v59, 16 }
 0xb21   :  { %24093 = vmatprep.mubr.bf16.mxu1 %v33137_v24  ;;  %24110 = vmatpush3.bf16.msra.mxu1 %v26449_v46  ;;  %v26470_v24 = vld [vmem:[%s32844_s3 + $0x458] sm:$0xff]  }
 0xb22   :  { %24111 = vmatprep.subr.bf16.mxu1 %v26450_v42 }
 0xb25   :  { %24112 = vmatpush3.bf16.msra.mxu1 %v26450_v42  ;;  %v13310_v42 = vor.u32 %v33144_v28, %v13306_v16  ;;  %v31359_v16 = vld [vmem:[#allocation2 + $0x30] sm:$0xff] }
 0xb26   :  { %24133 = vmatprep.subr.bf16.mxu1 %v26451_v25 }
 0xb28   :  { %24094 = vmatmul.mubr.bf16.gmra.mrb[132].mxu1 %v12632_v20  ;;  %v13330_v20 = vrot.slane %v33147_v44, 1 }
 0xb29   :  { %24113 = vmatprep.mubr.bf16.mxu1 %v12845_v5  ;;  %v26471_v5 = vld [vmem:[%s32844_s3 + $0x460] sm:$0xff]  }
 0xb30   :  { %24114 = vmatmul.mubr.bf16.vlgmr.msra.gmra.mrb[116].mxu1 %v30948_v4  ;;  %v26456_v4 = vld [vmem:[%s32844_s3 + $0x3e8] sm:$0xff]  }
 0xb31   :  { %24117 = vmatprep.mubr.bf16.mxu1 %v30960_v11  ;;  %24134 = vmatpush3.bf16.msra.mxu1 %v26451_v25  ;;  %v26457_v11 = vld [vmem:[%s32844_s3 + $0x3f0] sm:$0xff]  }
 0xb32   :  { %24135 = vmatprep.subr.bf16.mxu1 %v26452_v23 }
 0xb35   :  { %24136 = vmatpush3.bf16.msra.mxu1 %v26452_v23  ;;  %v33148_v23 = vshll.u32 %v30406_v29, 16 }
 0xb36   :  { %24137 = vmatprep.subr.bf16.mxu1 %v26453_v27 }
 0xb38   :  { %24118 = vmatmul.mubr.bf16.gmra.mrb[120].mxu1 %v30964_v37  ;;  %v31204_v37 = vrot.slane %v31043_v0, 2 }
 0xb39   :  { %24121 = vmatprep.mubr.bf16.mxu1 %v30976_v35  ;;  %24138 = vmatpush3.bf16.msra.mxu1 %v26453_v27  ;;  %v26458_v35 = vld [vmem:[%s32844_s3 + $0x3f8] sm:$0xff]   ;;  %v13338_v27 = vrot.slane %v33148_v23, 1 }
 0xb3a   :  { %24139 = vmatprep.subr.bf16.mxu1 %v26454_v2  ;;  %v12863_v33 = vsel %vm2565_vm5, %v31204_v37, %v12862_v12  ;;  %v33151_v12 = vshll.u32 %v30409_v47, 16 }
 0xb3d   :  { %24140 = vmatpush3.bf16.msra.mxu1 %v26454_v2  ;;  %v33149_v2 = vshrl.u32 %v30404_v40, 16  ;;  %v26473_v40 = vld [vmem:[%s32844_s3 + $0x470] sm:$0xff]  }
 0xb3e   :  { %24141 = vmatprep.subr.bf16.mxu1 %v26455_v21 }
 0xb40   :  { %24122 = vmatmul.mubr.bf16.gmra.mrb[124].mxu1 %v30980_v43  ;;  %v12861_v43 = vsel %vm2565_vm5, %v30990_v17, %v31204_v37  ;;  %v26461_v17 = vld [vmem:[%s32844_s3 + $0x410] sm:$0xff]  }
 0xb41   :  { %24125 = vmatprep.mubr.bf16.mxu1 %v30996_v30  ;;  %24142 = vmatpush3.bf16.msra.mxu1 %v26455_v21  ;;  %v26459_v30 = vld [vmem:[%s32844_s3 + $0x400] sm:$0xff]   ;;  %v13326_v21 = vor.u32 %v33149_v2, %v13322_v1  ;;  %v31419_v2 = vrot.slane %v31252_v31, 1 }
 0xb42   :  { %24143 = vmatprep.subr.bf16.mxu1 %v26456_v4 }
 0xb45   :  { %24144 = vmatpush3.bf16.msra.mxu1 %v26456_v4  ;;  %v33150_v4 = vshrl.u32 %v33146_v59, 16  ;;  %v31398_v59 = vld [vmem:[#allocation2 + $0x50] sm:$0xff] }
 0xb46   :  { %24145 = vmatprep.subr.bf16.mxu1 %v26457_v11  ;;  %v31401_v44 = vrot.slane %v31398_v59, 1 }
 0xb48   :  { %24126 = vmatmul.mubr.bf16.gmra.mrb[128].mxu1 %v31001_v57  ;;  %v26460_v57 = vld [vmem:[%s32844_s3 + $0x408] sm:$0xff]  }
 0xb49   :  { %24129 = vmatprep.mubr.bf16.mxu1 %v12861_v43  ;;  %24146 = vmatpush3.bf16.msra.mxu1 %v26457_v11  ;;  %v13334_v11 = vor.u32 %v33150_v4, %v13330_v20  ;;  %v31307_v43 = vsel %vm1623_vm2, %v13326_v21, %v13330_v20  ;;  %v26480_v20 = vld [vmem:[%s32844_s3 + $0x4a8] sm:$0xff]  }
 0xb4a   :  { %24147 = vmatprep.subr.bf16.mxu1 %v26458_v35 }
 0xb4d   :  { %24148 = vmatpush3.bf16.msra.mxu1 %v26458_v35  ;;  %v26472_v35 = vld [vmem:[%s32844_s3 + $0x468] sm:$0xff]  }
 0xb4e   :  { %24169 = vmatprep.subr.bf16.mxu1 %v26459_v30 }
 0xb50   :  { %24130 = vmatmul.mubr.bf16.gmra.mrb[132].mxu1 %v12863_v33  ;;  %v31319_v33 = vrot.slane %v33151_v12, 1 }
 0xb51   :  { %24149 = vmatprep.mubr.bf16.mxu1 %v30684_v60  ;;  %v26462_v60 = vld [vmem:[%s32844_s3 + $0x418] sm:$0xff]  }
 0xb58   :  { %24150 = vmatmul.mubr.bf16.vlgmr.msra.gmra.mrb[116].mxu1 %v30798_v36  ;;  %v26463_v36 = vld [vmem:[%s32844_s3 + $0x420] sm:$0xff]  }
 0xb59   :  { %24153 = vmatprep.mubr.bf16.mxu1 %v30814_v9  ;;  %24170 = vmatpush3.bf16.msra.mxu1 %v26459_v30  ;;  %v26464_v9 = vld [vmem:[%s32844_s3 + $0x428] sm:$0xff]   ;;  %v31311_v30 = vsel %vm1623_vm2, %v13334_v11, %v13338_v27  ;;  %v26482_v11 = vld [vmem:[%s32844_s3 + $0x4b8] sm:$0xff]  }
 0xb5a   :  { %24171 = vmatprep.subr.bf16.mxu1 %v26460_v57 }
 0xb5d   :  { %24172 = vmatpush3.bf16.msra.mxu1 %v26460_v57  ;;  %v31321_v57 = vld [vmem:[#allocation2 + $0x68] sm:$0x1] }
 0xb5e   :  { %24173 = vmatprep.subr.bf16.mxu1 %v26461_v17 }
 0xb60   :  { %24154 = vmatmul.mubr.bf16.gmra.mrb[120].mxu1 %v30817_v38  ;;  %v26465_v38 = vld [vmem:[%s32844_s3 + $0x430] sm:$0xff]  }
 0xb61   :  { %24157 = vmatprep.mubr.bf16.mxu1 %v30834_v26  ;;  %24174 = vmatpush3.bf16.msra.mxu1 %v26461_v17  ;;  %v13253_v26 = vld [vmem:[#allocation2 + $0x18] sm:$0xff]  ;;  %v33152_v17 = vshrl.u32 %v30406_v29, 16  ;;  %v26475_v29 = vld [vmem:[%s32844_s3 + $0x480] sm:$0xff]  }
 0xb62   :  { %24175 = vmatprep.subr.bf16.mxu1 %v26462_v60  ;;  %v13283_v18 = vshll.u32 %v13253_v26, 16  ;;  %v13281_v8 = vshrl.u32 %v13253_v26, 16  ;;  %v13355_v26 = vsel %vm1623_vm2, %v31091_v15, %v31319_v33 }
 0xb65   :  { %24176 = vmatpush3.bf16.msra.mxu1 %v26462_v60  ;;  %v31325_v60 = vor.u32 %v33152_v17, %v13338_v27  ;;  %v26481_v27 = vld [vmem:[%s32844_s3 + $0x4b0] sm:$0xff]  }
 0xb66   :  { %24177 = vmatprep.subr.bf16.mxu1 %v26463_v36 }
 0xb68   :  { %24158 = vmatmul.mubr.bf16.gmra.mrb[124].mxu1 %v30837_v48  ;;  %v26467_v48 = vld [vmem:[%s32844_s3 + $0x440] sm:$0xff]  }
 0xb69   :  { %24161 = vmatprep.mubr.bf16.mxu1 %v30854_v51  ;;  %24178 = vmatpush3.bf16.msra.mxu1 %v26463_v36  ;;  %v13285_v51 = vrot.slane %v13283_v18, 1  ;;  %v26474_v36 = vld [vmem:[%s32844_s3 + $0x478] sm:$0xff]  }
 0xb6a   :  { %24179 = vmatprep.subr.bf16.mxu1 %v26464_v9 }
 0xb6b   :  { %v13286_v52 = vor.u32 %v13285_v51, %v13281_v8  ;;  %v31342_v51 = vld [vmem:[#allocation2 + $0x20] sm:$0xff] }
 0xb6d   :  { %24180 = vmatpush3.bf16.msra.mxu1 %v26464_v9  ;;  %v13347_v9 = vsel %vm1623_vm2, %v31325_v60, %v31073_v62  ;;  %v13584_v62 = vrot.slane %v31342_v51, 1 }
 0xb6e   :  { %24181 = vmatprep.subr.bf16.mxu1 %v26465_v38 }
 0xb6f   :  { %v13587_v19 = vsel %vm2069_vm4, %v13584_v62, %v31357_v56 }
 0xb70   :  { %24162 = vmatmul.mubr.bf16.gmra.mrb[128].mxu1 %v30987_v6  ;;  %v13291_v6 = vsel %vm1623_vm2, %v13286_v52, %v30490_v3  ;;  %v33141_v3 = vld [vmem:[#allocation12_spill] sm:$0xff] }
 0xb71   :  { %24165 = vmatprep.mubr.bf16.mxu1 %v31043_v0  ;;  %24182 = vmatpush3.bf16.msra.mxu1 %v26465_v38  ;;  %v33142_v61 = vshll.u32 %v33141_v3, 16  ;;  %v33145_v45 = vshrl.u32 %v33141_v3, 16  ;;  %v13360_v38 = vshll.u32 %v31321_v57, 16  ;;  %v26477_v3 = vld [vmem:[%s32844_s3 + $0x490] sm:$0xff]  }
 0xb72   :  { %24183 = vmatprep.subr.bf16.mxu1 %v26466_v14 }
 0xb73   :  { %v13314_v46 = vrot.slane %v33142_v61, 1  ;;  %v13362_v18 = vrot.slane %v13360_v38, 1  ;;  %v31375_v61 = vld [vmem:[#allocation2 + $0x38] sm:$0xff] }
 0xb75   :  { %24184 = vmatpush3.bf16.msra.mxu1 %v26466_v14  ;;  %v13318_v50 = vor.u32 %v33145_v45, %v13314_v46  ;;  %v31285_v25 = vsel %vm1623_vm2, %v13310_v42, %v13314_v46  ;;  %v31340_v14 = vld [vmem:[#allocation2 + $0x18] sm:$0xfe]  ;;  %v13590_v46 = vrot.slane %v31375_v61, 1  ;;  %v26479_v45 = vld [vmem:[%s32844_s3 + $0x4a0] sm:$0xff]  }
 0xb76   :  { %24205 = vmatprep.subr.bf16.mxu1 %v26467_v48  ;;  %v13583_v15 = vrot.slane %v31340_v14, 1  ;;  %v13813_v21 = vshrl.u32 %v31340_v14, 16  ;;  %v13816_v4 = vshll.u32 %v31340_v14, 16  ;;  %v26488_v14 = vld [vmem:[%s32844_s3 + $0x4e8] sm:$0xff]  }
 0xb77   :  { %v31289_v41 = vsel %vm1623_vm2, %v13318_v50, %v13322_v1  ;;  %v26478_v1 = vld [vmem:[%s32844_s3 + $0x498] sm:$0xff]   ;;  %v31395_v50 = vld [vmem:[#allocation2 + $0x48] sm:$0xff] }
 0xb78   :  { %24166 = vmatmul.mubr.bf16.gmra.mrb[132].mxu1 %v31252_v31  ;;  %v13815_v12 = vrot.slane %v13813_v21, 1  ;;  %v13818_v17 = vrot.slane %v13816_v4, 2 }
 0xb79   :  { %24185 = vmatprep.mubr.bf16.mxu1 %v13291_v6  ;;  %v13585_v6 = vsel %vm2069_vm4, %v13583_v15, %v13584_v62  ;;  %v33155_v62 = vld [vmem:[#allocation18_spill] sm:$0xff]  ;;  %v33156_v15 = vld [vmem:[#allocation19_spill] sm:$0xff] }
 0xb7a   :  { %v13819_v38 = vor.u32 %v13818_v17, %v13815_v12  ;;  %v26493_v17 = vld [vmem:[%s32844_s3 + $0x510] sm:$0xff]  }
 0xb80   :  { %24186 = vmatmul.mubr.bf16.vlgmr.msra.gmra.mrb[116].mxu1 %v30508_v22 }
 0xb81   :  { %24189 = vmatprep.mubr.bf16.mxu1 %v31267_v63  ;;  %24206 = vmatpush3.bf16.msra.mxu1 %v26467_v48  ;;  %v33153_v48 = vshrl.u32 %v30409_v47, 16  ;;  %v13588_v47 = vrot.slane %v31359_v16, 1 }
 0xb82   :  { %24207 = vmatprep.subr.bf16.mxu1 %v26468_v54 }
 0xb83   :  { %v31348_v8 = vor.u32 %v33153_v48, %v31319_v33  ;;  %v31385_v28 = vsel %vm2069_vm4, %v13588_v47, %v13590_v46  ;;  %v31460_v48 = vld [vmem:[#allocation2 + $0x68] sm:$0x3] }
 0xb85   :  { %24208 = vmatpush3.bf16.msra.mxu1 %v26468_v54  ;;  %v13363_v52 = vsel %vm1623_vm2, %v31348_v8, %v13362_v18  ;;  %v31369_v54 = vsel %vm2069_vm4, %v31357_v56, %v13588_v47  ;;  %v33154_v18 = vld [vmem:[#allocation16_spill] sm:$0xff]  ;;  %v13860_v47 = vshll.u32 %v31460_v48, 16 }
 0xb86   :  { %24209 = vmatprep.subr.bf16.mxu1 %v26469_v7 }
 0xb88   :  { %24190 = vmatmul.mubr.bf16.gmra.mrb[120].mxu1 %v31285_v25 }
 0xb89   :  { %24193 = vmatprep.mubr.bf16.mxu1 %v31289_v41  ;;  %24210 = vmatpush3.bf16.msra.mxu1 %v26469_v7  ;;  %v31378_v7 = vld [vmem:[#allocation2 + $0x40] sm:$0xff] }
 0xb8a   :  { %24211 = vmatprep.subr.bf16.mxu1 %v26470_v24  ;;  %v13592_v55 = vrot.slane %v31378_v7, 1 }
 0xb8c   :  { %v31389_v42 = vsel %vm2069_vm4, %v13590_v46, %v13592_v55  ;;  %v33157_v46 = vld [vmem:[#allocation17_spill] sm:$0xff] }
 0xb8d   :  { %24212 = vmatpush3.bf16.msra.mxu1 %v26470_v24  ;;  %v13594_v24 = vrot.slane %v31395_v50, 1 }
 0xb8e   :  { %24213 = vmatprep.subr.bf16.mxu1 %v26471_v5 }
 0xb8f   :  { %v31412_v23 = vsel %vm2069_vm4, %v13594_v24, %v31401_v44 }
 0xb90   :  { %24194 = vmatmul.mubr.bf16.gmra.mrb[124].mxu1 %v31307_v43 }
 0xb91   :  { %24197 = vmatprep.mubr.bf16.mxu1 %v31311_v30  ;;  %24214 = vmatpush3.bf16.msra.mxu1 %v26471_v5  ;;  %v31407_v5 = vsel %vm2069_vm4, %v13592_v55, %v13594_v24  ;;  %v33158_v55 = vld [vmem:[#allocation20_spill] sm:$0xff]  ;;  %v14056_v24 = vld [vmem:[#allocation2 + $0x18] sm:$0xfc] }
 0xb92   :  { %24215 = vmatprep.subr.bf16.mxu1 %v26472_v35 }
 0xb95   :  { %24216 = vmatpush3.bf16.msra.mxu1 %v26472_v35  ;;  %v13599_v35 = vsel %vm2069_vm4, %v31401_v44, %v31122_v34 }
 0xb96   :  { %24217 = vmatprep.subr.bf16.mxu1 %v26473_v40 }
 0xb98   :  { %24198 = vmatmul.mubr.bf16.gmra.mrb[128].mxu1 %v13347_v9  ;;  %v13602_v9 = vrot.slane %v31321_v57, 1  ;;  %v26485_v57 = vld [vmem:[%s32844_s3 + $0x4d0] sm:$0xff]  }
 0xb99   :  { %24201 = vmatprep.mubr.bf16.mxu1 %v13355_v26  ;;  %24218 = vmatpush3.bf16.msra.mxu1 %v26473_v40  ;;  %v13601_v40 = vsel %vm2069_vm4, %v31122_v34, %v31419_v2  ;;  %v13823_v34 = vsel %vm2300_vm3, %v13819_v38, %v30440_v58  ;;  %v26486_v58 = vld [vmem:[%s32844_s3 + $0x4d8] sm:$0xff]  }
 0xb9a   :  { %24219 = vmatprep.subr.bf16.mxu1 %v26474_v36  ;;  %v13603_v26 = vsel %vm2069_vm4, %v31419_v2, %v13602_v9  ;;  %v14084_v9 = vrot.slane %v31378_v7, 2  ;;  %v26494_v38 = vld [vmem:[%s32844_s3 + $0x518] sm:$0xff]  }
 0xb9d   :  { %24220 = vmatpush3.bf16.msra.mxu1 %v26474_v36  ;;  %v26483_v36 = vld [vmem:[%s32844_s3 + $0x4c0] sm:$0xff]  }
 0xb9e   :  { %24241 = vmatprep.subr.bf16.mxu1 %v26475_v29 }
 0xba0   :  { %24202 = vmatmul.mubr.bf16.gmra.mrb[132].mxu1 %v13363_v52  ;;  %v26489_v52 = vld [vmem:[%s32844_s3 + $0x4f0] sm:$0xff]  }
 0xba1   :  { %24221 = vmatprep.mubr.bf16.mxu1 %v13585_v6  ;;  %v13857_v6 = vshrl.u32 %v31460_v48, 16 }
 0xba8   :  { %24222 = vmatmul.mubr.bf16.vlgmr.msra.gmra.mrb[116].mxu1 %v13587_v19  ;;  %v13859_v19 = vrot.slane %v13857_v6, 1  ;;  %v26497_v6 = vld [vmem:[%s32844_s3 + $0x530] sm:$0xff]  }
 0xba9   :  { %24225 = vmatprep.mubr.bf16.mxu1 %v31369_v54  ;;  %24242 = vmatpush3.bf16.msra.mxu1 %v26475_v29  ;;  %v26484_v29 = vld [vmem:[%s32844_s3 + $0x4c8] sm:$0xff]  }
 0xbaa   :  { %24243 = vmatprep.subr.bf16.mxu1 %v26476_v49 }
 0xbad   :  { %24244 = vmatpush3.bf16.msra.mxu1 %v26476_v49  ;;  %v26490_v49 = vld [vmem:[%s32844_s3 + $0x4f8] sm:$0xff]  }
 0xbae   :  { %24245 = vmatprep.subr.bf16.mxu1 %v26477_v3 }
 0xbb0   :  { %24226 = vmatmul.mubr.bf16.gmra.mrb[120].mxu1 %v31385_v28 }
 0xbb1   :  { %24229 = vmatprep.mubr.bf16.mxu1 %v31389_v42  ;;  %24246 = vmatpush3.bf16.msra.mxu1 %v26477_v3  ;;  %v13862_v3 = vrot.slane %v13860_v47, 2  ;;  %v26498_v47 = vld [vmem:[%s32844_s3 + $0x538] sm:$0xff]  }
 0xbb2   :  { %24247 = vmatprep.subr.bf16.mxu1 %v26478_v1 }
 0xbb5   :  { %24248 = vmatpush3.bf16.msra.mxu1 %v26478_v1  ;;  %v26491_v1 = vld [vmem:[%s32844_s3 + $0x500] sm:$0xff]  }
 0xbb6   :  { %24249 = vmatprep.subr.bf16.mxu1 %v26479_v45 }
 0xbb8   :  { %24230 = vmatmul.mubr.bf16.gmra.mrb[124].mxu1 %v31407_v5 }
 0xbb9   :  { %24233 = vmatprep.mubr.bf16.mxu1 %v31412_v23  ;;  %24250 = vmatpush3.bf16.msra.mxu1 %v26479_v45  ;;  %v13863_v45 = vor.u32 %v13862_v3, %v13859_v19  ;;  %v33160_v19 = vld [vmem:[#allocation22_spill] sm:$0xff] }
 0xbba   :  { %24251 = vmatprep.subr.bf16.mxu1 %v26480_v20  ;;  %v14093_v3 = vsel %vm2565_vm5, %v31204_v37, %v33160_v19 }
 0xbbb   :  { %v13864_v21 = vsel %vm2300_vm3, %v30472_v53, %v13863_v45 }
 0xbbd   :  { %24252 = vmatpush3.bf16.msra.mxu1 %v26480_v20  ;;  %v14076_v20 = vrot.slane %v31342_v51, 2 }
 0xbbe   :  { %24253 = vmatprep.subr.bf16.mxu1 %v26481_v27 }
 0xbc0   :  { %24234 = vmatmul.mubr.bf16.gmra.mrb[128].mxu1 %v13599_v35  ;;  %v14080_v35 = vrot.slane %v31359_v16, 2 }
 0xbc1   :  { %24237 = vmatprep.mubr.bf16.mxu1 %v13601_v40  ;;  %24254 = vmatpush3.bf16.msra.mxu1 %v26481_v27  ;;  %v14075_v27 = vrot.slane %v14056_v24, 2  ;;  %v26492_v40 = vld [vmem:[%s32844_s3 + $0x508] sm:$0xff]  }
 0xbc2   :  { %24255 = vmatprep.subr.bf16.mxu1 %v26482_v11 }
 0xbc3   :  { %v14077_v4 = vsel %vm2565_vm5, %v14075_v27, %v14076_v20  ;;  %v33163_v27 = vld [vmem:[#allocation21_spill] sm:$0xff] }
 0xbc5   :  { %24256 = vmatpush3.bf16.msra.mxu1 %v26482_v11  ;;  %v31481_v11 = vrot.slane %v31354_v39, 2 }
 0xbc6   :  { %24277 = vmatprep.subr.bf16.mxu1 %v26483_v36 }
 0xbc7   :  { %v14079_v12 = vsel %vm2565_vm5, %v14076_v20, %v31481_v11  ;;  %v31491_v53 = vsel %vm2565_vm5, %v31481_v11, %v14080_v35  ;;  %v26512_v20 = vld [vmem:[%s32844_s3 + $0x5a8] sm:$0xff]  }
 0xbc8   :  { %24238 = vmatmul.mubr.bf16.gmra.mrb[132].mxu1 %v13603_v26 }
 0xbc9   :  { %24257 = vmatprep.mubr.bf16.mxu1 %v13823_v34 }
 0xbd0   :  { %24258 = vmatmul.mubr.bf16.vlgmr.msra.gmra.mrb[116].mxu1 %v30452_v32  ;;  %v26487_v32 = vld [vmem:[%s32844_s3 + $0x4e0] sm:$0xff]  }
 0xbd1   :  { %24261 = vmatprep.mubr.bf16.mxu1 %v30456_v13  ;;  %24278 = vmatpush3.bf16.msra.mxu1 %v26483_v36  ;;  %v14082_v36 = vrot.slane %v31375_v61, 2 }
 0xbd2   :  { %24279 = vmatprep.subr.bf16.mxu1 %v26484_v29 }
 0xbd3   :  { %v31503_v26 = vsel %vm2565_vm5, %v14080_v35, %v14082_v36  ;;  %v31507_v34 = vsel %vm2565_vm5, %v14082_v36, %v14084_v9  ;;  %v31610_v35 = vld [vmem:[#allocation2 + $0x70] sm:$0x1] }
 0xbd5   :  { %24280 = vmatpush3.bf16.msra.mxu1 %v26484_v29  ;;  %v26495_v29 = vld [vmem:[%s32844_s3 + $0x520] sm:$0xff]  }
 0xbd6   :  { %24281 = vmatprep.subr.bf16.mxu1 %v26485_v57 }
 0xbd8   :  { %24262 = vmatmul.mubr.bf16.gmra.mrb[120].mxu1 %v30459_v10 }
 0xbd9   :  { %24265 = vmatprep.mubr.bf16.mxu1 %v33154_v18  ;;  %24282 = vmatpush3.bf16.msra.mxu1 %v26485_v57  ;;  %v14086_v57 = vrot.slane %v31395_v50, 2 }
 0xbda   :  { %24283 = vmatprep.subr.bf16.mxu1 %v26486_v58 }
 0xbdd   :  { %24284 = vmatpush3.bf16.msra.mxu1 %v26486_v58  ;;  %v26496_v58 = vld [vmem:[%s32844_s3 + $0x528] sm:$0xff]  }
 0xbde   :  { %24285 = vmatprep.subr.bf16.mxu1 %v26487_v32 }
 0xbe0   :  { %24266 = vmatmul.mubr.bf16.gmra.mrb[124].mxu1 %v33155_v62 }
 0xbe1   :  { %24269 = vmatprep.mubr.bf16.mxu1 %v33156_v15  ;;  %24286 = vmatpush3.bf16.msra.mxu1 %v26487_v32  ;;  %v31518_v32 = vsel %vm2565_vm5, %v14084_v9, %v14086_v57  ;;  %v26515_v9 = vld [vmem:[%s32844_s3 + $0x5c0] sm:$0xff]  }
 0xbe2   :  { %24287 = vmatprep.subr.bf16.mxu1 %v26488_v14 }
 0xbe5   :  { %24288 = vmatpush3.bf16.msra.mxu1 %v26488_v14  ;;  %v33159_v14 = vld [vmem:[#allocation26_spill] sm:$0xff] }
 0xbe6   :  { %24289 = vmatprep.subr.bf16.mxu1 %v26489_v52 }
 0xbe8   :  { %24270 = vmatmul.mubr.bf16.gmra.mrb[128].mxu1 %v33157_v46  ;;  %v26499_v46 = vld [vmem:[%s32844_s3 + $0x540] sm:$0xff]  }
 0xbe9   :  { %24273 = vmatprep.mubr.bf16.mxu1 %v33158_v55  ;;  %24290 = vmatpush3.bf16.msra.mxu1 %v26489_v52  ;;  %v31523_v52 = vsel %vm2565_vm5, %v14086_v57, %v33159_v14  ;;  %v14094_v55 = vrot.slane %v31460_v48, 2  ;;  %v26501_v48 = vld [vmem:[%s32844_s3 + $0x550] sm:$0xff]   ;;  %v33166_v57 = vshrl.u32 %v33163_v27, 16 }
 0xbea   :  { %24291 = vmatprep.subr.bf16.mxu1 %v26490_v49 }
 0xbed   :  { %24292 = vmatpush3.bf16.msra.mxu1 %v26490_v49  ;;  %v14091_v49 = vsel %vm2565_vm5, %v33159_v14, %v31204_v37  ;;  %v26500_v37 = vld [vmem:[%s32844_s3 + $0x548] sm:$0xff]  }
 0xbee   :  { %24313 = vmatprep.subr.bf16.mxu1 %v26491_v1 }
 0xbf0   :  { %24274 = vmatmul.mubr.bf16.gmra.mrb[132].mxu1 %v13864_v21  ;;  %v33164_v21 = vshll.u32 %v33163_v27, 16 }
 0xbf1   :  { %24293 = vmatprep.mubr.bf16.mxu1 %v14077_v4 }
 0xbf2   :  { %v14586_v4 = vrot.slane %v33164_v21, 1  ;;  %v15288_v21 = vld [vmem:[#allocation2 + $0x20] sm:$0xfc] }
 0xbf4   :  { %v14587_v36 = vsel %vm1623_vm2, %v31348_v8, %v14586_v4 }
 0xbf8   :  { %24294 = vmatmul.mubr.bf16.vlgmr.msra.gmra.mrb[116].mxu1 %v14079_v12 }
 0xbf9   :  { %24297 = vmatprep.mubr.bf16.mxu1 %v31491_v53  ;;  %24314 = vmatpush3.bf16.msra.mxu1 %v26491_v1  ;;  %v14095_v1 = vsel %vm2565_vm5, %v33160_v19, %v14094_v55 }
 0xbfa   :  { %24315 = vmatprep.subr.bf16.mxu1 %v26492_v40 }
 0xbfd   :  { %24316 = vmatpush3.bf16.msra.mxu1 %v26492_v40 }
 0xbfe   :  { %24317 = vmatprep.subr.bf16.mxu1 %v26493_v17 }
 0xc00   :  { %24298 = vmatmul.mubr.bf16.gmra.mrb[120].mxu1 %v31503_v26 }
 0xc01   :  { %24301 = vmatprep.mubr.bf16.mxu1 %v31507_v34  ;;  %24318 = vmatpush3.bf16.msra.mxu1 %v26493_v17  ;;  %v14592_v17 = vshll.u32 %v31610_v35, 16 }
 0xc02   :  { %24319 = vmatprep.subr.bf16.mxu1 %v26494_v38 }
 0xc05   :  { %24320 = vmatpush3.bf16.msra.mxu1 %v26494_v38  ;;  %v14594_v38 = vrot.slane %v14592_v17, 1 }
 0xc06   :  { %24321 = vmatprep.subr.bf16.mxu1 %v26495_v29 }
 0xc08   :  { %24302 = vmatmul.mubr.bf16.gmra.mrb[124].mxu1 %v31518_v32 }
 0xc09   :  { %24305 = vmatprep.mubr.bf16.mxu1 %v31523_v52  ;;  %24322 = vmatpush3.bf16.msra.mxu1 %v26495_v29  ;;  %v14787_v29 = vld [vmem:[#allocation2 + $0x20] sm:$0xfe] }
 0xc0a   :  { %24323 = vmatprep.subr.bf16.mxu1 %v26496_v58  ;;  %v15045_v55 = vshrl.u32 %v14787_v29, 16 }
 0xc0d   :  { %24324 = vmatpush3.bf16.msra.mxu1 %v26496_v58  ;;  %v14590_v58 = vor.u32 %v33166_v57, %v14586_v4  ;;  %v15307_v4 = vrot.slane %v15288_v21, 2 }
 0xc0e   :  { %24325 = vmatprep.subr.bf16.mxu1 %v26497_v6 }
 0xc0f   :  { %v14595_v14 = vsel %vm1623_vm2, %v14590_v58, %v14594_v38 }
 0xc10   :  { %24306 = vmatmul.mubr.bf16.gmra.mrb[128].mxu1 %v14091_v49 }
 0xc11   :  { %24309 = vmatprep.mubr.bf16.mxu1 %v14093_v3  ;;  %24326 = vmatpush3.bf16.msra.mxu1 %v26497_v6  ;;  %v26516_v6 = vld [vmem:[%s32844_s3 + $0x5c8] sm:$0xff]  }
 0xc12   :  { %24327 = vmatprep.subr.bf16.mxu1 %v26498_v47  ;;  %v26520_v3 = vld [vmem:[%s32844_s3 + $0x5e8] sm:$0xff]  }
 0xc15   :  { %24328 = vmatpush3.bf16.msra.mxu1 %v26498_v47  ;;  %v26517_v47 = vld [vmem:[%s32844_s3 + $0x5d0] sm:$0xff]  }
 0xc16   :  { %24349 = vmatprep.subr.bf16.mxu1 %v26499_v46 }
 0xc18   :  { %24310 = vmatmul.mubr.bf16.gmra.mrb[132].mxu1 %v14095_v1  ;;  %v15048_v1 = vshll.u32 %v14787_v29, 16 }
 0xc19   :  { %24329 = vmatprep.mubr.bf16.mxu1 %v31342_v51  ;;  %v26502_v51 = vld [vmem:[%s32844_s3 + $0x558] sm:$0xff]  }
 0xc20   :  { %24330 = vmatmul.mubr.bf16.vlgmr.msra.gmra.mrb[116].mxu1 %v31354_v39  ;;  %v26503_v39 = vld [vmem:[%s32844_s3 + $0x560] sm:$0xff]  }
 0xc21   :  { %24333 = vmatprep.mubr.bf16.mxu1 %v31359_v16  ;;  %24350 = vmatpush3.bf16.msra.mxu1 %v26499_v46  ;;  %v26504_v16 = vld [vmem:[%s32844_s3 + $0x568] sm:$0xff]  }
 0xc22   :  { %24351 = vmatprep.subr.bf16.mxu1 %v26500_v37 }
 0xc25   :  { %24352 = vmatpush3.bf16.msra.mxu1 %v26500_v37 }
 0xc26   :  { %24353 = vmatprep.subr.bf16.mxu1 %v26501_v48 }
 0xc28   :  { %24334 = vmatmul.mubr.bf16.gmra.mrb[120].mxu1 %v31375_v61  ;;  %v26505_v61 = vld [vmem:[%s32844_s3 + $0x570] sm:$0xff]  }
 0xc29   :  { %24337 = vmatprep.mubr.bf16.mxu1 %v31378_v7  ;;  %24354 = vmatpush3.bf16.msra.mxu1 %v26501_v48  ;;  %v26506_v7 = vld [vmem:[%s32844_s3 + $0x578] sm:$0xff]   ;;  %v15047_v48 = vrot.slane %v15045_v55, 1 }
 0xc2a   :  { %24355 = vmatprep.subr.bf16.mxu1 %v26502_v51 }
 0xc2d   :  { %24356 = vmatpush3.bf16.msra.mxu1 %v26502_v51  ;;  %v15050_v51 = vrot.slane %v15048_v1, 2 }
 0xc2e   :  { %24357 = vmatprep.subr.bf16.mxu1 %v26503_v39 }
 0xc30   :  { %24338 = vmatmul.mubr.bf16.gmra.mrb[124].mxu1 %v31395_v50  ;;  %v26507_v50 = vld [vmem:[%s32844_s3 + $0x580] sm:$0xff]  }
 0xc31   :  { %24341 = vmatprep.mubr.bf16.mxu1 %v31398_v59  ;;  %24358 = vmatpush3.bf16.msra.mxu1 %v26503_v39  ;;  %v31577_v59 = vld [vmem:[#allocation2 + $0x68] sm:$0xff]  ;;  %v26523_v39 = vld [vmem:[%s32844_s3 + $0x600] sm:$0xff]  }
 0xc32   :  { %24359 = vmatprep.subr.bf16.mxu1 %v26504_v16  ;;  %v14832_v46 = vrot.slane %v31577_v59, 1  ;;  %v15324_v17 = vrot.slane %v31577_v59, 2 }
 0xc34   :  { %v14833_v37 = vsel %vm2069_vm4, %v31419_v2, %v14832_v46 }
 0xc35   :  { %24360 = vmatpush3.bf16.msra.mxu1 %v26504_v16  ;;  %v14834_v16 = vrot.slane %v31610_v35, 1  ;;  %v33171_v35 = vmov 0.0  }
 0xc36   :  { %24361 = vmatprep.subr.bf16.mxu1 %v26505_v61 }
 0xc38   :  { %24342 = vmatmul.mubr.bf16.gmra.mrb[128].mxu1 %v31043_v0  ;;  %v26508_v0 = vld [vmem:[%s32844_s3 + $0x588] sm:$0xff]  }
 0xc39   :  { %24345 = vmatprep.mubr.bf16.mxu1 %v31252_v31  ;;  %24362 = vmatpush3.bf16.msra.mxu1 %v26505_v61  ;;  %v26509_v31 = vld [vmem:[%s32844_s3 + $0x590] sm:$0xff]   ;;  %v15051_v61 = vor.u32 %v15050_v51, %v15047_v48 }
 0xc3a   :  { %24363 = vmatprep.subr.bf16.mxu1 %v26506_v7 }
 0xc3d   :  { %24364 = vmatpush3.bf16.msra.mxu1 %v26506_v7  ;;  %v14835_v7 = vsel %vm2069_vm4, %v14832_v46, %v14834_v16 }
 0xc3e   :  { %24385 = vmatprep.subr.bf16.mxu1 %v26507_v50 }
 0xc40   :  { %24346 = vmatmul.mubr.bf16.gmra.mrb[132].mxu1 %v31577_v59 }
 0xc41   :  { %24365 = vmatprep.mubr.bf16.mxu1 %v30508_v22  ;;  %v26510_v22 = vld [vmem:[%s32844_s3 + $0x598] sm:$0xff]  }
 0xc48   :  { %24366 = vmatmul.mubr.bf16.vlgmr.msra.gmra.mrb[116].mxu1 %v31267_v63  ;;  %v26511_v63 = vld [vmem:[%s32844_s3 + $0x5a0] sm:$0xff]  }
 0xc49   :  { %24369 = vmatprep.mubr.bf16.mxu1 %v31285_v25  ;;  %24386 = vmatpush3.bf16.msra.mxu1 %v26507_v50  ;;  %v33161_v25 = vld [vmem:[#allocation10_spill] sm:$0xff] }
 0xc4a   :  { %24387 = vmatprep.subr.bf16.mxu1 %v26508_v0  ;;  %v33162_v45 = vshll.u32 %v33161_v25, 16  ;;  %v33165_v40 = vshrl.u32 %v33161_v25, 16  ;;  %v33167_v50 = vld [vmem:[#allocation14_spill] sm:$0xff]  ;;  %v33168_v25 = vld [vmem:[#allocation27_spill] sm:$0xff] }
 0xc4c   :  { %v14570_v24 = vrot.slane %v33162_v45, 1 }
 0xc4d   :  { %24388 = vmatpush3.bf16.msra.mxu1 %v26508_v0  ;;  %v26524_v0 = vld [vmem:[%s32844_s3 + $0x608] sm:$0xff]  }
 0xc4e   :  { %24389 = vmatprep.subr.bf16.mxu1 %v26509_v31  ;;  %v14574_v12 = vor.u32 %v33165_v40, %v14570_v24  ;;  %v33172_v40 = vld [vmem:[#allocation23_spill] sm:$0xff] }
 0xc50   :  { %24370 = vmatmul.mubr.bf16.gmra.mrb[120].mxu1 %v31289_v41  ;;  %v14571_v41 = vsel %vm1623_vm2, %v31325_v60, %v14570_v24  ;;  %v14579_v60 = vsel %vm1623_vm2, %v14574_v12, %v31319_v33  ;;  %v14815_v33 = vrot.slane %v14787_v29, 1  ;;  %v26530_v24 = vld [vmem:[%s32844_s3 + $0x638] sm:$0xff]  }
 0xc51   :  { %24373 = vmatprep.mubr.bf16.mxu1 %v31307_v43  ;;  %24390 = vmatpush3.bf16.msra.mxu1 %v26509_v31  ;;  %v26513_v43 = vld [vmem:[%s32844_s3 + $0x5b0] sm:$0xff]  }
 0xc52   :  { %24391 = vmatprep.subr.bf16.mxu1 %v26510_v22  ;;  %v14817_v8 = vsel %vm2069_vm4, %v14815_v33, %v31357_v56  ;;  %v26518_v56 = vld [vmem:[%s32844_s3 + $0x5d8] sm:$0xff]   ;;  %v26525_v31 = vld [vmem:[%s32844_s3 + $0x610] sm:$0xff]  }
 0xc55   :  { %24392 = vmatpush3.bf16.msra.mxu1 %v26510_v22  ;;  %v26526_v22 = vld [vmem:[%s32844_s3 + $0x618] sm:$0xff]  }
 0xc56   :  { %24393 = vmatprep.subr.bf16.mxu1 %v26511_v63 }
 0xc58   :  { %24374 = vmatmul.mubr.bf16.gmra.mrb[124].mxu1 %v31311_v30  ;;  %v26514_v30 = vld [vmem:[%s32844_s3 + $0x5b8] sm:$0xff]  }
 0xc59   :  { %24377 = vmatprep.mubr.bf16.mxu1 %v14571_v41  ;;  %24394 = vmatpush3.bf16.msra.mxu1 %v26511_v63  ;;  %v15027_v63 = vld [vmem:[#allocation2 + $0x70] sm:$0x3] }
 0xc5a   :  { %24395 = vmatprep.subr.bf16.mxu1 %v26512_v20  ;;  %v15092_v45 = vshll.u32 %v15027_v63, 16 }
 0xc5c   :  { %v15094_v41 = vrot.slane %v15092_v45, 2 }
 0xc5d   :  { %24396 = vmatpush3.bf16.msra.mxu1 %v26512_v20 }
 0xc5e   :  { %24397 = vmatprep.subr.bf16.mxu1 %v26513_v43 }
 0xc60   :  { %24378 = vmatmul.mubr.bf16.gmra.mrb[128].mxu1 %v14579_v60  ;;  %v33173_v60 = vld [vmem:[#allocation29_spill] sm:$0xff] }
 0xc61   :  { %24381 = vmatprep.mubr.bf16.mxu1 %v14587_v36  ;;  %24398 = vmatpush3.bf16.msra.mxu1 %v26513_v43  ;;  %v33170_v43 = vld [vmem:[#allocation30_spill] sm:$0xff]  ;;  %v33174_v36 = vld [vmem:[#allocation31_spill] sm:$0xff] }
 0xc62   :  { %24399 = vmatprep.subr.bf16.mxu1 %v26514_v30 }
 0xc65   :  { %24400 = vmatpush3.bf16.msra.mxu1 %v26514_v30  ;;  %v15309_v30 = vsel %vm2565_vm5, %v15307_v4, %v31481_v11  ;;  %v15325_v11 = vsel %vm2565_vm5, %v33160_v19, %v15324_v17  ;;  %v31736_v19 = vld [vmem:[%s32845_s4] ss:$0 sm:$0xff] }
 0xc66   :  { %24421 = vmatprep.subr.bf16.mxu1 %v26515_v9 }
 0xc68   :  { %24382 = vmatmul.mubr.bf16.gmra.mrb[132].mxu1 %v14595_v14 }
 0xc69   :  { %24401 = vmatprep.mubr.bf16.mxu1 %v14817_v8 }
 0xc70   :  { %24402 = vmatmul.mubr.bf16.vlgmr.msra.gmra.mrb[116].mxu1 %v31369_v54  ;;  %v26519_v54 = vld [vmem:[%s32844_s3 + $0x5e0] sm:$0xff]  }
 0xc71   :  { %24405 = vmatprep.mubr.bf16.mxu1 %v31385_v28  ;;  %24422 = vmatpush3.bf16.msra.mxu1 %v26515_v9  ;;  %v26812_v28 = vld [vmem:[#allocation2 + $0x58] sm:$0xff]  ;;  %v15326_v9 = vrot.slane %v15027_v63, 2 }
 0xc72   :  { %24423 = vmatprep.subr.bf16.mxu1 %v26516_v6  ;;  %v14828_v49 = vrot.slane %v26812_v28, 1 }
 0xc75   :  { %24424 = vmatpush3.bf16.msra.mxu1 %v26516_v6 }
 0xc76   :  { %24425 = vmatprep.subr.bf16.mxu1 %v26517_v47 }
 0xc78   :  { %24406 = vmatmul.mubr.bf16.gmra.mrb[120].mxu1 %v31389_v42  ;;  %v14829_v42 = vsel %vm2069_vm4, %v31401_v44, %v14828_v49  ;;  %v14831_v44 = vsel %vm2069_vm4, %v14828_v49, %v31419_v2  ;;  %v15055_v2 = vsel %vm2300_vm3, %v15051_v61, %v33167_v50 }
 0xc79   :  { %24409 = vmatprep.mubr.bf16.mxu1 %v31407_v5  ;;  %24426 = vmatpush3.bf16.msra.mxu1 %v26517_v47  ;;  %v26521_v5 = vld [vmem:[%s32844_s3 + $0x5f0] sm:$0xff]  }
 0xc7a   :  { %24427 = vmatprep.subr.bf16.mxu1 %v26518_v56 }
 0xc7d   :  { %24428 = vmatpush3.bf16.msra.mxu1 %v26518_v56 }
 0xc7e   :  { %24429 = vmatprep.subr.bf16.mxu1 %v26519_v54 }
 0xc80   :  { %24410 = vmatmul.mubr.bf16.gmra.mrb[124].mxu1 %v31412_v23  ;;  %v26522_v23 = vld [vmem:[%s32844_s3 + $0x5f8] sm:$0xff]  }
 0xc81   :  { %24413 = vmatprep.mubr.bf16.mxu1 %v14829_v42  ;;  %24430 = vmatpush3.bf16.msra.mxu1 %v26519_v54 }
 0xc82   :  { %24431 = vmatprep.subr.bf16.mxu1 %v26520_v3 }
 0xc85   :  { %24432 = vmatpush3.bf16.msra.mxu1 %v26520_v3 }
 0xc86   :  { %24433 = vmatprep.subr.bf16.mxu1 %v26521_v5 }
 0xc88   :  { %24414 = vmatmul.mubr.bf16.gmra.mrb[128].mxu1 %v14831_v44  ;;  %v33175_v44 = vmov 0  }
 0xc89   :  { %24417 = vmatprep.mubr.bf16.mxu1 %v14833_v37  ;;  %24434 = vmatpush3.bf16.msra.mxu1 %v26521_v5 }
 0xc8a   :  { %24435 = vmatprep.subr.bf16.mxu1 %v26522_v23 }
 0xc8d   :  { %24436 = vmatpush3.bf16.msra.mxu1 %v26522_v23 }
 0xc8e   :  { %24457 = vmatprep.subr.bf16.mxu1 %v26523_v39 }
 0xc90   :  { %24418 = vmatmul.mubr.bf16.gmra.mrb[132].mxu1 %v14835_v7 }
 0xc91   :  { %24437 = vmatprep.mubr.bf16.mxu1 %v15055_v2 }
 0xc98   :  { %24438 = vmatmul.mubr.bf16.vlgmr.msra.gmra.mrb[116].mxu1 %v30456_v13  ;;  %v26527_v13 = vld [vmem:[%s32844_s3 + $0x620] sm:$0xff]  }
 0xc99   :  { %24441 = vmatprep.mubr.bf16.mxu1 %v30459_v10  ;;  %24458 = vmatpush3.bf16.msra.mxu1 %v26523_v39  ;;  %v26528_v10 = vld [vmem:[%s32844_s3 + $0x628] sm:$0xff]  }
 0xc9a   :  { %24459 = vmatprep.subr.bf16.mxu1 %v26524_v0 }
 0xc9d   :  { %24460 = vmatpush3.bf16.msra.mxu1 %v26524_v0 }
 0xc9e   :  { %24461 = vmatprep.subr.bf16.mxu1 %v26525_v31 }
 0xca0   :  { %24442 = vmatmul.mubr.bf16.gmra.mrb[120].mxu1 %v33154_v18  ;;  %v26529_v18 = vld [vmem:[%s32844_s3 + $0x630] sm:$0xff]  }
 0xca1   :  { %24445 = vmatprep.mubr.bf16.mxu1 %v33155_v62  ;;  %24462 = vmatpush3.bf16.msra.mxu1 %v26525_v31  ;;  %v15089_v62 = vshrl.u32 %v15027_v63, 16 }
 0xca2   :  { %24463 = vmatprep.subr.bf16.mxu1 %v26526_v22 }
 0xca3   :  { %v15091_v20 = vrot.slane %v15089_v62, 1 }
 0xca5   :  { %24464 = vmatpush3.bf16.msra.mxu1 %v26526_v22  ;;  %v15095_v27 = vor.u32 %v15094_v41, %v15091_v20 }
 0xca6   :  { %24465 = vmatprep.subr.bf16.mxu1 %v26527_v13 }
 0xca7   :  { %v15096_v12 = vsel %vm2300_vm3, %v33172_v40, %v15095_v27 }
 0xca8   :  { %24446 = vmatmul.mubr.bf16.gmra.mrb[124].mxu1 %v33156_v15  ;;  %v33169_v15 = vld [vmem:[#allocation28_spill] sm:$0xff] }
 0xca9   :  { %24449 = vmatprep.mubr.bf16.mxu1 %v33168_v25  ;;  %24466 = vmatpush3.bf16.msra.mxu1 %v26527_v13 }
 0xcaa   :  { %24467 = vmatprep.subr.bf16.mxu1 %v26528_v10 }
 0xcad   :  { %24468 = vmatpush3.bf16.msra.mxu1 %v26528_v10 }
 0xcae   :  { %24469 = vmatprep.subr.bf16.mxu1 %v26529_v18 }
 0xcb0   :  { %24450 = vmatmul.mubr.bf16.gmra.mrb[128].mxu1 %v33169_v15 }
 0xcb1   :  { %24453 = vmatprep.mubr.bf16.mxu1 %v33170_v43  ;;  %24470 = vmatpush3.bf16.msra.mxu1 %v26529_v18 }
 0xcb2   :  { %24471 = vmatprep.subr.bf16.mxu1 %v26530_v24 }
 0xcb5   :  { %24472 = vmatpush3.bf16.msra.mxu1 %v26530_v24 }
 0xcb6   :  { %24793 = vmatprep.subr.bf16.mxu1 %v33171_v35 }
 0xcb8   :  { %24454 = vmatmul.mubr.bf16.gmra.mrb[132].mxu1 %v15096_v12 }
 0xcb9   :  { %24473 = vmatprep.mubr.bf16.mxu1 %v15309_v30 }
 0xcc0   :  { %24474 = vmatmul.mubr.bf16.vlgmr.msra.gmra.mrb[116].mxu1 %v31491_v53  ;;  %v15327_v53 = vsel %vm2565_vm5, %v15324_v17, %v15326_v9 }
 0xcc1   :  { %24477 = vmatprep.mubr.bf16.mxu1 %v31503_v26  ;;  %v26533_v26 = vld [vmem:[%s32846_s5 + $0x4] ss:$8 sps:$4 sm:$0xff]  }
 0xcc2   :  { %20297 = vmatprep.mubr.msk.bf16.mxu0 %vm171_vm1, %v26533_v26 }
 0xcc8   :  { %24478 = vmatmul.mubr.bf16.gmra.mrb[120].mxu1 %v31507_v34  ;;  %v26538_v34 = vld [vmem:[%s32847_s6 + $0x3c0] sm:$0xff]  }
 0xcc9   :  { %24481 = vmatprep.mubr.bf16.mxu1 %v31518_v32  ;;  %24794 = vmatpush3.bf16.msra.mxu1 %v26538_v34  ;;  %v26540_v32 = vld [vmem:[%s32847_s6 + $0x3c8] sm:$0xff]  }
 0xcca   :  { %24795 = vmatprep.subr.bf16.mxu1 %v33171_v35 }
 0xccd   :  { %24796 = vmatpush3.bf16.msra.mxu1 %v26540_v32 }
 0xcce   :  { %24797 = vmatprep.subr.bf16.mxu1 %v33171_v35 }
 0xcd0   :  { %24482 = vmatmul.mubr.bf16.gmra.mrb[124].mxu1 %v31523_v52  ;;  %v26542_v52 = vld [vmem:[%s32847_s6 + $0x3d0] sm:$0xff]  }
 0xcd1   :  { %24485 = vmatprep.mubr.bf16.mxu1 %v33173_v60  ;;  %24798 = vmatpush3.bf16.msra.mxu1 %v26542_v52 }
 0xcd2   :  { %24799 = vmatprep.subr.bf16.mxu1 %v33171_v35 }
 0xcd8   :  { %24486 = vmatmul.mubr.bf16.gmra.mrb[128].mxu1 %v33174_v36 }
 0xcd9   :  { %24489 = vmatprep.mubr.bf16.mxu1 %v15325_v11 }
 0xce0   :  { %24490 = vmatmul.mubr.bf16.gmra.mrb[132].mxu1 %v15327_v53 }
 0xce1   :  { %24809 = vmatprep.mubr.msk.bf16.mxu1 %vm26838_vm0, %v33171_v35 }
 0xd93   :  { %v24475_v59 = vpop.f32.mrb[116].mxu1 }
 0xd94   :  { %v15528_v38 = vadd.f32 %v24475_v59, %v31736_v19  ;;  %v15420_v29 = vpop.f32.mrb[117].mxu1 }
 0xd95   :  { %v15526_v57 = vadd.f32 %v31736_v19, %v15420_v29  ;;  %v24476_v58 = vpop.f32.mrb[118].mxu1 }
 0xd96   :  { %v15529_v33 = vadd.f32 %v24476_v58, %v31736_v19  ;;  %v15423_v14 = vpop.f32.mrb[119].mxu1  ;;  %v15548_v6 = vmax.f32 %v15528_v38, 0.0 }
 0xd97   :  { %v15527_v8 = vadd.f32 %v31736_v19, %v15423_v14  ;;  %v15546_v56 = vmax.f32 %v15526_v57, 0.0 }
 0xd98   :  { %v15549_v47 = vmax.f32 %v15529_v33, 0.0 }
 0xd99   :  { %v15547_v54 = vmax.f32 %v15527_v8, 0.0 }
 0xd9a   :  { %v15571_v28 = vpack.c.bf16 %v15549_v47, %v15548_v6  ;;  %v26531_v47 = vld [vmem:[%s32846_s5] ss:$8 sps:$4 sm:$0xff]  }
 0xd9b   :  { %v15570_v49 = vpack.c.bf16 %v15547_v54, %v15546_v56  ;;  %v24479_v3 = vpop.f32.mrb[120].mxu1  ;;  %v26537_v56 = vld [vmem:[%s32847_s6 + $0x40] sm:$0xff]   ;;  %v26539_v54 = vld [vmem:[%s32847_s6 + $0x48] sm:$0xff]  }
 0xd9c   :  { %v15532_v42 = vadd.f32 %v24479_v3, %v31736_v19  ;;  %v15436_v5 = vpop.f32.mrb[121].mxu1  ;;  %v26543_v3 = vld [vmem:[%s32847_s6 + $0x58] sm:$0xff]  }
 0xd9d   :  { %v15530_v46 = vadd.f32 %v31736_v19, %v15436_v5  ;;  %v24480_v55 = vpop.f32.mrb[122].mxu1  ;;  %15605 = vmatpush1.bf16.msra.mxu0 %v15570_v49  ;;  %v26541_v49 = vld [vmem:[%s32847_s6 + $0x50] sm:$0xff]   ;;  %v26545_v5 = vld [vmem:[%s32847_s6 + $0x60] sm:$0xff]  }
 0xd9e   :  { %v15533_v1 = vadd.f32 %v24480_v55, %v31736_v19  ;;  %v15439_v23 = vpop.f32.mrb[123].mxu1  ;;  %15606 = vmatprep.subr.bf16.mxu0 %v33175_v44  ;;  %v15552_v48 = vmax.f32 %v15532_v42, 0.0  ;;  %v26544_v42 = vld [vmem:[%s32847_s6 + $0x3d8] sm:$0xff]   ;;  %v26547_v55 = vld [vmem:[%s32847_s6 + $0x68] sm:$0xff]  }
 0xd9f   :  { %v15531_v37 = vadd.f32 %v31736_v19, %v15439_v23  ;;  %v15550_v39 = vmax.f32 %v15530_v46, 0.0  ;;  %24800 = vmatpush3.bf16.msra.mxu1 %v26544_v42  ;;  %v26546_v46 = vld [vmem:[%s32847_s6 + $0x3e0] sm:$0xff]   ;;  %v26549_v23 = vld [vmem:[%s32847_s6 + $0x70] sm:$0xff]  }
 0xda0   :  { %v15553_v51 = vmax.f32 %v15533_v1, 0.0  ;;  %24801 = vmatprep.subr.bf16.mxu1 %v33171_v35  ;;  %v26548_v1 = vld [vmem:[%s32847_s6 + $0x3e8] sm:$0xff]  }
 0xda1   :  { %v15551_v16 = vmax.f32 %v15531_v37, 0.0  ;;  %15607 = vmatpush1.bf16.msra.mxu0 %v15571_v28  ;;  %v26536_v28 = vld [vmem:[%s32846_s5 + $0x10] ss:$8 sps:$4 sm:$0xff]  }
 0xda2   :  { %v15573_v61 = vpack.c.bf16 %v15553_v51, %v15552_v48  ;;  %15608 = vmatprep.subr.bf16.mxu0 %v33175_v44  ;;  %v26551_v37 = vld [vmem:[%s32847_s6 + $0x78] sm:$0xff]  }
 0xda3   :  { %v15572_v7 = vpack.c.bf16 %v15551_v16, %v15550_v39  ;;  %v24483_v50 = vpop.f32.mrb[124].mxu1  ;;  %24802 = vmatpush3.bf16.msra.mxu1 %v26546_v46  ;;  %v26552_v48 = vld [vmem:[%s32847_s6 + $0x3f8] sm:$0xff]  }
 0xda4   :  { %v15536_v2 = vadd.f32 %v24483_v50, %v31736_v19  ;;  %v15452_v0 = vpop.f32.mrb[125].mxu1  ;;  %24803 = vmatprep.subr.bf16.mxu1 %v33171_v35  ;;  %v31832_v50 = vld [vmem:[#allocation3] sm:$0x1] }
 0xda5   :  { %v15534_v31 = vadd.f32 %v31736_v19, %v15452_v0  ;;  %v24484_v22 = vpop.f32.mrb[126].mxu1  ;;  %15609 = vmatpush1.bf16.msra.mxu0 %v15572_v7 }
 0xda6   :  { %v15537_v13 = vadd.f32 %v24484_v22, %v31736_v19  ;;  %v15455_v10 = vpop.f32.mrb[127].mxu1  ;;  %15610 = vmatprep.subr.bf16.mxu0 %v33175_v44  ;;  %v15556_v25 = vmax.f32 %v15536_v2, 0.0  ;;  %v17248_v2 = vld [vmem:[#allocation3] sm:$0x80]  ;;  %v15695_v22 = vunpack.c.l.b16 %v31832_v50  ;;  %v26570_v50 = vld [vmem:[%s32847_s6 + $0x4c0] sm:$0xff]  }
 0xda7   :  { %v15535_v63 = vadd.f32 %v31736_v19, %v15455_v10  ;;  %v15554_v62 = vmax.f32 %v15534_v31, 0.0  ;;  %24804 = vmatpush3.bf16.msra.mxu1 %v26548_v1  ;;  %v17269_v10 = vunpack.c.h.b16 %v17248_v2  ;;  %v26566_v2 = vld [vmem:[%s32847_s6 + $0x470] sm:$0xff]  }
 0xda8   :  { %v15557_v18 = vmax.f32 %v15537_v13, 0.0  ;;  %24805 = vmatprep.subr.bf16.mxu1 %v33171_v35 }
 0xda9   :  { %v15555_v45 = vmax.f32 %v15535_v63, 0.0  ;;  %15611 = vmatpush1.bf16.msra.mxu0 %v15573_v61 }
 0xdaa   :  { %v15575_v24 = vpack.c.bf16 %v15557_v18, %v15556_v25  ;;  %15612 = vmatprep.subr.bf16.mxu0 %v33175_v44 }
 0xdab   :  { %v15574_v20 = vpack.c.bf16 %v15555_v45, %v15554_v62  ;;  %v24487_v41 = vpop.f32.mrb[128].mxu1 }
 0xdac   :  { %v15540_v15 = vadd.f32 %v24487_v41, %v31736_v19  ;;  %v15468_v43 = vpop.f32.mrb[129].mxu1  ;;  %v17382_v41 = vrot.slane %v17269_v10, 7 }
 0xdad   :  { %v15538_v27 = vadd.f32 %v31736_v19, %v15468_v43  ;;  %v24488_v21 = vpop.f32.mrb[130].mxu1  ;;  %15613 = vmatpush1.bf16.msra.mxu0 %v15574_v20  ;;  %v15697_v20 = vrot.slane %v15695_v22, 1 }
 0xdae   :  { %v15541_v4 = vadd.f32 %v24488_v21, %v31736_v19  ;;  %v15471_v40 = vpop.f32.mrb[131].mxu1  ;;  %15614 = vmatprep.subr.bf16.mxu0 %v33175_v44  ;;  %v15560_v30 = vmax.f32 %v15540_v15, 0.0 }
 0xdaf   :  { %v15539_v12 = vadd.f32 %v31736_v19, %v15471_v40  ;;  %v15558_v17 = vmax.f32 %v15538_v27, 0.0  ;;  %v26553_v27 = vld [vmem:[%s32847_s6] sm:$0xff]  }
 0xdb0   :  { %v15561_v60 = vmax.f32 %v15541_v4, 0.0  ;;  %v26554_v40 = vld [vmem:[%s32847_s6 + $0x440] sm:$0xff]  }
 0xdb1   :  { %v15559_v36 = vmax.f32 %v15539_v12, 0.0  ;;  %15615 = vmatpush1.bf16.msra.mxu0 %v15575_v24 }
 0xdb2   :  { %v15577_v11 = vpack.c.bf16 %v15561_v60, %v15560_v30  ;;  %15616 = vmatprep.subr.bf16.mxu0 %v33175_v44  ;;  %v26555_v30 = vld [vmem:[%s32847_s6 + $0x8] sm:$0xff]  }
 0xdb3   :  { %v15576_v9 = vpack.c.bf16 %v15559_v36, %v15558_v17  ;;  %v24491_v53 = vpop.f32.mrb[132].mxu1  ;;  %v26556_v60 = vld [vmem:[%s32847_s6 + $0x448] sm:$0xff]  }
 0xdb4   :  { %v15544_v26 = vadd.f32 %v24491_v53, %v31736_v19  ;;  %v15484_v34 = vpop.f32.mrb[133].mxu1  ;;  %v31871_v53 = vld [vmem:[#allocation3 + $0x8] sm:$0x2] }
 0xdb5   :  { %v15542_v32 = vadd.f32 %v31736_v19, %v15484_v34  ;;  %v24492_v52 = vpop.f32.mrb[134].mxu1  ;;  %15617 = vmatpush1.bf16.msra.mxu0 %v15576_v9  ;;  %v26557_v9 = vld [vmem:[%s32847_s6 + $0x10] sm:$0xff]  }
 0xdb6   :  { %v15545_v59 = vadd.f32 %v24492_v52, %v31736_v19  ;;  %v15487_v38 = vpop.f32.mrb[135].mxu1  ;;  %15618 = vmatprep.subr.bf16.mxu0 %v33175_v44  ;;  %v15564_v57 = vmax.f32 %v15544_v26, 0.0  ;;  %v31874_v26 = vld [vmem:[#allocation3 + $0x8] sm:$0x4]  ;;  %v26558_v52 = vld [vmem:[%s32847_s6 + $0x450] sm:$0xff]  }
 0xdb7   :  { %v15543_v29 = vadd.f32 %v31736_v19, %v15487_v38  ;;  %v15562_v33 = vmax.f32 %v15542_v32, 0.0  ;;  %v26534_v19 = vld [vmem:[%s32846_s5 + $0x14] ss:$8 sps:$4 sm:$0xff]   ;;  %v17476_v38 = vld [vmem:[#allocation3 + $0x8] sm:$0x1] }
 0xdb8   :  { %v15565_v58 = vmax.f32 %v15545_v59, 0.0 }
 0xdb9   :  { %v15563_v14 = vmax.f32 %v15543_v29, 0.0  ;;  %15619 = vmatpush1.bf16.msra.mxu0 %v15577_v11  ;;  %v17723_v29 = vunpack.c.l.b16 %v31871_v53 }
 0xdba   :  { %v15579_v8 = vpack.c.bf16 %v15565_v58, %v15564_v57  ;;  %15620 = vmatprep.subr.bf16.mxu0 %v33175_v44  ;;  %v26559_v58 = vld [vmem:[%s32847_s6 + $0x18] sm:$0xff]  }
 0xdbb   :  { %v15578_v6 = vpack.c.bf16 %v15563_v14, %v15562_v33  ;;  %v17951_v33 = vunpack.c.l.b16 %v31874_v26  ;;  %v31890_v14 = vld [vmem:[#allocation3 + $0x8] sm:$0x8] }
 0xdbd   :  { %15621 = vmatpush1.bf16.msra.mxu0 %v15578_v6  ;;  %v26560_v6 = vld [vmem:[%s32847_s6 + $0x458] sm:$0xff]   ;;  %v17953_v46 = vrot.slane %v17951_v33, 4 }
 0xdbe   :  { %15622 = vmatprep.subr.bf16.mxu0 %v33175_v44  ;;  %v26550_v44 = vld [vmem:[%s32847_s6 + $0x3f0] sm:$0xff]  }
 0xdbf   :  { %24806 = vmatpush3.bf16.msra.mxu1 %v26550_v44  ;;  %v26562_v44 = vld [vmem:[%s32847_s6 + $0x460] sm:$0xff]  }
 0xdc0   :  { %24807 = vmatprep.subr.bf16.mxu1 %v33171_v35 }
 0xdc1   :  { %15623 = vmatpush1.bf16.msra.mxu0 %v15579_v8  ;;  %v17271_v8 = vrot.slane %v17269_v10, 6 }
 0xdc2   :  { %24493 = vmatprep.subr.bf16.mxu0 %v33171_v35 }
 0xdc3   :  { %24808 = vmatpush3.bf16.msra.mxu1 %v26552_v48 }
 0xdc4   :  { %15637 = vmatmul.mubr.bf16.vlgmr.msra.gmra.mrb[136].mxu0 %v26531_v47  ;;  %24833 = vmatprep.subr.bf16.mxu1 %v33171_v35  ;;  %v17497_v47 = vunpack.c.l.b16 %v17476_v38 }
 0xdc5   :  { %20298 = vmatprep.mubr.msk.bf16.mxu0 %vm171_vm1, %v26534_v19  ;;  %24494 = vmatpush3.bf16.msra.mxu0 %v26537_v56 }
 0xdc6   :  { %24495 = vmatprep.subr.bf16.mxu0 %v33171_v35 }
 0xdc9   :  { %24496 = vmatpush3.bf16.msra.mxu0 %v26539_v54 }
 0xdca   :  { %24497 = vmatprep.subr.bf16.mxu0 %v33171_v35 }
 0xdcc   :  { %15645 = vmatmul.mubr.bf16.gmra.mrb[140].mxu0 %v26536_v28 }
 0xdcd   :  { %24498 = vmatpush3.bf16.msra.mxu0 %v26541_v49  ;;  %24509 = vmatprep.mubr.msk.bf16.mxu0 %vm26838_vm0, %v33171_v35  ;;  %v18179_v49 = vunpack.c.l.b16 %v31890_v14  ;;  %v26618_v14 = vld [vmem:[%s32847_s6 + $0x148] sm:$0xff]  }
 0xdce   :  { %24499 = vmatprep.subr.bf16.mxu0 %v33171_v35 }
 0xdcf   :  { %v18181_v48 = vrot.slane %v18179_v49, 6 }
 0xdd1   :  { %24500 = vmatpush3.bf16.msra.mxu0 %v26543_v3  ;;  %v17725_v3 = vrot.slane %v17723_v29, 2 }
 0xdd2   :  { %24501 = vmatprep.subr.bf16.mxu0 %v33171_v35 }
 0xdd5   :  { %24502 = vmatpush3.bf16.msra.mxu0 %v26545_v5  ;;  %v26561_v5 = vld [vmem:[%s32847_s6 + $0x20] sm:$0xff]  }
 0xdd6   :  { %24503 = vmatprep.subr.bf16.mxu0 %v33171_v35 }
 0xdd9   :  { %24504 = vmatpush3.bf16.msra.mxu0 %v26547_v55 }
 0xdda   :  { %24505 = vmatprep.subr.bf16.mxu0 %v33171_v35 }
 0xddd   :  { %24506 = vmatpush3.bf16.msra.mxu0 %v26549_v23 }
 0xdde   :  { %24507 = vmatprep.subr.bf16.mxu0 %v33171_v35 }
 0xde1   :  { %24508 = vmatpush3.bf16.msra.mxu0 %v26551_v37 }
 0xde2   :  { %24513 = vmatprep.subr.bf16.mxu0 %v33171_v35 }
 0xe97   :  { %v15638_v51 = vpop.f32.mrb[136].mxu0 }
 0xe98   :  { %v15640_v39 = vpop.f32.mrb[137].mxu0 }
 0xe99   :  { %v15641_v16 = vpop.f32.mrb[138].mxu0  ;;  %v26563_v39 = vld [vmem:[%s32847_s6 + $0x28] sm:$0xff]  }
 0xe9a   :  { %v15653_v61 = vpack.c.bf16 %v15641_v16, %v15638_v51  ;;  %v15643_v7 = vpop.f32.mrb[139].mxu0 }
 0xe9b   :  { %v26565_v7 = vld [vmem:[%s32847_s6 + $0x30] sm:$0xff]  }
 0xe9c   :  { %15656 = vst [vmem:[#allocation3 + $0x10] sm:$0xff] %v15653_v61  ;;  %v26564_v61 = vld [vmem:[%s32847_s6 + $0x468] sm:$0xff]  }
 0xe9f   :  { %v15646_v0 = vpop.f32.mrb[140].mxu0 }
 0xea0   :  { %v15648_v31 = vpop.f32.mrb[141].mxu0 }
 0xea1   :  { %v15649_v13 = vpop.f32.mrb[142].mxu0  ;;  %v26567_v31 = vld [vmem:[%s32847_s6 + $0x38] sm:$0xff]  }
 0xea2   :  { %v15654_v63 = vpack.c.bf16 %v15649_v13, %v15646_v0  ;;  %v15651_v25 = vpop.f32.mrb[143].mxu0  ;;  %v26568_v13 = vld [vmem:[%s32847_s6 + $0x478] sm:$0xff]  }
 0xea3   :  { %v17249_v18 = vld [vmem:[#allocation3 + $0x10] sm:$0x80]  ;;  %v31835_v62 = vld [vmem:[#allocation3 + $0x10] sm:$0x1]  ;;  %v26569_v25 = vld [vmem:[%s32847_s6 + $0x80] sm:$0xff]  }
 0xea4   :  { %v17270_v45 = vunpack.c.h.b16 %v17249_v18  ;;  %15657 = vst [vmem:[#allocation3 + $0x18] sm:$0xff] %v15654_v63  ;;  %v15696_v24 = vunpack.c.l.b16 %v31835_v62  ;;  %v17609_v63 = vrot.slane %v17497_v47, 1 }
 0xea6   :  { %v17383_v15 = vrot.slane %v17270_v45, 6  ;;  %v15699_v43 = vsel %vm15698_vm6, %v15696_v24, %v15697_v20  ;;  %v17272_v19 = vrot.slane %v17270_v45, 5  ;;  %v15790_v0 = vrot.slane %v15696_v24, 7  ;;  %v26571_v45 = vld [vmem:[%s32847_s6 + $0x88] sm:$0xff]   ;;  %v26573_v20 = vld [vmem:[%s32847_s6 + $0x90] sm:$0xff]  }
 0xea7   :  { %v15700_v21 = vpack.c.b16 %v15699_v43, %v15699_v43  ;;  %v26572_v24 = vld [vmem:[%s32847_s6 + $0x4c8] sm:$0xff]   ;;  %v26576_v43 = vld [vmem:[%s32847_s6 + $0x4d8] sm:$0xff]  }
 0xea8   :  { %v17384_v4 = vsel %vm15698_vm6, %v17383_v15, %v17382_v41  ;;  %v31914_v55 = vsel %vm15698_vm6, %v17272_v19, %v17271_v8  ;;  %v15791_v10 = vsel %vm15698_vm6, %v15790_v0, %v15695_v22  ;;  %v26574_v41 = vld [vmem:[%s32847_s6 + $0x4d0] sm:$0xff]   ;;  %v26575_v15 = vld [vmem:[%s32847_s6 + $0x98] sm:$0xff]  }
 0xea9   :  { %24510 = vmatmul.mubr.bf16.vlgmr.msra.gmra.mrb[144].mxu0 %v15700_v21  ;;  %v17385_v12 = vpack.c.b16 %v17384_v4, %v17384_v4  ;;  %v15792_v62 = vpack.c.b16 %v15791_v10, %v15791_v10  ;;  %v26578_v21 = vld [vmem:[%s32847_s6 + $0x4e0] sm:$0xff]   ;;  %v32012_v4 = vld [vmem:[#allocation3 + $0x10] sm:$0x2] }
 0xeaa   :  { %24514 = vmatpush3.bf16.msra.mxu0 %v26553_v27  ;;  %24529 = vmatprep.mubr.msk.bf16.mxu0 %vm26838_vm0, %v33171_v35  ;;  %v26577_v27 = vld [vmem:[%s32847_s6 + $0xa0] sm:$0xff]  }
 0xeab   :  { %24810 = vmatmul.mubr.bf16.vlgmr.msra.gmra.mrb[136].mxu1 %v17385_v12  ;;  %24515 = vmatprep.subr.bf16.mxu0 %v33171_v35  ;;  %v31861_v17 = vld [vmem:[#allocation3 + $0x18] sm:$0x1]  ;;  %v31863_v36 = vld [vmem:[#allocation3 + $0x18] sm:$0x2]  ;;  %v31866_v11 = vld [vmem:[#allocation3 + $0x18] sm:$0x4] }
 0xeac   :  { %24834 = vmatpush3.bf16.msra.mxu1 %v26554_v40  ;;  %24849 = vmatprep.mubr.msk.bf16.mxu1 %vm26838_vm0, %v33171_v35  ;;  %v17498_v34 = vunpack.c.l.b16 %v31861_v17  ;;  %v17724_v32 = vunpack.c.l.b16 %v31863_v36  ;;  %v17952_v59 = vunpack.c.l.b16 %v31866_v11  ;;  %v31884_v57 = vld [vmem:[#allocation3 + $0x18] sm:$0x8]  ;;  %v26579_v40 = vld [vmem:[%s32847_s6 + $0xa8] sm:$0xff]   ;;  %v32018_v12 = vld [vmem:[#allocation3] sm:$0x2]  ;;  %v17836_v36 = vrot.slane %v17723_v29, 3 }
 0xead   :  { %24835 = vmatprep.subr.bf16.mxu1 %v33171_v35  ;;  %v18180_v28 = vunpack.c.l.b16 %v31884_v57  ;;  %v26581_v17 = vld [vmem:[%s32847_s6 + $0xb0] sm:$0xff]   ;;  %v26587_v29 = vld [vmem:[%s32847_s6 + $0xc8] sm:$0xff]   ;;  %v18064_v11 = vrot.slane %v17951_v33, 5  ;;  %v26617_v57 = vld [vmem:[%s32847_s6 + $0x140] sm:$0xff]  }
 0xeae   :  { %24516 = vmatpush3.bf16.msra.mxu0 %v26555_v30  ;;  %v17499_v56 = vrot.slane %v17498_v34, 7  ;;  %v17726_v54 = vrot.slane %v17724_v32, 1  ;;  %v17954_v42 = vrot.slane %v17952_v59, 3  ;;  %v17610_v18 = vsel %vm15698_vm6, %v17498_v34, %v17609_v63  ;;  %v26580_v30 = vld [vmem:[%s32847_s6 + $0x4e8] sm:$0xff]   ;;  %v26582_v34 = vld [vmem:[%s32847_s6 + $0x4f0] sm:$0xff]   ;;  %v26600_v63 = vld [vmem:[%s32847_s6 + $0x578] sm:$0xff]  }
 0xeaf   :  { %24517 = vmatprep.subr.bf16.mxu0 %v33171_v35  ;;  %v18182_v51 = vrot.slane %v18180_v28, 5  ;;  %v17611_v22 = vpack.c.b16 %v17610_v18, %v17610_v18  ;;  %v17837_v38 = vrot.slane %v17724_v32, 2  ;;  %v26585_v32 = vld [vmem:[%s32847_s6 + $0xc0] sm:$0xff]   ;;  %v26603_v33 = vld [vmem:[%s32847_s6 + $0x108] sm:$0xff]  }
 0xeb0   :  { %24836 = vmatpush3.bf16.msra.mxu1 %v26556_v60  ;;  %v31917_v1 = vsel %vm15698_vm6, %v17499_v56, %v17497_v47  ;;  %v31920_v23 = vsel %vm15698_vm6, %v17726_v54, %v17725_v3  ;;  %v31926_v37 = vsel %vm15698_vm6, %v17954_v42, %v17953_v46  ;;  %v15904_v60 = vunpack.c.l.b16 %v32012_v4  ;;  %v26586_v54 = vld [vmem:[%s32847_s6 + $0x540] sm:$0xff]   ;;  %v26588_v3 = vld [vmem:[%s32847_s6 + $0x548] sm:$0xff]   ;;  %v26589_v42 = vld [vmem:[%s32847_s6 + $0xd0] sm:$0xff]  }
 0xeb1   :  { %24837 = vmatprep.subr.bf16.mxu1 %v33171_v35  ;;  %v31938_v16 = vsel %vm15698_vm6, %v18182_v51, %v18181_v48  ;;  %v17838_v19 = vsel %vm15698_vm6, %v17837_v38, %v17836_v36  ;;  %v26591_v46 = vld [vmem:[%s32847_s6 + $0xd8] sm:$0xff]   ;;  %v26593_v48 = vld [vmem:[%s32847_s6 + $0xe0] sm:$0xff]  }
 0xeb2   :  { %24518 = vmatpush3.bf16.msra.mxu0 %v26557_v9  ;;  %v15903_v9 = vunpack.c.l.b16 %v32018_v12  ;;  %v17839_v53 = vpack.c.b16 %v17838_v19, %v17838_v19  ;;  %v26594_v51 = vld [vmem:[%s32847_s6 + $0x560] sm:$0xff]   ;;  %v16017_v0 = vrot.slane %v15904_v60, 2  ;;  %v16110_v4 = vld [vmem:[#allocation3] sm:$0x4] }
 0xeb3   :  { %24519 = vmatprep.subr.bf16.mxu0 %v33171_v35  ;;  %v26621_v19 = vld [vmem:[%s32847_s6 + $0x160] sm:$0xff]  }
 0xeb4   :  { %24838 = vmatpush3.bf16.msra.mxu1 %v26558_v52  ;;  %v15906_v52 = vrot.slane %v15904_v60, 1  ;;  %v15905_v8 = vrot.slane %v15903_v9, 2  ;;  %v16016_v10 = vrot.slane %v15903_v9, 3  ;;  %v16131_v60 = vunpack.c.l.b16 %v16110_v4 }
 0xeb5   :  { %24839 = vmatprep.subr.bf16.mxu1 %v33171_v35 }
 0xeb6   :  { %24520 = vmatpush3.bf16.msra.mxu0 %v26559_v58  ;;  %v26583_v58 = vld [vmem:[%s32847_s6 + $0xb8] sm:$0xff]   ;;  %v15907_v47 = vsel %vm15698_vm6, %v15906_v52, %v15905_v8  ;;  %v16133_v38 = vrot.slane %v16131_v60, 4 }
 0xeb7   :  { %24521 = vmatprep.subr.bf16.mxu0 %v33171_v35  ;;  %v15908_v56 = vpack.c.b16 %v15907_v47, %v15907_v47  ;;  %v26615_v52 = vld [vmem:[%s32847_s6 + $0x138] sm:$0xff]  }
 0xeb8   :  { %24840 = vmatpush3.bf16.msra.mxu1 %v26560_v6  ;;  %v26584_v6 = vld [vmem:[%s32847_s6 + $0x4f8] sm:$0xff]  }
 0xeb9   :  { %24841 = vmatprep.subr.bf16.mxu1 %v33171_v35 }
 0xeba   :  { %24522 = vmatpush3.bf16.msra.mxu0 %v26561_v5  ;;  %v26590_v5 = vld [vmem:[%s32847_s6 + $0x550] sm:$0xff]  }
 0xebb   :  { %24523 = vmatprep.subr.bf16.mxu0 %v33171_v35 }
 0xebc   :  { %24842 = vmatpush3.bf16.msra.mxu1 %v26562_v44  ;;  %v26592_v44 = vld [vmem:[%s32847_s6 + $0x558] sm:$0xff]  }
 0xebd   :  { %24843 = vmatprep.subr.bf16.mxu1 %v33171_v35 }
 0xebe   :  { %24524 = vmatpush3.bf16.msra.mxu0 %v26563_v39  ;;  %v26595_v39 = vld [vmem:[%s32847_s6 + $0xe8] sm:$0xff]  }
 0xebf   :  { %24525 = vmatprep.subr.bf16.mxu0 %v33171_v35 }
 0xec0   :  { %24844 = vmatpush3.bf16.msra.mxu1 %v26564_v61  ;;  %v26596_v61 = vld [vmem:[%s32847_s6 + $0x568] sm:$0xff]  }
 0xec1   :  { %24845 = vmatprep.subr.bf16.mxu1 %v33171_v35 }
 0xec2   :  { %24526 = vmatpush3.bf16.msra.mxu0 %v26565_v7  ;;  %v26597_v7 = vld [vmem:[%s32847_s6 + $0xf0] sm:$0xff]  }
 0xec3   :  { %24527 = vmatprep.subr.bf16.mxu0 %v33171_v35 }
 0xec4   :  { %24846 = vmatpush3.bf16.msra.mxu1 %v26566_v2  ;;  %v26598_v2 = vld [vmem:[%s32847_s6 + $0x570] sm:$0xff]  }
 0xec5   :  { %24847 = vmatprep.subr.bf16.mxu1 %v33171_v35 }
 0xec6   :  { %24528 = vmatpush3.bf16.msra.mxu0 %v26567_v31  ;;  %v18065_v31 = vrot.slane %v17952_v59, 4  ;;  %v26601_v59 = vld [vmem:[%s32847_s6 + $0x100] sm:$0xff]  }
 0xec7   :  { %24533 = vmatprep.subr.bf16.mxu0 %v33171_v35 }
 0xec8   :  { %24848 = vmatpush3.bf16.msra.mxu1 %v26568_v13  ;;  %v26599_v13 = vld [vmem:[%s32847_s6 + $0xf8] sm:$0xff]   ;;  %v18066_v18 = vsel %vm15698_vm6, %v18065_v31, %v18064_v11  ;;  %v26631_v31 = vld [vmem:[%s32847_s6 + $0x1b0] sm:$0xff]  }
 0xec9   :  { %24530 = vmatmul.mubr.bf16.vlgmr.msra.gmra.mrb[148].mxu0 %v15792_v62  ;;  %24873 = vmatprep.subr.bf16.mxu1 %v33171_v35  ;;  %v18067_v26 = vpack.c.b16 %v18066_v18, %v18066_v18 }
 0xeca   :  { %24534 = vmatpush3.bf16.msra.mxu0 %v26569_v25  ;;  %24549 = vmatprep.mubr.msk.bf16.mxu0 %vm26838_vm0, %v33171_v35  ;;  %v16018_v25 = vsel %vm15698_vm6, %v16017_v0, %v16016_v10 }
 0xecb   :  { %24850 = vmatmul.mubr.bf16.vlgmr.msra.gmra.mrb[140].mxu1 %v17611_v22  ;;  %24535 = vmatprep.subr.bf16.mxu0 %v33171_v35  ;;  %v16019_v62 = vpack.c.b16 %v16018_v25, %v16018_v25  ;;  %v26604_v22 = vld [vmem:[%s32847_s6 + $0x5c8] sm:$0xff]  }
 0xecc   :  { %24874 = vmatpush3.bf16.msra.mxu1 %v26570_v50  ;;  %24889 = vmatprep.mubr.msk.bf16.mxu1 %vm26838_vm0, %v33171_v35  ;;  %v26602_v50 = vld [vmem:[%s32847_s6 + $0x5c0] sm:$0xff]  }
 0xecd   :  { %24875 = vmatprep.subr.bf16.mxu1 %v33171_v35 }
 0xece   :  { %24536 = vmatpush3.bf16.msra.mxu0 %v26571_v45  ;;  %v26605_v45 = vld [vmem:[%s32847_s6 + $0x110] sm:$0xff]  }
 0xecf   :  { %24537 = vmatprep.subr.bf16.mxu0 %v33171_v35 }
 0xed0   :  { %24876 = vmatpush3.bf16.msra.mxu1 %v26572_v24  ;;  %v26606_v24 = vld [vmem:[%s32847_s6 + $0x5d0] sm:$0xff]  }
 0xed1   :  { %24877 = vmatprep.subr.bf16.mxu1 %v33171_v35 }
 0xed2   :  { %24538 = vmatpush3.bf16.msra.mxu0 %v26573_v20  ;;  %v26607_v20 = vld [vmem:[%s32847_s6 + $0x118] sm:$0xff]  }
 0xed3   :  { %24539 = vmatprep.subr.bf16.mxu0 %v33171_v35 }
 0xed4   :  { %24878 = vmatpush3.bf16.msra.mxu1 %v26574_v41  ;;  %v26608_v41 = vld [vmem:[%s32847_s6 + $0x5d8] sm:$0xff]  }
 0xed5   :  { %24879 = vmatprep.subr.bf16.mxu1 %v33171_v35 }
 0xed6   :  { %24540 = vmatpush3.bf16.msra.mxu0 %v26575_v15  ;;  %v26609_v15 = vld [vmem:[%s32847_s6 + $0x120] sm:$0xff]  }
 0xed7   :  { %24541 = vmatprep.subr.bf16.mxu0 %v33171_v35 }
 0xed8   :  { %24880 = vmatpush3.bf16.msra.mxu1 %v26576_v43  ;;  %v26610_v43 = vld [vmem:[%s32847_s6 + $0x5e0] sm:$0xff]  }
 0xed9   :  { %24881 = vmatprep.subr.bf16.mxu1 %v33171_v35 }
 0xeda   :  { %24542 = vmatpush3.bf16.msra.mxu0 %v26577_v27  ;;  %v16111_v27 = vld [vmem:[#allocation3 + $0x10] sm:$0x4] }
 0xedb   :  { %24543 = vmatprep.subr.bf16.mxu0 %v33171_v35  ;;  %v16132_v12 = vunpack.c.l.b16 %v16111_v27 }
 0xedc   :  { %24882 = vmatpush3.bf16.msra.mxu1 %v26578_v21  ;;  %v26611_v21 = vld [vmem:[%s32847_s6 + $0x128] sm:$0xff]  }
 0xedd   :  { %24883 = vmatprep.subr.bf16.mxu1 %v33171_v35  ;;  %v16134_v9 = vrot.slane %v16132_v12, 3 }
 0xede   :  { %24544 = vmatpush3.bf16.msra.mxu0 %v26579_v40  ;;  %v26612_v40 = vld [vmem:[%s32847_s6 + $0x5e8] sm:$0xff]  }
 0xedf   :  { %24545 = vmatprep.subr.bf16.mxu0 %v33171_v35  ;;  %v16135_v8 = vsel %vm15698_vm6, %v16134_v9, %v16133_v38  ;;  %v26644_v38 = vld [vmem:[%s32847_s6 + $0x218] sm:$0xff]  }
 0xee0   :  { %24884 = vmatpush3.bf16.msra.mxu1 %v26580_v30  ;;  %v26613_v30 = vld [vmem:[%s32847_s6 + $0x130] sm:$0xff]   ;;  %v16136_v47 = vpack.c.b16 %v16135_v8, %v16135_v8  ;;  %v32336_v8 = vld [vmem:[#allocation3 + $0x10] sm:$0x10] }
 0xee1   :  { %24885 = vmatprep.subr.bf16.mxu1 %v33171_v35 }
 0xee2   :  { %24546 = vmatpush3.bf16.msra.mxu0 %v26581_v17  ;;  %v26614_v17 = vld [vmem:[%s32847_s6 + $0x5f0] sm:$0xff]  }
 0xee3   :  { %24547 = vmatprep.subr.bf16.mxu0 %v33171_v35 }
 0xee4   :  { %24886 = vmatpush3.bf16.msra.mxu1 %v26582_v34  ;;  %v18293_v34 = vrot.slane %v18180_v28, 6 }
 0xee5   :  { %24887 = vmatprep.subr.bf16.mxu1 %v33171_v35 }
 0xee6   :  { %24548 = vmatpush3.bf16.msra.mxu0 %v26583_v58  ;;  %v26616_v58 = vld [vmem:[%s32847_s6 + $0x5f8] sm:$0xff]  }
 0xee7   :  { %24553 = vmatprep.subr.bf16.mxu0 %v33171_v35 }
 0xee8   :  { %24888 = vmatpush3.bf16.msra.mxu1 %v26584_v6  ;;  %v18292_v6 = vrot.slane %v18179_v49, 7  ;;  %v26619_v49 = vld [vmem:[%s32847_s6 + $0x150] sm:$0xff]  }
 0xee9   :  { %24550 = vmatmul.mubr.bf16.vlgmr.msra.gmra.mrb[152].mxu0 %v15908_v56  ;;  %24913 = vmatprep.subr.bf16.mxu1 %v33171_v35  ;;  %v26622_v56 = vld [vmem:[%s32847_s6 + $0x168] sm:$0xff]  }
 0xeea   :  { %24554 = vmatpush3.bf16.msra.mxu0 %v26585_v32  ;;  %24569 = vmatprep.mubr.msk.bf16.mxu0 %vm26838_vm0, %v33171_v35  ;;  %v18294_v28 = vsel %vm15698_vm6, %v18293_v34, %v18292_v6  ;;  %v26620_v32 = vld [vmem:[%s32847_s6 + $0x158] sm:$0xff]   ;;  %v26642_v34 = vld [vmem:[%s32847_s6 + $0x208] sm:$0xff]  }
 0xeeb   :  { %24890 = vmatmul.mubr.bf16.vlgmr.msra.gmra.mrb[144].mxu1 %v17839_v53  ;;  %24555 = vmatprep.subr.bf16.mxu0 %v33171_v35  ;;  %v18295_v36 = vpack.c.b16 %v18294_v28, %v18294_v28  ;;  %v16245_v53 = vrot.slane %v16132_v12, 4  ;;  %v26640_v12 = vld [vmem:[%s32847_s6 + $0x1f8] sm:$0xff]   ;;  %v26646_v6 = vld [vmem:[%s32847_s6 + $0x228] sm:$0xff]   ;;  %v16588_v28 = vunpack.c.h.b16 %v32336_v8 }
 0xeec   :  { %24914 = vmatpush3.bf16.msra.mxu1 %v26586_v54  ;;  %24929 = vmatprep.mubr.msk.bf16.mxu1 %vm26838_vm0, %v33171_v35  ;;  %v26623_v54 = vld [vmem:[%s32847_s6 + $0x170] sm:$0xff]  }
 0xeed   :  { %24915 = vmatprep.subr.bf16.mxu1 %v33171_v35 }
 0xeee   :  { %24556 = vmatpush3.bf16.msra.mxu0 %v26587_v29  ;;  %v26624_v29 = vld [vmem:[%s32847_s6 + $0x178] sm:$0xff]  }
 0xeef   :  { %24557 = vmatprep.subr.bf16.mxu0 %v33171_v35 }
 0xef0   :  { %24916 = vmatpush3.bf16.msra.mxu1 %v26588_v3  ;;  %v16244_v3 = vrot.slane %v16131_v60, 5 }
 0xef1   :  { %24917 = vmatprep.subr.bf16.mxu1 %v33171_v35 }
 0xef2   :  { %24558 = vmatpush3.bf16.msra.mxu0 %v26589_v42  ;;  %v16246_v42 = vsel %vm15698_vm6, %v16245_v53, %v16244_v3 }
 0xef3   :  { %24559 = vmatprep.subr.bf16.mxu0 %v33171_v35 }
 0xef4   :  { %24918 = vmatpush3.bf16.msra.mxu1 %v26590_v5  ;;  %v26625_v5 = vld [vmem:[%s32847_s6 + $0x180] sm:$0xff]  }
 0xef5   :  { %24919 = vmatprep.subr.bf16.mxu1 %v33171_v35 }
 0xef6   :  { %24560 = vmatpush3.bf16.msra.mxu0 %v26591_v46  ;;  %v16247_v46 = vpack.c.b16 %v16246_v42, %v16246_v42  ;;  %v26648_v42 = vld [vmem:[%s32847_s6 + $0x238] sm:$0xff]  }
 0xef7   :  { %24561 = vmatprep.subr.bf16.mxu0 %v33171_v35 }
 0xef8   :  { %24920 = vmatpush3.bf16.msra.mxu1 %v26592_v44  ;;  %v26626_v44 = vld [vmem:[%s32847_s6 + $0x188] sm:$0xff]  }
 0xef9   :  { %24921 = vmatprep.subr.bf16.mxu1 %v33171_v35 }
 0xefa   :  { %24562 = vmatpush3.bf16.msra.mxu0 %v26593_v48  ;;  %v26627_v48 = vld [vmem:[%s32847_s6 + $0x190] sm:$0xff]  }
 0xefb   :  { %24563 = vmatprep.subr.bf16.mxu0 %v33171_v35 }
 0xefc   :  { %24922 = vmatpush3.bf16.msra.mxu1 %v26594_v51  ;;  %v26628_v51 = vld [vmem:[%s32847_s6 + $0x198] sm:$0xff]  }
 0xefd   :  { %24923 = vmatprep.subr.bf16.mxu1 %v33171_v35 }
 0xefe   :  { %24564 = vmatpush3.bf16.msra.mxu0 %v26595_v39  ;;  %v26629_v39 = vld [vmem:[%s32847_s6 + $0x1a0] sm:$0xff]  }
 0xeff   :  { %24565 = vmatprep.subr.bf16.mxu0 %v33171_v35 }
 0xf00   :  { %24924 = vmatpush3.bf16.msra.mxu1 %v26596_v61  ;;  %v16339_v61 = vld [vmem:[#allocation3 + $0x10] sm:$0x8] }
 0xf01   :  { %24925 = vmatprep.subr.bf16.mxu1 %v33171_v35  ;;  %v16360_v0 = vunpack.c.l.b16 %v16339_v61  ;;  %v26652_v61 = vld [vmem:[%s32847_s6 + $0x258] sm:$0xff]  }
 0xf02   :  { %24566 = vmatpush3.bf16.msra.mxu0 %v26597_v7  ;;  %v26630_v7 = vld [vmem:[%s32847_s6 + $0x1a8] sm:$0xff]  }
 0xf03   :  { %24567 = vmatprep.subr.bf16.mxu0 %v33171_v35  ;;  %v16362_v10 = vrot.slane %v16360_v0, 5  ;;  %v16473_v4 = vrot.slane %v16360_v0, 6 }
 0xf04   :  { %24926 = vmatpush3.bf16.msra.mxu1 %v26598_v2  ;;  %v16338_v2 = vld [vmem:[#allocation3] sm:$0x8] }
 0xf05   :  { %24927 = vmatprep.subr.bf16.mxu1 %v33171_v35 }
 0xf06   :  { %24568 = vmatpush3.bf16.msra.mxu0 %v26599_v13  ;;  %v16359_v13 = vunpack.c.l.b16 %v16338_v2  ;;  %v26654_v2 = vld [vmem:[%s32847_s6 + $0x268] sm:$0xff]  }
 0xf07   :  { %24573 = vmatprep.subr.bf16.mxu0 %v33171_v35 }
 0xf08   :  { %24928 = vmatpush3.bf16.msra.mxu1 %v26600_v63  ;;  %v26632_v63 = vld [vmem:[%s32847_s6 + $0x1b8] sm:$0xff]   ;;  %v16361_v25 = vrot.slane %v16359_v13, 6 }
 0xf09   :  { %24570 = vmatmul.mubr.bf16.vlgmr.msra.gmra.mrb[156].mxu0 %v16019_v62  ;;  %24953 = vmatprep.subr.bf16.mxu1 %v33171_v35  ;;  %v26634_v62 = vld [vmem:[%s32847_s6 + $0x1c8] sm:$0xff]  }
 0xf0a   :  { %24574 = vmatpush3.bf16.msra.mxu0 %v26601_v59  ;;  %24589 = vmatprep.mubr.msk.bf16.mxu0 %vm26838_vm0, %v33171_v35  ;;  %v16363_v11 = vsel %vm15698_vm6, %v16362_v10, %v16361_v25  ;;  %v26633_v59 = vld [vmem:[%s32847_s6 + $0x1c0] sm:$0xff]   ;;  %v26655_v25 = vld [vmem:[%s32847_s6 + $0x270] sm:$0xff]  }
 0xf0b   :  { %24930 = vmatmul.mubr.bf16.vlgmr.msra.gmra.mrb[148].mxu1 %v18067_v26  ;;  %24575 = vmatprep.subr.bf16.mxu0 %v33171_v35  ;;  %v16364_v18 = vpack.c.b16 %v16363_v11, %v16363_v11  ;;  %v26636_v26 = vld [vmem:[%s32847_s6 + $0x1d8] sm:$0xff]  }
 0xf0c   :  { %24954 = vmatpush3.bf16.msra.mxu1 %v26602_v50  ;;  %24969 = vmatprep.mubr.msk.bf16.mxu1 %vm26838_vm0, %v33171_v35  ;;  %v26635_v50 = vld [vmem:[%s32847_s6 + $0x1d0] sm:$0xff]  }
 0xf0d   :  { %24955 = vmatprep.subr.bf16.mxu1 %v33171_v35 }
 0xf0e   :  { %24576 = vmatpush3.bf16.msra.mxu0 %v26603_v33  ;;  %v26637_v33 = vld [vmem:[%s32847_s6 + $0x1e0] sm:$0xff]  }
 0xf0f   :  { %24577 = vmatprep.subr.bf16.mxu0 %v33171_v35 }
 0xf10   :  { %24956 = vmatpush3.bf16.msra.mxu1 %v26604_v22  ;;  %v26638_v22 = vld [vmem:[%s32847_s6 + $0x1e8] sm:$0xff]  }
 0xf11   :  { %24957 = vmatprep.subr.bf16.mxu1 %v33171_v35 }
 0xf12   :  { %24578 = vmatpush3.bf16.msra.mxu0 %v26605_v45 }
 0xf13   :  { %24579 = vmatprep.subr.bf16.mxu0 %v33171_v35 }
 0xf14   :  { %24958 = vmatpush3.bf16.msra.mxu1 %v26606_v24 }
 0xf15   :  { %24959 = vmatprep.subr.bf16.mxu1 %v33171_v35 }
 0xf16   :  { %24580 = vmatpush3.bf16.msra.mxu0 %v26607_v20 }
 0xf17   :  { %24581 = vmatprep.subr.bf16.mxu0 %v33171_v35 }
 0xf18   :  { %24960 = vmatpush3.bf16.msra.mxu1 %v26608_v41 }
 0xf19   :  { %24961 = vmatprep.subr.bf16.mxu1 %v33171_v35 }
 0xf1a   :  { %24582 = vmatpush3.bf16.msra.mxu0 %v26609_v15  ;;  %v26639_v15 = vld [vmem:[%s32847_s6 + $0x1f0] sm:$0xff]  }
 0xf1b   :  { %24583 = vmatprep.subr.bf16.mxu0 %v33171_v35 }
 0xf1c   :  { %24962 = vmatpush3.bf16.msra.mxu1 %v26610_v43 }
 0xf1d   :  { %24963 = vmatprep.subr.bf16.mxu1 %v33171_v35 }
 0xf1e   :  { %24584 = vmatpush3.bf16.msra.mxu0 %v26611_v21 }
 0xf1f   :  { %24585 = vmatprep.subr.bf16.mxu0 %v33171_v35 }
 0xf20   :  { %24964 = vmatpush3.bf16.msra.mxu1 %v26612_v40 }
 0xf21   :  { %24965 = vmatprep.subr.bf16.mxu1 %v33171_v35 }
 0xf22   :  { %24586 = vmatpush3.bf16.msra.mxu0 %v26613_v30  ;;  %v16472_v30 = vrot.slane %v16359_v13, 7 }
 0xf23   :  { %24587 = vmatprep.subr.bf16.mxu0 %v33171_v35 }
 0xf24   :  { %24966 = vmatpush3.bf16.msra.mxu1 %v26614_v17  ;;  %v16474_v60 = vsel %vm15698_vm6, %v16473_v4, %v16472_v30  ;;  %v26641_v17 = vld [vmem:[%s32847_s6 + $0x200] sm:$0xff]   ;;  %v16792_v4 = vld [vmem:[#allocation3] sm:$0x20] }
 0xf25   :  { %24967 = vmatprep.subr.bf16.mxu1 %v33171_v35  ;;  %v16475_v9 = vpack.c.b16 %v16474_v60, %v16474_v60 }
 0xf26   :  { %24588 = vmatpush3.bf16.msra.mxu0 %v26615_v52  ;;  %v26643_v52 = vld [vmem:[%s32847_s6 + $0x210] sm:$0xff]  }
 0xf27   :  { %24593 = vmatprep.subr.bf16.mxu0 %v33171_v35 }
 0xf28   :  { %24968 = vmatpush3.bf16.msra.mxu1 %v26616_v58  ;;  %v26645_v58 = vld [vmem:[%s32847_s6 + $0x220] sm:$0xff]  }
 0xf29   :  { %24590 = vmatmul.mubr.bf16.vlgmr.msra.gmra.mrb[160].mxu0 %v16136_v47  ;;  %24993 = vmatprep.subr.bf16.mxu1 %v33171_v35 }
 0xf2a   :  { %24594 = vmatpush3.bf16.msra.mxu0 %v26617_v57  ;;  %24609 = vmatprep.mubr.msk.bf16.mxu0 %vm26838_vm0, %v33171_v35 }
 0xf2b   :  { %24970 = vmatmul.mubr.bf16.vlgmr.msra.gmra.mrb[152].mxu1 %v18295_v36  ;;  %24595 = vmatprep.subr.bf16.mxu0 %v33171_v35 }
 0xf2c   :  { %25009 = vmatprep.mubr.msk.bf16.mxu1 %vm26838_vm0, %v33171_v35 }
 0xf2e   :  { %24596 = vmatpush3.bf16.msra.mxu0 %v26618_v14 }
 0xf2f   :  { %24597 = vmatprep.subr.bf16.mxu0 %v33171_v35 }
 0xf32   :  { %24598 = vmatpush3.bf16.msra.mxu0 %v26619_v49 }
 0xf33   :  { %24599 = vmatprep.subr.bf16.mxu0 %v33171_v35 }
 0xf36   :  { %24600 = vmatpush3.bf16.msra.mxu0 %v26620_v32  ;;  %v26647_v32 = vld [vmem:[%s32847_s6 + $0x230] sm:$0xff]  }
 0xf37   :  { %24601 = vmatprep.subr.bf16.mxu0 %v33171_v35 }
 0xf3a   :  { %24602 = vmatpush3.bf16.msra.mxu0 %v26621_v19 }
 0xf3b   :  { %24603 = vmatprep.subr.bf16.mxu0 %v33171_v35 }
 0xf3e   :  { %24604 = vmatpush3.bf16.msra.mxu0 %v26622_v56 }
 0xf3f   :  { %24605 = vmatprep.subr.bf16.mxu0 %v33171_v35 }
 0xf42   :  { %24606 = vmatpush3.bf16.msra.mxu0 %v26623_v54  ;;  %v16566_v54 = vld [vmem:[#allocation3] sm:$0x10] }
 0xf43   :  { %24607 = vmatprep.subr.bf16.mxu0 %v33171_v35 }
 0xf46   :  { %24608 = vmatpush3.bf16.msra.mxu0 %v26624_v29  ;;  %v16589_v29 = vrot.slane %v16588_v28, 7 }
 0xf47   :  { %24613 = vmatprep.subr.bf16.mxu0 %v33171_v35 }
 0xf49   :  { %24610 = vmatmul.mubr.bf16.vlgmr.msra.gmra.mrb[164].mxu0 %v16247_v46 }
 0xf4a   :  { %24614 = vmatpush3.bf16.msra.mxu0 %v26625_v5  ;;  %24629 = vmatprep.mubr.msk.bf16.mxu0 %vm26838_vm0, %v33171_v35  ;;  %v16587_v5 = vunpack.c.h.b16 %v16566_v54  ;;  %v26668_v54 = vld [vmem:[%s32847_s6 + $0x2d8] sm:$0xff]  }
 0xf4b   :  { %24615 = vmatprep.subr.bf16.mxu0 %v33171_v35 }
 0xf4c   :  { %v16590_v46 = vsel %vm15698_vm6, %v16589_v29, %v16587_v5  ;;  %v26670_v29 = vld [vmem:[%s32847_s6 + $0x2e8] sm:$0xff]  }
 0xf4e   :  { %24616 = vmatpush3.bf16.msra.mxu0 %v26626_v44  ;;  %v26649_v44 = vld [vmem:[%s32847_s6 + $0x240] sm:$0xff]  }
 0xf4f   :  { %24617 = vmatprep.subr.bf16.mxu0 %v33171_v35 }
 0xf52   :  { %24618 = vmatpush3.bf16.msra.mxu0 %v26627_v48  ;;  %v16591_v48 = vpack.c.b16 %v16590_v46, %v16590_v46 }
 0xf53   :  { %24619 = vmatprep.subr.bf16.mxu0 %v33171_v35 }
 0xf56   :  { %24620 = vmatpush3.bf16.msra.mxu0 %v26628_v51  ;;  %v26650_v51 = vld [vmem:[%s32847_s6 + $0x248] sm:$0xff]  }
 0xf57   :  { %24621 = vmatprep.subr.bf16.mxu0 %v33171_v35 }
 0xf5a   :  { %24622 = vmatpush3.bf16.msra.mxu0 %v26629_v39  ;;  %v26651_v39 = vld [vmem:[%s32847_s6 + $0x250] sm:$0xff]  }
 0xf5b   :  { %24623 = vmatprep.subr.bf16.mxu0 %v33171_v35 }
 0xf5e   :  { %24624 = vmatpush3.bf16.msra.mxu0 %v26630_v7  ;;  %v26653_v7 = vld [vmem:[%s32847_s6 + $0x260] sm:$0xff]  }
 0xf5f   :  { %24625 = vmatprep.subr.bf16.mxu0 %v33171_v35 }
 0xf62   :  { %24626 = vmatpush3.bf16.msra.mxu0 %v26631_v31 }
 0xf63   :  { %24627 = vmatprep.subr.bf16.mxu0 %v33171_v35 }
 0xf66   :  { %24628 = vmatpush3.bf16.msra.mxu0 %v26632_v63 }
 0xf67   :  { %24633 = vmatprep.subr.bf16.mxu0 %v33171_v35 }
 0xf69   :  { %24630 = vmatmul.mubr.bf16.vlgmr.msra.gmra.mrb[168].mxu0 %v16364_v18 }
 0xf6a   :  { %24634 = vmatpush3.bf16.msra.mxu0 %v26633_v59  ;;  %24649 = vmatprep.mubr.msk.bf16.mxu0 %vm26838_vm0, %v33171_v35 }
 0xf6b   :  { %24635 = vmatprep.subr.bf16.mxu0 %v33171_v35 }
 0xf6e   :  { %24636 = vmatpush3.bf16.msra.mxu0 %v26634_v62 }
 0xf6f   :  { %24637 = vmatprep.subr.bf16.mxu0 %v33171_v35 }
 0xf72   :  { %24638 = vmatpush3.bf16.msra.mxu0 %v26635_v50  ;;  %v26656_v50 = vld [vmem:[%s32847_s6 + $0x278] sm:$0xff]  }
 0xf73   :  { %24639 = vmatprep.subr.bf16.mxu0 %v33171_v35 }
 0xf76   :  { %24640 = vmatpush3.bf16.msra.mxu0 %v26636_v26  ;;  %v16699_v26 = vrot.slane %v16587_v5, 1 }
 0xf77   :  { %24641 = vmatprep.subr.bf16.mxu0 %v33171_v35 }
 0xf7a   :  { %24642 = vmatpush3.bf16.msra.mxu0 %v26637_v33  ;;  %v16700_v33 = vsel %vm15698_vm6, %v16588_v28, %v16699_v26  ;;  %v26664_v28 = vld [vmem:[%s32847_s6 + $0x2b8] sm:$0xff]   ;;  %v26678_v26 = vld [vmem:[%s32847_s6 + $0x328] sm:$0xff]  }
 0xf7b   :  { %24643 = vmatprep.subr.bf16.mxu0 %v33171_v35 }
 0xf7c   :  { %v15784_v45 = vpop.f32.mrb[144].mxu0 }
 0xf7d   :  { %v24511_v24 = vpop.f32.mrb[145].mxu0 }
 0xf7e   :  { %24644 = vmatpush3.bf16.msra.mxu0 %v26638_v22  ;;  %v15787_v20 = vpop.f32.mrb[146].mxu0  ;;  %v32303_v41 = vpop.f32.mrb[136].mxu1  ;;  %v26657_v22 = vld [vmem:[%s32847_s6 + $0x280] sm:$0xff]   ;;  %v26658_v24 = vld [vmem:[%s32847_s6 + $0x288] sm:$0xff]  }
 0xf7f   :  { %v24512_v43 = vpop.f32.mrb[147].mxu0  ;;  %v24811_v27 = vpop.f32.mrb[137].mxu1  ;;  %24645 = vmatprep.subr.bf16.mxu0 %v33171_v35  ;;  %v26659_v20 = vld [vmem:[%s32847_s6 + $0x290] sm:$0xff]  }
 0xf80   :  { %v17472_v21 = vpop.f32.mrb[138].mxu1  ;;  %v26661_v43 = vld [vmem:[%s32847_s6 + $0x2a0] sm:$0xff]   ;;  %v16793_v27 = vld [vmem:[#allocation3 + $0x10] sm:$0x20] }
 0xf81   :  { %v24812_v40 = vpop.f32.mrb[139].mxu1  ;;  %v26662_v21 = vld [vmem:[%s32847_s6 + $0x2a8] sm:$0xff]  }
 0xf82   :  { %24646 = vmatpush3.bf16.msra.mxu0 %v26639_v15  ;;  %v26660_v15 = vld [vmem:[%s32847_s6 + $0x298] sm:$0xff]  }
 0xf83   :  { %24647 = vmatprep.subr.bf16.mxu0 %v33171_v35 }
 0xf86   :  { %24648 = vmatpush3.bf16.msra.mxu0 %v26640_v12  ;;  %v16814_v12 = vunpack.c.h.b16 %v16793_v27 }
 0xf87   :  { %24653 = vmatprep.subr.bf16.mxu0 %v33171_v35 }
 0xf89   :  { %24650 = vmatmul.mubr.bf16.vlgmr.msra.gmra.mrb[172].mxu0 %v16475_v9 }
 0xf8a   :  { %24654 = vmatpush3.bf16.msra.mxu0 %v26641_v17  ;;  %24669 = vmatprep.mubr.msk.bf16.mxu0 %vm26838_vm0, %v33171_v35 }
 0xf8b   :  { %24655 = vmatprep.subr.bf16.mxu0 %v33171_v35 }
 0xf8e   :  { %24656 = vmatpush3.bf16.msra.mxu0 %v26642_v34  ;;  %v26663_v34 = vld [vmem:[%s32847_s6 + $0x2b0] sm:$0xff]  }
 0xf8f   :  { %24657 = vmatprep.subr.bf16.mxu0 %v33171_v35 }
 0xf92   :  { %24658 = vmatpush3.bf16.msra.mxu0 %v26643_v52  ;;  %v16813_v52 = vunpack.c.h.b16 %v16792_v4 }
 0xf93   :  { %24659 = vmatprep.subr.bf16.mxu0 %v33171_v35 }
 0xf96   :  { %24660 = vmatpush3.bf16.msra.mxu0 %v26644_v38 }
 0xf97   :  { %24661 = vmatprep.subr.bf16.mxu0 %v33171_v35 }
 0xf9a   :  { %24662 = vmatpush3.bf16.msra.mxu0 %v26645_v58 }
 0xf9b   :  { %24663 = vmatprep.subr.bf16.mxu0 %v33171_v35 }
 0xf9c   :  { %v15876_v57 = vpop.f32.mrb[148].mxu0 }
 0xf9d   :  { %v15877_v47 = vadd.f32 %v15876_v57, %v15784_v45  ;;  %v24531_v36 = vpop.f32.mrb[149].mxu0  ;;  %v16701_v45 = vpack.c.b16 %v16700_v33, %v16700_v33  ;;  %v17020_v33 = vld [vmem:[#allocation3] sm:$0x40] }
 0xf9e   :  { %v15879_v14 = vpop.f32.mrb[150].mxu0  ;;  %24664 = vmatpush3.bf16.msra.mxu0 %v26646_v6  ;;  %v32343_v49 = vpop.f32.mrb[140].mxu1  ;;  %v16816_v6 = vrot.slane %v16814_v12, 1  ;;  %v17041_v27 = vunpack.c.h.b16 %v17020_v33 }
 0xf9f   :  { %v24532_v19 = vpop.f32.mrb[151].mxu0  ;;  %v24851_v56 = vpop.f32.mrb[141].mxu1  ;;  %24665 = vmatprep.subr.bf16.mxu0 %v33171_v35  ;;  %v26665_v14 = vld [vmem:[%s32847_s6 + $0x2c0] sm:$0xff]  }
 0xfa0   :  { %v17698_v53 = vpop.f32.mrb[142].mxu1  ;;  %v26666_v19 = vld [vmem:[%s32847_s6 + $0x2c8] sm:$0xff]   ;;  %v26667_v56 = vld [vmem:[%s32847_s6 + $0x2d0] sm:$0xff]  }
 0xfa1   :  { %v24852_v3 = vpop.f32.mrb[143].mxu1  ;;  %v26669_v53 = vld [vmem:[%s32847_s6 + $0x2e0] sm:$0xff]  }
 0xfa2   :  { %24666 = vmatpush3.bf16.msra.mxu0 %v26647_v32 }
 0xfa3   :  { %24667 = vmatprep.subr.bf16.mxu0 %v33171_v35 }
 0xfa6   :  { %24668 = vmatpush3.bf16.msra.mxu0 %v26648_v42 }
 0xfa7   :  { %24673 = vmatprep.subr.bf16.mxu0 %v33171_v35 }
 0xfa9   :  { %24670 = vmatmul.mubr.bf16.vlgmr.msra.gmra.mrb[176].mxu0 %v16591_v48  ;;  %v26671_v48 = vld [vmem:[%s32847_s6 + $0x2f0] sm:$0xff]  }
 0xfaa   :  { %24674 = vmatpush3.bf16.msra.mxu0 %v26649_v44  ;;  %24689 = vmatprep.mubr.msk.bf16.mxu0 %vm26838_vm0, %v33171_v35 }
 0xfab   :  { %24675 = vmatprep.subr.bf16.mxu0 %v33171_v35 }
 0xfae   :  { %24676 = vmatpush3.bf16.msra.mxu0 %v26650_v51 }
 0xfaf   :  { %24677 = vmatprep.subr.bf16.mxu0 %v33171_v35 }
 0xfb2   :  { %24678 = vmatpush3.bf16.msra.mxu0 %v26651_v39 }
 0xfb3   :  { %24679 = vmatprep.subr.bf16.mxu0 %v33171_v35 }
 0xfb6   :  { %24680 = vmatpush3.bf16.msra.mxu0 %v26652_v61 }
 0xfb7   :  { %24681 = vmatprep.subr.bf16.mxu0 %v33171_v35 }
 0xfba   :  { %24682 = vmatpush3.bf16.msra.mxu0 %v26653_v7  ;;  %v16927_v7 = vrot.slane %v16814_v12, 2  ;;  %v17043_v12 = vrot.slane %v17041_v27, 4 }
 0xfbb   :  { %24683 = vmatprep.subr.bf16.mxu0 %v33171_v35 }
 0xfbc   :  { %v15992_v0 = vpop.f32.mrb[152].mxu0 }
 0xfbd   :  { %v15998_v31 = vadd.f32 %v15992_v0, %v15877_v47  ;;  %v24551_v13 = vpop.f32.mrb[153].mxu0  ;;  %v16815_v47 = vrot.slane %v16813_v52, 2  ;;  %v26672_v0 = vld [vmem:[%s32847_s6 + $0x2f8] sm:$0xff]  }
 0xfbe   :  { %v15995_v10 = vpop.f32.mrb[154].mxu0  ;;  %24684 = vmatpush3.bf16.msra.mxu0 %v26654_v2  ;;  %v32380_v63 = vpop.f32.mrb[144].mxu1 }
 0xfbf   :  { %v24552_v11 = vpop.f32.mrb[155].mxu0  ;;  %v24891_v59 = vpop.f32.mrb[145].mxu1  ;;  %24685 = vmatprep.subr.bf16.mxu0 %v33171_v35  ;;  %v16817_v36 = vsel %vm15698_vm6, %v16816_v6, %v16815_v47  ;;  %v26673_v10 = vld [vmem:[%s32847_s6 + $0x300] sm:$0xff]  }
 0xfc0   :  { %v17926_v18 = vpop.f32.mrb[146].mxu1  ;;  %v16818_v32 = vpack.c.b16 %v16817_v36, %v16817_v36  ;;  %v26674_v11 = vld [vmem:[%s32847_s6 + $0x308] sm:$0xff]   ;;  %v26675_v59 = vld [vmem:[%s32847_s6 + $0x310] sm:$0xff]  }
 0xfc1   :  { %v24892_v62 = vpop.f32.mrb[147].mxu1  ;;  %v26676_v18 = vld [vmem:[%s32847_s6 + $0x318] sm:$0xff]   ;;  %v26687_v36 = vld [vmem:[%s32847_s6 + $0x370] sm:$0xff]  }
 0xfc2   :  { %24686 = vmatpush3.bf16.msra.mxu0 %v26655_v25  ;;  %v26677_v62 = vld [vmem:[%s32847_s6 + $0x320] sm:$0xff]  }
 0xfc3   :  { %24687 = vmatprep.subr.bf16.mxu0 %v33171_v35 }
 0xfc6   :  { %24688 = vmatpush3.bf16.msra.mxu0 %v26656_v50  ;;  %v17021_v50 = vld [vmem:[#allocation3 + $0x10] sm:$0x40] }
 0xfc7   :  { %24693 = vmatprep.subr.bf16.mxu0 %v33171_v35 }
 0xfc9   :  { %24690 = vmatmul.mubr.bf16.vlgmr.msra.gmra.mrb[180].mxu0 %v16701_v45  ;;  %v17042_v45 = vunpack.c.h.b16 %v17021_v50 }
 0xfca   :  { %24694 = vmatpush3.bf16.msra.mxu0 %v26657_v22  ;;  %24709 = vmatprep.mubr.msk.bf16.mxu0 %vm26838_vm0, %v33171_v35 }
 0xfcb   :  { %24695 = vmatprep.subr.bf16.mxu0 %v33171_v35  ;;  %v17044_v4 = vrot.slane %v17042_v45, 3 }
 0xfce   :  { %24696 = vmatpush3.bf16.msra.mxu0 %v26658_v24 }
 0xfcf   :  { %24697 = vmatprep.subr.bf16.mxu0 %v33171_v35 }
 0xfd2   :  { %24698 = vmatpush3.bf16.msra.mxu0 %v26659_v20 }
 0xfd3   :  { %24699 = vmatprep.subr.bf16.mxu0 %v33171_v35 }
 0xfd6   :  { %24700 = vmatpush3.bf16.msra.mxu0 %v26660_v15 }
 0xfd7   :  { %24701 = vmatprep.subr.bf16.mxu0 %v33171_v35 }
 0xfda   :  { %24702 = vmatpush3.bf16.msra.mxu0 %v26661_v43  ;;  %v26679_v43 = vld [vmem:[%s32847_s6 + $0x330] sm:$0xff]  }
 0xfdb   :  { %24703 = vmatprep.subr.bf16.mxu0 %v33171_v35 }
 0xfdc   :  { %v16103_v40 = vpop.f32.mrb[156].mxu0 }
 0xfdd   :  { %v16109_v30 = vadd.f32 %v16103_v40, %v15998_v31  ;;  %v24571_v60 = vpop.f32.mrb[157].mxu0  ;;  %v16926_v31 = vrot.slane %v16813_v52, 3  ;;  %v26680_v40 = vld [vmem:[%s32847_s6 + $0x338] sm:$0xff]   ;;  %v26683_v52 = vld [vmem:[%s32847_s6 + $0x350] sm:$0xff]  }
 0xfde   :  { %v16106_v17 = vpop.f32.mrb[158].mxu0  ;;  %24704 = vmatpush3.bf16.msra.mxu0 %v26662_v21  ;;  %v32417_v9 = vpop.f32.mrb[148].mxu1  ;;  %v26681_v60 = vld [vmem:[%s32847_s6 + $0x340] sm:$0xff]  }
 0xfdf   :  { %v24572_v38 = vpop.f32.mrb[159].mxu0  ;;  %v24931_v58 = vpop.f32.mrb[149].mxu1  ;;  %24705 = vmatprep.subr.bf16.mxu0 %v33171_v35  ;;  %v16928_v13 = vsel %vm15698_vm6, %v16927_v7, %v16926_v31  ;;  %v26696_v31 = vld [vmem:[%s32847_s6 + $0x3b8] sm:$0xff]  }
 0xfe0   :  { %v18154_v8 = vpop.f32.mrb[150].mxu1  ;;  %v16929_v25 = vpack.c.b16 %v16928_v13, %v16928_v13  ;;  %v26684_v38 = vld [vmem:[%s32847_s6 + $0x358] sm:$0xff]   ;;  %v26685_v58 = vld [vmem:[%s32847_s6 + $0x360] sm:$0xff]  }
 0xfe1   :  { %v24932_v57 = vpop.f32.mrb[151].mxu1  ;;  %v26686_v8 = vld [vmem:[%s32847_s6 + $0x368] sm:$0xff]   ;;  %v26697_v13 = vld [vmem:[%s32847_s6 + $0x400] sm:$0xff]  }
 0xfe2   :  { %24706 = vmatpush3.bf16.msra.mxu0 %v26663_v34  ;;  %v26682_v34 = vld [vmem:[%s32847_s6 + $0x348] sm:$0xff]  }
 0xfe3   :  { %24707 = vmatprep.subr.bf16.mxu0 %v33171_v35 }
 0xfe6   :  { %24708 = vmatpush3.bf16.msra.mxu0 %v26664_v28 }
 0xfe7   :  { %24713 = vmatprep.subr.bf16.mxu0 %v33171_v35 }
 0xfe9   :  { %24710 = vmatmul.mubr.bf16.vlgmr.msra.gmra.mrb[184].mxu0 %v16818_v32  ;;  %v17155_v32 = vrot.slane %v17042_v45, 4 }
 0xfea   :  { %24714 = vmatpush3.bf16.msra.mxu0 %v26665_v14  ;;  %24729 = vmatprep.mubr.msk.bf16.mxu0 %vm26838_vm0, %v33171_v35 }
 0xfeb   :  { %24715 = vmatprep.subr.bf16.mxu0 %v33171_v35 }
 0xfee   :  { %24716 = vmatpush3.bf16.msra.mxu0 %v26666_v19  ;;  %v26688_v19 = vld [vmem:[%s32847_s6 + $0x378] sm:$0xff]  }
 0xfef   :  { %24717 = vmatprep.subr.bf16.mxu0 %v33171_v35 }
 0xff2   :  { %24718 = vmatpush3.bf16.msra.mxu0 %v26667_v56  ;;  %v17154_v56 = vrot.slane %v17041_v27, 5  ;;  %v26707_v27 = vld [vmem:[%s32847_s6 + $0x490] sm:$0xff]  }
 0xff3   :  { %24719 = vmatprep.subr.bf16.mxu0 %v33171_v35 }
 0xff6   :  { %24720 = vmatpush3.bf16.msra.mxu0 %v26668_v54  ;;  %v17156_v54 = vsel %vm15698_vm6, %v17155_v32, %v17154_v56 }
 0xff7   :  { %24721 = vmatprep.subr.bf16.mxu0 %v33171_v35 }
 0xffa   :  { %24722 = vmatpush3.bf16.msra.mxu0 %v26669_v53  ;;  %v26689_v53 = vld [vmem:[%s32847_s6 + $0x380] sm:$0xff]  }
 0xffb   :  { %24723 = vmatprep.subr.bf16.mxu0 %v33171_v35 }
 0xffc   :  { %v16220_v3 = vpop.f32.mrb[160].mxu0 }
 0xffd   :  { %v16226_v42 = vadd.f32 %v16220_v3, %v16109_v30  ;;  %v24591_v5 = vpop.f32.mrb[161].mxu0  ;;  %v17045_v30 = vsel %vm15698_vm6, %v17044_v4, %v17043_v12  ;;  %v26690_v3 = vld [vmem:[%s32847_s6 + $0x388] sm:$0xff]  }
 0xffe   :  { %v16223_v46 = vpop.f32.mrb[162].mxu0  ;;  %24724 = vmatpush3.bf16.msra.mxu0 %v26670_v29  ;;  %v32454_v44 = vpop.f32.mrb[152].mxu1  ;;  %v17046_v17 = vpack.c.b16 %v17045_v30, %v17045_v30  ;;  %v17157_v29 = vpack.c.b16 %v17156_v54, %v17156_v54  ;;  %v26692_v5 = vld [vmem:[%s32847_s6 + $0x398] sm:$0xff]   ;;  %v26710_v4 = vld [vmem:[%s32847_s6 + $0x4a8] sm:$0xff]  }
 0xfff   :  { %v24592_v51 = vpop.f32.mrb[163].mxu0  ;;  %v24971_v39 = vpop.f32.mrb[153].mxu1  ;;  %24725 = vmatprep.subr.bf16.mxu0 %v33171_v35  ;;  %v26693_v46 = vld [vmem:[%s32847_s6 + $0x3a0] sm:$0xff]   ;;  %v26720_v54 = vld [vmem:[%s32847_s6 + $0x538] sm:$0xff]  }
0x1000   :  { %v18382_v61 = vpop.f32.mrb[154].mxu1 }
0x1001   :  { %v24972_v2 = vpop.f32.mrb[155].mxu1 }
0x1002   :  { %24726 = vmatpush3.bf16.msra.mxu0 %v26671_v48  ;;  %v26694_v48 = vld [vmem:[%s32847_s6 + $0x3a8] sm:$0xff]   ;;  %v26695_v2 = vld [vmem:[%s32847_s6 + $0x3b0] sm:$0xff]  }
0x1003   :  { %24727 = vmatprep.subr.bf16.mxu0 %v33171_v35 }
0x1006   :  { %24728 = vmatpush3.bf16.msra.mxu0 %v26672_v0 }
0x1007   :  { %24733 = vmatprep.subr.bf16.mxu0 %v33171_v35 }
0x1009   :  { %24730 = vmatmul.mubr.bf16.vlgmr.msra.gmra.mrb[188].mxu0 %v16929_v25  ;;  %v26698_v25 = vld [vmem:[%s32847_s6 + $0x408] sm:$0xff]  }
0x100a   :  { %24734 = vmatpush3.bf16.msra.mxu0 %v26673_v10  ;;  %24749 = vmatprep.mubr.msk.bf16.mxu0 %vm26838_vm0, %v33171_v35  ;;  %v17274_v10 = vpack.c.b16 %v31914_v55, %v31914_v55  ;;  %v26700_v55 = vld [vmem:[%s32847_s6 + $0x418] sm:$0xff]  }
0x100b   :  { %24735 = vmatprep.subr.bf16.mxu0 %v33171_v35 }
0x100e   :  { %24736 = vmatpush3.bf16.msra.mxu0 %v26674_v11  ;;  %v26699_v11 = vld [vmem:[%s32847_s6 + $0x410] sm:$0xff]  }
0x100f   :  { %24737 = vmatprep.subr.bf16.mxu0 %v33171_v35 }
0x1012   :  { %24738 = vmatpush3.bf16.msra.mxu0 %v26675_v59  ;;  %v26701_v59 = vld [vmem:[%s32847_s6 + $0x420] sm:$0xff]  }
0x1013   :  { %24739 = vmatprep.subr.bf16.mxu0 %v33171_v35 }
0x1016   :  { %24740 = vmatpush3.bf16.msra.mxu0 %v26676_v18  ;;  %v26702_v18 = vld [vmem:[%s32847_s6 + $0x428] sm:$0xff]  }
0x1017   :  { %24741 = vmatprep.subr.bf16.mxu0 %v33171_v35 }
0x101a   :  { %24742 = vmatpush3.bf16.msra.mxu0 %v26677_v62 }
0x101b   :  { %24743 = vmatprep.subr.bf16.mxu0 %v33171_v35 }
0x101c   :  { %v16331_v22 = vpop.f32.mrb[164].mxu0 }
0x101d   :  { %v16337_v24 = vadd.f32 %v16331_v22, %v16226_v42  ;;  %v24611_v20 = vpop.f32.mrb[165].mxu0  ;;  %v26691_v42 = vld [vmem:[%s32847_s6 + $0x390] sm:$0xff]  }
0x101e   :  { %v16334_v15 = vpop.f32.mrb[166].mxu0  ;;  %24744 = vmatpush3.bf16.msra.mxu0 %v26678_v26  ;;  %v26703_v22 = vld [vmem:[%s32847_s6 + $0x430] sm:$0xff]   ;;  %v26705_v20 = vld [vmem:[%s32847_s6 + $0x480] sm:$0xff]  }
0x101f   :  { %v24612_v21 = vpop.f32.mrb[167].mxu0  ;;  %24745 = vmatprep.subr.bf16.mxu0 %v33171_v35  ;;  %v17501_v15 = vpack.c.b16 %v31917_v1, %v31917_v1  ;;  %v26708_v1 = vld [vmem:[%s32847_s6 + $0x498] sm:$0xff]  }
0x1020   :  { %v26709_v21 = vld [vmem:[%s32847_s6 + $0x4a0] sm:$0xff]  }
0x1022   :  { %24746 = vmatpush3.bf16.msra.mxu0 %v26679_v43  ;;  %v26706_v43 = vld [vmem:[%s32847_s6 + $0x488] sm:$0xff]  }
0x1023   :  { %24747 = vmatprep.subr.bf16.mxu0 %v33171_v35 }
0x1026   :  { %24748 = vmatpush3.bf16.msra.mxu0 %v26680_v40 }
0x1027   :  { %24753 = vmatprep.subr.bf16.mxu0 %v33171_v35 }
0x1029   :  { %24750 = vmatmul.mubr.bf16.vlgmr.msra.gmra.mrb[192].mxu0 %v17046_v17  ;;  %v26711_v17 = vld [vmem:[%s32847_s6 + $0x4b0] sm:$0xff]  }
0x102a   :  { %24754 = vmatpush3.bf16.msra.mxu0 %v26681_v60  ;;  %24769 = vmatprep.mubr.msk.bf16.mxu0 %vm26838_vm0, %v33171_v35 }
0x102b   :  { %24755 = vmatprep.subr.bf16.mxu0 %v33171_v35 }
0x102e   :  { %24756 = vmatpush3.bf16.msra.mxu0 %v26682_v34 }
0x102f   :  { %24757 = vmatprep.subr.bf16.mxu0 %v33171_v35 }
0x1032   :  { %24758 = vmatpush3.bf16.msra.mxu0 %v26683_v52  ;;  %v26712_v52 = vld [vmem:[%s32847_s6 + $0x4b8] sm:$0xff]  }
0x1033   :  { %24759 = vmatprep.subr.bf16.mxu0 %v33171_v35 }
0x1036   :  { %24760 = vmatpush3.bf16.msra.mxu0 %v26684_v38  ;;  %v26713_v38 = vld [vmem:[%s32847_s6 + $0x500] sm:$0xff]  }
0x1037   :  { %24761 = vmatprep.subr.bf16.mxu0 %v33171_v35 }
0x103a   :  { %24762 = vmatpush3.bf16.msra.mxu0 %v26685_v58  ;;  %v17728_v58 = vpack.c.b16 %v31920_v23, %v31920_v23  ;;  %v26716_v23 = vld [vmem:[%s32847_s6 + $0x518] sm:$0xff]  }
0x103b   :  { %24763 = vmatprep.subr.bf16.mxu0 %v33171_v35 }
0x103c   :  { %v16448_v6 = vpop.f32.mrb[168].mxu0 }
0x103d   :  { %v16454_v57 = vadd.f32 %v16448_v6, %v16337_v24  ;;  %v24631_v28 = vpop.f32.mrb[169].mxu0  ;;  %v26704_v24 = vld [vmem:[%s32847_s6 + $0x438] sm:$0xff]   ;;  %v26715_v6 = vld [vmem:[%s32847_s6 + $0x510] sm:$0xff]  }
0x103e   :  { %v16451_v47 = vpop.f32.mrb[170].mxu0  ;;  %24764 = vmatpush3.bf16.msra.mxu0 %v26686_v8  ;;  %v26714_v8 = vld [vmem:[%s32847_s6 + $0x508] sm:$0xff]  }
0x103f   :  { %v24632_v14 = vpop.f32.mrb[171].mxu0  ;;  %24765 = vmatprep.subr.bf16.mxu0 %v33171_v35  ;;  %v26718_v28 = vld [vmem:[%s32847_s6 + $0x528] sm:$0xff]  }
0x1042   :  { %24766 = vmatpush3.bf16.msra.mxu0 %v26687_v36 }
0x1043   :  { %24767 = vmatprep.subr.bf16.mxu0 %v33171_v35 }
0x1046   :  { %24768 = vmatpush3.bf16.msra.mxu0 %v26688_v19  ;;  %v26719_v19 = vld [vmem:[%s32847_s6 + $0x530] sm:$0xff]  }
0x1047   :  { %24773 = vmatprep.subr.bf16.mxu0 %v33171_v35 }
0x1049   :  { %24770 = vmatmul.mubr.bf16.vlgmr.msra.gmra.mrb[196].mxu0 %v17157_v29  ;;  %v17956_v29 = vpack.c.b16 %v31926_v37, %v31926_v37  ;;  %v26724_v37 = vld [vmem:[%s32847_s6 + $0x598] sm:$0xff]  }
0x104a   :  { %24774 = vmatpush3.bf16.msra.mxu0 %v26689_v53  ;;  %24789 = vmatprep.mubr.msk.bf16.mxu0 %vm26838_vm0, %v33171_v35  ;;  %v26721_v53 = vld [vmem:[%s32847_s6 + $0x580] sm:$0xff]  }
0x104b   :  { %24775 = vmatprep.subr.bf16.mxu0 %v33171_v35 }
0x104e   :  { %24776 = vmatpush3.bf16.msra.mxu0 %v26690_v3  ;;  %v26722_v3 = vld [vmem:[%s32847_s6 + $0x588] sm:$0xff]  }
0x104f   :  { %24777 = vmatprep.subr.bf16.mxu0 %v33171_v35 }
0x1052   :  { %24778 = vmatpush3.bf16.msra.mxu0 %v26691_v42  ;;  %v26723_v42 = vld [vmem:[%s32847_s6 + $0x590] sm:$0xff]  }
0x1053   :  { %24779 = vmatprep.subr.bf16.mxu0 %v33171_v35 }
0x1056   :  { %24780 = vmatpush3.bf16.msra.mxu0 %v26692_v5  ;;  %v26725_v5 = vld [vmem:[%s32847_s6 + $0x5a0] sm:$0xff]  }
0x1057   :  { %24781 = vmatprep.subr.bf16.mxu0 %v33171_v35 }
0x105a   :  { %24782 = vmatpush3.bf16.msra.mxu0 %v26693_v46  ;;  %v26726_v46 = vld [vmem:[%s32847_s6 + $0x5a8] sm:$0xff]  }
0x105b   :  { %24783 = vmatprep.subr.bf16.mxu0 %v33171_v35 }
0x105c   :  { %v16559_v51 = vpop.f32.mrb[172].mxu0 }
0x105d   :  { %v16565_v39 = vadd.f32 %v16559_v51, %v16454_v57  ;;  %v24651_v61 = vpop.f32.mrb[173].mxu0  ;;  %v26717_v57 = vld [vmem:[%s32847_s6 + $0x520] sm:$0xff]  }
0x105e   :  { %v16562_v7 = vpop.f32.mrb[174].mxu0  ;;  %24784 = vmatpush3.bf16.msra.mxu0 %v26694_v48 }
0x105f   :  { %v24652_v0 = vpop.f32.mrb[175].mxu0  ;;  %24785 = vmatprep.subr.bf16.mxu0 %v33171_v35  ;;  %v26727_v7 = vld [vmem:[%s32847_s6 + $0x5b0] sm:$0xff]  }
0x1060   :  { %v26728_v0 = vld [vmem:[%s32847_s6 + $0x5b8] sm:$0xff]  }
0x1062   :  { %24786 = vmatpush3.bf16.msra.mxu0 %v26695_v2 }
0x1063   :  { %24787 = vmatprep.subr.bf16.mxu0 %v33171_v35 }
0x1066   :  { %24788 = vmatpush3.bf16.msra.mxu0 %v26696_v31  ;;  %v26729_v31 = vld [vmem:[%s32847_s6 + $0x600] sm:$0xff]  }
0x1067   :  { %24813 = vmatprep.subr.bf16.mxu0 %v33171_v35 }
0x1069   :  { %24790 = vmatmul.mubr.bf16.vlgmr.msra.gmra.mrb[200].mxu0 %v17274_v10  ;;  %v26730_v10 = vld [vmem:[%s32847_s6 + $0x608] sm:$0xff]  }
0x106a   :  { %24814 = vmatpush3.bf16.msra.mxu0 %v26697_v13  ;;  %24829 = vmatprep.mubr.msk.bf16.mxu0 %vm26838_vm0, %v33171_v35  ;;  %v18184_v13 = vpack.c.b16 %v31938_v16, %v31938_v16  ;;  %v26732_v16 = vld [vmem:[%s32847_s6 + $0x618] sm:$0xff]  }
0x106b   :  { %24815 = vmatprep.subr.bf16.mxu0 %v33171_v35 }
0x106e   :  { %24816 = vmatpush3.bf16.msra.mxu0 %v26698_v25  ;;  %v26731_v25 = vld [vmem:[%s32847_s6 + $0x610] sm:$0xff]  }
0x106f   :  { %24817 = vmatprep.subr.bf16.mxu0 %v33171_v35 }
0x1072   :  { %24818 = vmatpush3.bf16.msra.mxu0 %v26699_v11  ;;  %v26733_v11 = vld [vmem:[%s32847_s6 + $0x620] sm:$0xff]  }
0x1073   :  { %24819 = vmatprep.subr.bf16.mxu0 %v33171_v35 }
0x1076   :  { %24820 = vmatpush3.bf16.msra.mxu0 %v26700_v55  ;;  %v18387_v55 = vld [vmem:[#allocation3 + $0x18] sm:$0x10] }
0x1077   :  { %24821 = vmatprep.subr.bf16.mxu0 %v33171_v35 }
0x107a   :  { %24822 = vmatpush3.bf16.msra.mxu0 %v26701_v59  ;;  %v26734_v59 = vld [vmem:[%s32847_s6 + $0x628] sm:$0xff]  }
0x107b   :  { %24823 = vmatprep.subr.bf16.mxu0 %v33171_v35 }
0x107c   :  { %v16675_v62 = vpop.f32.mrb[176].mxu0 }
0x107d   :  { %v16681_v50 = vadd.f32 %v16675_v62, %v16565_v39  ;;  %v24671_v26 = vpop.f32.mrb[177].mxu0  ;;  %v18408_v62 = vunpack.c.h.b16 %v18387_v55 }
0x107e   :  { %v16678_v33 = vpop.f32.mrb[178].mxu0  ;;  %24824 = vmatpush3.bf16.msra.mxu0 %v26702_v18 }
0x107f   :  { %v24672_v45 = vpop.f32.mrb[179].mxu0  ;;  %24825 = vmatprep.subr.bf16.mxu0 %v33171_v35 }
0x1082   :  { %24826 = vmatpush3.bf16.msra.mxu0 %v26703_v22  ;;  %v26735_v22 = vld [vmem:[%s32847_s6 + $0x630] sm:$0xff]  }
0x1083   :  { %24827 = vmatprep.subr.bf16.mxu0 %v33171_v35 }
0x1086   :  { %24828 = vmatpush3.bf16.msra.mxu0 %v26704_v24  ;;  %v18386_v24 = vld [vmem:[#allocation3 + $0x8] sm:$0x10] }
0x1087   :  { %24853 = vmatprep.subr.bf16.mxu0 %v33171_v35 }
0x1089   :  { %24830 = vmatmul.mubr.bf16.vlgmr.msra.gmra.mrb[204].mxu0 %v17501_v15  ;;  %v26736_v15 = vld [vmem:[%s32847_s6 + $0x638] sm:$0xff]  }
0x108a   :  { %24854 = vmatpush3.bf16.msra.mxu0 %v26705_v20  ;;  %24869 = vmatprep.mubr.msk.bf16.mxu0 %vm26838_vm0, %v33171_v35  ;;  %v18409_v20 = vrot.slane %v18408_v62, 7 }
0x108b   :  { %24855 = vmatprep.subr.bf16.mxu0 %v33171_v35 }
0x108e   :  { %24856 = vmatpush3.bf16.msra.mxu0 %v26706_v43  ;;  %v18407_v43 = vunpack.c.h.b16 %v18386_v24 }
0x108f   :  { %24857 = vmatprep.subr.bf16.mxu0 %v33171_v35 }
0x1092   :  { %24858 = vmatpush3.bf16.msra.mxu0 %v26707_v27  ;;  %v18410_v27 = vsel %vm15698_vm6, %v18409_v20, %v18407_v43  ;;  %v20884_v43 = vld [vmem:[%s32850_s9] ss:$0 sm:$0xff] }
0x1093   :  { %24859 = vmatprep.subr.bf16.mxu0 %v33171_v35 }
0x1096   :  { %24860 = vmatpush3.bf16.msra.mxu0 %v26708_v1  ;;  %v18411_v1 = vpack.c.b16 %v18410_v27, %v18410_v27 }
0x1097   :  { %24861 = vmatprep.subr.bf16.mxu0 %v33171_v35 }
0x109a   :  { %24862 = vmatpush3.bf16.msra.mxu0 %v26709_v21 }
0x109b   :  { %24863 = vmatprep.subr.bf16.mxu0 %v33171_v35 }
0x109c   :  { %v16785_v40 = vpop.f32.mrb[180].mxu0 }
0x109d   :  { %v16791_v12 = vadd.f32 %v16785_v40, %v16681_v50  ;;  %v24691_v30 = vpop.f32.mrb[181].mxu0 }
0x109e   :  { %v16788_v60 = vpop.f32.mrb[182].mxu0  ;;  %24864 = vmatpush3.bf16.msra.mxu0 %v26710_v4 }
0x109f   :  { %v24692_v34 = vpop.f32.mrb[183].mxu0  ;;  %24865 = vmatprep.subr.bf16.mxu0 %v33171_v35 }
0x10a2   :  { %24866 = vmatpush3.bf16.msra.mxu0 %v26711_v17 }
0x10a3   :  { %24867 = vmatprep.subr.bf16.mxu0 %v33171_v35 }
0x10a6   :  { %24868 = vmatpush3.bf16.msra.mxu0 %v26712_v52 }
0x10a7   :  { %24893 = vmatprep.subr.bf16.mxu0 %v33171_v35 }
0x10a9   :  { %24870 = vmatmul.mubr.bf16.vlgmr.msra.gmra.mrb[208].mxu0 %v17728_v58 }
0x10aa   :  { %24894 = vmatpush3.bf16.msra.mxu0 %v26713_v38  ;;  %24909 = vmatprep.mubr.msk.bf16.mxu0 %vm26838_vm0, %v33171_v35 }
0x10ab   :  { %24895 = vmatprep.subr.bf16.mxu0 %v33171_v35 }
0x10ae   :  { %24896 = vmatpush3.bf16.msra.mxu0 %v26714_v8  ;;  %v26737_v8 = vld [vmem:[%s32849_s8] sm:$0xff]  }
0x10af   :  { %24897 = vmatprep.subr.bf16.mxu0 %v33171_v35  ;;  %24994 = vmatpush3.bf16.msra.mxu1 %v26737_v8 }
0x10b0   :  { %24995 = vmatprep.subr.bf16.mxu1 %v33171_v35 }
0x10b2   :  { %24898 = vmatpush3.bf16.msra.mxu0 %v26715_v6  ;;  %v26738_v6 = vld [vmem:[%s32849_s8 + $0x8] sm:$0xff]  }
0x10b3   :  { %24899 = vmatprep.subr.bf16.mxu0 %v33171_v35  ;;  %24996 = vmatpush3.bf16.msra.mxu1 %v26738_v6 }
0x10b4   :  { %24997 = vmatprep.subr.bf16.mxu1 %v33171_v35 }
0x10b6   :  { %24900 = vmatpush3.bf16.msra.mxu0 %v26716_v23  ;;  %v26739_v23 = vld [vmem:[%s32849_s8 + $0x10] sm:$0xff]  }
0x10b7   :  { %24901 = vmatprep.subr.bf16.mxu0 %v33171_v35  ;;  %24998 = vmatpush3.bf16.msra.mxu1 %v26739_v23 }
0x10b8   :  { %24999 = vmatprep.subr.bf16.mxu1 %v33171_v35 }
0x10ba   :  { %24902 = vmatpush3.bf16.msra.mxu0 %v26717_v57  ;;  %v26741_v57 = vld [vmem:[%s32849_s8 + $0x20] sm:$0xff]  }
0x10bb   :  { %24903 = vmatprep.subr.bf16.mxu0 %v33171_v35 }
0x10bc   :  { %v16902_v47 = vpop.f32.mrb[184].mxu0 }
0x10bd   :  { %v16908_v36 = vadd.f32 %v16902_v47, %v16791_v12  ;;  %v24711_v14 = vpop.f32.mrb[185].mxu0 }
0x10be   :  { %v16905_v32 = vpop.f32.mrb[186].mxu0  ;;  %24904 = vmatpush3.bf16.msra.mxu0 %v26718_v28  ;;  %v26742_v28 = vld [vmem:[%s32849_s8 + $0x28] sm:$0xff]  }
0x10bf   :  { %v24712_v56 = vpop.f32.mrb[187].mxu0  ;;  %24905 = vmatprep.subr.bf16.mxu0 %v33171_v35 }
0x10c2   :  { %24906 = vmatpush3.bf16.msra.mxu0 %v26719_v19 }
0x10c3   :  { %24907 = vmatprep.subr.bf16.mxu0 %v33171_v35 }
0x10c6   :  { %24908 = vmatpush3.bf16.msra.mxu0 %v26720_v54  ;;  %v26743_v54 = vld [vmem:[%s32849_s8 + $0x30] sm:$0xff]  }
0x10c7   :  { %24933 = vmatprep.subr.bf16.mxu0 %v33171_v35 }
0x10c9   :  { %24910 = vmatmul.mubr.bf16.vlgmr.msra.gmra.mrb[212].mxu0 %v17956_v29  ;;  %v26745_v29 = vld [vmem:[%s32851_s10] sm:$0xff]  }
0x10ca   :  { %24934 = vmatpush3.bf16.msra.mxu0 %v26721_v53  ;;  %24949 = vmatprep.mubr.msk.bf16.mxu0 %vm26838_vm0, %v33171_v35  ;;  %v26744_v53 = vld [vmem:[%s32849_s8 + $0x38] sm:$0xff]  }
0x10cb   :  { %24935 = vmatprep.subr.bf16.mxu0 %v33171_v35 }
0x10ce   :  { %24936 = vmatpush3.bf16.msra.mxu0 %v26722_v3  ;;  %v26747_v3 = vld [vmem:[%s32851_s10 + $0x10] sm:$0xff]  }
0x10cf   :  { %24937 = vmatprep.subr.bf16.mxu0 %v33171_v35 }
0x10d2   :  { %24938 = vmatpush3.bf16.msra.mxu0 %v26723_v42  ;;  %v26748_v42 = vld [vmem:[%s32851_s10 + $0x18] sm:$0xff]  }
0x10d3   :  { %24939 = vmatprep.subr.bf16.mxu0 %v33171_v35 }
0x10d6   :  { %24940 = vmatpush3.bf16.msra.mxu0 %v26724_v37  ;;  %v26749_v37 = vld [vmem:[%s32851_s10 + $0x20] sm:$0xff]  }
0x10d7   :  { %24941 = vmatprep.subr.bf16.mxu0 %v33171_v35 }
0x10da   :  { %24942 = vmatpush3.bf16.msra.mxu0 %v26725_v5  ;;  %v26750_v5 = vld [vmem:[%s32851_s10 + $0x28] sm:$0xff]  }
0x10db   :  { %24943 = vmatprep.subr.bf16.mxu0 %v33171_v35 }
0x10dc   :  { %v17013_v48 = vpop.f32.mrb[188].mxu0 }
0x10dd   :  { %v17019_v51 = vadd.f32 %v17013_v48, %v16908_v36  ;;  %v24731_v39 = vpop.f32.mrb[189].mxu0 }
0x10de   :  { %v17016_v61 = vpop.f32.mrb[190].mxu0  ;;  %24944 = vmatpush3.bf16.msra.mxu0 %v26726_v46 }
0x10df   :  { %v24732_v2 = vpop.f32.mrb[191].mxu0  ;;  %24945 = vmatprep.subr.bf16.mxu0 %v33171_v35 }
0x10e2   :  { %24946 = vmatpush3.bf16.msra.mxu0 %v26727_v7 }
0x10e3   :  { %24947 = vmatprep.subr.bf16.mxu0 %v33171_v35 }
0x10e6   :  { %24948 = vmatpush3.bf16.msra.mxu0 %v26728_v0 }
0x10e7   :  { %24973 = vmatprep.subr.bf16.mxu0 %v33171_v35 }
0x10e9   :  { %24950 = vmatmul.mubr.bf16.vlgmr.msra.gmra.mrb[216].mxu0 %v18184_v13 }
0x10ea   :  { %24974 = vmatpush3.bf16.msra.mxu0 %v26729_v31  ;;  %24989 = vmatprep.mubr.msk.bf16.mxu0 %vm26838_vm0, %v33171_v35 }
0x10eb   :  { %24975 = vmatprep.subr.bf16.mxu0 %v33171_v35 }
0x10ee   :  { %24976 = vmatpush3.bf16.msra.mxu0 %v26730_v10 }
0x10ef   :  { %24977 = vmatprep.subr.bf16.mxu0 %v33171_v35 }
0x10f2   :  { %24978 = vmatpush3.bf16.msra.mxu0 %v26731_v25 }
0x10f3   :  { %24979 = vmatprep.subr.bf16.mxu0 %v33171_v35 }
0x10f6   :  { %24980 = vmatpush3.bf16.msra.mxu0 %v26732_v16 }
0x10f7   :  { %24981 = vmatprep.subr.bf16.mxu0 %v33171_v35 }
0x10fa   :  { %24982 = vmatpush3.bf16.msra.mxu0 %v26733_v11 }
0x10fb   :  { %24983 = vmatprep.subr.bf16.mxu0 %v33171_v35 }
0x10fc   :  { %v17130_v18 = vpop.f32.mrb[192].mxu0 }
0x10fd   :  { %v17136_v50 = vadd.f32 %v17130_v18, %v17019_v51  ;;  %v24751_v26 = vpop.f32.mrb[193].mxu0 }
0x10fe   :  { %v17133_v33 = vpop.f32.mrb[194].mxu0  ;;  %24984 = vmatpush3.bf16.msra.mxu0 %v26734_v59  ;;  %v20883_v26 = vld [vmem:[%s32848_s7] ss:$0 sm:$0xff] }
0x10ff   :  { %v24752_v45 = vpop.f32.mrb[195].mxu0  ;;  %24985 = vmatprep.subr.bf16.mxu0 %v33171_v35 }
0x1102   :  { %24986 = vmatpush3.bf16.msra.mxu0 %v26735_v22 }
0x1103   :  { %24987 = vmatprep.subr.bf16.mxu0 %v33171_v35 }
0x1106   :  { %24988 = vmatpush3.bf16.msra.mxu0 %v26736_v15 }
0x1107   :  { %25013 = vmatprep.subr.bf16.mxu0 %v33171_v35 }
0x1109   :  { %24990 = vmatmul.mubr.bf16.vlgmr.msra.gmra.mrb[220].mxu0 %v18411_v1 }
0x110a   :  { %25029 = vmatprep.mubr.msk.bf16.mxu0 %vm26838_vm0, %v33171_v35  ;;  %25014 = vmatpush3.bf16.msra.mxu0 %v26745_v29 }
0x110b   :  { %25015 = vmatprep.subr.bf16.mxu0 %v33171_v35 }
0x111c   :  { %v17241_v21 = vpop.f32.mrb[196].mxu0 }
0x111d   :  { %v17247_v4 = vadd.f32 %v17241_v21, %v17136_v50  ;;  %v24771_v40 = vpop.f32.mrb[197].mxu0 }
0x111e   :  { %v17244_v12 = vpop.f32.mrb[198].mxu0 }
0x111f   :  { %v24772_v30 = vpop.f32.mrb[199].mxu0 }
0x113c   :  { %v17358_v60 = vpop.f32.mrb[200].mxu0 }
0x113d   :  { %v17364_v17 = vadd.f32 %v17358_v60, %v17247_v4  ;;  %v24791_v34 = vpop.f32.mrb[201].mxu0  ;;  %v20893_v60 = vld [vmem:[%s32852_s11] ss:$0 sm:$0xff] }
0x113e   :  { %v17361_v52 = vpop.f32.mrb[202].mxu0 }
0x113f   :  { %v24792_v38 = vpop.f32.mrb[203].mxu0  ;;  %v17475_v58 = vadd.f32 %v32303_v41, %v17364_v17  ;;  %v26740_v41 = vld [vmem:[%s32849_s8 + $0x18] sm:$0xff]  }
0x1140   :  { %25000 = vmatpush3.bf16.msra.mxu1 %v26740_v41 }
0x1141   :  { %25001 = vmatprep.subr.bf16.mxu1 %v33171_v35 }
0x1144   :  { %25002 = vmatpush3.bf16.msra.mxu1 %v26741_v57 }
0x1145   :  { %25003 = vmatprep.subr.bf16.mxu1 %v33171_v35 }
0x1148   :  { %25004 = vmatpush3.bf16.msra.mxu1 %v26742_v28 }
0x1149   :  { %25005 = vmatprep.subr.bf16.mxu1 %v33171_v35 }
0x114c   :  { %25006 = vmatpush3.bf16.msra.mxu1 %v26743_v54 }
0x114d   :  { %25007 = vmatprep.subr.bf16.mxu1 %v33171_v35 }
0x1150   :  { %25008 = vmatpush3.bf16.msra.mxu1 %v26744_v53 }
0x115c   :  { %v17585_v47 = vpop.f32.mrb[204].mxu0 }
0x115d   :  { %v17591_v36 = vadd.f32 %v17585_v47, %v17475_v58  ;;  %v24831_v14 = vpop.f32.mrb[205].mxu0 }
0x115e   :  { %v17588_v32 = vpop.f32.mrb[206].mxu0 }
0x115f   :  { %v24832_v19 = vpop.f32.mrb[207].mxu0  ;;  %v17701_v56 = vadd.f32 %v32343_v49, %v17591_v36  ;;  %v26746_v49 = vld [vmem:[%s32851_s10 + $0x8] sm:$0xff]  }
0x1160   :  { %25016 = vmatpush3.bf16.msra.mxu0 %v26746_v49 }
0x1161   :  { %25017 = vmatprep.subr.bf16.mxu0 %v33171_v35 }
0x1164   :  { %25018 = vmatpush3.bf16.msra.mxu0 %v26747_v3 }
0x1165   :  { %25019 = vmatprep.subr.bf16.mxu0 %v33171_v35 }
0x1168   :  { %25020 = vmatpush3.bf16.msra.mxu0 %v26748_v42 }
0x1169   :  { %25021 = vmatprep.subr.bf16.mxu0 %v33171_v35 }
0x116c   :  { %25022 = vmatpush3.bf16.msra.mxu0 %v26749_v37 }
0x116d   :  { %25023 = vmatprep.subr.bf16.mxu0 %v33171_v35 }
0x1170   :  { %25024 = vmatpush3.bf16.msra.mxu0 %v26750_v5 }
0x1171   :  { %25025 = vmatprep.subr.bf16.mxu0 %v33171_v35 }
0x117c   :  { %v17812_v46 = vpop.f32.mrb[208].mxu0 }
0x117d   :  { %v17818_v48 = vadd.f32 %v17812_v46, %v17701_v56  ;;  %v24871_v51 = vpop.f32.mrb[209].mxu0 }
0x117e   :  { %v17815_v39 = vpop.f32.mrb[210].mxu0 }
0x117f   :  { %v24872_v61 = vpop.f32.mrb[211].mxu0  ;;  %v17929_v7 = vadd.f32 %v32380_v63, %v17818_v48 }
0x119c   :  { %v18040_v2 = vpop.f32.mrb[212].mxu0 }
0x119d   :  { %v18046_v0 = vadd.f32 %v18040_v2, %v17929_v7  ;;  %v24911_v31 = vpop.f32.mrb[213].mxu0 }
0x119e   :  { %v18043_v13 = vpop.f32.mrb[214].mxu0 }
0x119f   :  { %v24912_v10 = vpop.f32.mrb[215].mxu0  ;;  %v18157_v25 = vadd.f32 %v32417_v9, %v18046_v0  ;;  %v26751_v9 = vld [vmem:[%s32851_s10 + $0x30] sm:$0xff]  }
0x11a0   :  { %25026 = vmatpush3.bf16.msra.mxu0 %v26751_v9 }
0x11a1   :  { %25027 = vmatprep.subr.bf16.mxu0 %v33171_v35 }
0x11bc   :  { %v18268_v16 = vpop.f32.mrb[216].mxu0 }
0x11bd   :  { %v18274_v11 = vadd.f32 %v18268_v16, %v18157_v25  ;;  %v24951_v55 = vpop.f32.mrb[217].mxu0 }
0x11be   :  { %v18271_v59 = vpop.f32.mrb[218].mxu0 }
0x11bf   :  { %v24952_v18 = vpop.f32.mrb[219].mxu0  ;;  %v18385_v62 = vadd.f32 %v32454_v44, %v18274_v11  ;;  %v26752_v44 = vld [vmem:[%s32851_s10 + $0x38] sm:$0xff]   ;;  %s26840_s10 = smov [#allocation4]  }
0x11c0   :  { %25028 = vmatpush3.bf16.msra.mxu0 %v26752_v44  ;;  %s18743_s26 = sshll.u32 %s26840_s10, 4  ;;  %s18744_s26 = int_to_ptr.vmem [resolvable:$true] %s18743_s26 }
0x11c1   :  { %s26813_s9 = scalar_lea.vmem %s18744_s26, 32  ;;  %p26818_p1 = scmp.lt.s32.totalorder %s18744_s26, %s18744_s26 }
0x11c2   :  { %p26814_p0 = scmp.ne.s32.totalorder %s18744_s26, %s26813_s9  ;;  %p26819_p2 = scmp.lt.s32.totalorder %s26813_s9, %s26813_s9 }
0x11c4   :  { %p26820_p3 = por %p26819_p2, %p26818_p1 }
0x11c6   :  { %p26821_p4 = pnand %p26820_p3, %p26814_p0 }
0x11dc   :  { %v18495_v50 = vpop.f32.mrb[220].mxu0 }
0x11dd   :  { %v18501_v63 = vadd.f32 %v18495_v50, %v18385_v62  ;;  %v24991_v33 = vpop.f32.mrb[221].mxu0 }
0x11de   :  { %v18498_v22 = vpop.f32.mrb[222].mxu0 }
0x11df   :  { %v18509_v45 = vadd.f32 %v20883_v26, %v18501_v63  ;;  %v24992_v24 = vpop.f32.mrb[223].mxu0 }
0x11e1   :  { %v18510_v20 = vmax.f32 %v18509_v45, 0.0 }
0x11e3   :  { %v18511_v15 = vpack.c.bf16 %v18510_v20, %v18510_v20 }
0x11e5   :  { %25010 = vmatmul.mubr.bf16.vlgmr.msra.gmra.mrb[156].mxu1 %v18511_v15 }
0x12b8   :  { %v18617_v27 = vpop.f32.mrb[156].mxu1 }
0x12b9   :  { %v18618_v1 = vadd.f32 %v20884_v43, %v18617_v27  ;;  %v25011_v21 = vpop.f32.mrb[157].mxu1 }
0x12ba   :  { %v18620_v4 = vpop.f32.mrb[158].mxu1 }
0x12bb   :  { %v18623_v40 = vmax.f32 %v18618_v1, 0.0  ;;  %v25012_v12 = vpop.f32.mrb[159].mxu1 }
0x12bd   :  { %v18624_v30 = vpack.c.bf16 %v18623_v40, %v18623_v40 }
0x12bf   :  { %25030 = vmatmul.mubr.bf16.vlgmr.msra.gmra.mrb[224].mxu0 %v18624_v30 }
0x1392   :  { %v18730_v35 = vpop.f32.mrb[224].mxu0 }
0x1393   :  { %v18731_v17 = vadd.f32 %v20893_v60, %v18730_v35  ;;  %v25031_v34 = vpop.f32.mrb[225].mxu0 }
0x1394   :  { %v18733_v52 = vpop.f32.mrb[226].mxu0 }
0x1395   :  { %18736 = vst [vmem:[#allocation4] sm:$0x3] %v18731_v17  ;;  %v25032_v38 = vpop.f32.mrb[227].mxu0 }
0x1396   :  { %26824 = shalt.err (!%p26821_p4)
}
0x1397   :  { %s26825_s11 = scalar_lea.hbm %s32853_s12, 32 }
0x1398   :  { %p26826_p5 = scmp.ne.s32.totalorder %s32853_s12, %s26825_s11  ;;  %p26829_p6 = scmp.lt.u32.totalorder %s26825_s11, %s32853_s12 }
0x139a   :  { %p26831_p7 = pnand %p26829_p6, %p26826_p5 }
0x139c   :  { %26834 = shalt.err (!%p26831_p7)
}
0x139d   :  { %18746 = dma.vmem_to_hbm [thread:$0]  %s18744_s26, 32, %s32853_s12, [#allocation5]  }
0x139e   :  { %26835 = dma.done.wait [#allocation5], 32  }
0x139f   :  { %26836 = vsyncadd [#allocation5], 4294967264 }
0x13a0   :  { %18750 = vsyncpa [#allocation5], 1 }

</bundles_post_ra>
